<compile_context>
chip_gen: v6e
topology: v6e:2x2x1
jax: 0.10.0
libtpu: 0.0.40
codegen_flags: <defaults>
</compile_context>

<pallas_src>
import functools

import jax
import jax.numpy as jnp
from jax import lax
from jax.experimental import pallas as pl
from jax.experimental.pallas import tpu as pltpu

EPS = 1e-5


def _residual_block_kernel(x_ref, wb1_ref, g1_ref, b1_ref, wb2_ref, g2_ref, b2_ref,
                           out_ref, pad_ref, *, nb, H, W, C, groups):
    """Processes `nb` images per grid step.  Activations are lane-dense (H, W*C)."""
    gc = C // groups
    denom = float(H * W * gc)
    WC = W * C

    # Vertical halo only: zero top/bottom rows once per step; horizontal zero padding is
    # folded into the banded weights, so no left/right border (and no masked column
    # stores) is needed.  Interior rows are fully overwritten per image.
    zrow = jnp.zeros((1, WC), pad_ref.dtype)
    pad_ref[pl.ds(0, 1), :] = zrow
    pad_ref[pl.ds(H + 1, 1), :] = zrow

    def conv3x3(wb_ref):
        # One MXU matmul per kernel row dy; lhs rows come straight off the halo scratch
        # (full-width, offset-0 loads); the dx taps + horizontal padding live in the
        # banded rhs.  K = N = W*C, f32 accumulation.
        acc = jnp.dot(pad_ref[pl.ds(0, H), :], wb_ref[0],
                      preferred_element_type=jnp.float32)
        acc = acc + jnp.dot(pad_ref[pl.ds(1, H), :], wb_ref[1],
                            preferred_element_type=jnp.float32)
        acc = acc + jnp.dot(pad_ref[pl.ds(2, H), :], wb_ref[2],
                            preferred_element_type=jnp.float32)
        return acc                                            # (H, W*C) f32

    def channel_sums(v):
        # (H, W*C) -> (1, C): fold the W lane-groups with static slices, then reduce rows.
        acc = v[:, 0:C]
        for w in range(1, W):
            acc = acc + v[:, w * C:(w + 1) * C]
        return jnp.sum(acc, axis=0, keepdims=True)

    def group_norm(h, gamma, beta):
        # One-pass stats (E[x^2] - mean^2) in f32 + fused affine (scale/shift) per group.
        s = channel_sums(h)                                   # (1, C)
        ss = channel_sums(h * h)                              # (1, C)
        scale_parts, shift_parts = [], []
        for g in range(groups):                               # tiny (1, gc) work per group
            lo, hi = g * gc, (g + 1) * gc
            m = jnp.sum(s[:, lo:hi]) / denom
            e2 = jnp.sum(ss[:, lo:hi]) / denom
            var = jnp.maximum(e2 - m * m, 0.0)                # guard tiny negative variance
            r = lax.rsqrt(var + EPS)                          # biased var, like PyTorch
            sc = r * gamma[:, lo:hi]                          # (1, gc)
            scale_parts.append(sc)
            shift_parts.append(beta[:, lo:hi] - m * sc)
        scale_c = jnp.concatenate(scale_parts, axis=1)        # (1, C)
        shift_c = jnp.concatenate(shift_parts, axis=1)        # (1, C)
        scale_map = jnp.concatenate([scale_c] * W, axis=1)    # (1, W*C) lane-dense map
        shift_map = jnp.concatenate([shift_c] * W, axis=1)
        return h * scale_map + shift_map                      # fused affine: 1 mul + 1 add

    for b in range(nb):                                       # unrolled; nb is small
        x = x_ref[b]                                          # (H, W*C) f32

        # ---------------- conv1 -> GN1 -> ReLU ----------------
        pad_ref[pl.ds(1, H), :] = x.astype(pad_ref.dtype)     # bf16 halo write, unmasked
        h = conv3x3(wb1_ref)
        h = group_norm(h, g1_ref[...], b1_ref[...])
        h = jnp.maximum(h, 0.0)

        # ---------------- conv2 -> GN2 (reuse the halo scratch) ----------------
        pad_ref[pl.ds(1, H), :] = h.astype(pad_ref.dtype)
        h2 = conv3x3(wb2_ref)
        h2 = group_norm(h2, g2_ref[...], b2_ref[...])

        # ---------------- identity skip + lane-dense (H, W*C) store ----------------
        out_ref[b] = (h2 + x).astype(out_ref.dtype)


def _band_conv_weights(w_hwio, width, dtype=jnp.bfloat16):
    """(3,3,Cin,Cout) HWIO conv weights -> (3, width*Cin, width*Cout) banded matrices.

    band[dy][wi*Cin+ci, wo*Cout+co] = w[dy, wi-wo+1, ci, co] when wi-wo+1 in {0,1,2};
    missing entries are zero, which implements the horizontal zero padding exactly.
    """
    kh, kw, cin, cout = w_hwio.shape
    assert (kh, kw) == (3, 3), "3x3 conv expected"
    w32 = w_hwio.astype(jnp.float32)
    bands = []
    for dy in range(3):
        b = jnp.zeros((width * cin, width * cout), jnp.float32)
        for dx in range(3):
            sel = jnp.eye(width, width, k=1 - dx, dtype=jnp.float32)
            b = b + jnp.kron(sel, w32[dy, dx])
        bands.append(b)
    return jnp.stack(bands).astype(dtype)


def residual_block_nhwc(x_nhwc, w1_hwio, g1, b1, w2_hwio, g2, b2, *, groups,
                        images_per_step=None):
    """NHWC entry point (no layout transposes).  x_nhwc: (B, H, W, C) float32."""
    B, H, W, C = x_nhwc.shape
    assert w1_hwio.shape[-1] == C and w2_hwio.shape[-1] == C, \
        "identity skip requires in_channel == out_channel (downsample=False)"
    assert C % groups == 0, "GroupNorm requires C % groups == 0"
    nb = B if images_per_step is None else images_per_step
    assert B % nb == 0, "batch must be divisible by images_per_step"

    WC = W * C
    x2d = x_nhwc.reshape(B, H, WC).astype(jnp.float32)        # contiguous, free reshape
    wb1 = _band_conv_weights(w1_hwio, W)
    wb2 = _band_conv_weights(w2_hwio, W)
    g1r = g1.reshape(1, C).astype(jnp.float32)
    b1r = b1.reshape(1, C).astype(jnp.float32)
    g2r = g2.reshape(1, C).astype(jnp.float32)
    b2r = b2.reshape(1, C).astype(jnp.float32)

    kernel = functools.partial(_residual_block_kernel, nb=nb, H=H, W=W, C=C,
                               groups=groups)
    const2 = lambda i: (0, 0)
    const3 = lambda i: (0, 0, 0)

    out2d = pl.pallas_call(
        kernel,
        out_shape=jax.ShapeDtypeStruct((B, H, WC), jnp.float32),   # lane-dense output
        grid_spec=pltpu.PrefetchScalarGridSpec(
            num_scalar_prefetch=0,
            grid=(B // nb,),
            in_specs=[
                pl.BlockSpec((nb, H, WC), lambda i: (i, 0, 0)),
                pl.BlockSpec((3, WC, WC), const3),                 # banded conv1 weights
                pl.BlockSpec((1, C), const2),
                pl.BlockSpec((1, C), const2),
                pl.BlockSpec((3, WC, WC), const3),                 # banded conv2 weights
                pl.BlockSpec((1, C), const2),
                pl.BlockSpec((1, C), const2),
            ],
            out_specs=pl.BlockSpec((nb, H, WC), lambda i: (i, 0, 0)),
            scratch_shapes=[pltpu.VMEM((H + 2, WC), jnp.bfloat16)],  # vertical halo only
        ),
        compiler_params=pltpu.CompilerParams(dimension_semantics=("parallel",)),
    )(x2d, wb1, g1r, b1r, wb2, g2r, b2r)

    return out2d.reshape(B, H, W, C)


def residual_block(x_nchw, w1_hwio, g1, b1, w2_hwio, g2, b2, *, groups,
                   images_per_step=None):
    """NCHW wrapper matching the PyTorch module layout (prefer the NHWC entry point)."""
    x_nhwc = jnp.transpose(x_nchw, (0, 2, 3, 1))
    y = residual_block_nhwc(x_nhwc, w1_hwio, g1, b1, w2_hwio, g2, b2,
                            groups=groups, images_per_step=images_per_step)
    return jnp.transpose(y, (0, 3, 1, 2))


# ---------------- pure-JAX reference (for correctness check) ----------------
def _ref_conv3x3(x_nhwc, w_hwio):
    return lax.conv_general_dilated(
        x_nhwc, w_hwio, window_strides=(1, 1), padding=((1, 1), (1, 1)),
        dimension_numbers=("NHWC", "HWIO", "NHWC"))


def _ref_group_norm(x_nhwc, gamma, beta, groups, eps=EPS):
    B, H, W, C = x_nhwc.shape
    gc = C // groups
    xr = x_nhwc.reshape(B, H, W, groups, gc)
    mean = xr.mean(axis=(1, 2, 4), keepdims=True)
    var = xr.var(axis=(1, 2, 4), keepdims=True)          # biased, like PyTorch
    xn = ((xr - mean) / jnp.sqrt(var + eps)).reshape(B, H, W, C)
    return xn * gamma + beta


def _ref_residual_block(x_nchw, w1, g1, b1, w2, g2, b2, groups):
    x = jnp.transpose(x_nchw, (0, 2, 3, 1)).astype(jnp.float32)
    h = _ref_conv3x3(x, w1)
    h = _ref_group_norm(h, g1, b1, groups)
    h = jnp.maximum(h, 0.0)
    h = _ref_conv3x3(h, w2)
    h = _ref_group_norm(h, g2, b2, groups)
    y = h + x
    return jnp.transpose(y, (0, 3, 1, 2))


if __name__ == "__main__":
    # Module config: in_channel = out_channel = 32, downsample=False,
    # group_channels=16 -> groups = 32 // 16 = 2.
    B, C, H, W = 2, 32, 16, 16
    groups = C // 16

    key = jax.random.PRNGKey(0)
    kx, kw1, kw2, kg1, kb1, kg2, kb2 = jax.random.split(key, 7)

    x = jax.random.normal(kx, (B, C, H, W), jnp.float32)            # NCHW like PyTorch
    # HWIO conv weights (a PyTorch OIHW weight converts via w.transpose(2, 3, 1, 0)).
    w1 = jax.random.normal(kw1, (3, 3, C, C), jnp.float32) * 0.05
    w2 = jax.random.normal(kw2, (3, 3, C, C), jnp.float32) * 0.05
    gamma1 = 1.0 + 0.1 * jax.random.normal(kg1, (C,), jnp.float32)
    beta1 = 0.1 * jax.random.normal(kb1, (C,), jnp.float32)
    gamma2 = 1.0 + 0.1 * jax.random.normal(kg2, (C,), jnp.float32)
    beta2 = 0.1 * jax.random.normal(kb2, (C,), jnp.float32)

    ref = jax.block_until_ready(
        _ref_residual_block(x, w1, gamma1, beta1, w2, gamma2, beta2, groups))

    # Default: whole batch folded into one grid step (best on single-TC v5e/v6e).
    out = jax.block_until_ready(
        residual_block(x, w1, gamma1, beta1, w2, gamma2, beta2, groups=groups))
    assert out.shape == (B, C, H, W)
    # Convs run with bf16 MXU operands (f32 accumulation / GN), so tolerance is bf16-level.
    assert jnp.allclose(out, ref, rtol=5e-2, atol=5e-2), (
        f"max abs err = {jnp.max(jnp.abs(out - ref))}")

    # One image per grid step (parallel batch grid; keeps both v7x TensorCores busy).
    out_p = jax.block_until_ready(
        residual_block(x, w1, gamma1, beta1, w2, gamma2, beta2, groups=groups,
                       images_per_step=1))
    assert jnp.allclose(out_p, ref, rtol=5e-2, atol=5e-2), (
        f"max abs err = {jnp.max(jnp.abs(out_p - ref))}")

    print("KERNEL_OK")
</pallas_src>

<mosaic_0001>
module attributes {stable_mosaic.version = 11 : i64} {
  func.func @_residual_block_kernel(%arg0: i32, %arg1: memref<2x16x512xf32, #tpu.memory_space<vmem>>, %arg2: memref<3x512x512xbf16, #tpu.memory_space<vmem>>, %arg3: memref<1x32xf32, #tpu.memory_space<vmem>>, %arg4: memref<1x32xf32, #tpu.memory_space<vmem>>, %arg5: memref<3x512x512xbf16, #tpu.memory_space<vmem>>, %arg6: memref<1x32xf32, #tpu.memory_space<vmem>>, %arg7: memref<1x32xf32, #tpu.memory_space<vmem>>, %arg8: memref<2x16x512xf32, #tpu.memory_space<vmem>>, %arg9: memref<18x512xbf16, #tpu.memory_space<vmem>>) attributes {dimension_semantics = [#tpu.dimension_semantics<parallel>], iteration_bounds = array<i64: 1>, scalar_prefetch = 0 : i64, scratch_operands = 1 : i64, tpu.core_type = #tpu.core_type<tc>, window_params = [{transform_indices = @transform_0, window_bounds = array<i64: 2, 16, 512>}, {pipeline_mode = #tpu.pipeline_mode<synchronous>, transform_indices = @transform_1, window_bounds = array<i64: 3, 512, 512>}, {pipeline_mode = #tpu.pipeline_mode<synchronous>, transform_indices = @transform_2, window_bounds = array<i64: 1, 32>}, {pipeline_mode = #tpu.pipeline_mode<synchronous>, transform_indices = @transform_3, window_bounds = array<i64: 1, 32>}, {pipeline_mode = #tpu.pipeline_mode<synchronous>, transform_indices = @transform_4, window_bounds = array<i64: 3, 512, 512>}, {pipeline_mode = #tpu.pipeline_mode<synchronous>, transform_indices = @transform_5, window_bounds = array<i64: 1, 32>}, {pipeline_mode = #tpu.pipeline_mode<synchronous>, transform_indices = @transform_6, window_bounds = array<i64: 1, 32>}, {transform_indices = @transform_7, window_bounds = array<i64: 2, 16, 512>}]} {
    %cst = arith.constant 0.000000e+00 : bf16
    %0 = vector.broadcast %cst : bf16 to vector<1x512xbf16>
    %c0 = arith.constant 0 : index
    %c0_0 = arith.constant 0 : index
    %1 = vector.load %arg9[%c0, %c0_0] : memref<18x512xbf16, #tpu.memory_space<vmem>>, vector<1x512xbf16>
    tpu.vector_store %arg9[%c0, %c0_0], %0 {strides = array<i32>} : memref<18x512xbf16, #tpu.memory_space<vmem>>, vector<1x512xbf16>,
    %c17 = arith.constant 17 : index
    %c0_1 = arith.constant 0 : index
    %2 = vector.load %arg9[%c17, %c0_1] : memref<18x512xbf16, #tpu.memory_space<vmem>>, vector<1x512xbf16>
    tpu.vector_store %arg9[%c17, %c0_1], %0 {strides = array<i32>} : memref<18x512xbf16, #tpu.memory_space<vmem>>, vector<1x512xbf16>,
    %c0_2 = arith.constant 0 : index
    %c0_3 = arith.constant 0 : index
    %c0_4 = arith.constant 0 : index
    %3 = vector.load %arg1[%c0_2, %c0_3, %c0_4] : memref<2x16x512xf32, #tpu.memory_space<vmem>>, vector<1x16x512xf32>
    %4 = vector.shape_cast %3 : vector<1x16x512xf32> to vector<16x512xf32>
    %5 = arith.truncf %4 : vector<16x512xf32> to vector<16x512xbf16>
    %c1 = arith.constant 1 : index
    %c0_5 = arith.constant 0 : index
    %6 = vector.load %arg9[%c1, %c0_5] : memref<18x512xbf16, #tpu.memory_space<vmem>>, vector<16x512xbf16>
    tpu.vector_store %arg9[%c1, %c0_5], %5 {strides = array<i32>} : memref<18x512xbf16, #tpu.memory_space<vmem>>, vector<16x512xbf16>,
    %c0_6 = arith.constant 0 : index
    %c0_7 = arith.constant 0 : index
    %7 = vector.load %arg9[%c0_6, %c0_7] : memref<18x512xbf16, #tpu.memory_space<vmem>>, vector<16x512xbf16>
    %c0_8 = arith.constant 0 : index
    %c0_9 = arith.constant 0 : index
    %c0_10 = arith.constant 0 : index
    %8 = vector.load %arg2[%c0_8, %c0_9, %c0_10] : memref<3x512x512xbf16, #tpu.memory_space<vmem>>, vector<1x512x512xbf16>
    %9 = vector.shape_cast %8 : vector<1x512x512xbf16> to vector<512x512xbf16>
    %cst_11 = arith.constant dense<0.000000e+00> : vector<16x512xf32>
    %10 = tpu.matmul %7, %9, %cst_11 {dimension_numbers = #tpu.dot_dimension_numbers<[1], [0], [0], [1], [0, 0, 1, 1], [], []>} : vector<16x512xbf16>, vector<512x512xbf16>, vector<16x512xf32> -> vector<16x512xf32>
    %c1_12 = arith.constant 1 : index
    %c0_13 = arith.constant 0 : index
    %11 = vector.load %arg9[%c1_12, %c0_13] : memref<18x512xbf16, #tpu.memory_space<vmem>>, vector<16x512xbf16>
    %c1_14 = arith.constant 1 : index
    %c0_15 = arith.constant 0 : index
    %c0_16 = arith.constant 0 : index
    %12 = vector.load %arg2[%c1_14, %c0_15, %c0_16] : memref<3x512x512xbf16, #tpu.memory_space<vmem>>, vector<1x512x512xbf16>
    %13 = vector.shape_cast %12 : vector<1x512x512xbf16> to vector<512x512xbf16>
    %cst_17 = arith.constant dense<0.000000e+00> : vector<16x512xf32>
    %14 = tpu.matmul %11, %13, %cst_17 {dimension_numbers = #tpu.dot_dimension_numbers<[1], [0], [0], [1], [0, 0, 1, 1], [], []>} : vector<16x512xbf16>, vector<512x512xbf16>, vector<16x512xf32> -> vector<16x512xf32>
    %15 = arith.addf %10, %14 : vector<16x512xf32>
    %c2 = arith.constant 2 : index
    %c0_18 = arith.constant 0 : index
    %16 = vector.load %arg9[%c2, %c0_18] : memref<18x512xbf16, #tpu.memory_space<vmem>>, vector<16x512xbf16>
    %c2_19 = arith.constant 2 : index
    %c0_20 = arith.constant 0 : index
    %c0_21 = arith.constant 0 : index
    %17 = vector.load %arg2[%c2_19, %c0_20, %c0_21] : memref<3x512x512xbf16, #tpu.memory_space<vmem>>, vector<1x512x512xbf16>
    %18 = vector.shape_cast %17 : vector<1x512x512xbf16> to vector<512x512xbf16>
    %cst_22 = arith.constant dense<0.000000e+00> : vector<16x512xf32>
    %19 = tpu.matmul %16, %18, %cst_22 {dimension_numbers = #tpu.dot_dimension_numbers<[1], [0], [0], [1], [0, 0, 1, 1], [], []>} : vector<16x512xbf16>, vector<512x512xbf16>, vector<16x512xf32> -> vector<16x512xf32>
    %20 = arith.addf %15, %19 : vector<16x512xf32>
    %c0_23 = arith.constant 0 : index
    %c0_24 = arith.constant 0 : index
    %21 = vector.load %arg3[%c0_23, %c0_24] : memref<1x32xf32, #tpu.memory_space<vmem>>, vector<1x32xf32>
    %c0_25 = arith.constant 0 : index
    %c0_26 = arith.constant 0 : index
    %22 = vector.load %arg4[%c0_25, %c0_26] : memref<1x32xf32, #tpu.memory_space<vmem>>, vector<1x32xf32>
    %23 = vector.extract_strided_slice %20 {offsets = [0, 0], sizes = [16, 32], strides = [1, 1]} : vector<16x512xf32> to vector<16x32xf32>
    %24 = vector.extract_strided_slice %20 {offsets = [0, 32], sizes = [16, 32], strides = [1, 1]} : vector<16x512xf32> to vector<16x32xf32>
    %25 = arith.addf %23, %24 : vector<16x32xf32>
    %26 = vector.extract_strided_slice %20 {offsets = [0, 64], sizes = [16, 32], strides = [1, 1]} : vector<16x512xf32> to vector<16x32xf32>
    %27 = arith.addf %25, %26 : vector<16x32xf32>
    %28 = vector.extract_strided_slice %20 {offsets = [0, 96], sizes = [16, 32], strides = [1, 1]} : vector<16x512xf32> to vector<16x32xf32>
    %29 = arith.addf %27, %28 : vector<16x32xf32>
    %30 = vector.extract_strided_slice %20 {offsets = [0, 128], sizes = [16, 32], strides = [1, 1]} : vector<16x512xf32> to vector<16x32xf32>
    %31 = arith.addf %29, %30 : vector<16x32xf32>
    %32 = vector.extract_strided_slice %20 {offsets = [0, 160], sizes = [16, 32], strides = [1, 1]} : vector<16x512xf32> to vector<16x32xf32>
    %33 = arith.addf %31, %32 : vector<16x32xf32>
    %34 = vector.extract_strided_slice %20 {offsets = [0, 192], sizes = [16, 32], strides = [1, 1]} : vector<16x512xf32> to vector<16x32xf32>
    %35 = arith.addf %33, %34 : vector<16x32xf32>
    %36 = vector.extract_strided_slice %20 {offsets = [0, 224], sizes = [16, 32], strides = [1, 1]} : vector<16x512xf32> to vector<16x32xf32>
    %37 = arith.addf %35, %36 : vector<16x32xf32>
    %38 = vector.extract_strided_slice %20 {offsets = [0, 256], sizes = [16, 32], strides = [1, 1]} : vector<16x512xf32> to vector<16x32xf32>
    %39 = arith.addf %37, %38 : vector<16x32xf32>
    %40 = vector.extract_strided_slice %20 {offsets = [0, 288], sizes = [16, 32], strides = [1, 1]} : vector<16x512xf32> to vector<16x32xf32>
    %41 = arith.addf %39, %40 : vector<16x32xf32>
    %42 = vector.extract_strided_slice %20 {offsets = [0, 320], sizes = [16, 32], strides = [1, 1]} : vector<16x512xf32> to vector<16x32xf32>
    %43 = arith.addf %41, %42 : vector<16x32xf32>
    %44 = vector.extract_strided_slice %20 {offsets = [0, 352], sizes = [16, 32], strides = [1, 1]} : vector<16x512xf32> to vector<16x32xf32>
    %45 = arith.addf %43, %44 : vector<16x32xf32>
    %46 = vector.extract_strided_slice %20 {offsets = [0, 384], sizes = [16, 32], strides = [1, 1]} : vector<16x512xf32> to vector<16x32xf32>
    %47 = arith.addf %45, %46 : vector<16x32xf32>
    %48 = vector.extract_strided_slice %20 {offsets = [0, 416], sizes = [16, 32], strides = [1, 1]} : vector<16x512xf32> to vector<16x32xf32>
    %49 = arith.addf %47, %48 : vector<16x32xf32>
    %50 = vector.extract_strided_slice %20 {offsets = [0, 448], sizes = [16, 32], strides = [1, 1]} : vector<16x512xf32> to vector<16x32xf32>
    %51 = arith.addf %49, %50 : vector<16x32xf32>
    %52 = vector.extract_strided_slice %20 {offsets = [0, 480], sizes = [16, 32], strides = [1, 1]} : vector<16x512xf32> to vector<16x32xf32>
    %53 = arith.addf %51, %52 : vector<16x32xf32>
    %cst_27 = arith.constant dense<0.000000e+00> : vector<32xf32>
    %54 = vector.multi_reduction <add>, %53, %cst_27 [0] : vector<16x32xf32> to vector<32xf32>
    %55 = vector.shape_cast %54 : vector<32xf32> to vector<1x32xf32>
    %56 = arith.mulf %20, %20 : vector<16x512xf32>
    %57 = vector.extract_strided_slice %56 {offsets = [0, 0], sizes = [16, 32], strides = [1, 1]} : vector<16x512xf32> to vector<16x32xf32>
    %58 = vector.extract_strided_slice %56 {offsets = [0, 32], sizes = [16, 32], strides = [1, 1]} : vector<16x512xf32> to vector<16x32xf32>
    %59 = arith.addf %57, %58 : vector<16x32xf32>
    %60 = vector.extract_strided_slice %56 {offsets = [0, 64], sizes = [16, 32], strides = [1, 1]} : vector<16x512xf32> to vector<16x32xf32>
    %61 = arith.addf %59, %60 : vector<16x32xf32>
    %62 = vector.extract_strided_slice %56 {offsets = [0, 96], sizes = [16, 32], strides = [1, 1]} : vector<16x512xf32> to vector<16x32xf32>
    %63 = arith.addf %61, %62 : vector<16x32xf32>
    %64 = vector.extract_strided_slice %56 {offsets = [0, 128], sizes = [16, 32], strides = [1, 1]} : vector<16x512xf32> to vector<16x32xf32>
    %65 = arith.addf %63, %64 : vector<16x32xf32>
    %66 = vector.extract_strided_slice %56 {offsets = [0, 160], sizes = [16, 32], strides = [1, 1]} : vector<16x512xf32> to vector<16x32xf32>
    %67 = arith.addf %65, %66 : vector<16x32xf32>
    %68 = vector.extract_strided_slice %56 {offsets = [0, 192], sizes = [16, 32], strides = [1, 1]} : vector<16x512xf32> to vector<16x32xf32>
    %69 = arith.addf %67, %68 : vector<16x32xf32>
    %70 = vector.extract_strided_slice %56 {offsets = [0, 224], sizes = [16, 32], strides = [1, 1]} : vector<16x512xf32> to vector<16x32xf32>
    %71 = arith.addf %69, %70 : vector<16x32xf32>
    %72 = vector.extract_strided_slice %56 {offsets = [0, 256], sizes = [16, 32], strides = [1, 1]} : vector<16x512xf32> to vector<16x32xf32>
    %73 = arith.addf %71, %72 : vector<16x32xf32>
    %74 = vector.extract_strided_slice %56 {offsets = [0, 288], sizes = [16, 32], strides = [1, 1]} : vector<16x512xf32> to vector<16x32xf32>
    %75 = arith.addf %73, %74 : vector<16x32xf32>
    %76 = vector.extract_strided_slice %56 {offsets = [0, 320], sizes = [16, 32], strides = [1, 1]} : vector<16x512xf32> to vector<16x32xf32>
    %77 = arith.addf %75, %76 : vector<16x32xf32>
    %78 = vector.extract_strided_slice %56 {offsets = [0, 352], sizes = [16, 32], strides = [1, 1]} : vector<16x512xf32> to vector<16x32xf32>
    %79 = arith.addf %77, %78 : vector<16x32xf32>
    %80 = vector.extract_strided_slice %56 {offsets = [0, 384], sizes = [16, 32], strides = [1, 1]} : vector<16x512xf32> to vector<16x32xf32>
    %81 = arith.addf %79, %80 : vector<16x32xf32>
    %82 = vector.extract_strided_slice %56 {offsets = [0, 416], sizes = [16, 32], strides = [1, 1]} : vector<16x512xf32> to vector<16x32xf32>
    %83 = arith.addf %81, %82 : vector<16x32xf32>
    %84 = vector.extract_strided_slice %56 {offsets = [0, 448], sizes = [16, 32], strides = [1, 1]} : vector<16x512xf32> to vector<16x32xf32>
    %85 = arith.addf %83, %84 : vector<16x32xf32>
    %86 = vector.extract_strided_slice %56 {offsets = [0, 480], sizes = [16, 32], strides = [1, 1]} : vector<16x512xf32> to vector<16x32xf32>
    %87 = arith.addf %85, %86 : vector<16x32xf32>
    %cst_28 = arith.constant dense<0.000000e+00> : vector<32xf32>
    %88 = vector.multi_reduction <add>, %87, %cst_28 [0] : vector<16x32xf32> to vector<32xf32>
    %89 = vector.shape_cast %88 : vector<32xf32> to vector<1x32xf32>
    %90 = vector.extract_strided_slice %55 {offsets = [0, 0], sizes = [1, 16], strides = [1, 1]} : vector<1x32xf32> to vector<1x16xf32>
    %91 = vector.shape_cast %90 : vector<1x16xf32> to vector<1x1x16xf32>
    %cst_29 = arith.constant dense<0.000000e+00> : vector<1xf32>
    %92 = vector.multi_reduction <add>, %91, %cst_29 [1, 2] : vector<1x1x16xf32> to vector<1xf32>
    %93 = vector.shape_cast %92 : vector<1xf32> to vector<1x1x1xf32>
    %94 = vector.extract %93[0, 0, 0] : f32 from vector<1x1x1xf32>
    %cst_30 = arith.constant 4.096000e+03 : f32
    %95 = arith.divf %94, %cst_30 : f32
    %96 = vector.extract_strided_slice %89 {offsets = [0, 0], sizes = [1, 16], strides = [1, 1]} : vector<1x32xf32> to vector<1x16xf32>
    %97 = vector.shape_cast %96 : vector<1x16xf32> to vector<1x1x16xf32>
    %cst_31 = arith.constant dense<0.000000e+00> : vector<1xf32>
    %98 = vector.multi_reduction <add>, %97, %cst_31 [1, 2] : vector<1x1x16xf32> to vector<1xf32>
    %99 = vector.shape_cast %98 : vector<1xf32> to vector<1x1x1xf32>
    %100 = vector.extract %99[0, 0, 0] : f32 from vector<1x1x1xf32>
    %cst_32 = arith.constant 4.096000e+03 : f32
    %101 = arith.divf %100, %cst_32 : f32
    %102 = arith.mulf %95, %95 : f32
    %103 = arith.subf %101, %102 : f32
    %cst_33 = arith.constant 0.000000e+00 : f32
    %104 = arith.maximumf %103, %cst_33 : f32
    %cst_34 = arith.constant 9.99999974E-6 : f32
    %105 = arith.addf %104, %cst_34 : f32
    %106 = math.rsqrt %105 : f32
    %107 = vector.extract_strided_slice %21 {offsets = [0, 0], sizes = [1, 16], strides = [1, 1]} : vector<1x32xf32> to vector<1x16xf32>
    %108 = vector.broadcast %106 : f32 to vector<1x16xf32>
    %109 = arith.mulf %108, %107 : vector<1x16xf32>
    %110 = vector.extract_strided_slice %22 {offsets = [0, 0], sizes = [1, 16], strides = [1, 1]} : vector<1x32xf32> to vector<1x16xf32>
    %111 = vector.broadcast %95 : f32 to vector<1x16xf32>
    %112 = arith.mulf %111, %109 : vector<1x16xf32>
    %113 = arith.subf %110, %112 : vector<1x16xf32>
    %114 = vector.extract_strided_slice %55 {offsets = [0, 16], sizes = [1, 16], strides = [1, 1]} : vector<1x32xf32> to vector<1x16xf32>
    %115 = vector.shape_cast %114 : vector<1x16xf32> to vector<1x1x16xf32>
    %cst_35 = arith.constant dense<0.000000e+00> : vector<1xf32>
    %116 = vector.multi_reduction <add>, %115, %cst_35 [1, 2] : vector<1x1x16xf32> to vector<1xf32>
    %117 = vector.shape_cast %116 : vector<1xf32> to vector<1x1x1xf32>
    %118 = vector.extract %117[0, 0, 0] : f32 from vector<1x1x1xf32>
    %cst_36 = arith.constant 4.096000e+03 : f32
    %119 = arith.divf %118, %cst_36 : f32
    %120 = vector.extract_strided_slice %89 {offsets = [0, 16], sizes = [1, 16], strides = [1, 1]} : vector<1x32xf32> to vector<1x16xf32>
    %121 = vector.shape_cast %120 : vector<1x16xf32> to vector<1x1x16xf32>
    %cst_37 = arith.constant dense<0.000000e+00> : vector<1xf32>
    %122 = vector.multi_reduction <add>, %121, %cst_37 [1, 2] : vector<1x1x16xf32> to vector<1xf32>
    %123 = vector.shape_cast %122 : vector<1xf32> to vector<1x1x1xf32>
    %124 = vector.extract %123[0, 0, 0] : f32 from vector<1x1x1xf32>
    %cst_38 = arith.constant 4.096000e+03 : f32
    %125 = arith.divf %124, %cst_38 : f32
    %126 = arith.mulf %119, %119 : f32
    %127 = arith.subf %125, %126 : f32
    %cst_39 = arith.constant 0.000000e+00 : f32
    %128 = arith.maximumf %127, %cst_39 : f32
    %cst_40 = arith.constant 9.99999974E-6 : f32
    %129 = arith.addf %128, %cst_40 : f32
    %130 = math.rsqrt %129 : f32
    %131 = vector.extract_strided_slice %21 {offsets = [0, 16], sizes = [1, 16], strides = [1, 1]} : vector<1x32xf32> to vector<1x16xf32>
    %132 = vector.broadcast %130 : f32 to vector<1x16xf32>
    %133 = arith.mulf %132, %131 : vector<1x16xf32>
    %134 = vector.extract_strided_slice %22 {offsets = [0, 16], sizes = [1, 16], strides = [1, 1]} : vector<1x32xf32> to vector<1x16xf32>
    %135 = vector.broadcast %119 : f32 to vector<1x16xf32>
    %136 = arith.mulf %135, %133 : vector<1x16xf32>
    %137 = arith.subf %134, %136 : vector<1x16xf32>
    %138 = tpu.concatenate %109, %133 in 1 : vector<1x16xf32>, vector<1x16xf32> -> vector<1x32xf32>
    %139 = tpu.concatenate %113, %137 in 1 : vector<1x16xf32>, vector<1x16xf32> -> vector<1x32xf32>
    %140 = tpu.concatenate %138, %138, %138, %138, %138, %138, %138, %138, %138, %138, %138, %138, %138, %138, %138, %138 in 1 : vector<1x32xf32>, vector<1x32xf32>, vector<1x32xf32>, vector<1x32xf32>, vector<1x32xf32>, vector<1x32xf32>, vector<1x32xf32>, vector<1x32xf32>, vector<1x32xf32>, vector<1x32xf32>, vector<1x32xf32>, vector<1x32xf32>, vector<1x32xf32>, vector<1x32xf32>, vector<1x32xf32>, vector<1x32xf32> -> vector<1x512xf32>
    %141 = tpu.concatenate %139, %139, %139, %139, %139, %139, %139, %139, %139, %139, %139, %139, %139, %139, %139, %139 in 1 : vector<1x32xf32>, vector<1x32xf32>, vector<1x32xf32>, vector<1x32xf32>, vector<1x32xf32>, vector<1x32xf32>, vector<1x32xf32>, vector<1x32xf32>, vector<1x32xf32>, vector<1x32xf32>, vector<1x32xf32>, vector<1x32xf32>, vector<1x32xf32>, vector<1x32xf32>, vector<1x32xf32>, vector<1x32xf32> -> vector<1x512xf32>
    %142 = vector.broadcast %140 : vector<1x512xf32> to vector<16x512xf32>
    %143 = arith.mulf %20, %142 : vector<16x512xf32>
    %144 = vector.broadcast %141 : vector<1x512xf32> to vector<16x512xf32>
    %145 = arith.addf %143, %144 : vector<16x512xf32>
    %cst_41 = arith.constant 0.000000e+00 : f32
    %146 = vector.broadcast %cst_41 : f32 to vector<16x512xf32>
    %147 = arith.maximumf %145, %146 : vector<16x512xf32>
    %148 = arith.truncf %147 : vector<16x512xf32> to vector<16x512xbf16>
    %c1_42 = arith.constant 1 : index
    %c0_43 = arith.constant 0 : index
    %149 = vector.load %arg9[%c1_42, %c0_43] : memref<18x512xbf16, #tpu.memory_space<vmem>>, vector<16x512xbf16>
    tpu.vector_store %arg9[%c1_42, %c0_43], %148 {strides = array<i32>} : memref<18x512xbf16, #tpu.memory_space<vmem>>, vector<16x512xbf16>,
    %c0_44 = arith.constant 0 : index
    %c0_45 = arith.constant 0 : index
    %150 = vector.load %arg9[%c0_44, %c0_45] : memref<18x512xbf16, #tpu.memory_space<vmem>>, vector<16x512xbf16>
    %c0_46 = arith.constant 0 : index
    %c0_47 = arith.constant 0 : index
    %c0_48 = arith.constant 0 : index
    %151 = vector.load %arg5[%c0_46, %c0_47, %c0_48] : memref<3x512x512xbf16, #tpu.memory_space<vmem>>, vector<1x512x512xbf16>
    %152 = vector.shape_cast %151 : vector<1x512x512xbf16> to vector<512x512xbf16>
    %cst_49 = arith.constant dense<0.000000e+00> : vector<16x512xf32>
    %153 = tpu.matmul %150, %152, %cst_49 {dimension_numbers = #tpu.dot_dimension_numbers<[1], [0], [0], [1], [0, 0, 1, 1], [], []>} : vector<16x512xbf16>, vector<512x512xbf16>, vector<16x512xf32> -> vector<16x512xf32>
    %c1_50 = arith.constant 1 : index
    %c0_51 = arith.constant 0 : index
    %154 = vector.load %arg9[%c1_50, %c0_51] : memref<18x512xbf16, #tpu.memory_space<vmem>>, vector<16x512xbf16>
    %c1_52 = arith.constant 1 : index
    %c0_53 = arith.constant 0 : index
    %c0_54 = arith.constant 0 : index
    %155 = vector.load %arg5[%c1_52, %c0_53, %c0_54] : memref<3x512x512xbf16, #tpu.memory_space<vmem>>, vector<1x512x512xbf16>
    %156 = vector.shape_cast %155 : vector<1x512x512xbf16> to vector<512x512xbf16>
    %cst_55 = arith.constant dense<0.000000e+00> : vector<16x512xf32>
    %157 = tpu.matmul %154, %156, %cst_55 {dimension_numbers = #tpu.dot_dimension_numbers<[1], [0], [0], [1], [0, 0, 1, 1], [], []>} : vector<16x512xbf16>, vector<512x512xbf16>, vector<16x512xf32> -> vector<16x512xf32>
    %158 = arith.addf %153, %157 : vector<16x512xf32>
    %c2_56 = arith.constant 2 : index
    %c0_57 = arith.constant 0 : index
    %159 = vector.load %arg9[%c2_56, %c0_57] : memref<18x512xbf16, #tpu.memory_space<vmem>>, vector<16x512xbf16>
    %c2_58 = arith.constant 2 : index
    %c0_59 = arith.constant 0 : index
    %c0_60 = arith.constant 0 : index
    %160 = vector.load %arg5[%c2_58, %c0_59, %c0_60] : memref<3x512x512xbf16, #tpu.memory_space<vmem>>, vector<1x512x512xbf16>
    %161 = vector.shape_cast %160 : vector<1x512x512xbf16> to vector<512x512xbf16>
    %cst_61 = arith.constant dense<0.000000e+00> : vector<16x512xf32>
    %162 = tpu.matmul %159, %161, %cst_61 {dimension_numbers = #tpu.dot_dimension_numbers<[1], [0], [0], [1], [0, 0, 1, 1], [], []>} : vector<16x512xbf16>, vector<512x512xbf16>, vector<16x512xf32> -> vector<16x512xf32>
    %163 = arith.addf %158, %162 : vector<16x512xf32>
    %c0_62 = arith.constant 0 : index
    %c0_63 = arith.constant 0 : index
    %164 = vector.load %arg6[%c0_62, %c0_63] : memref<1x32xf32, #tpu.memory_space<vmem>>, vector<1x32xf32>
    %c0_64 = arith.constant 0 : index
    %c0_65 = arith.constant 0 : index
    %165 = vector.load %arg7[%c0_64, %c0_65] : memref<1x32xf32, #tpu.memory_space<vmem>>, vector<1x32xf32>
    %166 = vector.extract_strided_slice %163 {offsets = [0, 0], sizes = [16, 32], strides = [1, 1]} : vector<16x512xf32> to vector<16x32xf32>
    %167 = vector.extract_strided_slice %163 {offsets = [0, 32], sizes = [16, 32], strides = [1, 1]} : vector<16x512xf32> to vector<16x32xf32>
    %168 = arith.addf %166, %167 : vector<16x32xf32>
    %169 = vector.extract_strided_slice %163 {offsets = [0, 64], sizes = [16, 32], strides = [1, 1]} : vector<16x512xf32> to vector<16x32xf32>
    %170 = arith.addf %168, %169 : vector<16x32xf32>
    %171 = vector.extract_strided_slice %163 {offsets = [0, 96], sizes = [16, 32], strides = [1, 1]} : vector<16x512xf32> to vector<16x32xf32>
    %172 = arith.addf %170, %171 : vector<16x32xf32>
    %173 = vector.extract_strided_slice %163 {offsets = [0, 128], sizes = [16, 32], strides = [1, 1]} : vector<16x512xf32> to vector<16x32xf32>
    %174 = arith.addf %172, %173 : vector<16x32xf32>
    %175 = vector.extract_strided_slice %163 {offsets = [0, 160], sizes = [16, 32], strides = [1, 1]} : vector<16x512xf32> to vector<16x32xf32>
    %176 = arith.addf %174, %175 : vector<16x32xf32>
    %177 = vector.extract_strided_slice %163 {offsets = [0, 192], sizes = [16, 32], strides = [1, 1]} : vector<16x512xf32> to vector<16x32xf32>
    %178 = arith.addf %176, %177 : vector<16x32xf32>
    %179 = vector.extract_strided_slice %163 {offsets = [0, 224], sizes = [16, 32], strides = [1, 1]} : vector<16x512xf32> to vector<16x32xf32>
    %180 = arith.addf %178, %179 : vector<16x32xf32>
    %181 = vector.extract_strided_slice %163 {offsets = [0, 256], sizes = [16, 32], strides = [1, 1]} : vector<16x512xf32> to vector<16x32xf32>
    %182 = arith.addf %180, %181 : vector<16x32xf32>
    %183 = vector.extract_strided_slice %163 {offsets = [0, 288], sizes = [16, 32], strides = [1, 1]} : vector<16x512xf32> to vector<16x32xf32>
    %184 = arith.addf %182, %183 : vector<16x32xf32>
    %185 = vector.extract_strided_slice %163 {offsets = [0, 320], sizes = [16, 32], strides = [1, 1]} : vector<16x512xf32> to vector<16x32xf32>
    %186 = arith.addf %184, %185 : vector<16x32xf32>
    %187 = vector.extract_strided_slice %163 {offsets = [0, 352], sizes = [16, 32], strides = [1, 1]} : vector<16x512xf32> to vector<16x32xf32>
    %188 = arith.addf %186, %187 : vector<16x32xf32>
    %189 = vector.extract_strided_slice %163 {offsets = [0, 384], sizes = [16, 32], strides = [1, 1]} : vector<16x512xf32> to vector<16x32xf32>
    %190 = arith.addf %188, %189 : vector<16x32xf32>
    %191 = vector.extract_strided_slice %163 {offsets = [0, 416], sizes = [16, 32], strides = [1, 1]} : vector<16x512xf32> to vector<16x32xf32>
    %192 = arith.addf %190, %191 : vector<16x32xf32>
    %193 = vector.extract_strided_slice %163 {offsets = [0, 448], sizes = [16, 32], strides = [1, 1]} : vector<16x512xf32> to vector<16x32xf32>
    %194 = arith.addf %192, %193 : vector<16x32xf32>
    %195 = vector.extract_strided_slice %163 {offsets = [0, 480], sizes = [16, 32], strides = [1, 1]} : vector<16x512xf32> to vector<16x32xf32>
    %196 = arith.addf %194, %195 : vector<16x32xf32>
    %cst_66 = arith.constant dense<0.000000e+00> : vector<32xf32>
    %197 = vector.multi_reduction <add>, %196, %cst_66 [0] : vector<16x32xf32> to vector<32xf32>
    %198 = vector.shape_cast %197 : vector<32xf32> to vector<1x32xf32>
    %199 = arith.mulf %163, %163 : vector<16x512xf32>
    %200 = vector.extract_strided_slice %199 {offsets = [0, 0], sizes = [16, 32], strides = [1, 1]} : vector<16x512xf32> to vector<16x32xf32>
    %201 = vector.extract_strided_slice %199 {offsets = [0, 32], sizes = [16, 32], strides = [1, 1]} : vector<16x512xf32> to vector<16x32xf32>
    %202 = arith.addf %200, %201 : vector<16x32xf32>
    %203 = vector.extract_strided_slice %199 {offsets = [0, 64], sizes = [16, 32], strides = [1, 1]} : vector<16x512xf32> to vector<16x32xf32>
    %204 = arith.addf %202, %203 : vector<16x32xf32>
    %205 = vector.extract_strided_slice %199 {offsets = [0, 96], sizes = [16, 32], strides = [1, 1]} : vector<16x512xf32> to vector<16x32xf32>
    %206 = arith.addf %204, %205 : vector<16x32xf32>
    %207 = vector.extract_strided_slice %199 {offsets = [0, 128], sizes = [16, 32], strides = [1, 1]} : vector<16x512xf32> to vector<16x32xf32>
    %208 = arith.addf %206, %207 : vector<16x32xf32>
    %209 = vector.extract_strided_slice %199 {offsets = [0, 160], sizes = [16, 32], strides = [1, 1]} : vector<16x512xf32> to vector<16x32xf32>
    %210 = arith.addf %208, %209 : vector<16x32xf32>
    %211 = vector.extract_strided_slice %199 {offsets = [0, 192], sizes = [16, 32], strides = [1, 1]} : vector<16x512xf32> to vector<16x32xf32>
    %212 = arith.addf %210, %211 : vector<16x32xf32>
    %213 = vector.extract_strided_slice %199 {offsets = [0, 224], sizes = [16, 32], strides = [1, 1]} : vector<16x512xf32> to vector<16x32xf32>
    %214 = arith.addf %212, %213 : vector<16x32xf32>
    %215 = vector.extract_strided_slice %199 {offsets = [0, 256], sizes = [16, 32], strides = [1, 1]} : vector<16x512xf32> to vector<16x32xf32>
    %216 = arith.addf %214, %215 : vector<16x32xf32>
    %217 = vector.extract_strided_slice %199 {offsets = [0, 288], sizes = [16, 32], strides = [1, 1]} : vector<16x512xf32> to vector<16x32xf32>
    %218 = arith.addf %216, %217 : vector<16x32xf32>
    %219 = vector.extract_strided_slice %199 {offsets = [0, 320], sizes = [16, 32], strides = [1, 1]} : vector<16x512xf32> to vector<16x32xf32>
    %220 = arith.addf %218, %219 : vector<16x32xf32>
    %221 = vector.extract_strided_slice %199 {offsets = [0, 352], sizes = [16, 32], strides = [1, 1]} : vector<16x512xf32> to vector<16x32xf32>
    %222 = arith.addf %220, %221 : vector<16x32xf32>
    %223 = vector.extract_strided_slice %199 {offsets = [0, 384], sizes = [16, 32], strides = [1, 1]} : vector<16x512xf32> to vector<16x32xf32>
    %224 = arith.addf %222, %223 : vector<16x32xf32>
    %225 = vector.extract_strided_slice %199 {offsets = [0, 416], sizes = [16, 32], strides = [1, 1]} : vector<16x512xf32> to vector<16x32xf32>
    %226 = arith.addf %224, %225 : vector<16x32xf32>
    %227 = vector.extract_strided_slice %199 {offsets = [0, 448], sizes = [16, 32], strides = [1, 1]} : vector<16x512xf32> to vector<16x32xf32>
    %228 = arith.addf %226, %227 : vector<16x32xf32>
    %229 = vector.extract_strided_slice %199 {offsets = [0, 480], sizes = [16, 32], strides = [1, 1]} : vector<16x512xf32> to vector<16x32xf32>
    %230 = arith.addf %228, %229 : vector<16x32xf32>
    %cst_67 = arith.constant dense<0.000000e+00> : vector<32xf32>
    %231 = vector.multi_reduction <add>, %230, %cst_67 [0] : vector<16x32xf32> to vector<32xf32>
    %232 = vector.shape_cast %231 : vector<32xf32> to vector<1x32xf32>
    %233 = vector.extract_strided_slice %198 {offsets = [0, 0], sizes = [1, 16], strides = [1, 1]} : vector<1x32xf32> to vector<1x16xf32>
    %234 = vector.shape_cast %233 : vector<1x16xf32> to vector<1x1x16xf32>
    %cst_68 = arith.constant dense<0.000000e+00> : vector<1xf32>
    %235 = vector.multi_reduction <add>, %234, %cst_68 [1, 2] : vector<1x1x16xf32> to vector<1xf32>
    %236 = vector.shape_cast %235 : vector<1xf32> to vector<1x1x1xf32>
    %237 = vector.extract %236[0, 0, 0] : f32 from vector<1x1x1xf32>
    %cst_69 = arith.constant 4.096000e+03 : f32
    %238 = arith.divf %237, %cst_69 : f32
    %239 = vector.extract_strided_slice %232 {offsets = [0, 0], sizes = [1, 16], strides = [1, 1]} : vector<1x32xf32> to vector<1x16xf32>
    %240 = vector.shape_cast %239 : vector<1x16xf32> to vector<1x1x16xf32>
    %cst_70 = arith.constant dense<0.000000e+00> : vector<1xf32>
    %241 = vector.multi_reduction <add>, %240, %cst_70 [1, 2] : vector<1x1x16xf32> to vector<1xf32>
    %242 = vector.shape_cast %241 : vector<1xf32> to vector<1x1x1xf32>
    %243 = vector.extract %242[0, 0, 0] : f32 from vector<1x1x1xf32>
    %cst_71 = arith.constant 4.096000e+03 : f32
    %244 = arith.divf %243, %cst_71 : f32
    %245 = arith.mulf %238, %238 : f32
    %246 = arith.subf %244, %245 : f32
    %cst_72 = arith.constant 0.000000e+00 : f32
    %247 = arith.maximumf %246, %cst_72 : f32
    %cst_73 = arith.constant 9.99999974E-6 : f32
    %248 = arith.addf %247, %cst_73 : f32
    %249 = math.rsqrt %248 : f32
    %250 = vector.extract_strided_slice %164 {offsets = [0, 0], sizes = [1, 16], strides = [1, 1]} : vector<1x32xf32> to vector<1x16xf32>
    %251 = vector.broadcast %249 : f32 to vector<1x16xf32>
    %252 = arith.mulf %251, %250 : vector<1x16xf32>
    %253 = vector.extract_strided_slice %165 {offsets = [0, 0], sizes = [1, 16], strides = [1, 1]} : vector<1x32xf32> to vector<1x16xf32>
    %254 = vector.broadcast %238 : f32 to vector<1x16xf32>
    %255 = arith.mulf %254, %252 : vector<1x16xf32>
    %256 = arith.subf %253, %255 : vector<1x16xf32>
    %257 = vector.extract_strided_slice %198 {offsets = [0, 16], sizes = [1, 16], strides = [1, 1]} : vector<1x32xf32> to vector<1x16xf32>
    %258 = vector.shape_cast %257 : vector<1x16xf32> to vector<1x1x16xf32>
    %cst_74 = arith.constant dense<0.000000e+00> : vector<1xf32>
    %259 = vector.multi_reduction <add>, %258, %cst_74 [1, 2] : vector<1x1x16xf32> to vector<1xf32>
    %260 = vector.shape_cast %259 : vector<1xf32> to vector<1x1x1xf32>
    %261 = vector.extract %260[0, 0, 0] : f32 from vector<1x1x1xf32>
    %cst_75 = arith.constant 4.096000e+03 : f32
    %262 = arith.divf %261, %cst_75 : f32
    %263 = vector.extract_strided_slice %232 {offsets = [0, 16], sizes = [1, 16], strides = [1, 1]} : vector<1x32xf32> to vector<1x16xf32>
    %264 = vector.shape_cast %263 : vector<1x16xf32> to vector<1x1x16xf32>
    %cst_76 = arith.constant dense<0.000000e+00> : vector<1xf32>
    %265 = vector.multi_reduction <add>, %264, %cst_76 [1, 2] : vector<1x1x16xf32> to vector<1xf32>
    %266 = vector.shape_cast %265 : vector<1xf32> to vector<1x1x1xf32>
    %267 = vector.extract %266[0, 0, 0] : f32 from vector<1x1x1xf32>
    %cst_77 = arith.constant 4.096000e+03 : f32
    %268 = arith.divf %267, %cst_77 : f32
    %269 = arith.mulf %262, %262 : f32
    %270 = arith.subf %268, %269 : f32
    %cst_78 = arith.constant 0.000000e+00 : f32
    %271 = arith.maximumf %270, %cst_78 : f32
    %cst_79 = arith.constant 9.99999974E-6 : f32
    %272 = arith.addf %271, %cst_79 : f32
    %273 = math.rsqrt %272 : f32
    %274 = vector.extract_strided_slice %164 {offsets = [0, 16], sizes = [1, 16], strides = [1, 1]} : vector<1x32xf32> to vector<1x16xf32>
    %275 = vector.broadcast %273 : f32 to vector<1x16xf32>
    %276 = arith.mulf %275, %274 : vector<1x16xf32>
    %277 = vector.extract_strided_slice %165 {offsets = [0, 16], sizes = [1, 16], strides = [1, 1]} : vector<1x32xf32> to vector<1x16xf32>
    %278 = vector.broadcast %262 : f32 to vector<1x16xf32>
    %279 = arith.mulf %278, %276 : vector<1x16xf32>
    %280 = arith.subf %277, %279 : vector<1x16xf32>
    %281 = tpu.concatenate %252, %276 in 1 : vector<1x16xf32>, vector<1x16xf32> -> vector<1x32xf32>
    %282 = tpu.concatenate %256, %280 in 1 : vector<1x16xf32>, vector<1x16xf32> -> vector<1x32xf32>
    %283 = tpu.concatenate %281, %281, %281, %281, %281, %281, %281, %281, %281, %281, %281, %281, %281, %281, %281, %281 in 1 : vector<1x32xf32>, vector<1x32xf32>, vector<1x32xf32>, vector<1x32xf32>, vector<1x32xf32>, vector<1x32xf32>, vector<1x32xf32>, vector<1x32xf32>, vector<1x32xf32>, vector<1x32xf32>, vector<1x32xf32>, vector<1x32xf32>, vector<1x32xf32>, vector<1x32xf32>, vector<1x32xf32>, vector<1x32xf32> -> vector<1x512xf32>
    %284 = tpu.concatenate %282, %282, %282, %282, %282, %282, %282, %282, %282, %282, %282, %282, %282, %282, %282, %282 in 1 : vector<1x32xf32>, vector<1x32xf32>, vector<1x32xf32>, vector<1x32xf32>, vector<1x32xf32>, vector<1x32xf32>, vector<1x32xf32>, vector<1x32xf32>, vector<1x32xf32>, vector<1x32xf32>, vector<1x32xf32>, vector<1x32xf32>, vector<1x32xf32>, vector<1x32xf32>, vector<1x32xf32>, vector<1x32xf32> -> vector<1x512xf32>
    %285 = vector.broadcast %283 : vector<1x512xf32> to vector<16x512xf32>
    %286 = arith.mulf %163, %285 : vector<16x512xf32>
    %287 = vector.broadcast %284 : vector<1x512xf32> to vector<16x512xf32>
    %288 = arith.addf %286, %287 : vector<16x512xf32>
    %289 = arith.addf %288, %4 : vector<16x512xf32>
    %c0_80 = arith.constant 0 : index
    %c0_81 = arith.constant 0 : index
    %c0_82 = arith.constant 0 : index
    %290 = vector.load %arg8[%c0_80, %c0_81, %c0_82] : memref<2x16x512xf32, #tpu.memory_space<vmem>>, vector<1x16x512xf32>
    %291 = vector.shape_cast %290 : vector<1x16x512xf32> to vector<16x512xf32>
    %292 = vector.shape_cast %289 : vector<16x512xf32> to vector<1x16x512xf32>
    tpu.vector_store %arg8[%c0_80, %c0_81, %c0_82], %292 {strides = array<i32>} : memref<2x16x512xf32, #tpu.memory_space<vmem>>, vector<1x16x512xf32>,
    %c1_83 = arith.constant 1 : index
    %c0_84 = arith.constant 0 : index
    %c0_85 = arith.constant 0 : index
    %293 = vector.load %arg1[%c1_83, %c0_84, %c0_85] : memref<2x16x512xf32, #tpu.memory_space<vmem>>, vector<1x16x512xf32>
    %294 = vector.shape_cast %293 : vector<1x16x512xf32> to vector<16x512xf32>
    %295 = arith.truncf %294 : vector<16x512xf32> to vector<16x512xbf16>
    %c1_86 = arith.constant 1 : index
    %c0_87 = arith.constant 0 : index
    %296 = vector.load %arg9[%c1_86, %c0_87] : memref<18x512xbf16, #tpu.memory_space<vmem>>, vector<16x512xbf16>
    tpu.vector_store %arg9[%c1_86, %c0_87], %295 {strides = array<i32>} : memref<18x512xbf16, #tpu.memory_space<vmem>>, vector<16x512xbf16>,
    %c0_88 = arith.constant 0 : index
    %c0_89 = arith.constant 0 : index
    %297 = vector.load %arg9[%c0_88, %c0_89] : memref<18x512xbf16, #tpu.memory_space<vmem>>, vector<16x512xbf16>
    %c0_90 = arith.constant 0 : index
    %c0_91 = arith.constant 0 : index
    %c0_92 = arith.constant 0 : index
    %298 = vector.load %arg2[%c0_90, %c0_91, %c0_92] : memref<3x512x512xbf16, #tpu.memory_space<vmem>>, vector<1x512x512xbf16>
    %299 = vector.shape_cast %298 : vector<1x512x512xbf16> to vector<512x512xbf16>
    %cst_93 = arith.constant dense<0.000000e+00> : vector<16x512xf32>
    %300 = tpu.matmul %297, %299, %cst_93 {dimension_numbers = #tpu.dot_dimension_numbers<[1], [0], [0], [1], [0, 0, 1, 1], [], []>} : vector<16x512xbf16>, vector<512x512xbf16>, vector<16x512xf32> -> vector<16x512xf32>
    %c1_94 = arith.constant 1 : index
    %c0_95 = arith.constant 0 : index
    %301 = vector.load %arg9[%c1_94, %c0_95] : memref<18x512xbf16, #tpu.memory_space<vmem>>, vector<16x512xbf16>
    %c1_96 = arith.constant 1 : index
    %c0_97 = arith.constant 0 : index
    %c0_98 = arith.constant 0 : index
    %302 = vector.load %arg2[%c1_96, %c0_97, %c0_98] : memref<3x512x512xbf16, #tpu.memory_space<vmem>>, vector<1x512x512xbf16>
    %303 = vector.shape_cast %302 : vector<1x512x512xbf16> to vector<512x512xbf16>
    %cst_99 = arith.constant dense<0.000000e+00> : vector<16x512xf32>
    %304 = tpu.matmul %301, %303, %cst_99 {dimension_numbers = #tpu.dot_dimension_numbers<[1], [0], [0], [1], [0, 0, 1, 1], [], []>} : vector<16x512xbf16>, vector<512x512xbf16>, vector<16x512xf32> -> vector<16x512xf32>
    %305 = arith.addf %300, %304 : vector<16x512xf32>
    %c2_100 = arith.constant 2 : index
    %c0_101 = arith.constant 0 : index
    %306 = vector.load %arg9[%c2_100, %c0_101] : memref<18x512xbf16, #tpu.memory_space<vmem>>, vector<16x512xbf16>
    %c2_102 = arith.constant 2 : index
    %c0_103 = arith.constant 0 : index
    %c0_104 = arith.constant 0 : index
    %307 = vector.load %arg2[%c2_102, %c0_103, %c0_104] : memref<3x512x512xbf16, #tpu.memory_space<vmem>>, vector<1x512x512xbf16>
    %308 = vector.shape_cast %307 : vector<1x512x512xbf16> to vector<512x512xbf16>
    %cst_105 = arith.constant dense<0.000000e+00> : vector<16x512xf32>
    %309 = tpu.matmul %306, %308, %cst_105 {dimension_numbers = #tpu.dot_dimension_numbers<[1], [0], [0], [1], [0, 0, 1, 1], [], []>} : vector<16x512xbf16>, vector<512x512xbf16>, vector<16x512xf32> -> vector<16x512xf32>
    %310 = arith.addf %305, %309 : vector<16x512xf32>
    %c0_106 = arith.constant 0 : index
    %c0_107 = arith.constant 0 : index
    %311 = vector.load %arg3[%c0_106, %c0_107] : memref<1x32xf32, #tpu.memory_space<vmem>>, vector<1x32xf32>
    %c0_108 = arith.constant 0 : index
    %c0_109 = arith.constant 0 : index
    %312 = vector.load %arg4[%c0_108, %c0_109] : memref<1x32xf32, #tpu.memory_space<vmem>>, vector<1x32xf32>
    %313 = vector.extract_strided_slice %310 {offsets = [0, 0], sizes = [16, 32], strides = [1, 1]} : vector<16x512xf32> to vector<16x32xf32>
    %314 = vector.extract_strided_slice %310 {offsets = [0, 32], sizes = [16, 32], strides = [1, 1]} : vector<16x512xf32> to vector<16x32xf32>
    %315 = arith.addf %313, %314 : vector<16x32xf32>
    %316 = vector.extract_strided_slice %310 {offsets = [0, 64], sizes = [16, 32], strides = [1, 1]} : vector<16x512xf32> to vector<16x32xf32>
    %317 = arith.addf %315, %316 : vector<16x32xf32>
    %318 = vector.extract_strided_slice %310 {offsets = [0, 96], sizes = [16, 32], strides = [1, 1]} : vector<16x512xf32> to vector<16x32xf32>
    %319 = arith.addf %317, %318 : vector<16x32xf32>
    %320 = vector.extract_strided_slice %310 {offsets = [0, 128], sizes = [16, 32], strides = [1, 1]} : vector<16x512xf32> to vector<16x32xf32>
    %321 = arith.addf %319, %320 : vector<16x32xf32>
    %322 = vector.extract_strided_slice %310 {offsets = [0, 160], sizes = [16, 32], strides = [1, 1]} : vector<16x512xf32> to vector<16x32xf32>
    %323 = arith.addf %321, %322 : vector<16x32xf32>
    %324 = vector.extract_strided_slice %310 {offsets = [0, 192], sizes = [16, 32], strides = [1, 1]} : vector<16x512xf32> to vector<16x32xf32>
    %325 = arith.addf %323, %324 : vector<16x32xf32>
    %326 = vector.extract_strided_slice %310 {offsets = [0, 224], sizes = [16, 32], strides = [1, 1]} : vector<16x512xf32> to vector<16x32xf32>
    %327 = arith.addf %325, %326 : vector<16x32xf32>
    %328 = vector.extract_strided_slice %310 {offsets = [0, 256], sizes = [16, 32], strides = [1, 1]} : vector<16x512xf32> to vector<16x32xf32>
    %329 = arith.addf %327, %328 : vector<16x32xf32>
    %330 = vector.extract_strided_slice %310 {offsets = [0, 288], sizes = [16, 32], strides = [1, 1]} : vector<16x512xf32> to vector<16x32xf32>
    %331 = arith.addf %329, %330 : vector<16x32xf32>
    %332 = vector.extract_strided_slice %310 {offsets = [0, 320], sizes = [16, 32], strides = [1, 1]} : vector<16x512xf32> to vector<16x32xf32>
    %333 = arith.addf %331, %332 : vector<16x32xf32>
    %334 = vector.extract_strided_slice %310 {offsets = [0, 352], sizes = [16, 32], strides = [1, 1]} : vector<16x512xf32> to vector<16x32xf32>
    %335 = arith.addf %333, %334 : vector<16x32xf32>
    %336 = vector.extract_strided_slice %310 {offsets = [0, 384], sizes = [16, 32], strides = [1, 1]} : vector<16x512xf32> to vector<16x32xf32>
    %337 = arith.addf %335, %336 : vector<16x32xf32>
    %338 = vector.extract_strided_slice %310 {offsets = [0, 416], sizes = [16, 32], strides = [1, 1]} : vector<16x512xf32> to vector<16x32xf32>
    %339 = arith.addf %337, %338 : vector<16x32xf32>
    %340 = vector.extract_strided_slice %310 {offsets = [0, 448], sizes = [16, 32], strides = [1, 1]} : vector<16x512xf32> to vector<16x32xf32>
    %341 = arith.addf %339, %340 : vector<16x32xf32>
    %342 = vector.extract_strided_slice %310 {offsets = [0, 480], sizes = [16, 32], strides = [1, 1]} : vector<16x512xf32> to vector<16x32xf32>
    %343 = arith.addf %341, %342 : vector<16x32xf32>
    %cst_110 = arith.constant dense<0.000000e+00> : vector<32xf32>
    %344 = vector.multi_reduction <add>, %343, %cst_110 [0] : vector<16x32xf32> to vector<32xf32>
    %345 = vector.shape_cast %344 : vector<32xf32> to vector<1x32xf32>
    %346 = arith.mulf %310, %310 : vector<16x512xf32>
    %347 = vector.extract_strided_slice %346 {offsets = [0, 0], sizes = [16, 32], strides = [1, 1]} : vector<16x512xf32> to vector<16x32xf32>
    %348 = vector.extract_strided_slice %346 {offsets = [0, 32], sizes = [16, 32], strides = [1, 1]} : vector<16x512xf32> to vector<16x32xf32>
    %349 = arith.addf %347, %348 : vector<16x32xf32>
    %350 = vector.extract_strided_slice %346 {offsets = [0, 64], sizes = [16, 32], strides = [1, 1]} : vector<16x512xf32> to vector<16x32xf32>
    %351 = arith.addf %349, %350 : vector<16x32xf32>
    %352 = vector.extract_strided_slice %346 {offsets = [0, 96], sizes = [16, 32], strides = [1, 1]} : vector<16x512xf32> to vector<16x32xf32>
    %353 = arith.addf %351, %352 : vector<16x32xf32>
    %354 = vector.extract_strided_slice %346 {offsets = [0, 128], sizes = [16, 32], strides = [1, 1]} : vector<16x512xf32> to vector<16x32xf32>
    %355 = arith.addf %353, %354 : vector<16x32xf32>
    %356 = vector.extract_strided_slice %346 {offsets = [0, 160], sizes = [16, 32], strides = [1, 1]} : vector<16x512xf32> to vector<16x32xf32>
    %357 = arith.addf %355, %356 : vector<16x32xf32>
    %358 = vector.extract_strided_slice %346 {offsets = [0, 192], sizes = [16, 32], strides = [1, 1]} : vector<16x512xf32> to vector<16x32xf32>
    %359 = arith.addf %357, %358 : vector<16x32xf32>
    %360 = vector.extract_strided_slice %346 {offsets = [0, 224], sizes = [16, 32], strides = [1, 1]} : vector<16x512xf32> to vector<16x32xf32>
    %361 = arith.addf %359, %360 : vector<16x32xf32>
    %362 = vector.extract_strided_slice %346 {offsets = [0, 256], sizes = [16, 32], strides = [1, 1]} : vector<16x512xf32> to vector<16x32xf32>
    %363 = arith.addf %361, %362 : vector<16x32xf32>
    %364 = vector.extract_strided_slice %346 {offsets = [0, 288], sizes = [16, 32], strides = [1, 1]} : vector<16x512xf32> to vector<16x32xf32>
    %365 = arith.addf %363, %364 : vector<16x32xf32>
    %366 = vector.extract_strided_slice %346 {offsets = [0, 320], sizes = [16, 32], strides = [1, 1]} : vector<16x512xf32> to vector<16x32xf32>
    %367 = arith.addf %365, %366 : vector<16x32xf32>
    %368 = vector.extract_strided_slice %346 {offsets = [0, 352], sizes = [16, 32], strides = [1, 1]} : vector<16x512xf32> to vector<16x32xf32>
    %369 = arith.addf %367, %368 : vector<16x32xf32>
    %370 = vector.extract_strided_slice %346 {offsets = [0, 384], sizes = [16, 32], strides = [1, 1]} : vector<16x512xf32> to vector<16x32xf32>
    %371 = arith.addf %369, %370 : vector<16x32xf32>
    %372 = vector.extract_strided_slice %346 {offsets = [0, 416], sizes = [16, 32], strides = [1, 1]} : vector<16x512xf32> to vector<16x32xf32>
    %373 = arith.addf %371, %372 : vector<16x32xf32>
    %374 = vector.extract_strided_slice %346 {offsets = [0, 448], sizes = [16, 32], strides = [1, 1]} : vector<16x512xf32> to vector<16x32xf32>
    %375 = arith.addf %373, %374 : vector<16x32xf32>
    %376 = vector.extract_strided_slice %346 {offsets = [0, 480], sizes = [16, 32], strides = [1, 1]} : vector<16x512xf32> to vector<16x32xf32>
    %377 = arith.addf %375, %376 : vector<16x32xf32>
    %cst_111 = arith.constant dense<0.000000e+00> : vector<32xf32>
    %378 = vector.multi_reduction <add>, %377, %cst_111 [0] : vector<16x32xf32> to vector<32xf32>
    %379 = vector.shape_cast %378 : vector<32xf32> to vector<1x32xf32>
    %380 = vector.extract_strided_slice %345 {offsets = [0, 0], sizes = [1, 16], strides = [1, 1]} : vector<1x32xf32> to vector<1x16xf32>
    %381 = vector.shape_cast %380 : vector<1x16xf32> to vector<1x1x16xf32>
    %cst_112 = arith.constant dense<0.000000e+00> : vector<1xf32>
    %382 = vector.multi_reduction <add>, %381, %cst_112 [1, 2] : vector<1x1x16xf32> to vector<1xf32>
    %383 = vector.shape_cast %382 : vector<1xf32> to vector<1x1x1xf32>
    %384 = vector.extract %383[0, 0, 0] : f32 from vector<1x1x1xf32>
    %cst_113 = arith.constant 4.096000e+03 : f32
    %385 = arith.divf %384, %cst_113 : f32
    %386 = vector.extract_strided_slice %379 {offsets = [0, 0], sizes = [1, 16], strides = [1, 1]} : vector<1x32xf32> to vector<1x16xf32>
    %387 = vector.shape_cast %386 : vector<1x16xf32> to vector<1x1x16xf32>
    %cst_114 = arith.constant dense<0.000000e+00> : vector<1xf32>
    %388 = vector.multi_reduction <add>, %387, %cst_114 [1, 2] : vector<1x1x16xf32> to vector<1xf32>
    %389 = vector.shape_cast %388 : vector<1xf32> to vector<1x1x1xf32>
    %390 = vector.extract %389[0, 0, 0] : f32 from vector<1x1x1xf32>
    %cst_115 = arith.constant 4.096000e+03 : f32
    %391 = arith.divf %390, %cst_115 : f32
    %392 = arith.mulf %385, %385 : f32
    %393 = arith.subf %391, %392 : f32
    %cst_116 = arith.constant 0.000000e+00 : f32
    %394 = arith.maximumf %393, %cst_116 : f32
    %cst_117 = arith.constant 9.99999974E-6 : f32
    %395 = arith.addf %394, %cst_117 : f32
    %396 = math.rsqrt %395 : f32
    %397 = vector.extract_strided_slice %311 {offsets = [0, 0], sizes = [1, 16], strides = [1, 1]} : vector<1x32xf32> to vector<1x16xf32>
    %398 = vector.broadcast %396 : f32 to vector<1x16xf32>
    %399 = arith.mulf %398, %397 : vector<1x16xf32>
    %400 = vector.extract_strided_slice %312 {offsets = [0, 0], sizes = [1, 16], strides = [1, 1]} : vector<1x32xf32> to vector<1x16xf32>
    %401 = vector.broadcast %385 : f32 to vector<1x16xf32>
    %402 = arith.mulf %401, %399 : vector<1x16xf32>
    %403 = arith.subf %400, %402 : vector<1x16xf32>
    %404 = vector.extract_strided_slice %345 {offsets = [0, 16], sizes = [1, 16], strides = [1, 1]} : vector<1x32xf32> to vector<1x16xf32>
    %405 = vector.shape_cast %404 : vector<1x16xf32> to vector<1x1x16xf32>
    %cst_118 = arith.constant dense<0.000000e+00> : vector<1xf32>
    %406 = vector.multi_reduction <add>, %405, %cst_118 [1, 2] : vector<1x1x16xf32> to vector<1xf32>
    %407 = vector.shape_cast %406 : vector<1xf32> to vector<1x1x1xf32>
    %408 = vector.extract %407[0, 0, 0] : f32 from vector<1x1x1xf32>
    %cst_119 = arith.constant 4.096000e+03 : f32
    %409 = arith.divf %408, %cst_119 : f32
    %410 = vector.extract_strided_slice %379 {offsets = [0, 16], sizes = [1, 16], strides = [1, 1]} : vector<1x32xf32> to vector<1x16xf32>
    %411 = vector.shape_cast %410 : vector<1x16xf32> to vector<1x1x16xf32>
    %cst_120 = arith.constant dense<0.000000e+00> : vector<1xf32>
    %412 = vector.multi_reduction <add>, %411, %cst_120 [1, 2] : vector<1x1x16xf32> to vector<1xf32>
    %413 = vector.shape_cast %412 : vector<1xf32> to vector<1x1x1xf32>
    %414 = vector.extract %413[0, 0, 0] : f32 from vector<1x1x1xf32>
    %cst_121 = arith.constant 4.096000e+03 : f32
    %415 = arith.divf %414, %cst_121 : f32
    %416 = arith.mulf %409, %409 : f32
    %417 = arith.subf %415, %416 : f32
    %cst_122 = arith.constant 0.000000e+00 : f32
    %418 = arith.maximumf %417, %cst_122 : f32
    %cst_123 = arith.constant 9.99999974E-6 : f32
    %419 = arith.addf %418, %cst_123 : f32
    %420 = math.rsqrt %419 : f32
    %421 = vector.extract_strided_slice %311 {offsets = [0, 16], sizes = [1, 16], strides = [1, 1]} : vector<1x32xf32> to vector<1x16xf32>
    %422 = vector.broadcast %420 : f32 to vector<1x16xf32>
    %423 = arith.mulf %422, %421 : vector<1x16xf32>
    %424 = vector.extract_strided_slice %312 {offsets = [0, 16], sizes = [1, 16], strides = [1, 1]} : vector<1x32xf32> to vector<1x16xf32>
    %425 = vector.broadcast %409 : f32 to vector<1x16xf32>
    %426 = arith.mulf %425, %423 : vector<1x16xf32>
    %427 = arith.subf %424, %426 : vector<1x16xf32>
    %428 = tpu.concatenate %399, %423 in 1 : vector<1x16xf32>, vector<1x16xf32> -> vector<1x32xf32>
    %429 = tpu.concatenate %403, %427 in 1 : vector<1x16xf32>, vector<1x16xf32> -> vector<1x32xf32>
    %430 = tpu.concatenate %428, %428, %428, %428, %428, %428, %428, %428, %428, %428, %428, %428, %428, %428, %428, %428 in 1 : vector<1x32xf32>, vector<1x32xf32>, vector<1x32xf32>, vector<1x32xf32>, vector<1x32xf32>, vector<1x32xf32>, vector<1x32xf32>, vector<1x32xf32>, vector<1x32xf32>, vector<1x32xf32>, vector<1x32xf32>, vector<1x32xf32>, vector<1x32xf32>, vector<1x32xf32>, vector<1x32xf32>, vector<1x32xf32> -> vector<1x512xf32>
    %431 = tpu.concatenate %429, %429, %429, %429, %429, %429, %429, %429, %429, %429, %429, %429, %429, %429, %429, %429 in 1 : vector<1x32xf32>, vector<1x32xf32>, vector<1x32xf32>, vector<1x32xf32>, vector<1x32xf32>, vector<1x32xf32>, vector<1x32xf32>, vector<1x32xf32>, vector<1x32xf32>, vector<1x32xf32>, vector<1x32xf32>, vector<1x32xf32>, vector<1x32xf32>, vector<1x32xf32>, vector<1x32xf32>, vector<1x32xf32> -> vector<1x512xf32>
    %432 = vector.broadcast %430 : vector<1x512xf32> to vector<16x512xf32>
    %433 = arith.mulf %310, %432 : vector<16x512xf32>
    %434 = vector.broadcast %431 : vector<1x512xf32> to vector<16x512xf32>
    %435 = arith.addf %433, %434 : vector<16x512xf32>
    %cst_124 = arith.constant 0.000000e+00 : f32
    %436 = vector.broadcast %cst_124 : f32 to vector<16x512xf32>
    %437 = arith.maximumf %435, %436 : vector<16x512xf32>
    %438 = arith.truncf %437 : vector<16x512xf32> to vector<16x512xbf16>
    %c1_125 = arith.constant 1 : index
    %c0_126 = arith.constant 0 : index
    %439 = vector.load %arg9[%c1_125, %c0_126] : memref<18x512xbf16, #tpu.memory_space<vmem>>, vector<16x512xbf16>
    tpu.vector_store %arg9[%c1_125, %c0_126], %438 {strides = array<i32>} : memref<18x512xbf16, #tpu.memory_space<vmem>>, vector<16x512xbf16>,
    %c0_127 = arith.constant 0 : index
    %c0_128 = arith.constant 0 : index
    %440 = vector.load %arg9[%c0_127, %c0_128] : memref<18x512xbf16, #tpu.memory_space<vmem>>, vector<16x512xbf16>
    %c0_129 = arith.constant 0 : index
    %c0_130 = arith.constant 0 : index
    %c0_131 = arith.constant 0 : index
    %441 = vector.load %arg5[%c0_129, %c0_130, %c0_131] : memref<3x512x512xbf16, #tpu.memory_space<vmem>>, vector<1x512x512xbf16>
    %442 = vector.shape_cast %441 : vector<1x512x512xbf16> to vector<512x512xbf16>
    %cst_132 = arith.constant dense<0.000000e+00> : vector<16x512xf32>
    %443 = tpu.matmul %440, %442, %cst_132 {dimension_numbers = #tpu.dot_dimension_numbers<[1], [0], [0], [1], [0, 0, 1, 1], [], []>} : vector<16x512xbf16>, vector<512x512xbf16>, vector<16x512xf32> -> vector<16x512xf32>
    %c1_133 = arith.constant 1 : index
    %c0_134 = arith.constant 0 : index
    %444 = vector.load %arg9[%c1_133, %c0_134] : memref<18x512xbf16, #tpu.memory_space<vmem>>, vector<16x512xbf16>
    %c1_135 = arith.constant 1 : index
    %c0_136 = arith.constant 0 : index
    %c0_137 = arith.constant 0 : index
    %445 = vector.load %arg5[%c1_135, %c0_136, %c0_137] : memref<3x512x512xbf16, #tpu.memory_space<vmem>>, vector<1x512x512xbf16>
    %446 = vector.shape_cast %445 : vector<1x512x512xbf16> to vector<512x512xbf16>
    %cst_138 = arith.constant dense<0.000000e+00> : vector<16x512xf32>
    %447 = tpu.matmul %444, %446, %cst_138 {dimension_numbers = #tpu.dot_dimension_numbers<[1], [0], [0], [1], [0, 0, 1, 1], [], []>} : vector<16x512xbf16>, vector<512x512xbf16>, vector<16x512xf32> -> vector<16x512xf32>
    %448 = arith.addf %443, %447 : vector<16x512xf32>
    %c2_139 = arith.constant 2 : index
    %c0_140 = arith.constant 0 : index
    %449 = vector.load %arg9[%c2_139, %c0_140] : memref<18x512xbf16, #tpu.memory_space<vmem>>, vector<16x512xbf16>
    %c2_141 = arith.constant 2 : index
    %c0_142 = arith.constant 0 : index
    %c0_143 = arith.constant 0 : index
    %450 = vector.load %arg5[%c2_141, %c0_142, %c0_143] : memref<3x512x512xbf16, #tpu.memory_space<vmem>>, vector<1x512x512xbf16>
    %451 = vector.shape_cast %450 : vector<1x512x512xbf16> to vector<512x512xbf16>
    %cst_144 = arith.constant dense<0.000000e+00> : vector<16x512xf32>
    %452 = tpu.matmul %449, %451, %cst_144 {dimension_numbers = #tpu.dot_dimension_numbers<[1], [0], [0], [1], [0, 0, 1, 1], [], []>} : vector<16x512xbf16>, vector<512x512xbf16>, vector<16x512xf32> -> vector<16x512xf32>
    %453 = arith.addf %448, %452 : vector<16x512xf32>
    %c0_145 = arith.constant 0 : index
    %c0_146 = arith.constant 0 : index
    %454 = vector.load %arg6[%c0_145, %c0_146] : memref<1x32xf32, #tpu.memory_space<vmem>>, vector<1x32xf32>
    %c0_147 = arith.constant 0 : index
    %c0_148 = arith.constant 0 : index
    %455 = vector.load %arg7[%c0_147, %c0_148] : memref<1x32xf32, #tpu.memory_space<vmem>>, vector<1x32xf32>
    %456 = vector.extract_strided_slice %453 {offsets = [0, 0], sizes = [16, 32], strides = [1, 1]} : vector<16x512xf32> to vector<16x32xf32>
    %457 = vector.extract_strided_slice %453 {offsets = [0, 32], sizes = [16, 32], strides = [1, 1]} : vector<16x512xf32> to vector<16x32xf32>
    %458 = arith.addf %456, %457 : vector<16x32xf32>
    %459 = vector.extract_strided_slice %453 {offsets = [0, 64], sizes = [16, 32], strides = [1, 1]} : vector<16x512xf32> to vector<16x32xf32>
    %460 = arith.addf %458, %459 : vector<16x32xf32>
    %461 = vector.extract_strided_slice %453 {offsets = [0, 96], sizes = [16, 32], strides = [1, 1]} : vector<16x512xf32> to vector<16x32xf32>
    %462 = arith.addf %460, %461 : vector<16x32xf32>
    %463 = vector.extract_strided_slice %453 {offsets = [0, 128], sizes = [16, 32], strides = [1, 1]} : vector<16x512xf32> to vector<16x32xf32>
    %464 = arith.addf %462, %463 : vector<16x32xf32>
    %465 = vector.extract_strided_slice %453 {offsets = [0, 160], sizes = [16, 32], strides = [1, 1]} : vector<16x512xf32> to vector<16x32xf32>
    %466 = arith.addf %464, %465 : vector<16x32xf32>
    %467 = vector.extract_strided_slice %453 {offsets = [0, 192], sizes = [16, 32], strides = [1, 1]} : vector<16x512xf32> to vector<16x32xf32>
    %468 = arith.addf %466, %467 : vector<16x32xf32>
    %469 = vector.extract_strided_slice %453 {offsets = [0, 224], sizes = [16, 32], strides = [1, 1]} : vector<16x512xf32> to vector<16x32xf32>
    %470 = arith.addf %468, %469 : vector<16x32xf32>
    %471 = vector.extract_strided_slice %453 {offsets = [0, 256], sizes = [16, 32], strides = [1, 1]} : vector<16x512xf32> to vector<16x32xf32>
    %472 = arith.addf %470, %471 : vector<16x32xf32>
    %473 = vector.extract_strided_slice %453 {offsets = [0, 288], sizes = [16, 32], strides = [1, 1]} : vector<16x512xf32> to vector<16x32xf32>
    %474 = arith.addf %472, %473 : vector<16x32xf32>
    %475 = vector.extract_strided_slice %453 {offsets = [0, 320], sizes = [16, 32], strides = [1, 1]} : vector<16x512xf32> to vector<16x32xf32>
    %476 = arith.addf %474, %475 : vector<16x32xf32>
    %477 = vector.extract_strided_slice %453 {offsets = [0, 352], sizes = [16, 32], strides = [1, 1]} : vector<16x512xf32> to vector<16x32xf32>
    %478 = arith.addf %476, %477 : vector<16x32xf32>
    %479 = vector.extract_strided_slice %453 {offsets = [0, 384], sizes = [16, 32], strides = [1, 1]} : vector<16x512xf32> to vector<16x32xf32>
    %480 = arith.addf %478, %479 : vector<16x32xf32>
    %481 = vector.extract_strided_slice %453 {offsets = [0, 416], sizes = [16, 32], strides = [1, 1]} : vector<16x512xf32> to vector<16x32xf32>
    %482 = arith.addf %480, %481 : vector<16x32xf32>
    %483 = vector.extract_strided_slice %453 {offsets = [0, 448], sizes = [16, 32], strides = [1, 1]} : vector<16x512xf32> to vector<16x32xf32>
    %484 = arith.addf %482, %483 : vector<16x32xf32>
    %485 = vector.extract_strided_slice %453 {offsets = [0, 480], sizes = [16, 32], strides = [1, 1]} : vector<16x512xf32> to vector<16x32xf32>
    %486 = arith.addf %484, %485 : vector<16x32xf32>
    %cst_149 = arith.constant dense<0.000000e+00> : vector<32xf32>
    %487 = vector.multi_reduction <add>, %486, %cst_149 [0] : vector<16x32xf32> to vector<32xf32>
    %488 = vector.shape_cast %487 : vector<32xf32> to vector<1x32xf32>
    %489 = arith.mulf %453, %453 : vector<16x512xf32>
    %490 = vector.extract_strided_slice %489 {offsets = [0, 0], sizes = [16, 32], strides = [1, 1]} : vector<16x512xf32> to vector<16x32xf32>
    %491 = vector.extract_strided_slice %489 {offsets = [0, 32], sizes = [16, 32], strides = [1, 1]} : vector<16x512xf32> to vector<16x32xf32>
    %492 = arith.addf %490, %491 : vector<16x32xf32>
    %493 = vector.extract_strided_slice %489 {offsets = [0, 64], sizes = [16, 32], strides = [1, 1]} : vector<16x512xf32> to vector<16x32xf32>
    %494 = arith.addf %492, %493 : vector<16x32xf32>
    %495 = vector.extract_strided_slice %489 {offsets = [0, 96], sizes = [16, 32], strides = [1, 1]} : vector<16x512xf32> to vector<16x32xf32>
    %496 = arith.addf %494, %495 : vector<16x32xf32>
    %497 = vector.extract_strided_slice %489 {offsets = [0, 128], sizes = [16, 32], strides = [1, 1]} : vector<16x512xf32> to vector<16x32xf32>
    %498 = arith.addf %496, %497 : vector<16x32xf32>
    %499 = vector.extract_strided_slice %489 {offsets = [0, 160], sizes = [16, 32], strides = [1, 1]} : vector<16x512xf32> to vector<16x32xf32>
    %500 = arith.addf %498, %499 : vector<16x32xf32>
    %501 = vector.extract_strided_slice %489 {offsets = [0, 192], sizes = [16, 32], strides = [1, 1]} : vector<16x512xf32> to vector<16x32xf32>
    %502 = arith.addf %500, %501 : vector<16x32xf32>
    %503 = vector.extract_strided_slice %489 {offsets = [0, 224], sizes = [16, 32], strides = [1, 1]} : vector<16x512xf32> to vector<16x32xf32>
    %504 = arith.addf %502, %503 : vector<16x32xf32>
    %505 = vector.extract_strided_slice %489 {offsets = [0, 256], sizes = [16, 32], strides = [1, 1]} : vector<16x512xf32> to vector<16x32xf32>
    %506 = arith.addf %504, %505 : vector<16x32xf32>
    %507 = vector.extract_strided_slice %489 {offsets = [0, 288], sizes = [16, 32], strides = [1, 1]} : vector<16x512xf32> to vector<16x32xf32>
    %508 = arith.addf %506, %507 : vector<16x32xf32>
    %509 = vector.extract_strided_slice %489 {offsets = [0, 320], sizes = [16, 32], strides = [1, 1]} : vector<16x512xf32> to vector<16x32xf32>
    %510 = arith.addf %508, %509 : vector<16x32xf32>
    %511 = vector.extract_strided_slice %489 {offsets = [0, 352], sizes = [16, 32], strides = [1, 1]} : vector<16x512xf32> to vector<16x32xf32>
    %512 = arith.addf %510, %511 : vector<16x32xf32>
    %513 = vector.extract_strided_slice %489 {offsets = [0, 384], sizes = [16, 32], strides = [1, 1]} : vector<16x512xf32> to vector<16x32xf32>
    %514 = arith.addf %512, %513 : vector<16x32xf32>
    %515 = vector.extract_strided_slice %489 {offsets = [0, 416], sizes = [16, 32], strides = [1, 1]} : vector<16x512xf32> to vector<16x32xf32>
    %516 = arith.addf %514, %515 : vector<16x32xf32>
    %517 = vector.extract_strided_slice %489 {offsets = [0, 448], sizes = [16, 32], strides = [1, 1]} : vector<16x512xf32> to vector<16x32xf32>
    %518 = arith.addf %516, %517 : vector<16x32xf32>
    %519 = vector.extract_strided_slice %489 {offsets = [0, 480], sizes = [16, 32], strides = [1, 1]} : vector<16x512xf32> to vector<16x32xf32>
    %520 = arith.addf %518, %519 : vector<16x32xf32>
    %cst_150 = arith.constant dense<0.000000e+00> : vector<32xf32>
    %521 = vector.multi_reduction <add>, %520, %cst_150 [0] : vector<16x32xf32> to vector<32xf32>
    %522 = vector.shape_cast %521 : vector<32xf32> to vector<1x32xf32>
    %523 = vector.extract_strided_slice %488 {offsets = [0, 0], sizes = [1, 16], strides = [1, 1]} : vector<1x32xf32> to vector<1x16xf32>
    %524 = vector.shape_cast %523 : vector<1x16xf32> to vector<1x1x16xf32>
    %cst_151 = arith.constant dense<0.000000e+00> : vector<1xf32>
    %525 = vector.multi_reduction <add>, %524, %cst_151 [1, 2] : vector<1x1x16xf32> to vector<1xf32>
    %526 = vector.shape_cast %525 : vector<1xf32> to vector<1x1x1xf32>
    %527 = vector.extract %526[0, 0, 0] : f32 from vector<1x1x1xf32>
    %cst_152 = arith.constant 4.096000e+03 : f32
    %528 = arith.divf %527, %cst_152 : f32
    %529 = vector.extract_strided_slice %522 {offsets = [0, 0], sizes = [1, 16], strides = [1, 1]} : vector<1x32xf32> to vector<1x16xf32>
    %530 = vector.shape_cast %529 : vector<1x16xf32> to vector<1x1x16xf32>
    %cst_153 = arith.constant dense<0.000000e+00> : vector<1xf32>
    %531 = vector.multi_reduction <add>, %530, %cst_153 [1, 2] : vector<1x1x16xf32> to vector<1xf32>
    %532 = vector.shape_cast %531 : vector<1xf32> to vector<1x1x1xf32>
    %533 = vector.extract %532[0, 0, 0] : f32 from vector<1x1x1xf32>
    %cst_154 = arith.constant 4.096000e+03 : f32
    %534 = arith.divf %533, %cst_154 : f32
    %535 = arith.mulf %528, %528 : f32
    %536 = arith.subf %534, %535 : f32
    %cst_155 = arith.constant 0.000000e+00 : f32
    %537 = arith.maximumf %536, %cst_155 : f32
    %cst_156 = arith.constant 9.99999974E-6 : f32
    %538 = arith.addf %537, %cst_156 : f32
    %539 = math.rsqrt %538 : f32
    %540 = vector.extract_strided_slice %454 {offsets = [0, 0], sizes = [1, 16], strides = [1, 1]} : vector<1x32xf32> to vector<1x16xf32>
    %541 = vector.broadcast %539 : f32 to vector<1x16xf32>
    %542 = arith.mulf %541, %540 : vector<1x16xf32>
    %543 = vector.extract_strided_slice %455 {offsets = [0, 0], sizes = [1, 16], strides = [1, 1]} : vector<1x32xf32> to vector<1x16xf32>
    %544 = vector.broadcast %528 : f32 to vector<1x16xf32>
    %545 = arith.mulf %544, %542 : vector<1x16xf32>
    %546 = arith.subf %543, %545 : vector<1x16xf32>
    %547 = vector.extract_strided_slice %488 {offsets = [0, 16], sizes = [1, 16], strides = [1, 1]} : vector<1x32xf32> to vector<1x16xf32>
    %548 = vector.shape_cast %547 : vector<1x16xf32> to vector<1x1x16xf32>
    %cst_157 = arith.constant dense<0.000000e+00> : vector<1xf32>
    %549 = vector.multi_reduction <add>, %548, %cst_157 [1, 2] : vector<1x1x16xf32> to vector<1xf32>
    %550 = vector.shape_cast %549 : vector<1xf32> to vector<1x1x1xf32>
    %551 = vector.extract %550[0, 0, 0] : f32 from vector<1x1x1xf32>
    %cst_158 = arith.constant 4.096000e+03 : f32
    %552 = arith.divf %551, %cst_158 : f32
    %553 = vector.extract_strided_slice %522 {offsets = [0, 16], sizes = [1, 16], strides = [1, 1]} : vector<1x32xf32> to vector<1x16xf32>
    %554 = vector.shape_cast %553 : vector<1x16xf32> to vector<1x1x16xf32>
    %cst_159 = arith.constant dense<0.000000e+00> : vector<1xf32>
    %555 = vector.multi_reduction <add>, %554, %cst_159 [1, 2] : vector<1x1x16xf32> to vector<1xf32>
    %556 = vector.shape_cast %555 : vector<1xf32> to vector<1x1x1xf32>
    %557 = vector.extract %556[0, 0, 0] : f32 from vector<1x1x1xf32>
    %cst_160 = arith.constant 4.096000e+03 : f32
    %558 = arith.divf %557, %cst_160 : f32
    %559 = arith.mulf %552, %552 : f32
    %560 = arith.subf %558, %559 : f32
    %cst_161 = arith.constant 0.000000e+00 : f32
    %561 = arith.maximumf %560, %cst_161 : f32
    %cst_162 = arith.constant 9.99999974E-6 : f32
    %562 = arith.addf %561, %cst_162 : f32
    %563 = math.rsqrt %562 : f32
    %564 = vector.extract_strided_slice %454 {offsets = [0, 16], sizes = [1, 16], strides = [1, 1]} : vector<1x32xf32> to vector<1x16xf32>
    %565 = vector.broadcast %563 : f32 to vector<1x16xf32>
    %566 = arith.mulf %565, %564 : vector<1x16xf32>
    %567 = vector.extract_strided_slice %455 {offsets = [0, 16], sizes = [1, 16], strides = [1, 1]} : vector<1x32xf32> to vector<1x16xf32>
    %568 = vector.broadcast %552 : f32 to vector<1x16xf32>
    %569 = arith.mulf %568, %566 : vector<1x16xf32>
    %570 = arith.subf %567, %569 : vector<1x16xf32>
    %571 = tpu.concatenate %542, %566 in 1 : vector<1x16xf32>, vector<1x16xf32> -> vector<1x32xf32>
    %572 = tpu.concatenate %546, %570 in 1 : vector<1x16xf32>, vector<1x16xf32> -> vector<1x32xf32>
    %573 = tpu.concatenate %571, %571, %571, %571, %571, %571, %571, %571, %571, %571, %571, %571, %571, %571, %571, %571 in 1 : vector<1x32xf32>, vector<1x32xf32>, vector<1x32xf32>, vector<1x32xf32>, vector<1x32xf32>, vector<1x32xf32>, vector<1x32xf32>, vector<1x32xf32>, vector<1x32xf32>, vector<1x32xf32>, vector<1x32xf32>, vector<1x32xf32>, vector<1x32xf32>, vector<1x32xf32>, vector<1x32xf32>, vector<1x32xf32> -> vector<1x512xf32>
    %574 = tpu.concatenate %572, %572, %572, %572, %572, %572, %572, %572, %572, %572, %572, %572, %572, %572, %572, %572 in 1 : vector<1x32xf32>, vector<1x32xf32>, vector<1x32xf32>, vector<1x32xf32>, vector<1x32xf32>, vector<1x32xf32>, vector<1x32xf32>, vector<1x32xf32>, vector<1x32xf32>, vector<1x32xf32>, vector<1x32xf32>, vector<1x32xf32>, vector<1x32xf32>, vector<1x32xf32>, vector<1x32xf32>, vector<1x32xf32> -> vector<1x512xf32>
    %575 = vector.broadcast %573 : vector<1x512xf32> to vector<16x512xf32>
    %576 = arith.mulf %453, %575 : vector<16x512xf32>
    %577 = vector.broadcast %574 : vector<1x512xf32> to vector<16x512xf32>
    %578 = arith.addf %576, %577 : vector<16x512xf32>
    %579 = arith.addf %578, %294 : vector<16x512xf32>
    %c1_163 = arith.constant 1 : index
    %c0_164 = arith.constant 0 : index
    %c0_165 = arith.constant 0 : index
    %580 = vector.load %arg8[%c1_163, %c0_164, %c0_165] : memref<2x16x512xf32, #tpu.memory_space<vmem>>, vector<1x16x512xf32>
    %581 = vector.shape_cast %580 : vector<1x16x512xf32> to vector<16x512xf32>
    %582 = vector.shape_cast %579 : vector<16x512xf32> to vector<1x16x512xf32>
    tpu.vector_store %arg8[%c1_163, %c0_164, %c0_165], %582 {strides = array<i32>} : memref<2x16x512xf32, #tpu.memory_space<vmem>>, vector<1x16x512xf32>,
    return
  }
  func.func @transform_0(%arg0: i32) -> (i32, i32, i32) {
    %c0_i32 = arith.constant 0 : i32
    %c0_i32_0 = arith.constant 0 : i32
    %c0_i32_1 = arith.constant 0 : i32
    return %arg0, %c0_i32, %c0_i32_0 : i32, i32, i32
  }
  func.func @transform_1(%arg0: i32) -> (i32, i32, i32) {
    %c0_i32 = arith.constant 0 : i32
    %c0_i32_0 = arith.constant 0 : i32
    %c0_i32_1 = arith.constant 0 : i32
    %c0_i32_2 = arith.constant 0 : i32
    return %c0_i32, %c0_i32_0, %c0_i32_1 : i32, i32, i32
  }
  func.func @transform_2(%arg0: i32) -> (i32, i32) {
    %c0_i32 = arith.constant 0 : i32
    %c0_i32_0 = arith.constant 0 : i32
    %c0_i32_1 = arith.constant 0 : i32
    return %c0_i32, %c0_i32_0 : i32, i32
  }
  func.func @transform_3(%arg0: i32) -> (i32, i32) {
    %c0_i32 = arith.constant 0 : i32
    %c0_i32_0 = arith.constant 0 : i32
    %c0_i32_1 = arith.constant 0 : i32
    return %c0_i32, %c0_i32_0 : i32, i32
  }
  func.func @transform_4(%arg0: i32) -> (i32, i32, i32) {
    %c0_i32 = arith.constant 0 : i32
    %c0_i32_0 = arith.constant 0 : i32
    %c0_i32_1 = arith.constant 0 : i32
    %c0_i32_2 = arith.constant 0 : i32
    return %c0_i32, %c0_i32_0, %c0_i32_1 : i32, i32, i32
  }
  func.func @transform_5(%arg0: i32) -> (i32, i32) {
    %c0_i32 = arith.constant 0 : i32
    %c0_i32_0 = arith.constant 0 : i32
    %c0_i32_1 = arith.constant 0 : i32
    return %c0_i32, %c0_i32_0 : i32, i32
  }
  func.func @transform_6(%arg0: i32) -> (i32, i32) {
    %c0_i32 = arith.constant 0 : i32
    %c0_i32_0 = arith.constant 0 : i32
    %c0_i32_1 = arith.constant 0 : i32
    return %c0_i32, %c0_i32_0 : i32, i32
  }
  func.func @transform_7(%arg0: i32) -> (i32, i32, i32) {
    %c0_i32 = arith.constant 0 : i32
    %c0_i32_0 = arith.constant 0 : i32
    %c0_i32_1 = arith.constant 0 : i32
    return %arg0, %c0_i32, %c0_i32_0 : i32, i32, i32
  }
}

</mosaic_0001>

<bundles_post_ra>
// kernel: tpu_custom_call.1
= control target key start
LH: loop header
LB: loop body
LE: loop exit
PB: predicated region body
PF: predicated region fallthrough
CT: control target
= control target key end

     0   :  { %12 = vsyncpa [#allocation4], 0  ;;  %s19850_s0 = inlined_call_operand.hbm [shape: f32[2,16,512], index: 0, kind: input, shape index: {}]   ;;  %s19851_s1 = inlined_call_operand.hbm [shape: bf16[3,512,512], index: 1, kind: input, shape index: {}]   ;;  %s19852_s2 = inlined_call_operand.hbm [shape: f32[1,32], index: 2, kind: input, shape index: {}]   ;;  %s19853_s3 = inlined_call_operand.hbm [shape: f32[1,32], index: 3, kind: input, shape index: {}]   ;;  %s19854_s4 = inlined_call_operand.hbm [shape: bf16[3,512,512], index: 4, kind: input, shape index: {}]   ;;  %s19855_s5 = inlined_call_operand.hbm [shape: f32[1,32], index: 5, kind: input, shape index: {}]   ;;  %s19856_s6 = inlined_call_operand.hbm [shape: f32[1,32], index: 6, kind: input, shape index: {}]   ;;  %s19857_s7 = inlined_call_operand.hbm [shape: f32[2,16,512], index: 7, kind: output, shape index: {}]  }
   0x1   :  { %13 = vsyncpa [#allocation7], 0 }
   0x2   :  { %14 = vsyncpa [#allocation10], 0 }
   0x3   :  { %15 = vsyncpa [#allocation13], 0 }
   0x4   :  { %16 = vsyncpa [#allocation5], 0  ;;  %s18059_s24 = smov [#allocation6]  }
   0x5   :  { %s34_s25 = sshll.u32 %s18059_s24, 4  ;;  %s35_s25 = int_to_ptr.vmem [resolvable:$true] %s34_s25 }
   0x6   :  { %s17897_s26 = scalar_lea.vmem %s35_s25, 49152  ;;  %p17902_p1 = scmp.lt.s32.totalorder %s35_s25, %s35_s25 }
   0x7   :  { %p17898_p0 = scmp.ne.s32.totalorder %s35_s25, %s17897_s26  ;;  %p17903_p2 = scmp.lt.s32.totalorder %s17897_s26, %s17897_s26 }
   0x9   :  { %p17904_p3 = por %p17903_p2, %p17902_p1 }
   0xb   :  { %p17905_p4 = pnand %p17904_p3, %p17898_p0 }
   0xd   :  { %17908 = shalt.err (!%p17905_p4)
}
   0xe   :  { %s18060_s27 = smov 256   ;;  %s18061_s28 = smov 16  }
   0xf   :  { %40 = dma.hbm_to_vmem [thread:$0]  %s19851_s1, 49152, %s35_s25, [#allocation7], %s18060_s27, %s18060_s27, %s18061_s28  }
  0x10   :  { %s18062_s8 = smov [#allocation9]   ;;  %s18063_s10 = smov [#allocation12]  }
  0x11   :  { %s57_s9 = sshll.u32 %s18062_s8, 4  ;;  %s79_s11 = sshll.u32 %s18063_s10, 4  ;;  %s58_s9 = int_to_ptr.vmem [resolvable:$true] %s57_s9  ;;  %s80_s11 = int_to_ptr.vmem [resolvable:$true] %s79_s11 }
  0x12   :  { %s17917_s12 = scalar_lea.vmem %s58_s9, 16  ;;  %s17921_s13 = scalar_lea.vmem %s58_s9, 32 }
  0x13   :  { %p17918_p5 = scmp.ne.s32.totalorder %s58_s9, %s17917_s12  ;;  %p17922_p6 = scmp.lt.s32.totalorder %s58_s9, %s58_s9 }
  0x14   :  { %p17923_p7 = scmp.lt.s32.totalorder %s17921_s13, %s17917_s12 }
  0x16   :  { %p17924_p8 = por %p17923_p7, %p17922_p6 }
  0x18   :  { %p17925_p9 = pnand %p17924_p8, %p17918_p5 }
  0x1a   :  { %17928 = shalt.err (!%p17925_p9)
}
  0x1b   :  { %60 = dma.hbm_to_vmem [thread:$0]  %s19853_s3, 16, %s58_s9, [#allocation10]  }
  0x1c   :  { %s17937_s16 = scalar_lea.vmem %s80_s11, 16  ;;  %s17941_s1 = scalar_lea.vmem %s80_s11, 32 }
  0x1d   :  { %p17938_p10 = scmp.ne.s32.totalorder %s80_s11, %s17937_s16  ;;  %p17942_p11 = scmp.lt.s32.totalorder %s80_s11, %s80_s11 }
  0x1e   :  { %p17943_p12 = scmp.lt.s32.totalorder %s17941_s1, %s17937_s16 }
  0x20   :  { %p17944_p13 = por %p17943_p12, %p17942_p11 }
  0x22   :  { %p17945_p0 = pnand %p17944_p13, %p17938_p10 }
  0x24   :  { %17948 = shalt.err (!%p17945_p0)
}
  0x25   :  { %82 = dma.hbm_to_vmem [thread:$0]  %s19855_s5, 16, %s80_s11, [#allocation13]  }
  0x26   :  { %s18064_s19 = smov [#allocation3]  }
  0x27   :  { %s22_s20 = sshll.u32 %s18064_s19, 4  ;;  %s23_s20 = int_to_ptr.vmem [resolvable:$true] %s22_s20 }
  0x28   :  { %s17957_s21 = scalar_lea.vmem %s23_s20, 2048  ;;  %p17962_p2 = scmp.lt.s32.totalorder %s23_s20, %s23_s20 }
  0x29   :  { %p17958_p1 = scmp.ne.s32.totalorder %s23_s20, %s17957_s21  ;;  %p17963_p3 = scmp.lt.s32.totalorder %s17957_s21, %s17957_s21 }
  0x2b   :  { %p17964_p4 = por %p17963_p3, %p17962_p2 }
  0x2d   :  { %p17965_p5 = pnand %p17964_p4, %p17958_p1 }
  0x2f   :  { %17968 = shalt.err (!%p17965_p5)
}
  0x30   :  { %s18065_s3 = smov 512   ;;  %s18066_s22 = smov 32  }
  0x31   :  { %28 = dma.hbm_to_vmem [thread:$0]  %s19850_s0, 2048, %s23_s20, [#allocation4], %s18065_s3, %s18065_s3, %s18066_s22  }
  0x32   :  { %s18067_s5 = smov [#allocation8]   ;;  %s18068_s26 = smov [#allocation11]  }
  0x33   :  { %s47_s25 = sshll.u32 %s18067_s5, 4  ;;  %s66_s29 = sshll.u32 %s18068_s26, 4  ;;  %s48_s25 = int_to_ptr.vmem [resolvable:$true] %s47_s25  ;;  %s67_s29 = int_to_ptr.vmem [resolvable:$true] %s66_s29 }
  0x34   :  { %s17977_s30 = scalar_lea.vmem %s48_s25, 16  ;;  %s17981_s8 = scalar_lea.vmem %s48_s25, 32 }
  0x35   :  { %p17978_p6 = scmp.ne.s32.totalorder %s48_s25, %s17977_s30  ;;  %p17982_p7 = scmp.lt.s32.totalorder %s48_s25, %s48_s25 }
  0x36   :  { %p17983_p8 = scmp.lt.s32.totalorder %s17981_s8, %s17977_s30 }
  0x38   :  { %p17984_p9 = por %p17983_p8, %p17982_p7 }
  0x3a   :  { %p17985_p10 = pnand %p17984_p9, %p17978_p6 }
  0x3c   :  { %17988 = shalt.err (!%p17985_p10)
}
  0x3d   :  { %50 = dma.hbm_to_vmem [thread:$0]  %s19852_s2, 16, %s48_s25, [#allocation7]  }
  0x3e   :  { %s17997_s11 = scalar_lea.vmem %s67_s29, 49152  ;;  %p18002_p12 = scmp.lt.s32.totalorder %s67_s29, %s67_s29 }
  0x3f   :  { %p17998_p11 = scmp.ne.s32.totalorder %s67_s29, %s17997_s11  ;;  %p18003_p13 = scmp.lt.s32.totalorder %s17997_s11, %s17997_s11 }
  0x41   :  { %p18004_p0 = por %p18003_p13, %p18002_p12 }
  0x43   :  { %p18005_p1 = pnand %p18004_p0, %p17998_p11 }
  0x45   :  { %18008 = shalt.err (!%p18005_p1)
}
  0x46   :  { %72 = dma.hbm_to_vmem [thread:$0]  %s19854_s4, 49152, %s67_s29, [#allocation10], %s18060_s27, %s18060_s27, %s18061_s28  }
  0x47   :  { %s18069_s13 = smov [#allocation14]  }
  0x48   :  { %s89_s14 = sshll.u32 %s18069_s13, 4  ;;  %s90_s14 = int_to_ptr.vmem [resolvable:$true] %s89_s14 }
  0x49   :  { %s18017_s15 = scalar_lea.vmem %s90_s14, 16  ;;  %s18021_s2 = scalar_lea.vmem %s90_s14, 32 }
  0x4a   :  { %p18018_p2 = scmp.ne.s32.totalorder %s90_s14, %s18017_s15  ;;  %p18022_p3 = scmp.lt.s32.totalorder %s90_s14, %s90_s14 }
  0x4b   :  { %p18023_p4 = scmp.lt.s32.totalorder %s18021_s2, %s18017_s15 }
  0x4d   :  { %p18024_p5 = por %p18023_p4, %p18022_p3 }
  0x4f   :  { %p18025_p6 = pnand %p18024_p5, %p18018_p2 }
  0x51   :  { %18028 = shalt.err (!%p18025_p6)
}
  0x52   :  { %92 = dma.hbm_to_vmem [thread:$0]  %s19856_s6, 16, %s90_s14, [#allocation13]  }
  0x53   :  { %18049 = dma.done.wait [#allocation4], 2048  }
  0x54   :  { %18050 = vsyncadd [#allocation4], 4294965248 }
  0x55   :  { %18051 = dma.done.wait [#allocation7], 49168  }
  0x56   :  { %18052 = vsyncadd [#allocation7], 4294918128 }
  0x57   :  { %18053 = dma.done.wait [#allocation10], 49168  }
  0x58   :  { %18054 = vsyncadd [#allocation10], 4294918128 }
  0x59   :  { %18055 = dma.done.wait [#allocation13], 32  }
  0x5a   :  { %18056 = vsyncadd [#allocation13], 4294967264  ;;  %v15529_v0 = vld [vmem:[#allocation6 + $0x4e4] ss:$16 sps:$4 sm:$0xff]   ;;  %v15533_v2 = vld [vmem:[#allocation6 + $0x4e0] ss:$16 sps:$4 sm:$0xff]  }
  0x5b   :  { %v15531_v1 = vld [vmem:[#allocation6 + $0x6e4] ss:$16 sps:$4 sm:$0xff]   ;;  %1210 = vmatprep.subr.bf16.mxu0 %v15529_v0  ;;  %v15534_v3 = vld [vmem:[#allocation6 + $0x6e0] ss:$16 sps:$4 sm:$0xff]   ;;  %vm116_vm0 = vsmask.f32 256 }
  0x5c   :  { %1253 = vmatprep.subr.bf16.mxu1 %v15531_v1  ;;  %v15535_v4 = vld [vmem:[#allocation6 + $0x4c4] ss:$16 sps:$4 sm:$0xff]   ;;  %1211 = vmatpush1.bf16.msra.mxu0 %v15533_v2  ;;  %v15539_v6 = vld [vmem:[#allocation6 + $0x4c0] ss:$16 sps:$4 sm:$0xff]   ;;  %vm115_vm1 = vcmask 1040384   ;;  %vm118_vm5 = vcmask 1044484  }
  0x5d   :  { %1254 = vmatpush1.bf16.msra.mxu1 %v15534_v3  ;;  %v15537_v5 = vld [vmem:[#allocation6 + $0x6c4] ss:$16 sps:$4 sm:$0xff]   ;;  %1212 = vmatprep.subr.bf16.mxu0 %v15535_v4  ;;  %v15540_v7 = vld [vmem:[#allocation6 + $0x6c0] ss:$16 sps:$4 sm:$0xff]   ;;  %vm119_vm2 = vsmask.f32 4352  ;;  %vm18147_vm3 = vmand %vm115_vm1, %vm116_vm0 }
  0x5e   :  { %1255 = vmatprep.subr.bf16.mxu1 %v15537_v5  ;;  %v15541_v8 = vld [vmem:[#allocation6 + $0x4a4] ss:$16 sps:$4 sm:$0xff]   ;;  %v15545_v10 = vld [vmem:[#allocation6 + $0x4a0] ss:$16 sps:$4 sm:$0xff]   ;;  %vm128_vm4 = vsmask.f32 7938  ;;  %vm18151_vm6 = vmand %vm118_vm5, %vm119_vm2 }
  0x5f   :  { %v15543_v9 = vld [vmem:[#allocation6 + $0x6a4] ss:$16 sps:$4 sm:$0xff]   ;;  %v15546_v11 = vld [vmem:[#allocation6 + $0x6a0] ss:$16 sps:$4 sm:$0xff]   ;;  %vm18157_vm7 = vmand %vm115_vm1, %vm128_vm4  ;;  %vm130_vm8 = vsmask.f32 7954 }
  0x60   :  { %1213 = vmatpush1.bf16.msra.mxu0 %v15539_v6  ;;  %v15547_v12 = vld [vmem:[#allocation6 + $0x484] ss:$16 sps:$4 sm:$0xff]   ;;  %v15551_v14 = vld [vmem:[#allocation6 + $0x480] ss:$16 sps:$4 sm:$0xff]   ;;  %vm18162_vm9 = vmand %vm118_vm5, %vm130_vm8  ;;  %v19881_v46 = vmov 0  ;;  %vm209_vm12 = vcmask 1043456  }
  0x61   :  { %1256 = vmatpush1.bf16.msra.mxu1 %v15540_v7  ;;  %1214 = vmatprep.subr.bf16.mxu0 %v15541_v8  ;;  %v15549_v13 = vld [vmem:[#allocation6 + $0x684] ss:$16 sps:$4 sm:$0xff]   ;;  %v15552_v15 = vld [vmem:[#allocation6 + $0x680] ss:$16 sps:$4 sm:$0xff]   ;;  %vm18170_vm10 = vmor %vm18151_vm6, %vm18147_vm3  ;;  %vm211_vm13 = vcmask 1047556   ;;  %s18070_s4 = smov 64  }
  0x62   :  { %1257 = vmatprep.subr.bf16.mxu1 %v15543_v9  ;;  %v15553_v16 = vld [vmem:[#allocation6 + $0x464] ss:$16 sps:$4 sm:$0xff]   ;;  %v15557_v18 = vld [vmem:[#allocation6 + $0x460] ss:$16 sps:$4 sm:$0xff]   ;;  %v19882_v46 = vsel %vm18170_vm10, 4294967295, %v19881_v46  ;;  %vm132_vm11 = vmor %vm18162_vm9, %vm18157_vm7  ;;  %s18071_s6 = smov 96  }
  0x63   :  { %v15555_v17 = vld [vmem:[#allocation6 + $0x664] ss:$16 sps:$4 sm:$0xff]   ;;  %v15558_v19 = vld [vmem:[#allocation6 + $0x660] ss:$16 sps:$4 sm:$0xff]   ;;  %19883 = vst [vmem:[#allocation21_spill] sm:$0xff] %v19882_v46  ;;  %v140_v58 = vld [vmem:[#allocation3 + $0x8] sm:$0xff] }
  0x64   :  { %1215 = vmatpush1.bf16.msra.mxu0 %v15545_v10  ;;  %v15559_v20 = vld [vmem:[#allocation6 + $0x444] ss:$16 sps:$4 sm:$0xff]   ;;  %v15563_v22 = vld [vmem:[#allocation6 + $0x440] ss:$16 sps:$4 sm:$0xff]   ;;  %v122_v53 = vld [vmem:[#allocation2 + $0x18] sm:$0x11] }
  0x65   :  { %1258 = vmatpush1.bf16.msra.mxu1 %v15546_v11  ;;  %1216 = vmatprep.subr.bf16.mxu0 %v15547_v12  ;;  %v15561_v21 = vld [vmem:[#allocation6 + $0x644] ss:$16 sps:$4 sm:$0xff]   ;;  %v15564_v23 = vld [vmem:[#allocation6 + $0x640] ss:$16 sps:$4 sm:$0xff]   ;;  %v123_v55 = vsel %vm18170_vm10, 0, %v122_v53  ;;  %v144_v62 = vld [vmem:[#allocation3 + $0x28] sm:$0xff] }
  0x66   :  { %1259 = vmatprep.subr.bf16.mxu1 %v15549_v13  ;;  %v15565_v24 = vld [vmem:[#allocation6 + $0x424] ss:$16 sps:$4 sm:$0xff]   ;;  %v15569_v26 = vld [vmem:[#allocation6 + $0x420] ss:$16 sps:$4 sm:$0xff]   ;;  %v133_v56 = vld [vmem:[#allocation2 + $0x8] sm:$0x11] }
  0x67   :  { %v15567_v25 = vld [vmem:[#allocation6 + $0x624] ss:$16 sps:$4 sm:$0xff]   ;;  %v15570_v27 = vld [vmem:[#allocation6 + $0x620] ss:$16 sps:$4 sm:$0xff]   ;;  %124 = vst [vmem:[#allocation2 + $0x18] sm:$0x11] %v123_v55  ;;  %vm18187_vm15 = vmand %vm209_vm12, %vm128_vm4 }
  0x68   :  { %1217 = vmatpush1.bf16.msra.mxu0 %v15551_v14  ;;  %v15571_v28 = vld [vmem:[#allocation6 + $0x404] ss:$16 sps:$4 sm:$0xff]   ;;  %v15575_v30 = vld [vmem:[#allocation6 + $0x400] ss:$16 sps:$4 sm:$0xff]   ;;  %v134_v60 = vsel %vm132_vm11, 0, %v133_v56  ;;  %vm18193_vm1 = vmand %vm211_vm13, %vm130_vm8  ;;  %vm2339_vm4 = vcmask 1046528  }
  0x69   :  { %1260 = vmatpush1.bf16.msra.mxu1 %v15552_v15  ;;  %1218 = vmatprep.subr.bf16.mxu0 %v15553_v16  ;;  %v15573_v29 = vld [vmem:[#allocation6 + $0x604] ss:$16 sps:$4 sm:$0xff]   ;;  %v15576_v32 = vld [vmem:[#allocation6 + $0x600] ss:$16 sps:$4 sm:$0xff]   ;;  %135 = vst [vmem:[#allocation2 + $0x8] sm:$0x11] %v134_v60  ;;  %vm18208_vm2 = vmor %vm18193_vm1, %vm18187_vm15 }
  0x6a   :  { %1261 = vmatprep.subr.bf16.mxu1 %v15555_v17  ;;  %v15577_v33 = vld [vmem:[#allocation6 + $0x5e4] ss:$16 sps:$4 sm:$0xff]   ;;  %v15581_v36 = vld [vmem:[#allocation6 + $0x5e0] ss:$16 sps:$4 sm:$0xff]   ;;  %vm167_vm14 = vsmask.f32 4368 }
  0x6b   :  { %v15579_v34 = vld [vmem:[#allocation6 + $0x7e4] ss:$16 sps:$4 sm:$0xff]   ;;  %v15582_v37 = vld [vmem:[#allocation6 + $0x7e0] ss:$16 sps:$4 sm:$0xff]   ;;  %v142_v11 = vld [vmem:[#allocation3 + $0x18] sm:$0xff]  ;;  %vm3288_vm5 = vcmask 261120  }
  0x6c   :  { %1219 = vmatpush1.bf16.msra.mxu0 %v15557_v18  ;;  %v15583_v39 = vld [vmem:[#allocation6 + $0x5c4] ss:$16 sps:$4 sm:$0xff]   ;;  %v15587_v42 = vld [vmem:[#allocation6 + $0x5c0] ss:$16 sps:$4 sm:$0xff]   ;;  %v146_v16 = vld [vmem:[#allocation3 + $0x38] sm:$0xff]  ;;  %vm3425_vm6 = vcmask 122880  }
  0x6d   :  { %1262 = vmatpush1.bf16.msra.mxu1 %v15558_v19  ;;  %1220 = vmatprep.subr.bf16.mxu0 %v15559_v20  ;;  %v15585_v40 = vld [vmem:[#allocation6 + $0x7c4] ss:$16 sps:$4 sm:$0xff]   ;;  %v15588_v43 = vld [vmem:[#allocation6 + $0x7c0] ss:$16 sps:$4 sm:$0xff]   ;;  %vm18214_vm3 = vmor %vm116_vm0, %vm167_vm14  ;;  %vm517_vm0 = vsmask.f32 7424 }
  0x6e   :  { %1263 = vmatprep.subr.bf16.mxu1 %v15561_v21  ;;  %v15589_v44 = vld [vmem:[#allocation6 + $0x5a4] ss:$16 sps:$4 sm:$0xff]   ;;  %v15593_v47 = vld [vmem:[#allocation6 + $0x5a0] ss:$16 sps:$4 sm:$0xff]   ;;  %v214_v35 = vld [vmem:[#allocation2 + $0x18] sm:$0xff]  ;;  %s18072_s27 = smov 112  }
  0x6f   :  { %v15591_v45 = vld [vmem:[#allocation6 + $0x7a4] ss:$16 sps:$4 sm:$0xff]   ;;  %v15594_v48 = vld [vmem:[#allocation6 + $0x7a0] ss:$16 sps:$4 sm:$0xff]   ;;  %s18073_s23 = smov 0.0   ;;  %vm3510_vm7 = vcmask 130048  }
  0x70   :  { %1221 = vmatpush1.bf16.msra.mxu0 %v15563_v22  ;;  %v15595_v49 = vld [vmem:[#allocation6 + $0x584] ss:$16 sps:$4 sm:$0xff]   ;;  %v15599_v51 = vld [vmem:[#allocation6 + $0x580] ss:$16 sps:$4 sm:$0xff]   ;;  %vm3524_vm8 = vcmask 523264   ;;  %vm3526_vm9 = vcmask 785408  }
  0x71   :  { %1264 = vmatpush1.bf16.msra.mxu1 %v15564_v23  ;;  %1222 = vmatprep.subr.bf16.mxu0 %v15565_v24  ;;  %v15597_v50 = vld [vmem:[#allocation6 + $0x784] ss:$16 sps:$4 sm:$0xff]   ;;  %v15600_v52 = vld [vmem:[#allocation6 + $0x780] ss:$16 sps:$4 sm:$0xff]   ;;  %v19888_v23 = vmov 0 }
  0x72   :  { %1265 = vmatprep.subr.bf16.mxu1 %v15567_v25  ;;  %v15601_v54 = vld [vmem:[#allocation6 + $0x564] ss:$16 sps:$4 sm:$0xff]   ;;  %v15605_v4 = vld [vmem:[#allocation6 + $0x560] ss:$16 sps:$4 sm:$0xff]   ;;  %v19889_v23 = vsel %vm18208_vm2, 4294967295, %v19888_v23 }
  0x73   :  { %v139_v57 = vld [vmem:[#allocation3] sm:$0xff]  ;;  %v125_v2 = vld [vmem:[#allocation2 + $0x20] sm:$0x11]  ;;  %19890 = vst [vmem:[#allocation22_spill] sm:$0xff] %v19889_v23 }
  0x74   :  { %1223 = vmatpush1.bf16.msra.mxu0 %v15569_v26  ;;  %v15603_v59 = vld [vmem:[#allocation6 + $0x764] ss:$16 sps:$4 sm:$0xff]   ;;  %v15449_v63 = vpack.c.bf16 %v140_v58, %v139_v57  ;;  %v126_v8 = vsel %vm18170_vm10, 0, %v125_v2  ;;  %v15606_v12 = vld [vmem:[#allocation6 + $0x760] ss:$16 sps:$4 sm:$0xff]  }
  0x75   :  { %1266 = vmatpush1.bf16.msra.mxu1 %v15570_v27  ;;  %1224 = vmatprep.subr.bf16.mxu0 %v15571_v28  ;;  %v143_v61 = vld [vmem:[#allocation3 + $0x20] sm:$0xff]  ;;  %v136_v3 = vld [vmem:[#allocation2] sm:$0x11]  ;;  %127 = vst [vmem:[#allocation2 + $0x20] sm:$0x11] %v126_v8  ;;  %v19891_v27 = vmov 0 }
  0x76   :  { %1267 = vmatprep.subr.bf16.mxu1 %v15573_v29  ;;  %v15451_v0 = vpack.c.bf16 %v144_v62, %v143_v61  ;;  %v170_v5 = vshrl.u32 %v15449_v63, 16  ;;  %v173_v6 = vshll.u32 %v15449_v63, 16  ;;  %v137_v9 = vsel %vm132_vm11, 0, %v136_v3  ;;  %v141_v10 = vld [vmem:[#allocation3 + $0x10] sm:$0xff] }
  0x77   :  { %138 = vst [vmem:[#allocation2] sm:$0x11] %v137_v9  ;;  %v145_v15 = vld [vmem:[#allocation3 + $0x30] sm:$0xff]  ;;  %v15450_v17 = vpack.c.bf16 %v142_v11, %v141_v10  ;;  %v19892_v27 = vsel %vm18214_vm3, 4294967295, %v19891_v27  ;;  %v15634_v10 = vld [vmem:[#allocation6 + $0x6ec] ss:$16 sps:$4 sm:$0xff]  }
  0x78   :  { %1225 = vmatpush1.bf16.msra.mxu0 %v15575_v30  ;;  %v185_v13 = vshrl.u32 %v15451_v0, 16  ;;  %v188_v14 = vshll.u32 %v15451_v0, 16  ;;  %v15607_v18 = vld [vmem:[#allocation6 + $0x544] ss:$16 sps:$4 sm:$0xff]   ;;  %v172_v19 = vrot.slane %v170_v5, 7  ;;  %v15452_v20 = vpack.c.bf16 %v146_v16, %v145_v15  ;;  %19893 = vst [vmem:[#allocation23_spill] sm:$0xff] %v19892_v27 }
  0x79   :  { %1268 = vmatpush1.bf16.msra.mxu1 %v15576_v32  ;;  %1226 = vmatprep.subr.bf16.mxu0 %v15577_v33  ;;  %v15609_v21 = vld [vmem:[#allocation6 + $0x744] ss:$16 sps:$4 sm:$0xff]   ;;  %v177_v24 = vshrl.u32 %v15450_v17, 16  ;;  %v180_v25 = vshll.u32 %v15450_v17, 16  ;;  %v15611_v26 = vld [vmem:[#allocation6 + $0x540] ss:$16 sps:$4 sm:$0xff]  }
  0x7a   :  { %1269 = vmatprep.subr.bf16.mxu1 %v15579_v34  ;;  %v187_v22 = vrot.slane %v185_v13, 7  ;;  %v175_v28 = vor.u32 %v173_v6, %v172_v19  ;;  %v183_v29 = vrot.slane %v172_v19, 4  ;;  %v194_v30 = vshrl.u32 %v15452_v20, 16  ;;  %v15612_v32 = vld [vmem:[#allocation6 + $0x740] ss:$16 sps:$4 sm:$0xff]  }
  0x7b   :  { %v197_v31 = vshll.u32 %v15452_v20, 16  ;;  %v15615_v41 = vld [vmem:[#allocation6 + $0x724] ss:$16 sps:$4 sm:$0xff]   ;;  %v15617_v53 = vld [vmem:[#allocation6 + $0x520] ss:$16 sps:$4 sm:$0xff]  }
  0x7c   :  { %1227 = vmatpush2.bf16.msra.mxu0 %v15581_v36  ;;  %v190_v33 = vor.u32 %v188_v14, %v187_v22  ;;  %v201_v34 = vrot.slane %v187_v22, 4  ;;  %v179_v36 = vrot.slane %v177_v24, 7  ;;  %v215_v38 = vsel %vm18208_vm2, %v175_v28, %v214_v35  ;;  %v15618_v55 = vld [vmem:[#allocation6 + $0x720] ss:$16 sps:$4 sm:$0xff]   ;;  %v15619_v56 = vld [vmem:[#allocation6 + $0x504] ss:$16 sps:$4 sm:$0xff]  }
  0x7d   :  { %1270 = vmatpush2.bf16.msra.mxu1 %v15582_v37  ;;  %1228 = vmatprep.subr.bf16.mxu0 %v15583_v39  ;;  %v15613_v37 = vld [vmem:[#allocation6 + $0x524] ss:$16 sps:$4 sm:$0xff]   ;;  %v222_v39 = vld [vmem:[#allocation2 + $0x8] sm:$0x11]  ;;  %216 = vst [vmem:[#allocation2 + $0x18] sm:$0xff] %v215_v38 }
  0x7e   :  { %1271 = vmatprep.subr.bf16.mxu1 %v15585_v40  ;;  %v196_v40 = vrot.slane %v194_v30, 7  ;;  %v15621_v60 = vld [vmem:[#allocation6 + $0x704] ss:$16 sps:$4 sm:$0xff]   ;;  %v15623_v0 = vld [vmem:[#allocation6 + $0x500] ss:$16 sps:$4 sm:$0xff]  }
  0x7f   :  { %v15624_v1 = vld [vmem:[#allocation6 + $0x700] ss:$16 sps:$4 sm:$0xff]   ;;  %v15637_v35 = vld [vmem:[#allocation6 + $0x4cc] ss:$16 sps:$4 sm:$0xff]  }
  0x80   :  { %1229 = vmatpush2.bf16.msra.mxu0 %v15587_v42  ;;  %v18222_v42 = vsel %vm18214_vm3, %v183_v29, %v190_v33  ;;  %v17167_v23 = vld [vmem:[#allocation6 + $0x900] ss:$16 sps:$4 sm:$0xff]  }
  0x81   :  { %1272 = vmatpush2.bf16.msra.mxu1 %v15588_v43  ;;  %1230 = vmatprep.subr.bf16.mxu0 %v15589_v44  ;;  %v223_v43 = vsel %vm18170_vm10, %v201_v34, %v222_v39  ;;  %v182_v44 = vor.u32 %v180_v25, %v179_v36  ;;  %v15635_v39 = vld [vmem:[#allocation6 + $0x4c8] ss:$16 sps:$4 sm:$0xff]  }
  0x82   :  { %1273 = vmatprep.subr.bf16.mxu1 %v15591_v45  ;;  %v192_v45 = vrot.slane %v179_v36, 4  ;;  %224 = vst [vmem:[#allocation2 + $0x8] sm:$0x11] %v223_v43  ;;  %v15640_v43 = vld [vmem:[#allocation6 + $0x6cc] ss:$16 sps:$4 sm:$0xff]  }
  0x84   :  { %1231 = vmatpush2.bf16.msra.mxu0 %v15593_v47  ;;  %v18227_v47 = vcombine.high %v215_v38, %v18222_v42 }
  0x85   :  { %1274 = vmatpush2.bf16.msra.mxu1 %v15594_v48  ;;  %1232 = vmatprep.subr.bf16.mxu0 %v15595_v49  ;;  %v199_v48 = vor.u32 %v197_v31, %v196_v40  ;;  %v202_v49 = vrot.slane %v196_v40, 4 }
  0x86   :  { %1275 = vmatprep.subr.bf16.mxu1 %v15597_v50  ;;  %v217_v50 = vld [vmem:[#allocation2 + $0x20] sm:$0xff]  ;;  %v533_v57 = vshll.u32 %v18227_v47, 16  ;;  %v531_v2 = vshrl.u32 %v18227_v47, 16 }
  0x87   :  { %v18237_v58 = vsel %vm18214_vm3, %v192_v45, %v199_v48  ;;  %v15638_v45 = vld [vmem:[#allocation6 + $0x6c8] ss:$16 sps:$4 sm:$0xff]  }
  0x88   :  { %1233 = vmatpush2.bf16.msra.mxu0 %v15599_v51  ;;  %v225_v51 = vld [vmem:[#allocation2] sm:$0x11]  ;;  %v535_v5 = vrot.slane %v533_v57, 1  ;;  %v15641_v48 = vld [vmem:[#allocation6 + $0x4a8] ss:$16 sps:$4 sm:$0xff]  }
  0x89   :  { %1276 = vmatpush2.bf16.msra.mxu1 %v15600_v52  ;;  %1234 = vmatprep.subr.bf16.mxu0 %v15601_v54  ;;  %v18230_v52 = vcombine.low %v215_v38, %v18222_v42  ;;  %v218_v54 = vsel %vm18208_vm2, %v182_v44, %v217_v50  ;;  %v360_v9 = vld [vmem:[#allocation2 + $0x8] sm:$0x11] }
  0x8a   :  { %1277 = vmatprep.subr.bf16.mxu1 %v15603_v59  ;;  %219 = vst [vmem:[#allocation2 + $0x20] sm:$0xff] %v218_v54  ;;  %v226_v59 = vsel %vm18170_vm10, %v202_v49, %v225_v51  ;;  %v18242_v61 = vcombine.high %v218_v54, %v18237_v58  ;;  %v18246_v63 = vcombine.low %v218_v54, %v18237_v58  ;;  %v15632_v38 = vld [vmem:[#allocation6 + $0x6e8] ss:$16 sps:$4 sm:$0xff]   ;;  %v15643_v44 = vld [vmem:[#allocation6 + $0x4ac] ss:$16 sps:$4 sm:$0xff]  }
  0x8b   :  { %227 = vst [vmem:[#allocation2] sm:$0x11] %v226_v59  ;;  %v521_v62 = vshll.u32 %v18230_v52, 16  ;;  %v519_v6 = vshrl.u32 %v18230_v52, 16  ;;  %v18252_v11 = vcombine.high %v360_v9, %v360_v9  ;;  %v536_v17 = vor.u32 %v535_v5, %v531_v2  ;;  %v15646_v49 = vld [vmem:[#allocation6 + $0x6ac] ss:$16 sps:$4 sm:$0xff]  }
  0x8c   :  { %1235 = vmatpush2.bf16.msra.mxu0 %v15605_v4  ;;  %v557_v3 = vshll.u32 %v18242_v61, 16  ;;  %v15631_v4 = vld [vmem:[#allocation6 + $0x4ec] ss:$16 sps:$4 sm:$0xff]   ;;  %v545_v8 = vshll.u32 %v18246_v63, 16  ;;  %v555_v13 = vshrl.u32 %v18242_v61, 16  ;;  %v543_v15 = vshrl.u32 %v18246_v63, 16 }
  0x8d   :  { %1278 = vmatpush2.bf16.msra.mxu1 %v15606_v12  ;;  %1236 = vmatprep.subr.bf16.mxu0 %v15607_v18  ;;  %v523_v7 = vrot.slane %v521_v62, 1  ;;  %v18254_v12 = vcombine.low %v360_v9, %v360_v9  ;;  %v538_v18 = vshll.u32 %v18252_v11, 16  ;;  %v15649_v50 = vld [vmem:[#allocation6 + $0x48c] ss:$16 sps:$4 sm:$0xff]   ;;  %v15644_v51 = vld [vmem:[#allocation6 + $0x6a8] ss:$16 sps:$4 sm:$0xff]  }
  0x8e   :  { %1279 = vmatprep.subr.bf16.mxu1 %v15609_v21  ;;  %v559_v14 = vrot.slane %v557_v3, 1  ;;  %v547_v16 = vrot.slane %v545_v8, 1  ;;  %v15652_v54 = vld [vmem:[#allocation6 + $0x68c] ss:$16 sps:$4 sm:$0xff]   ;;  %v15653_v57 = vld [vmem:[#allocation6 + $0x468] ss:$16 sps:$4 sm:$0xff]  }
  0x8f   :  { %v524_v20 = vor.u32 %v523_v7, %v519_v6  ;;  %v526_v21 = vshll.u32 %v18254_v12, 16  ;;  %v540_v25 = vrot.slane %v538_v18, 1  ;;  %v15658_v59 = vld [vmem:[#allocation6 + $0x66c] ss:$16 sps:$4 sm:$0xff]   ;;  %v15656_v62 = vld [vmem:[#allocation6 + $0x668] ss:$16 sps:$4 sm:$0xff]  }
  0x90   :  { %1237 = vmatpush2.bf16.msra.mxu0 %v15611_v26  ;;  %v560_v28 = vor.u32 %v559_v14, %v555_v13  ;;  %v548_v30 = vor.u32 %v547_v16, %v543_v15  ;;  %v15667_v2 = vld [vmem:[#allocation6 + $0x42c] ss:$16 sps:$4 sm:$0xff]   ;;  %v15662_v3 = vld [vmem:[#allocation6 + $0x648] ss:$16 sps:$4 sm:$0xff]  }
  0x91   :  { %1280 = vmatpush2.bf16.msra.mxu1 %v15612_v32  ;;  %1238 = vmatprep.subr.bf16.mxu0 %v15613_v37  ;;  %v528_v26 = vrot.slane %v526_v21, 1  ;;  %v15629_v32 = vld [vmem:[#allocation6 + $0x4e8] ss:$16 sps:$4 sm:$0xff]   ;;  %v541_v33 = vsel %vm517_vm0, %v536_v17, %v540_v25  ;;  %v15670_v5 = vld [vmem:[#allocation6 + $0x62c] ss:$16 sps:$4 sm:$0xff]  }
  0x92   :  { %1281 = vmatprep.subr.bf16.mxu1 %v15615_v41  ;;  %v361_v19 = vld [vmem:[#allocation2] sm:$0x11]  ;;  %1242 = vmatprep.mubr.bf16.mxu0 %v541_v33  ;;  %v15673_v6 = vld [vmem:[#allocation6 + $0x40c] ss:$16 sps:$4 sm:$0xff]   ;;  %v15668_v7 = vld [vmem:[#allocation6 + $0x628] ss:$16 sps:$4 sm:$0xff]  }
  0x93   :  { %v18260_v22 = vcombine.high %v361_v19, %v361_v19  ;;  %v18262_v24 = vcombine.low %v361_v19, %v361_v19  ;;  %v18268_v34 = vsel %vm517_vm0, %v524_v20, %v528_v26  ;;  %v15671_v8 = vld [vmem:[#allocation6 + $0x408] ss:$16 sps:$4 sm:$0xff]   ;;  %v15676_v9 = vld [vmem:[#allocation6 + $0x60c] ss:$16 sps:$4 sm:$0xff]  }
  0x94   :  { %1239 = vmatpush2.bf16.msra.mxu0 %v15617_v53  ;;  %v15647_v53 = vld [vmem:[#allocation6 + $0x488] ss:$16 sps:$4 sm:$0xff]   ;;  %v15682_v15 = vld [vmem:[#allocation6 + $0x7ec] ss:$16 sps:$4 sm:$0xff]  }
  0x95   :  { %1282 = vmatpush2.bf16.msra.mxu1 %v15618_v55  ;;  %1240 = vmatprep.subr.bf16.mxu0 %v15619_v56  ;;  %v562_v29 = vshll.u32 %v18260_v22, 16  ;;  %v550_v31 = vshll.u32 %v18262_v24, 16  ;;  %v15655_v55 = vld [vmem:[#allocation6 + $0x46c] ss:$16 sps:$4 sm:$0xff]   ;;  %v15650_v56 = vld [vmem:[#allocation6 + $0x688] ss:$16 sps:$4 sm:$0xff]  }
  0x96   :  { %1283 = vmatprep.subr.bf16.mxu1 %v15621_v60  ;;  %v15661_v60 = vld [vmem:[#allocation6 + $0x44c] ss:$16 sps:$4 sm:$0xff]   ;;  %v15674_v13 = vld [vmem:[#allocation6 + $0x608] ss:$16 sps:$4 sm:$0xff]  }
  0x97   :  { %v564_v36 = vrot.slane %v562_v29, 1  ;;  %v552_v37 = vrot.slane %v550_v31, 1  ;;  %v15677_v14 = vld [vmem:[#allocation6 + $0x5e8] ss:$16 sps:$4 sm:$0xff]   ;;  %v15685_v16 = vld [vmem:[#allocation6 + $0x5cc] ss:$16 sps:$4 sm:$0xff]  }
  0x98   :  { %1241 = vmatpush2.bf16.msra.mxu0 %v15623_v0  ;;  %v15659_v0 = vld [vmem:[#allocation6 + $0x448] ss:$16 sps:$4 sm:$0xff]   ;;  %v15688_v19 = vld [vmem:[#allocation6 + $0x7cc] ss:$16 sps:$4 sm:$0xff]  }
  0x99   :  { %1284 = vmatpush2.bf16.msra.mxu1 %v15624_v1  ;;  %1296 = vmatprep.subr.bf16.mxu0 %v15631_v4  ;;  %v565_v40 = vsel %vm517_vm0, %v560_v28, %v564_v36  ;;  %v18273_v41 = vsel %vm517_vm0, %v548_v30, %v552_v37  ;;  %v15664_v1 = vld [vmem:[#allocation6 + $0x64c] ss:$16 sps:$4 sm:$0xff]   ;;  %v15665_v4 = vld [vmem:[#allocation6 + $0x428] ss:$16 sps:$4 sm:$0xff]  }
  0x9a   :  { %1339 = vmatprep.subr.bf16.mxu1 %v15634_v10  ;;  %1285 = vmatprep.mubr.bf16.mxu1 %v565_v40  ;;  %v15679_v10 = vld [vmem:[#allocation6 + $0x5ec] ss:$16 sps:$4 sm:$0xff]   ;;  %v15680_v17 = vld [vmem:[#allocation6 + $0x7e8] ss:$16 sps:$4 sm:$0xff]  }
  0x9b   :  { %1243 = vmatmul.mubr.bf16.vlgmr.msra.gmra.mxu0 %v18268_v34  ;;  %v15683_v18 = vld [vmem:[#allocation6 + $0x5c8] ss:$16 sps:$4 sm:$0xff]   ;;  %v15691_v20 = vld [vmem:[#allocation6 + $0x5ac] ss:$16 sps:$4 sm:$0xff]  }
  0x9c   :  { %1297 = vmatpush1.bf16.msra.mxu0 %v15629_v32  ;;  %1328 = vmatprep.mubr.bf16.mxu0 %v541_v33  ;;  %v15686_v21 = vld [vmem:[#allocation6 + $0x7c8] ss:$16 sps:$4 sm:$0xff]   ;;  %v15694_v26 = vld [vmem:[#allocation6 + $0x7ac] ss:$16 sps:$4 sm:$0xff]  }
  0x9d   :  { %1298 = vmatprep.subr.bf16.mxu0 %v15637_v35  ;;  %1286 = vmatmul.mubr.bf16.vlgmr.msra.gmra.mxu1 %v18273_v41  ;;  %v15689_v25 = vld [vmem:[#allocation6 + $0x5a8] ss:$16 sps:$4 sm:$0xff]   ;;  %v15697_v28 = vld [vmem:[#allocation6 + $0x58c] ss:$16 sps:$4 sm:$0xff]  }
  0x9e   :  { %1340 = vmatpush1.bf16.msra.mxu1 %v15632_v38  ;;  %1371 = vmatprep.mubr.bf16.mxu1 %v565_v40  ;;  %v15692_v29 = vld [vmem:[#allocation6 + $0x7a8] ss:$16 sps:$4 sm:$0xff]   ;;  %v15700_v31 = vld [vmem:[#allocation6 + $0x78c] ss:$16 sps:$4 sm:$0xff]  }
  0x9f   :  { %1341 = vmatprep.subr.bf16.mxu1 %v15640_v43  ;;  %v15695_v30 = vld [vmem:[#allocation6 + $0x588] ss:$16 sps:$4 sm:$0xff]   ;;  %v15703_v32 = vld [vmem:[#allocation6 + $0x56c] ss:$16 sps:$4 sm:$0xff]  }
  0xa0   :  { %1299 = vmatpush1.bf16.msra.mxu0 %v15635_v39  ;;  %v15698_v33 = vld [vmem:[#allocation6 + $0x788] ss:$16 sps:$4 sm:$0xff]   ;;  %v15706_v36 = vld [vmem:[#allocation6 + $0x76c] ss:$16 sps:$4 sm:$0xff]  }
  0xa1   :  { %1300 = vmatprep.subr.bf16.mxu0 %v15643_v44  ;;  %v15701_v35 = vld [vmem:[#allocation6 + $0x568] ss:$16 sps:$4 sm:$0xff]   ;;  %v15709_v37 = vld [vmem:[#allocation6 + $0x54c] ss:$16 sps:$4 sm:$0xff]  }
  0xa2   :  { %1342 = vmatpush1.bf16.msra.mxu1 %v15638_v45  ;;  %v15704_v38 = vld [vmem:[#allocation6 + $0x768] ss:$16 sps:$4 sm:$0xff]   ;;  %v15712_v40 = vld [vmem:[#allocation6 + $0x74c] ss:$16 sps:$4 sm:$0xff]  }
  0xa3   :  { %1343 = vmatprep.subr.bf16.mxu1 %v15646_v49  ;;  %v15707_v39 = vld [vmem:[#allocation6 + $0x548] ss:$16 sps:$4 sm:$0xff]   ;;  %v15715_v43 = vld [vmem:[#allocation6 + $0x52c] ss:$16 sps:$4 sm:$0xff]  }
  0xa4   :  { %1301 = vmatpush1.bf16.msra.mxu0 %v15641_v48  ;;  %v15710_v44 = vld [vmem:[#allocation6 + $0x748] ss:$16 sps:$4 sm:$0xff]   ;;  %v15718_v48 = vld [vmem:[#allocation6 + $0x72c] ss:$16 sps:$4 sm:$0xff]  }
  0xa5   :  { %1302 = vmatprep.subr.bf16.mxu0 %v15649_v50  ;;  %v15713_v45 = vld [vmem:[#allocation6 + $0x528] ss:$16 sps:$4 sm:$0xff]   ;;  %v15721_v49 = vld [vmem:[#allocation6 + $0x50c] ss:$16 sps:$4 sm:$0xff]  }
  0xa6   :  { %1344 = vmatpush1.bf16.msra.mxu1 %v15644_v51  ;;  %v15716_v50 = vld [vmem:[#allocation6 + $0x728] ss:$16 sps:$4 sm:$0xff]  }
  0xa7   :  { %1345 = vmatprep.subr.bf16.mxu1 %v15652_v54  ;;  %v15719_v51 = vld [vmem:[#allocation6 + $0x508] ss:$16 sps:$4 sm:$0xff]   ;;  %v15727_v54 = vld [vmem:[#allocation6 + $0xe4] ss:$16 sps:$4 sm:$0xff]  }
  0xa8   :  { %1303 = vmatpush1.bf16.msra.mxu0 %v15647_v53  ;;  %v15724_v53 = vld [vmem:[#allocation6 + $0x70c] ss:$16 sps:$4 sm:$0xff]  }
  0xa9   :  { %1304 = vmatprep.subr.bf16.mxu0 %v15655_v55  ;;  %v15722_v55 = vld [vmem:[#allocation6 + $0x708] ss:$16 sps:$4 sm:$0xff]  }
  0xaa   :  { %1346 = vmatpush1.bf16.msra.mxu1 %v15650_v56  ;;  %v15725_v56 = vld [vmem:[#allocation6 + $0xe0] ss:$16 sps:$4 sm:$0xff]  }
  0xab   :  { %1347 = vmatprep.subr.bf16.mxu1 %v15658_v59  ;;  %v15733_v59 = vld [vmem:[#allocation6 + $0xc4] ss:$16 sps:$4 sm:$0xff]  }
  0xac   :  { %1305 = vmatpush1.bf16.msra.mxu0 %v15653_v57  ;;  %v15730_v57 = vld [vmem:[#allocation6 + $0x2e4] ss:$16 sps:$4 sm:$0xff]  }
  0xad   :  { %1306 = vmatprep.subr.bf16.mxu0 %v15661_v60  ;;  %v15728_v60 = vld [vmem:[#allocation6 + $0x2e0] ss:$16 sps:$4 sm:$0xff]  }
  0xae   :  { %1348 = vmatpush1.bf16.msra.mxu1 %v15656_v62  ;;  %v15731_v62 = vld [vmem:[#allocation6 + $0xc0] ss:$16 sps:$4 sm:$0xff]  }
  0xaf   :  { %1349 = vmatprep.subr.bf16.mxu1 %v15664_v1  ;;  %v15739_v1 = vld [vmem:[#allocation6 + $0xa4] ss:$16 sps:$4 sm:$0xff]  }
  0xb0   :  { %1307 = vmatpush1.bf16.msra.mxu0 %v15659_v0  ;;  %v15736_v0 = vld [vmem:[#allocation6 + $0x2c4] ss:$16 sps:$4 sm:$0xff]  }
  0xb1   :  { %1308 = vmatprep.subr.bf16.mxu0 %v15667_v2  ;;  %v15734_v2 = vld [vmem:[#allocation6 + $0x2c0] ss:$16 sps:$4 sm:$0xff]  }
  0xb2   :  { %1350 = vmatpush1.bf16.msra.mxu1 %v15662_v3  ;;  %v15737_v3 = vld [vmem:[#allocation6 + $0xa0] ss:$16 sps:$4 sm:$0xff]  }
  0xb3   :  { %1351 = vmatprep.subr.bf16.mxu1 %v15670_v5  ;;  %v15740_v5 = vld [vmem:[#allocation6 + $0x2a0] ss:$16 sps:$4 sm:$0xff]  }
  0xb4   :  { %1309 = vmatpush1.bf16.msra.mxu0 %v15665_v4  ;;  %v15742_v4 = vld [vmem:[#allocation6 + $0x2a4] ss:$16 sps:$4 sm:$0xff]  }
  0xb5   :  { %1310 = vmatprep.subr.bf16.mxu0 %v15673_v6  ;;  %v15743_v6 = vld [vmem:[#allocation6 + $0x80] ss:$16 sps:$4 sm:$0xff]  }
  0xb6   :  { %1352 = vmatpush1.bf16.msra.mxu1 %v15668_v7  ;;  %v15748_v7 = vld [vmem:[#allocation6 + $0x284] ss:$16 sps:$4 sm:$0xff]  }
  0xb7   :  { %1353 = vmatprep.subr.bf16.mxu1 %v15676_v9  ;;  %v15746_v9 = vld [vmem:[#allocation6 + $0x280] ss:$16 sps:$4 sm:$0xff]  }
  0xb8   :  { %1311 = vmatpush1.bf16.msra.mxu0 %v15671_v8  ;;  %v15751_v8 = vld [vmem:[#allocation6 + $0x64] ss:$16 sps:$4 sm:$0xff]  }
  0xb9   :  { %1312 = vmatprep.subr.bf16.mxu0 %v15679_v10  ;;  %v15754_v10 = vld [vmem:[#allocation6 + $0x264] ss:$16 sps:$4 sm:$0xff]  }
  0xba   :  { %1354 = vmatpush1.bf16.msra.mxu1 %v15674_v13  ;;  %v15757_v13 = vld [vmem:[#allocation6 + $0x44] ss:$16 sps:$4 sm:$0xff]  }
  0xbb   :  { %1355 = vmatprep.subr.bf16.mxu1 %v15682_v15  ;;  %v15755_v15 = vld [vmem:[#allocation6 + $0x40] ss:$16 sps:$4 sm:$0xff]  }
  0xbc   :  { %1313 = vmatpush2.bf16.msra.mxu0 %v15677_v14  ;;  %v15752_v14 = vld [vmem:[#allocation6 + $0x260] ss:$16 sps:$4 sm:$0xff]  }
  0xbd   :  { %1314 = vmatprep.subr.bf16.mxu0 %v15685_v16  ;;  %v15760_v16 = vld [vmem:[#allocation6 + $0x244] ss:$16 sps:$4 sm:$0xff]  }
  0xbe   :  { %1356 = vmatpush2.bf16.msra.mxu1 %v15680_v17  ;;  %v15763_v17 = vld [vmem:[#allocation6 + $0x24] ss:$16 sps:$4 sm:$0xff]  }
  0xbf   :  { %1357 = vmatprep.subr.bf16.mxu1 %v15688_v19  ;;  %v15761_v19 = vld [vmem:[#allocation6 + $0x20] ss:$16 sps:$4 sm:$0xff]  }
  0xc0   :  { %1315 = vmatpush2.bf16.msra.mxu0 %v15683_v18  ;;  %v15758_v18 = vld [vmem:[#allocation6 + $0x240] ss:$16 sps:$4 sm:$0xff]  }
  0xc1   :  { %1316 = vmatprep.subr.bf16.mxu0 %v15691_v20  ;;  %v15766_v20 = vld [vmem:[#allocation6 + $0x224] ss:$16 sps:$4 sm:$0xff]  }
  0xc2   :  { %1358 = vmatpush2.bf16.msra.mxu1 %v15686_v21  ;;  %v15769_v21 = vld [vmem:[#allocation6 + $0x4] ss:$16 sps:$4 sm:$0xff]  }
  0xc3   :  { %1359 = vmatprep.subr.bf16.mxu1 %v15694_v26  ;;  %v15767_v26 = vld [vmem:[#allocation6] ss:$16 sps:$4 sm:$0xff]  }
  0xc4   :  { %1317 = vmatpush2.bf16.msra.mxu0 %v15689_v25  ;;  %v15764_v25 = vld [vmem:[#allocation6 + $0x220] ss:$16 sps:$4 sm:$0xff]  }
  0xc5   :  { %1318 = vmatprep.subr.bf16.mxu0 %v15697_v28  ;;  %v15772_v28 = vld [vmem:[#allocation6 + $0x204] ss:$16 sps:$4 sm:$0xff]  }
  0xc6   :  { %1360 = vmatpush2.bf16.msra.mxu1 %v15692_v29  ;;  %v15775_v29 = vld [vmem:[#allocation6 + $0x1e4] ss:$16 sps:$4 sm:$0xff]  }
  0xc7   :  { %1361 = vmatprep.subr.bf16.mxu1 %v15700_v31  ;;  %v15773_v31 = vld [vmem:[#allocation6 + $0x1e0] ss:$16 sps:$4 sm:$0xff]  }
  0xc8   :  { %1319 = vmatpush2.bf16.msra.mxu0 %v15695_v30  ;;  %v15770_v30 = vld [vmem:[#allocation6 + $0x200] ss:$16 sps:$4 sm:$0xff]  }
  0xc9   :  { %1320 = vmatprep.subr.bf16.mxu0 %v15703_v32  ;;  %v15778_v32 = vld [vmem:[#allocation6 + $0x3e4] ss:$16 sps:$4 sm:$0xff]  }
  0xca   :  { %1362 = vmatpush2.bf16.msra.mxu1 %v15698_v33  ;;  %v15781_v33 = vld [vmem:[#allocation6 + $0x1c4] ss:$16 sps:$4 sm:$0xff]  }
  0xcb   :  { %1363 = vmatprep.subr.bf16.mxu1 %v15706_v36  ;;  %v15779_v36 = vld [vmem:[#allocation6 + $0x1c0] ss:$16 sps:$4 sm:$0xff]  }
  0xcc   :  { %1321 = vmatpush2.bf16.msra.mxu0 %v15701_v35  ;;  %v15776_v35 = vld [vmem:[#allocation6 + $0x3e0] ss:$16 sps:$4 sm:$0xff]  }
  0xcd   :  { %1322 = vmatprep.subr.bf16.mxu0 %v15709_v37  ;;  %v15784_v37 = vld [vmem:[#allocation6 + $0x3c4] ss:$16 sps:$4 sm:$0xff]  }
  0xce   :  { %1364 = vmatpush2.bf16.msra.mxu1 %v15704_v38  ;;  %v15787_v38 = vld [vmem:[#allocation6 + $0x1a4] ss:$16 sps:$4 sm:$0xff]  }
  0xcf   :  { %1365 = vmatprep.subr.bf16.mxu1 %v15712_v40  ;;  %v15785_v40 = vld [vmem:[#allocation6 + $0x1a0] ss:$16 sps:$4 sm:$0xff]  }
  0xd0   :  { %1323 = vmatpush2.bf16.msra.mxu0 %v15707_v39  ;;  %v15782_v39 = vld [vmem:[#allocation6 + $0x3c0] ss:$16 sps:$4 sm:$0xff]  }
  0xd1   :  { %1324 = vmatprep.subr.bf16.mxu0 %v15715_v43  ;;  %v15790_v43 = vld [vmem:[#allocation6 + $0x3a4] ss:$16 sps:$4 sm:$0xff]  }
  0xd2   :  { %1366 = vmatpush2.bf16.msra.mxu1 %v15710_v44  ;;  %v15793_v44 = vld [vmem:[#allocation6 + $0x184] ss:$16 sps:$4 sm:$0xff]  }
  0xd3   :  { %1367 = vmatprep.subr.bf16.mxu1 %v15718_v48  ;;  %v15791_v48 = vld [vmem:[#allocation6 + $0x180] ss:$16 sps:$4 sm:$0xff]  }
  0xd4   :  { %1325 = vmatpush2.bf16.msra.mxu0 %v15713_v45  ;;  %v15788_v45 = vld [vmem:[#allocation6 + $0x3a0] ss:$16 sps:$4 sm:$0xff]  }
  0xd5   :  { %1326 = vmatprep.subr.bf16.mxu0 %v15721_v49  ;;  %v15796_v49 = vld [vmem:[#allocation6 + $0x384] ss:$16 sps:$4 sm:$0xff]  }
  0xd6   :  { %1368 = vmatpush2.bf16.msra.mxu1 %v15716_v50  ;;  %v15799_v50 = vld [vmem:[#allocation6 + $0x164] ss:$16 sps:$4 sm:$0xff]  }
  0xd7   :  { %1369 = vmatprep.subr.bf16.mxu1 %v15724_v53  ;;  %v15797_v53 = vld [vmem:[#allocation6 + $0x160] ss:$16 sps:$4 sm:$0xff]  }
  0xd8   :  { %1327 = vmatpush2.bf16.msra.mxu0 %v15719_v51  ;;  %v15794_v51 = vld [vmem:[#allocation6 + $0x380] ss:$16 sps:$4 sm:$0xff]  }
  0xd9   :  { %2026 = vmatprep.subr.bf16.mxu0 %v15727_v54  ;;  %v15802_v54 = vld [vmem:[#allocation6 + $0x364] ss:$16 sps:$4 sm:$0xff]  }
  0xda   :  { %1370 = vmatpush2.bf16.msra.mxu1 %v15722_v55  ;;  %v15805_v55 = vld [vmem:[#allocation6 + $0x144] ss:$16 sps:$4 sm:$0xff]  }
  0xdb   :  { %1329 = vmatmul.mubr.bf16.vlgmr.msra.gmra.mxu0 %v18268_v34  ;;  %2069 = vmatprep.subr.bf16.mxu1 %v15730_v57  ;;  %v15745_v34 = vld [vmem:[#allocation6 + $0x84] ss:$16 sps:$4 sm:$0xff]   ;;  %v15803_v57 = vld [vmem:[#allocation6 + $0x140] ss:$16 sps:$4 sm:$0xff]  }
  0xdc   :  { %2027 = vmatpush1.bf16.msra.mxu0 %v15725_v56  ;;  %2058 = vmatprep.mubr.bf16.mxu0 %v18227_v47  ;;  %v15800_v56 = vld [vmem:[#allocation6 + $0x360] ss:$16 sps:$4 sm:$0xff]  }
  0xdd   :  { %2028 = vmatprep.subr.bf16.mxu0 %v15733_v59  ;;  %1372 = vmatmul.mubr.bf16.vlgmr.msra.gmra.mxu1 %v18273_v41  ;;  %v15749_v41 = vld [vmem:[#allocation6 + $0x60] ss:$16 sps:$4 sm:$0xff]   ;;  %v15808_v59 = vld [vmem:[#allocation6 + $0x344] ss:$16 sps:$4 sm:$0xff]  }
  0xde   :  { %2070 = vmatpush1.bf16.msra.mxu1 %v15728_v60  ;;  %2101 = vmatprep.mubr.bf16.mxu1 %v18242_v61  ;;  %v15811_v60 = vld [vmem:[#allocation6 + $0x124] ss:$16 sps:$4 sm:$0xff]  }
  0xdf   :  { %2071 = vmatprep.subr.bf16.mxu1 %v15736_v0  ;;  %v15809_v0 = vld [vmem:[#allocation6 + $0x120] ss:$16 sps:$4 sm:$0xff]  }
  0xe0   :  { %2029 = vmatpush1.bf16.msra.mxu0 %v15731_v62  ;;  %v15806_v62 = vld [vmem:[#allocation6 + $0x340] ss:$16 sps:$4 sm:$0xff]  }
  0xe1   :  { %2030 = vmatprep.subr.bf16.mxu0 %v15739_v1  ;;  %v15814_v1 = vld [vmem:[#allocation6 + $0x324] ss:$16 sps:$4 sm:$0xff]  }
  0xe2   :  { %2072 = vmatpush1.bf16.msra.mxu1 %v15734_v2  ;;  %v15817_v2 = vld [vmem:[#allocation6 + $0x104] ss:$16 sps:$4 sm:$0xff]  }
  0xe3   :  { %2073 = vmatprep.subr.bf16.mxu1 %v15742_v4  ;;  %v15815_v4 = vld [vmem:[#allocation6 + $0x100] ss:$16 sps:$4 sm:$0xff]  }
  0xe4   :  { %2031 = vmatpush1.bf16.msra.mxu0 %v15737_v3  ;;  %v15812_v3 = vld [vmem:[#allocation6 + $0x320] ss:$16 sps:$4 sm:$0xff]  }
  0xe5   :  { %2032 = vmatprep.subr.bf16.mxu0 %v15745_v34  ;;  %v15820_v34 = vld [vmem:[#allocation6 + $0x304] ss:$16 sps:$4 sm:$0xff]  }
  0xe6   :  { %2074 = vmatpush1.bf16.msra.mxu1 %v15740_v5  ;;  %v15823_v5 = vld [vmem:[#allocation6 + $0xec] ss:$16 sps:$4 sm:$0xff]  }
  0xe7   :  { %2075 = vmatprep.subr.bf16.mxu1 %v15748_v7  ;;  %v15821_v7 = vld [vmem:[#allocation6 + $0xe8] ss:$16 sps:$4 sm:$0xff]  }
  0xe8   :  { %2033 = vmatpush1.bf16.msra.mxu0 %v15743_v6  ;;  %v15818_v6 = vld [vmem:[#allocation6 + $0x300] ss:$16 sps:$4 sm:$0xff]  }
  0xe9   :  { %2034 = vmatprep.subr.bf16.mxu0 %v15751_v8  ;;  %v15826_v8 = vld [vmem:[#allocation6 + $0x2ec] ss:$16 sps:$4 sm:$0xff]  }
  0xea   :  { %2076 = vmatpush1.bf16.msra.mxu1 %v15746_v9  ;;  %v15829_v9 = vld [vmem:[#allocation6 + $0xcc] ss:$16 sps:$4 sm:$0xff]  }
  0xeb   :  { %2077 = vmatprep.subr.bf16.mxu1 %v15754_v10  ;;  %v15827_v10 = vld [vmem:[#allocation6 + $0xc8] ss:$16 sps:$4 sm:$0xff]  }
  0xec   :  { %2035 = vmatpush1.bf16.msra.mxu0 %v15749_v41  ;;  %v15824_v41 = vld [vmem:[#allocation6 + $0x2e8] ss:$16 sps:$4 sm:$0xff]  }
  0xed   :  { %2036 = vmatprep.subr.bf16.mxu0 %v15757_v13  ;;  %v15832_v13 = vld [vmem:[#allocation6 + $0x2cc] ss:$16 sps:$4 sm:$0xff]  }
  0xee   :  { %2078 = vmatpush1.bf16.msra.mxu1 %v15752_v14  ;;  %v15835_v14 = vld [vmem:[#allocation6 + $0xac] ss:$16 sps:$4 sm:$0xff]  }
  0xef   :  { %2079 = vmatprep.subr.bf16.mxu1 %v15760_v16  ;;  %v15833_v16 = vld [vmem:[#allocation6 + $0xa8] ss:$16 sps:$4 sm:$0xff]  }
  0xf0   :  { %2037 = vmatpush1.bf16.msra.mxu0 %v15755_v15  ;;  %v15830_v15 = vld [vmem:[#allocation6 + $0x2c8] ss:$16 sps:$4 sm:$0xff]  }
  0xf1   :  { %2038 = vmatprep.subr.bf16.mxu0 %v15763_v17  ;;  %v15838_v17 = vld [vmem:[#allocation6 + $0x2ac] ss:$16 sps:$4 sm:$0xff]  }
  0xf2   :  { %2080 = vmatpush1.bf16.msra.mxu1 %v15758_v18  ;;  %v15841_v18 = vld [vmem:[#allocation6 + $0x8c] ss:$16 sps:$4 sm:$0xff]  }
  0xf3   :  { %2081 = vmatprep.subr.bf16.mxu1 %v15766_v20  ;;  %v15839_v20 = vld [vmem:[#allocation6 + $0x88] ss:$16 sps:$4 sm:$0xff]  }
  0xf4   :  { %2039 = vmatpush1.bf16.msra.mxu0 %v15761_v19  ;;  %v15836_v19 = vld [vmem:[#allocation6 + $0x2a8] ss:$16 sps:$4 sm:$0xff]  }
  0xf5   :  { %2040 = vmatprep.subr.bf16.mxu0 %v15769_v21  ;;  %v15844_v21 = vld [vmem:[#allocation6 + $0x28c] ss:$16 sps:$4 sm:$0xff]  }
  0xf6   :  { %2082 = vmatpush1.bf16.msra.mxu1 %v15764_v25  ;;  %v15842_v25 = vld [vmem:[#allocation6 + $0x288] ss:$16 sps:$4 sm:$0xff]  }
  0xf7   :  { %2083 = vmatprep.subr.bf16.mxu1 %v15772_v28  ;;  %v15850_v28 = vld [vmem:[#allocation6 + $0x26c] ss:$16 sps:$4 sm:$0xff]  }
  0xf8   :  { %2041 = vmatpush1.bf16.msra.mxu0 %v15767_v26  ;;  %v15845_v26 = vld [vmem:[#allocation6 + $0x68] ss:$16 sps:$4 sm:$0xff]  }
  0xf9   :  { %2042 = vmatprep.subr.bf16.mxu0 %v15775_v29  ;;  %v15848_v29 = vld [vmem:[#allocation6 + $0x268] ss:$16 sps:$4 sm:$0xff]  }
  0xfa   :  { %2084 = vmatpush1.bf16.msra.mxu1 %v15770_v30  ;;  %v15851_v30 = vld [vmem:[#allocation6 + $0x48] ss:$16 sps:$4 sm:$0xff]  }
  0xfb   :  { %2085 = vmatprep.subr.bf16.mxu1 %v15778_v32  ;;  %v15859_v32 = vld [vmem:[#allocation6 + $0x2c] ss:$16 sps:$4 sm:$0xff]  }
  0xfc   :  { %2043 = vmatpush2.bf16.msra.mxu0 %v15773_v31  ;;  %v15856_v31 = vld [vmem:[#allocation6 + $0x24c] ss:$16 sps:$4 sm:$0xff]  }
  0xfd   :  { %2044 = vmatprep.subr.bf16.mxu0 %v15781_v33  ;;  %v15854_v33 = vld [vmem:[#allocation6 + $0x248] ss:$16 sps:$4 sm:$0xff]  }
  0xfe   :  { %2086 = vmatpush2.bf16.msra.mxu1 %v15776_v35  ;;  %v15857_v35 = vld [vmem:[#allocation6 + $0x28] ss:$16 sps:$4 sm:$0xff]  }
  0xff   :  { %2087 = vmatprep.subr.bf16.mxu1 %v15784_v37  ;;  %v15865_v37 = vld [vmem:[#allocation6 + $0xc] ss:$16 sps:$4 sm:$0xff]  }
 0x100   :  { %2045 = vmatpush2.bf16.msra.mxu0 %v15779_v36  ;;  %v15862_v36 = vld [vmem:[#allocation6 + $0x22c] ss:$16 sps:$4 sm:$0xff]  }
 0x101   :  { %2046 = vmatprep.subr.bf16.mxu0 %v15787_v38  ;;  %v15860_v38 = vld [vmem:[#allocation6 + $0x228] ss:$16 sps:$4 sm:$0xff]  }
 0x102   :  { %2088 = vmatpush2.bf16.msra.mxu1 %v15782_v39  ;;  %v15863_v39 = vld [vmem:[#allocation6 + $0x8] ss:$16 sps:$4 sm:$0xff]  }
 0x103   :  { %2089 = vmatprep.subr.bf16.mxu1 %v15790_v43  ;;  %v15871_v43 = vld [vmem:[#allocation6 + $0x1ec] ss:$16 sps:$4 sm:$0xff]  }
 0x104   :  { %2047 = vmatpush2.bf16.msra.mxu0 %v15785_v40  ;;  %v15868_v40 = vld [vmem:[#allocation6 + $0x20c] ss:$16 sps:$4 sm:$0xff]  }
 0x105   :  { %2048 = vmatprep.subr.bf16.mxu0 %v15793_v44  ;;  %v15866_v44 = vld [vmem:[#allocation6 + $0x208] ss:$16 sps:$4 sm:$0xff]  }
 0x106   :  { %2090 = vmatpush2.bf16.msra.mxu1 %v15788_v45  ;;  %v15869_v45 = vld [vmem:[#allocation6 + $0x1e8] ss:$16 sps:$4 sm:$0xff]  }
 0x107   :  { %2091 = vmatprep.subr.bf16.mxu1 %v15796_v49  ;;  %v15877_v49 = vld [vmem:[#allocation6 + $0x1cc] ss:$16 sps:$4 sm:$0xff]  }
 0x108   :  { %2049 = vmatpush2.bf16.msra.mxu0 %v15791_v48  ;;  %v15874_v48 = vld [vmem:[#allocation6 + $0x3ec] ss:$16 sps:$4 sm:$0xff]  }
 0x109   :  { %2050 = vmatprep.subr.bf16.mxu0 %v15799_v50  ;;  %v15872_v50 = vld [vmem:[#allocation6 + $0x3e8] ss:$16 sps:$4 sm:$0xff]  }
 0x10a   :  { %2092 = vmatpush2.bf16.msra.mxu1 %v15794_v51  ;;  %v15875_v51 = vld [vmem:[#allocation6 + $0x1c8] ss:$16 sps:$4 sm:$0xff]  }
 0x10b   :  { %2093 = vmatprep.subr.bf16.mxu1 %v15802_v54  ;;  %v15883_v54 = vld [vmem:[#allocation6 + $0x1ac] ss:$16 sps:$4 sm:$0xff]  }
 0x10c   :  { %2051 = vmatpush2.bf16.msra.mxu0 %v15797_v53  ;;  %v15880_v53 = vld [vmem:[#allocation6 + $0x3cc] ss:$16 sps:$4 sm:$0xff]  }
 0x10d   :  { %2052 = vmatprep.subr.bf16.mxu0 %v15805_v55  ;;  %v15878_v55 = vld [vmem:[#allocation6 + $0x3c8] ss:$16 sps:$4 sm:$0xff]  }
 0x10e   :  { %2094 = vmatpush2.bf16.msra.mxu1 %v15800_v56  ;;  %v15881_v56 = vld [vmem:[#allocation6 + $0x1a8] ss:$16 sps:$4 sm:$0xff]  }
 0x10f   :  { %2095 = vmatprep.subr.bf16.mxu1 %v15808_v59  ;;  %v15889_v59 = vld [vmem:[#allocation6 + $0x18c] ss:$16 sps:$4 sm:$0xff]  }
 0x110   :  { %2053 = vmatpush2.bf16.msra.mxu0 %v15803_v57  ;;  %v15886_v57 = vld [vmem:[#allocation6 + $0x3ac] ss:$16 sps:$4 sm:$0xff]  }
 0x111   :  { %2054 = vmatprep.subr.bf16.mxu0 %v15811_v60  ;;  %v15884_v60 = vld [vmem:[#allocation6 + $0x3a8] ss:$16 sps:$4 sm:$0xff]  }
 0x112   :  { %2096 = vmatpush2.bf16.msra.mxu1 %v15806_v62  ;;  %v15887_v62 = vld [vmem:[#allocation6 + $0x188] ss:$16 sps:$4 sm:$0xff]  }
 0x113   :  { %2097 = vmatprep.subr.bf16.mxu1 %v15814_v1  ;;  %v15895_v1 = vld [vmem:[#allocation6 + $0x16c] ss:$16 sps:$4 sm:$0xff]  }
 0x114   :  { %2055 = vmatpush2.bf16.msra.mxu0 %v15809_v0  ;;  %v15892_v0 = vld [vmem:[#allocation6 + $0x38c] ss:$16 sps:$4 sm:$0xff]  }
 0x115   :  { %2056 = vmatprep.subr.bf16.mxu0 %v15817_v2  ;;  %v15890_v2 = vld [vmem:[#allocation6 + $0x388] ss:$16 sps:$4 sm:$0xff]  }
 0x116   :  { %2098 = vmatpush2.bf16.msra.mxu1 %v15812_v3  ;;  %v15893_v3 = vld [vmem:[#allocation6 + $0x168] ss:$16 sps:$4 sm:$0xff]  }
 0x117   :  { %2099 = vmatprep.subr.bf16.mxu1 %v15820_v34  ;;  %v15901_v34 = vld [vmem:[#allocation6 + $0x14c] ss:$16 sps:$4 sm:$0xff]  }
 0x118   :  { %2057 = vmatpush2.bf16.msra.mxu0 %v15815_v4  ;;  %v15898_v4 = vld [vmem:[#allocation6 + $0x36c] ss:$16 sps:$4 sm:$0xff]  }
 0x119   :  { %2112 = vmatprep.subr.bf16.mxu0 %v15823_v5  ;;  %v15896_v5 = vld [vmem:[#allocation6 + $0x368] ss:$16 sps:$4 sm:$0xff]  }
 0x11a   :  { %2100 = vmatpush2.bf16.msra.mxu1 %v15818_v6  ;;  %v15899_v6 = vld [vmem:[#allocation6 + $0x148] ss:$16 sps:$4 sm:$0xff]  }
 0x11b   :  { %2059 = vmatmul.mubr.bf16.vlgmr.msra.gmra.mxu0 %v18230_v52  ;;  %2155 = vmatprep.subr.bf16.mxu1 %v15826_v8  ;;  %v15907_v8 = vld [vmem:[#allocation6 + $0x12c] ss:$16 sps:$4 sm:$0xff]  }
 0x11c   :  { %2113 = vmatpush1.bf16.msra.mxu0 %v15821_v7  ;;  %2144 = vmatprep.mubr.bf16.mxu0 %v18227_v47  ;;  %v15847_v47 = vld [vmem:[#allocation6 + $0x6c] ss:$16 sps:$4 sm:$0xff]  }
 0x11d   :  { %2114 = vmatprep.subr.bf16.mxu0 %v15829_v9  ;;  %2102 = vmatmul.mubr.bf16.vlgmr.msra.gmra.mxu1 %v18246_v63  ;;  %v15904_v7 = vld [vmem:[#allocation6 + $0x34c] ss:$16 sps:$4 sm:$0xff]   ;;  %v15902_v9 = vld [vmem:[#allocation6 + $0x348] ss:$16 sps:$4 sm:$0xff]  }
 0x11e   :  { %2156 = vmatpush1.bf16.msra.mxu1 %v15824_v41  ;;  %2187 = vmatprep.mubr.bf16.mxu1 %v18242_v61  ;;  %v15853_v61 = vld [vmem:[#allocation6 + $0x4c] ss:$16 sps:$4 sm:$0xff]   ;;  %v15905_v41 = vld [vmem:[#allocation6 + $0x128] ss:$16 sps:$4 sm:$0xff]  }
 0x11f   :  { %2157 = vmatprep.subr.bf16.mxu1 %v15832_v13  ;;  %v15910_v13 = vld [vmem:[#allocation6 + $0x32c] ss:$16 sps:$4 sm:$0xff]  }
 0x120   :  { %2115 = vmatpush1.bf16.msra.mxu0 %v15827_v10  ;;  %v18284_v10 = vld [vmem:[#allocation2 + $0x18] sm:$0xee] }
 0x121   :  { %2116 = vmatprep.subr.bf16.mxu0 %v15835_v14  ;;  %v15913_v14 = vld [vmem:[#allocation6 + $0x10c] ss:$16 sps:$4 sm:$0xff]  }
 0x122   :  { %2158 = vmatpush1.bf16.msra.mxu1 %v15830_v15  ;;  %v18286_v15 = vld [vmem:[#allocation2 + $0x20] sm:$0xee] }
 0x123   :  { %2159 = vmatprep.subr.bf16.mxu1 %v15838_v17  ;;  %v14118_v17 = vcombine.high %v18284_v10, %v18222_v42 }
 0x124   :  { %2117 = vmatpush1.bf16.msra.mxu0 %v15833_v16  ;;  %v15908_v16 = vld [vmem:[#allocation6 + $0x328] ss:$16 sps:$4 sm:$0xff]  }
 0x125   :  { %2118 = vmatprep.subr.bf16.mxu0 %v15841_v18  ;;  %v15911_v18 = vld [vmem:[#allocation6 + $0x108] ss:$16 sps:$4 sm:$0xff]  }
 0x126   :  { %2160 = vmatpush1.bf16.msra.mxu1 %v15836_v19  ;;  %v15916_v19 = vld [vmem:[#allocation6 + $0x30c] ss:$16 sps:$4 sm:$0xff]  }
 0x127   :  { %2161 = vmatprep.subr.bf16.mxu1 %v15844_v21  ;;  %v15919_v21 = vld [vmem:[#allocation6 + $0x8e4] ss:$16 sps:$4 sm:$0xff]  }
 0x128   :  { %2119 = vmatpush1.bf16.msra.mxu0 %v15839_v20  ;;  %v14120_v20 = vcombine.high %v18286_v15, %v18237_v58 }
 0x129   :  { %2120 = vmatprep.subr.bf16.mxu0 %v15847_v47  ;;  %v15914_v47 = vld [vmem:[#allocation6 + $0x308] ss:$16 sps:$4 sm:$0xff]  }
 0x12a   :  { %2162 = vmatpush1.bf16.msra.mxu1 %v15842_v25  ;;  %v2343_v25 = vrot.slane %v14118_v17, 1  ;;  %v15980_v17 = vld [vmem:[#allocation6 + $0xba0] ss:$16 sps:$4 sm:$0xff]  }
 0x12b   :  { %2163 = vmatprep.subr.bf16.mxu1 %v15850_v28  ;;  %v15917_v28 = vld [vmem:[#allocation6 + $0x8e0] ss:$16 sps:$4 sm:$0xff]  }
 0x12c   :  { %2121 = vmatpush1.bf16.msra.mxu0 %v15845_v26  ;;  %v2344_v26 = vrot.slane %v18252_v11, 1  ;;  %v15928_v11 = vld [vmem:[#allocation6 + $0xac4] ss:$16 sps:$4 sm:$0xff]  }
 0x12d   :  { %2122 = vmatprep.subr.bf16.mxu0 %v15853_v61  ;;  %v15922_v61 = vld [vmem:[#allocation6 + $0xae4] ss:$16 sps:$4 sm:$0xff]  }
 0x12e   :  { %2164 = vmatpush1.bf16.msra.mxu1 %v15848_v29  ;;  %v2349_v29 = vrot.slane %v14120_v20, 1  ;;  %v15991_v20 = vld [vmem:[#allocation6 + $0x964] ss:$16 sps:$4 sm:$0xff]  }
 0x12f   :  { %2165 = vmatprep.subr.bf16.mxu1 %v15856_v31  ;;  %v15925_v31 = vld [vmem:[#allocation6 + $0x8c4] ss:$16 sps:$4 sm:$0xff]  }
 0x130   :  { %2123 = vmatpush1.bf16.msra.mxu0 %v15851_v30  ;;  %v2350_v30 = vrot.slane %v18260_v22, 1  ;;  %v15926_v22 = vld [vmem:[#allocation6 + $0xac0] ss:$16 sps:$4 sm:$0xff]  }
 0x131   :  { %2124 = vmatprep.subr.bf16.mxu0 %v15859_v32  ;;  %v15920_v32 = vld [vmem:[#allocation6 + $0xae0] ss:$16 sps:$4 sm:$0xff]  }
 0x132   :  { %2166 = vmatpush1.bf16.msra.mxu1 %v15854_v33  ;;  %v18295_v33 = vsel %vm2339_vm4, %v2343_v25, %v2344_v26  ;;  %v15994_v25 = vld [vmem:[#allocation6 + $0xb64] ss:$16 sps:$4 sm:$0xff]  }
 0x133   :  { %2167 = vmatprep.subr.bf16.mxu1 %v15862_v36  ;;  %v18299_v36 = vsel %vm2339_vm4, %v2349_v29, %v2350_v30  ;;  %v15997_v26 = vld [vmem:[#allocation6 + $0x944] ss:$16 sps:$4 sm:$0xff]  }
 0x134   :  { %2125 = vmatpush1.bf16.msra.mxu0 %v15857_v35  ;;  %v15923_v35 = vld [vmem:[#allocation6 + $0x8c0] ss:$16 sps:$4 sm:$0xff]   ;;  %v16000_v29 = vld [vmem:[#allocation6 + $0xb44] ss:$16 sps:$4 sm:$0xff]  }
 0x135   :  { %2126 = vmatprep.subr.bf16.mxu0 %v15865_v37  ;;  %v15931_v37 = vld [vmem:[#allocation6 + $0x8a4] ss:$16 sps:$4 sm:$0xff]  }
 0x136   :  { %2168 = vmatpush1.bf16.msra.mxu1 %v15860_v38  ;;  %v15929_v38 = vld [vmem:[#allocation6 + $0x8a0] ss:$16 sps:$4 sm:$0xff]   ;;  %v16003_v30 = vld [vmem:[#allocation6 + $0x924] ss:$16 sps:$4 sm:$0xff]  }
 0x137   :  { %2169 = vmatprep.subr.bf16.mxu1 %v15868_v40  ;;  %v15932_v40 = vld [vmem:[#allocation6 + $0xaa0] ss:$16 sps:$4 sm:$0xff]  }
 0x138   :  { %2127 = vmatpush1.bf16.msra.mxu0 %v15863_v39  ;;  %v15934_v39 = vld [vmem:[#allocation6 + $0xaa4] ss:$16 sps:$4 sm:$0xff]  }
 0x139   :  { %2128 = vmatprep.subr.bf16.mxu0 %v15871_v43  ;;  %v15935_v43 = vld [vmem:[#allocation6 + $0x880] ss:$16 sps:$4 sm:$0xff]  }
 0x13a   :  { %2170 = vmatpush1.bf16.msra.mxu1 %v15866_v44  ;;  %v15940_v44 = vld [vmem:[#allocation6 + $0xa84] ss:$16 sps:$4 sm:$0xff]  }
 0x13b   :  { %2171 = vmatprep.subr.bf16.mxu1 %v15874_v48  ;;  %v15938_v48 = vld [vmem:[#allocation6 + $0xa80] ss:$16 sps:$4 sm:$0xff]  }
 0x13c   :  { %2129 = vmatpush2.bf16.msra.mxu0 %v15869_v45  ;;  %v15943_v45 = vld [vmem:[#allocation6 + $0x864] ss:$16 sps:$4 sm:$0xff]  }
 0x13d   :  { %2130 = vmatprep.subr.bf16.mxu0 %v15877_v49  ;;  %v15946_v49 = vld [vmem:[#allocation6 + $0xa64] ss:$16 sps:$4 sm:$0xff]  }
 0x13e   :  { %2172 = vmatpush2.bf16.msra.mxu1 %v15872_v50  ;;  %v15949_v50 = vld [vmem:[#allocation6 + $0x844] ss:$16 sps:$4 sm:$0xff]  }
 0x13f   :  { %2173 = vmatprep.subr.bf16.mxu1 %v15880_v53  ;;  %v15947_v53 = vld [vmem:[#allocation6 + $0x840] ss:$16 sps:$4 sm:$0xff]  }
 0x140   :  { %2131 = vmatpush2.bf16.msra.mxu0 %v15875_v51  ;;  %v15944_v51 = vld [vmem:[#allocation6 + $0xa60] ss:$16 sps:$4 sm:$0xff]  }
 0x141   :  { %2132 = vmatprep.subr.bf16.mxu0 %v15883_v54  ;;  %v15952_v54 = vld [vmem:[#allocation6 + $0xa44] ss:$16 sps:$4 sm:$0xff]  }
 0x142   :  { %2174 = vmatpush2.bf16.msra.mxu1 %v15878_v55  ;;  %v15955_v55 = vld [vmem:[#allocation6 + $0x824] ss:$16 sps:$4 sm:$0xff]  }
 0x143   :  { %2175 = vmatprep.subr.bf16.mxu1 %v15886_v57  ;;  %v15953_v57 = vld [vmem:[#allocation6 + $0x820] ss:$16 sps:$4 sm:$0xff]  }
 0x144   :  { %2133 = vmatpush2.bf16.msra.mxu0 %v15881_v56  ;;  %v15950_v56 = vld [vmem:[#allocation6 + $0xa40] ss:$16 sps:$4 sm:$0xff]  }
 0x145   :  { %2134 = vmatprep.subr.bf16.mxu0 %v15889_v59  ;;  %v15958_v59 = vld [vmem:[#allocation6 + $0xa24] ss:$16 sps:$4 sm:$0xff]  }
 0x146   :  { %2176 = vmatpush2.bf16.msra.mxu1 %v15884_v60  ;;  %v15961_v60 = vld [vmem:[#allocation6 + $0x804] ss:$16 sps:$4 sm:$0xff]  }
 0x147   :  { %2177 = vmatprep.subr.bf16.mxu1 %v15892_v0  ;;  %v15959_v0 = vld [vmem:[#allocation6 + $0x800] ss:$16 sps:$4 sm:$0xff]  }
 0x148   :  { %2135 = vmatpush2.bf16.msra.mxu0 %v15887_v62  ;;  %v15956_v62 = vld [vmem:[#allocation6 + $0xa20] ss:$16 sps:$4 sm:$0xff]  }
 0x149   :  { %2136 = vmatprep.subr.bf16.mxu0 %v15895_v1  ;;  %v15964_v1 = vld [vmem:[#allocation6 + $0xa04] ss:$16 sps:$4 sm:$0xff]  }
 0x14a   :  { %2178 = vmatpush2.bf16.msra.mxu1 %v15890_v2  ;;  %v15967_v2 = vld [vmem:[#allocation6 + $0x9e4] ss:$16 sps:$4 sm:$0xff]  }
 0x14b   :  { %2179 = vmatprep.subr.bf16.mxu1 %v15898_v4  ;;  %v15965_v4 = vld [vmem:[#allocation6 + $0x9e0] ss:$16 sps:$4 sm:$0xff]  }
 0x14c   :  { %2137 = vmatpush2.bf16.msra.mxu0 %v15893_v3  ;;  %v15962_v3 = vld [vmem:[#allocation6 + $0xa00] ss:$16 sps:$4 sm:$0xff]  }
 0x14d   :  { %2138 = vmatprep.subr.bf16.mxu0 %v15901_v34  ;;  %v15970_v34 = vld [vmem:[#allocation6 + $0xbe4] ss:$16 sps:$4 sm:$0xff]  }
 0x14e   :  { %2180 = vmatpush2.bf16.msra.mxu1 %v15896_v5  ;;  %v15973_v5 = vld [vmem:[#allocation6 + $0x9c4] ss:$16 sps:$4 sm:$0xff]  }
 0x14f   :  { %2181 = vmatprep.subr.bf16.mxu1 %v15904_v7  ;;  %v15971_v7 = vld [vmem:[#allocation6 + $0x9c0] ss:$16 sps:$4 sm:$0xff]  }
 0x150   :  { %2139 = vmatpush2.bf16.msra.mxu0 %v15899_v6  ;;  %v15968_v6 = vld [vmem:[#allocation6 + $0xbe0] ss:$16 sps:$4 sm:$0xff]  }
 0x151   :  { %2140 = vmatprep.subr.bf16.mxu0 %v15907_v8  ;;  %v15976_v8 = vld [vmem:[#allocation6 + $0xbc4] ss:$16 sps:$4 sm:$0xff]  }
 0x152   :  { %2182 = vmatpush2.bf16.msra.mxu1 %v15902_v9  ;;  %v15979_v9 = vld [vmem:[#allocation6 + $0x9a4] ss:$16 sps:$4 sm:$0xff]  }
 0x153   :  { %2183 = vmatprep.subr.bf16.mxu1 %v15910_v13  ;;  %v15977_v13 = vld [vmem:[#allocation6 + $0x9a0] ss:$16 sps:$4 sm:$0xff]  }
 0x154   :  { %2141 = vmatpush2.bf16.msra.mxu0 %v15905_v41  ;;  %v15974_v41 = vld [vmem:[#allocation6 + $0xbc0] ss:$16 sps:$4 sm:$0xff]  }
 0x155   :  { %2142 = vmatprep.subr.bf16.mxu0 %v15913_v14  ;;  %v15982_v14 = vld [vmem:[#allocation6 + $0xba4] ss:$16 sps:$4 sm:$0xff]  }
 0x156   :  { %2184 = vmatpush2.bf16.msra.mxu1 %v15908_v16  ;;  %v15985_v16 = vld [vmem:[#allocation6 + $0x984] ss:$16 sps:$4 sm:$0xff]  }
 0x157   :  { %2185 = vmatprep.subr.bf16.mxu1 %v15916_v19  ;;  %v15988_v19 = vld [vmem:[#allocation6 + $0xb84] ss:$16 sps:$4 sm:$0xff]  }
 0x158   :  { %2143 = vmatpush2.bf16.msra.mxu0 %v15911_v18  ;;  %v15983_v18 = vld [vmem:[#allocation6 + $0x980] ss:$16 sps:$4 sm:$0xff]  }
 0x159   :  { %2996 = vmatprep.subr.bf16.mxu0 %v15919_v21  ;;  %v15986_v21 = vld [vmem:[#allocation6 + $0xb80] ss:$16 sps:$4 sm:$0xff]  }
 0x15a   :  { %2186 = vmatpush2.bf16.msra.mxu1 %v15914_v47  ;;  %v15989_v47 = vld [vmem:[#allocation6 + $0x960] ss:$16 sps:$4 sm:$0xff]  }
 0x15b   :  { %2145 = vmatmul.mubr.bf16.vlgmr.msra.gmra.mxu0 %v18230_v52  ;;  %3039 = vmatprep.subr.bf16.mxu1 %v15922_v61  ;;  %v15937_v52 = vld [vmem:[#allocation6 + $0x884] ss:$16 sps:$4 sm:$0xff]   ;;  %v15995_v61 = vld [vmem:[#allocation6 + $0x940] ss:$16 sps:$4 sm:$0xff]  }
 0x15c   :  { %2997 = vmatpush1.bf16.msra.mxu0 %v15917_v28  ;;  %3028 = vmatprep.mubr.bf16.mxu0 %v18295_v33  ;;  %v15992_v28 = vld [vmem:[#allocation6 + $0xb60] ss:$16 sps:$4 sm:$0xff]  }
 0x15d   :  { %2998 = vmatprep.subr.bf16.mxu0 %v15925_v31  ;;  %2188 = vmatmul.mubr.bf16.vlgmr.msra.gmra.mxu1 %v18246_v63  ;;  %v15941_v63 = vld [vmem:[#allocation6 + $0x860] ss:$16 sps:$4 sm:$0xff]   ;;  %v18304_v31 = vpop.f32.mrf.mxu0 }
 0x15e   :  { %3040 = vmatpush1.bf16.msra.mxu1 %v15920_v32  ;;  %3071 = vmatprep.mubr.bf16.mxu1 %v18299_v36  ;;  %v15998_v32 = vld [vmem:[#allocation6 + $0xb40] ss:$16 sps:$4 sm:$0xff]  }
 0x15f   :  { %3041 = vmatprep.subr.bf16.mxu1 %v15928_v11  ;;  %v16006_v11 = vld [vmem:[#allocation6 + $0xb24] ss:$16 sps:$4 sm:$0xff]  }
 0x160   :  { %2999 = vmatpush1.bf16.msra.mxu0 %v15923_v35  ;;  %v16001_v35 = vld [vmem:[#allocation6 + $0x920] ss:$16 sps:$4 sm:$0xff]  }
 0x161   :  { %3000 = vmatprep.subr.bf16.mxu0 %v15931_v37  ;;  %v16009_v37 = vld [vmem:[#allocation6 + $0x904] ss:$16 sps:$4 sm:$0xff]  }
 0x162   :  { %3042 = vmatpush1.bf16.msra.mxu1 %v15926_v22  ;;  %v18306_v22 = vpop.f32.mrf.mxu1 }
 0x163   :  { %3043 = vmatprep.subr.bf16.mxu1 %v15934_v39  ;;  %v18310_v39 = vpop.f32.mrf.mxu0 }
 0x164   :  { %3001 = vmatpush1.bf16.msra.mxu0 %v15929_v38  ;;  %v14117_v38 = vcombine.low %v18284_v10, %v18222_v42  ;;  %v16010_v42 = vld [vmem:[#allocation6 + $0xb00] ss:$16 sps:$4 sm:$0xff]   ;;  %v16013_v10 = vld [vmem:[#allocation6 + $0x8e8] ss:$16 sps:$4 sm:$0xff]  }
 0x165   :  { %3002 = vmatprep.subr.bf16.mxu0 %v15937_v52  ;;  %v16004_v52 = vld [vmem:[#allocation6 + $0xb20] ss:$16 sps:$4 sm:$0xff]  }
 0x166   :  { %3044 = vmatpush1.bf16.msra.mxu1 %v15932_v40  ;;  %v16007_v40 = vld [vmem:[#allocation6 + $0x900] ss:$16 sps:$4 sm:$0xff]  }
 0x167   :  { %3045 = vmatprep.subr.bf16.mxu1 %v15940_v44  ;;  %v14119_v44 = vcombine.low %v18286_v15, %v18237_v58 }
 0x168   :  { %3003 = vmatpush1.bf16.msra.mxu0 %v15935_v43  ;;  %v16012_v43 = vld [vmem:[#allocation6 + $0xb04] ss:$16 sps:$4 sm:$0xff]  }
 0x169   :  { %3004 = vmatprep.subr.bf16.mxu0 %v15943_v45  ;;  %v16015_v45 = vld [vmem:[#allocation6 + $0x8ec] ss:$16 sps:$4 sm:$0xff]  }
 0x16a   :  { %3046 = vmatpush1.bf16.msra.mxu1 %v15938_v48  ;;  %v18314_v48 = vpop.f32.mrf.mxu1 }
 0x16b   :  { %3047 = vmatprep.subr.bf16.mxu1 %v15946_v49  ;;  %v2341_v49 = vrot.slane %v18254_v12, 1  ;;  %v16016_v12 = vld [vmem:[#allocation6 + $0xae8] ss:$16 sps:$4 sm:$0xff]  }
 0x16c   :  { %3005 = vmatpush1.bf16.msra.mxu0 %v15941_v63  ;;  %v2340_v63 = vrot.slane %v14117_v38, 1  ;;  %v18320_v58 = vpop.f32.mrf.mxu1  ;;  %v16055_v38 = vld [vmem:[#allocation6 + $0x808] ss:$16 sps:$4 sm:$0xff]  }
 0x16d   :  { %3006 = vmatprep.subr.bf16.mxu0 %v15949_v50  ;;  %v18317_v50 = vpop.f32.mrf.mxu0 }
 0x16e   :  { %3048 = vmatpush1.bf16.msra.mxu1 %v15944_v51  ;;  %v16018_v51 = vld [vmem:[#allocation6 + $0xaec] ss:$16 sps:$4 sm:$0xff]   ;;  %v18323_v15 = vsel %vm2339_vm4, %v2340_v63, %v2341_v49  ;;  %v16064_v49 = vld [vmem:[#allocation6 + $0xbe8] ss:$16 sps:$4 sm:$0xff]  }
 0x16f   :  { %3049 = vmatprep.subr.bf16.mxu1 %v15952_v54  ;;  %v2347_v54 = vrot.slane %v18262_v24, 1  ;;  %v16069_v63 = vld [vmem:[#allocation6 + $0x9cc] ss:$16 sps:$4 sm:$0xff]  }
 0x170   :  { %3007 = vmatpush1.bf16.msra.mxu0 %v15947_v53  ;;  %v2346_v53 = vrot.slane %v14119_v44, 1  ;;  %v16061_v44 = vld [vmem:[#allocation6 + $0x9e8] ss:$16 sps:$4 sm:$0xff]  }
 0x171   :  { %3008 = vmatprep.subr.bf16.mxu0 %v15955_v55  ;;  %v16021_v55 = vld [vmem:[#allocation6 + $0x8cc] ss:$16 sps:$4 sm:$0xff]  }
 0x172   :  { %3050 = vmatpush1.bf16.msra.mxu1 %v15950_v56  ;;  %v18325_v56 = vpop.f32.mrf.mxu0  ;;  %v18329_v24 = vsel %vm2339_vm4, %v2346_v53, %v2347_v54  ;;  %v16070_v53 = vld [vmem:[#allocation6 + $0xbc8] ss:$16 sps:$4 sm:$0xff]  }
 0x173   :  { %3051 = vmatprep.subr.bf16.mxu1 %v15958_v59  ;;  %v16024_v59 = vld [vmem:[#allocation6 + $0xacc] ss:$16 sps:$4 sm:$0xff]   ;;  %v16073_v54 = vld [vmem:[#allocation6 + $0x9a8] ss:$16 sps:$4 sm:$0xff]  }
 0x174   :  { %3009 = vmatpush1.bf16.msra.mxu0 %v15953_v57  ;;  %v16019_v57 = vld [vmem:[#allocation6 + $0x8c8] ss:$16 sps:$4 sm:$0xff]  }
 0x175   :  { %3010 = vmatprep.subr.bf16.mxu0 %v15961_v60 }
 0x176   :  { %3052 = vmatpush1.bf16.msra.mxu1 %v15956_v62  ;;  %v16027_v62 = vld [vmem:[#allocation6 + $0x8ac] ss:$16 sps:$4 sm:$0xff]  }
 0x177   :  { %3053 = vmatprep.subr.bf16.mxu1 %v15964_v1 }
 0x178   :  { %3011 = vmatpush1.bf16.msra.mxu0 %v15959_v0  ;;  %v18331_v0 = vpop.f32.mrf.mxu1 }
 0x179   :  { %3012 = vmatprep.subr.bf16.mxu0 %v15967_v2  ;;  %v16022_v2 = vld [vmem:[#allocation6 + $0xac8] ss:$16 sps:$4 sm:$0xff]  }
 0x17a   :  { %3054 = vmatpush1.bf16.msra.mxu1 %v15962_v3 }
 0x17b   :  { %3055 = vmatprep.subr.bf16.mxu1 %v15970_v34  ;;  %v16030_v34 = vld [vmem:[#allocation6 + $0xaac] ss:$16 sps:$4 sm:$0xff]  }
 0x17c   :  { %3013 = vmatpush2.bf16.msra.mxu0 %v15965_v4  ;;  %v16025_v4 = vld [vmem:[#allocation6 + $0x8a8] ss:$16 sps:$4 sm:$0xff]  }
 0x17d   :  { %3014 = vmatprep.subr.bf16.mxu0 %v15973_v5 }
 0x17e   :  { %3056 = vmatpush2.bf16.msra.mxu1 %v15968_v6 }
 0x17f   :  { %3057 = vmatprep.subr.bf16.mxu1 %v15976_v8 }
 0x180   :  { %3015 = vmatpush2.bf16.msra.mxu0 %v15971_v7  ;;  %v16033_v7 = vld [vmem:[#allocation6 + $0x88c] ss:$16 sps:$4 sm:$0xff]  }
 0x181   :  { %3016 = vmatprep.subr.bf16.mxu0 %v15979_v9 }
 0x182   :  { %3058 = vmatpush2.bf16.msra.mxu1 %v15974_v41  ;;  %v16028_v41 = vld [vmem:[#allocation6 + $0xaa8] ss:$16 sps:$4 sm:$0xff]  }
 0x183   :  { %3059 = vmatprep.subr.bf16.mxu1 %v15982_v14  ;;  %v16031_v14 = vld [vmem:[#allocation6 + $0x888] ss:$16 sps:$4 sm:$0xff]  }
 0x184   :  { %3017 = vmatpush2.bf16.msra.mxu0 %v15977_v13 }
 0x185   :  { %3018 = vmatprep.subr.bf16.mxu0 %v15985_v16  ;;  %v16036_v16 = vld [vmem:[#allocation6 + $0xa8c] ss:$16 sps:$4 sm:$0xff]  }
 0x186   :  { %3060 = vmatpush2.bf16.msra.mxu1 %v15980_v17 }
 0x187   :  { %3061 = vmatprep.subr.bf16.mxu1 %v15988_v19 }
 0x188   :  { %3019 = vmatpush2.bf16.msra.mxu0 %v15983_v18  ;;  %v16039_v18 = vld [vmem:[#allocation6 + $0x86c] ss:$16 sps:$4 sm:$0xff]  }
 0x189   :  { %3020 = vmatprep.subr.bf16.mxu0 %v15991_v20 }
 0x18a   :  { %3062 = vmatpush2.bf16.msra.mxu1 %v15986_v21  ;;  %v16037_v21 = vld [vmem:[#allocation6 + $0x868] ss:$16 sps:$4 sm:$0xff]  }
 0x18b   :  { %3063 = vmatprep.subr.bf16.mxu1 %v15994_v25  ;;  %v16045_v25 = vld [vmem:[#allocation6 + $0x84c] ss:$16 sps:$4 sm:$0xff]  }
 0x18c   :  { %3021 = vmatpush2.bf16.msra.mxu0 %v15989_v47  ;;  %v16042_v47 = vld [vmem:[#allocation6 + $0xa6c] ss:$16 sps:$4 sm:$0xff]  }
 0x18d   :  { %3022 = vmatprep.subr.bf16.mxu0 %v15997_v26  ;;  %v16040_v26 = vld [vmem:[#allocation6 + $0xa68] ss:$16 sps:$4 sm:$0xff]  }
 0x18e   :  { %3064 = vmatpush2.bf16.msra.mxu1 %v15992_v28  ;;  %v16043_v28 = vld [vmem:[#allocation6 + $0x848] ss:$16 sps:$4 sm:$0xff]  }
 0x18f   :  { %3065 = vmatprep.subr.bf16.mxu1 %v16000_v29  ;;  %v16051_v29 = vld [vmem:[#allocation6 + $0x82c] ss:$16 sps:$4 sm:$0xff]  }
 0x190   :  { %3023 = vmatpush2.bf16.msra.mxu0 %v15995_v61  ;;  %v16048_v61 = vld [vmem:[#allocation6 + $0xa4c] ss:$16 sps:$4 sm:$0xff]  }
 0x191   :  { %3024 = vmatprep.subr.bf16.mxu0 %v16003_v30  ;;  %v16046_v30 = vld [vmem:[#allocation6 + $0xa48] ss:$16 sps:$4 sm:$0xff]  }
 0x192   :  { %3066 = vmatpush2.bf16.msra.mxu1 %v15998_v32  ;;  %v16049_v32 = vld [vmem:[#allocation6 + $0x828] ss:$16 sps:$4 sm:$0xff]  }
 0x193   :  { %3067 = vmatprep.subr.bf16.mxu1 %v16006_v11  ;;  %v16057_v11 = vld [vmem:[#allocation6 + $0x80c] ss:$16 sps:$4 sm:$0xff]  }
 0x194   :  { %3025 = vmatpush2.bf16.msra.mxu0 %v16001_v35  ;;  %v16054_v35 = vld [vmem:[#allocation6 + $0xa2c] ss:$16 sps:$4 sm:$0xff]  }
 0x195   :  { %3026 = vmatprep.subr.bf16.mxu0 %v16009_v37  ;;  %v16052_v37 = vld [vmem:[#allocation6 + $0xa28] ss:$16 sps:$4 sm:$0xff]  }
 0x196   :  { %3068 = vmatpush2.bf16.msra.mxu1 %v16004_v52  ;;  %v16060_v52 = vld [vmem:[#allocation6 + $0xa0c] ss:$16 sps:$4 sm:$0xff]  }
 0x197   :  { %3069 = vmatprep.subr.bf16.mxu1 %v16012_v43  ;;  %v16058_v43 = vld [vmem:[#allocation6 + $0xa08] ss:$16 sps:$4 sm:$0xff]  }
 0x198   :  { %3027 = vmatpush2.bf16.msra.mxu0 %v16007_v40  ;;  %v16063_v40 = vld [vmem:[#allocation6 + $0x9ec] ss:$16 sps:$4 sm:$0xff]  }
 0x199   :  { %3082 = vmatprep.subr.bf16.mxu0 %v16015_v45  ;;  %v16066_v45 = vld [vmem:[#allocation6 + $0xbec] ss:$16 sps:$4 sm:$0xff]  }
 0x19a   :  { %3070 = vmatpush2.bf16.msra.mxu1 %v16010_v42  ;;  %v16067_v42 = vld [vmem:[#allocation6 + $0x9c8] ss:$16 sps:$4 sm:$0xff]  }
 0x19b   :  { %v1330_v60 = vpop.f32.mrf.mxu0  ;;  %3029 = vmatmul.mubr.bf16.vlgmr.msra.gmra.mxu0 %v18323_v15  ;;  %3125 = vmatprep.subr.bf16.mxu1 %v16018_v51  ;;  %v16075_v51 = vld [vmem:[#allocation6 + $0x9ac] ss:$16 sps:$4 sm:$0xff]  }
 0x19c   :  { %3083 = vmatpush1.bf16.msra.mxu0 %v16013_v10  ;;  %3114 = vmatprep.mubr.bf16.mxu0 %v18295_v33  ;;  %v16072_v10 = vld [vmem:[#allocation6 + $0xbcc] ss:$16 sps:$4 sm:$0xff]  }
 0x19d   :  { %v1332_v1 = vpop.f32.mrf.mxu0  ;;  %3084 = vmatprep.subr.bf16.mxu0 %v16021_v55  ;;  %v1373_v3 = vpop.f32.mrf.mxu1  ;;  %3072 = vmatmul.mubr.bf16.vlgmr.msra.gmra.mxu1 %v18329_v24  ;;  %v16078_v55 = vld [vmem:[#allocation6 + $0xbac] ss:$16 sps:$4 sm:$0xff]  }
 0x19e   :  { %v18335_v5 = vadd.f32 %v1373_v3, %v1330_v60  ;;  %3126 = vmatpush1.bf16.msra.mxu1 %v16016_v12  ;;  %3157 = vmatprep.mubr.bf16.mxu1 %v18299_v36  ;;  %v16034_v36 = vld [vmem:[#allocation6 + $0xa88] ss:$16 sps:$4 sm:$0xff]   ;;  %v16081_v12 = vld [vmem:[#allocation6 + $0x98c] ss:$16 sps:$4 sm:$0xff]  }
 0x19f   :  { %v1334_v6 = vpop.f32.mrf.mxu0  ;;  %v1375_v8 = vpop.f32.mrf.mxu1  ;;  %3127 = vmatprep.subr.bf16.mxu1 %v16024_v59  ;;  %v16079_v59 = vld [vmem:[#allocation6 + $0x988] ss:$16 sps:$4 sm:$0xff]   ;;  %v16084_v60 = vld [vmem:[#allocation6 + $0xb8c] ss:$16 sps:$4 sm:$0xff]  }
 0x1a0   :  { %3085 = vmatpush1.bf16.msra.mxu0 %v16019_v57  ;;  %v18338_v9 = vadd.f32 %v1375_v8, %v1332_v1  ;;  %v16076_v57 = vld [vmem:[#allocation6 + $0xba8] ss:$16 sps:$4 sm:$0xff]   ;;  %v16090_v3 = vld [vmem:[#allocation6 + $0xb6c] ss:$16 sps:$4 sm:$0xff]  }
 0x1a1   :  { %3086 = vmatprep.subr.bf16.mxu0 %v16027_v62  ;;  %v1377_v33 = vpop.f32.mrf.mxu1  ;;  %v1336_v13 = vpop.f32.mrf.mxu0  ;;  %v16087_v62 = vld [vmem:[#allocation6 + $0x96c] ss:$16 sps:$4 sm:$0xff]   ;;  %v16082_v1 = vld [vmem:[#allocation6 + $0xb88] ss:$16 sps:$4 sm:$0xff]  }
 0x1a2   :  { %v18340_v17 = vadd.f32 %v1377_v33, %v1334_v6  ;;  %3128 = vmatpush1.bf16.msra.mxu1 %v16022_v2  ;;  %v16085_v2 = vld [vmem:[#allocation6 + $0x968] ss:$16 sps:$4 sm:$0xff]   ;;  %v16099_v8 = vld [vmem:[#allocation6 + $0x92c] ss:$16 sps:$4 sm:$0xff]  }
 0x1a3   :  { %v1379_v19 = vpop.f32.mrf.mxu1  ;;  %3129 = vmatprep.subr.bf16.mxu1 %v16030_v34  ;;  %v16088_v34 = vld [vmem:[#allocation6 + $0xb68] ss:$16 sps:$4 sm:$0xff]  }
 0x1a4   :  { %3087 = vmatpush1.bf16.msra.mxu0 %v16025_v4  ;;  %v18342_v20 = vadd.f32 %v1379_v19, %v1336_v13  ;;  %v16093_v4 = vld [vmem:[#allocation6 + $0x94c] ss:$16 sps:$4 sm:$0xff]   ;;  %v16091_v6 = vld [vmem:[#allocation6 + $0x948] ss:$16 sps:$4 sm:$0xff]  }
 0x1a5   :  { %3088 = vmatprep.subr.bf16.mxu0 %v16033_v7  ;;  %v16096_v7 = vld [vmem:[#allocation6 + $0xb4c] ss:$16 sps:$4 sm:$0xff]   ;;  %v16097_v33 = vld [vmem:[#allocation6 + $0x928] ss:$16 sps:$4 sm:$0xff]  }
 0x1a6   :  { %3130 = vmatpush1.bf16.msra.mxu1 %v16028_v41  ;;  %v16094_v41 = vld [vmem:[#allocation6 + $0xb48] ss:$16 sps:$4 sm:$0xff]   ;;  %v16102_v13 = vld [vmem:[#allocation6 + $0xb2c] ss:$16 sps:$4 sm:$0xff]  }
 0x1a7   :  { %3131 = vmatprep.subr.bf16.mxu1 %v16036_v16  ;;  %v16100_v16 = vld [vmem:[#allocation6 + $0xb28] ss:$16 sps:$4 sm:$0xff]   ;;  %v16108_v19 = vld [vmem:[#allocation6 + $0xb0c] ss:$16 sps:$4 sm:$0xff]  }
 0x1a8   :  { %3089 = vmatpush1.bf16.msra.mxu0 %v16031_v14  ;;  %v16105_v14 = vld [vmem:[#allocation6 + $0x90c] ss:$16 sps:$4 sm:$0xff]  }
 0x1a9   :  { %3090 = vmatprep.subr.bf16.mxu0 %v16039_v18  ;;  %v16103_v18 = vld [vmem:[#allocation6 + $0x908] ss:$16 sps:$4 sm:$0xff]  }
 0x1aa   :  { %3132 = vmatpush1.bf16.msra.mxu1 %v16034_v36  ;;  %v16106_v36 = vld [vmem:[#allocation6 + $0xb08] ss:$16 sps:$4 sm:$0xff]  }
 0x1ab   :  { %3133 = vmatprep.subr.bf16.mxu1 %v16042_v47 }
 0x1ac   :  { %3091 = vmatpush1.bf16.msra.mxu0 %v16037_v21 }
 0x1ad   :  { %3092 = vmatprep.subr.bf16.mxu0 %v16045_v25 }
 0x1ae   :  { %3134 = vmatpush1.bf16.msra.mxu1 %v16040_v26 }
 0x1af   :  { %3135 = vmatprep.subr.bf16.mxu1 %v16048_v61 }
 0x1b0   :  { %3093 = vmatpush1.bf16.msra.mxu0 %v16043_v28 }
 0x1b1   :  { %3094 = vmatprep.subr.bf16.mxu0 %v16051_v29 }
 0x1b2   :  { %3136 = vmatpush1.bf16.msra.mxu1 %v16046_v30 }
 0x1b3   :  { %3137 = vmatprep.subr.bf16.mxu1 %v16054_v35 }
 0x1b4   :  { %3095 = vmatpush1.bf16.msra.mxu0 %v16049_v32 }
 0x1b5   :  { %3096 = vmatprep.subr.bf16.mxu0 %v16057_v11 }
 0x1b6   :  { %3138 = vmatpush1.bf16.msra.mxu1 %v16052_v37 }
 0x1b7   :  { %3139 = vmatprep.subr.bf16.mxu1 %v16060_v52 }
 0x1b8   :  { %3097 = vmatpush1.bf16.msra.mxu0 %v16055_v38 }
 0x1b9   :  { %3098 = vmatprep.subr.bf16.mxu0 %v16063_v40 }
 0x1ba   :  { %3140 = vmatpush1.bf16.msra.mxu1 %v16058_v43 }
 0x1bb   :  { %3141 = vmatprep.subr.bf16.mxu1 %v16066_v45 }
 0x1bc   :  { %3099 = vmatpush2.bf16.msra.mxu0 %v16061_v44 }
 0x1bd   :  { %3100 = vmatprep.subr.bf16.mxu0 %v16069_v63 }
 0x1be   :  { %3142 = vmatpush2.bf16.msra.mxu1 %v16064_v49 }
 0x1bf   :  { %3143 = vmatprep.subr.bf16.mxu1 %v16072_v10 }
 0x1c0   :  { %3101 = vmatpush2.bf16.msra.mxu0 %v16067_v42 }
 0x1c1   :  { %3102 = vmatprep.subr.bf16.mxu0 %v16075_v51 }
 0x1c2   :  { %3144 = vmatpush2.bf16.msra.mxu1 %v16070_v53  ;;  %v1292_v53 = vadd.f32 %v18320_v58, %v18317_v50  ;;  %v1290_v50 = vadd.f32 %v18314_v48, %v18310_v39 }
 0x1c3   :  { %3145 = vmatprep.subr.bf16.mxu1 %v16078_v55 }
 0x1c4   :  { %3103 = vmatpush2.bf16.msra.mxu0 %v16073_v54 }
 0x1c5   :  { %3104 = vmatprep.subr.bf16.mxu0 %v16081_v12 }
 0x1c6   :  { %3146 = vmatpush2.bf16.msra.mxu1 %v16076_v57 }
 0x1c7   :  { %3147 = vmatprep.subr.bf16.mxu1 %v16084_v60 }
 0x1c8   :  { %3105 = vmatpush2.bf16.msra.mxu0 %v16079_v59 }
 0x1c9   :  { %3106 = vmatprep.subr.bf16.mxu0 %v16087_v62 }
 0x1ca   :  { %3148 = vmatpush2.bf16.msra.mxu1 %v16082_v1 }
 0x1cb   :  { %3149 = vmatprep.subr.bf16.mxu1 %v16090_v3 }
 0x1cc   :  { %3107 = vmatpush2.bf16.msra.mxu0 %v16085_v2 }
 0x1cd   :  { %3108 = vmatprep.subr.bf16.mxu0 %v16093_v4  ;;  %v1294_v4 = vadd.f32 %v18331_v0, %v18325_v56 }
 0x1ce   :  { %3150 = vmatpush2.bf16.msra.mxu1 %v16088_v34 }
 0x1cf   :  { %3151 = vmatprep.subr.bf16.mxu1 %v16096_v7 }
 0x1d0   :  { %3109 = vmatpush2.bf16.msra.mxu0 %v16091_v6 }
 0x1d1   :  { %3110 = vmatprep.subr.bf16.mxu0 %v16099_v8 }
 0x1d2   :  { %3152 = vmatpush2.bf16.msra.mxu1 %v16094_v41 }
 0x1d3   :  { %3153 = vmatprep.subr.bf16.mxu1 %v16102_v13 }
 0x1d4   :  { %3111 = vmatpush2.bf16.msra.mxu0 %v16097_v33 }
 0x1d5   :  { %3112 = vmatprep.subr.bf16.mxu0 %v16105_v14 }
 0x1d6   :  { %3154 = vmatpush2.bf16.msra.mxu1 %v16100_v16 }
 0x1d7   :  { %3155 = vmatprep.subr.bf16.mxu1 %v16108_v19 }
 0x1d8   :  { %3113 = vmatpush2.bf16.msra.mxu0 %v16103_v18 }
 0x1da   :  { %3156 = vmatpush2.bf16.msra.mxu1 %v16106_v36 }
 0x1db   :  { %3115 = vmatmul.mubr.bf16.vlgmr.msra.gmra.mxu0 %v18323_v15  ;;  %v2060_v21 = vpop.f32.mrf.mxu0 }
 0x1dd   :  { %3158 = vmatmul.mubr.bf16.vlgmr.msra.gmra.mxu1 %v18329_v24  ;;  %v2103_v47 = vpop.f32.mrf.mxu1  ;;  %v2062_v25 = vpop.f32.mrf.mxu0 }
 0x1de   :  { %v2063_v3 = vadd.f32 %v2062_v25, %v1290_v50 }
 0x1df   :  { %v2105_v26 = vpop.f32.mrf.mxu1  ;;  %v2064_v28 = vpop.f32.mrf.mxu0 }
 0x1e0   :  { %v2065_v12 = vadd.f32 %v2064_v28, %v1292_v53  ;;  %v2106_v8 = vadd.f32 %v2105_v26, %v2063_v3 }
 0x1e1   :  { %v2107_v61 = vpop.f32.mrf.mxu1  ;;  %v2066_v29 = vpop.f32.mrf.mxu0 }
 0x1e2   :  { %v2108_v1 = vadd.f32 %v2107_v61, %v2065_v12  ;;  %v2067_v41 = vadd.f32 %v2066_v29, %v1294_v4 }
 0x1e3   :  { %v2109_v32 = vpop.f32.mrf.mxu1 }
 0x1e4   :  { %v2110_v33 = vadd.f32 %v2109_v32, %v2067_v41 }
 0x21b   :  { %v2146_v30 = vpop.f32.mrf.mxu0 }
 0x21c   :  { %v2147_v35 = vadd.f32 %v2146_v30, %v18335_v5 }
 0x21d   :  { %v2148_v11 = vpop.f32.mrf.mxu0  ;;  %v2189_v37 = vpop.f32.mrf.mxu1 }
 0x21e   :  { %v2149_v38 = vadd.f32 %v2148_v11, %v18338_v9  ;;  %v18348_v52 = vadd.f32 %v2189_v37, %v2147_v35  ;;  %v1288_v9 = vadd.f32 %v18306_v22, %v18304_v31 }
 0x21f   :  { %v2150_v15 = vpop.f32.mrf.mxu0  ;;  %v2191_v40 = vpop.f32.mrf.mxu1 }
 0x220   :  { %v2151_v24 = vadd.f32 %v2150_v15, %v18340_v17  ;;  %v18351_v43 = vadd.f32 %v2191_v40, %v2149_v38  ;;  %v2061_v10 = vadd.f32 %v2060_v21, %v1288_v9 }
 0x221   :  { %v2152_v44 = vpop.f32.mrf.mxu0  ;;  %v2193_v45 = vpop.f32.mrf.mxu1 }
 0x222   :  { %v2153_v63 = vadd.f32 %v2152_v44, %v18342_v20  ;;  %v18354_v49 = vadd.f32 %v2193_v45, %v2151_v24  ;;  %v2104_v55 = vadd.f32 %v2103_v47, %v2061_v10 }
 0x223   :  { %v2195_v42 = vpop.f32.mrf.mxu1 }
 0x224   :  { %v18356_v5 = vadd.f32 %v2195_v42, %v2153_v63 }
 0x25b   :  { %v3030_v51 = vpop.f32.mrf.mxu0 }
 0x25d   :  { %v3032_v17 = vpop.f32.mrf.mxu0  ;;  %v3073_v54 = vpop.f32.mrf.mxu1 }
 0x25e   :  { %v3074_v57 = vadd.f32 %v3073_v54, %v3030_v51 }
 0x25f   :  { %v3075_v59 = vpop.f32.mrf.mxu1  ;;  %v3034_v20 = vpop.f32.mrf.mxu0 }
 0x260   :  { %v18362_v60 = vadd.f32 %v3074_v57, %v2104_v55  ;;  %v3076_v34 = vadd.f32 %v3075_v59, %v3032_v17 }
 0x261   :  { %v3077_v62 = vpop.f32.mrf.mxu1  ;;  %v3036_v6 = vpop.f32.mrf.mxu0 }
 0x262   :  { %v3078_v2 = vadd.f32 %v3077_v62, %v3034_v20  ;;  %3188 = vrot.lane.b32.xlu1 %v18362_v60, %s18070_s4  ;;  %3180 = vrot.lane.b32.xlu0 %v18362_v60, %s18071_s6  ;;  %v18376_v22 = vmul.f32 %v18362_v60, %v18362_v60  ;;  %v18398_v39 = vadd.f32 %v3076_v34, %v2106_v8 }
 0x263   :  { %v3079_v7 = vpop.f32.mrf.mxu1 }
 0x264   :  { %v18368_v31 = vadd.f32 %v3078_v2, %v2108_v1  ;;  %v3080_v48 = vadd.f32 %v3079_v7, %v3036_v6  ;;  %v18420_v0 = vmul.f32 %v18398_v39, %v18398_v39 }
 0x266   :  { %3190 = vrot.lane.b32.xlu1 %v18368_v31, %s18070_s4  ;;  %3196 = vrot.lane.b32.xlu0 %v18362_v60, %s18066_s22  ;;  %v18386_v58 = vmul.f32 %v18368_v31, %v18368_v31  ;;  %v18404_v56 = vadd.f32 %v3080_v48, %v2110_v33 }
 0x268   :  { %v18424_v13 = vmul.f32 %v18404_v56, %v18404_v56 }
 0x26a   :  { %3198 = vrot.lane.b32.xlu1 %v18368_v31, %s18066_s22  ;;  %3308 = vrot.lane.b32.xlu0 %v18376_v22, %s18071_s6 }
 0x26e   :  { %3310 = vrot.lane.b32.xlu1 %v18386_v58, %s18071_s6  ;;  %3316 = vrot.lane.b32.xlu0 %v18376_v22, %s18070_s4 }
 0x272   :  { %3318 = vrot.lane.b32.xlu1 %v18386_v58, %s18070_s4  ;;  %3324 = vrot.lane.b32.xlu0 %v18376_v22, %s18066_s22 }
 0x276   :  { %3326 = vrot.lane.b32.xlu1 %v18386_v58, %s18066_s22  ;;  %3208 = vrot.lane.b32.xlu0 %v18398_v39, %s18071_s6 }
 0x27a   :  { %3216 = vrot.lane.b32.xlu0 %v18398_v39, %s18070_s4  ;;  %3210 = vrot.lane.b32.xlu1 %v18404_v56, %s18071_s6 }
 0x27e   :  { %3224 = vrot.lane.b32.xlu0 %v18398_v39, %s18066_s22  ;;  %3218 = vrot.lane.b32.xlu1 %v18404_v56, %s18070_s4 }
 0x282   :  { %3182 = vrot.lane.b32.xlu0 %v18368_v31, %s18071_s6  ;;  %3226 = vrot.lane.b32.xlu1 %v18404_v56, %s18066_s22 }
 0x286   :  { %3336 = vrot.lane.b32.xlu0 %v18420_v0, %s18071_s6  ;;  %3338 = vrot.lane.b32.xlu1 %v18424_v13, %s18071_s6 }
 0x28a   :  { %3344 = vrot.lane.b32.xlu0 %v18420_v0, %s18070_s4  ;;  %3346 = vrot.lane.b32.xlu1 %v18424_v13, %s18070_s4 }
 0x28e   :  { %3352 = vrot.lane.b32.xlu0 %v18420_v0, %s18066_s22  ;;  %3354 = vrot.lane.b32.xlu1 %v18424_v13, %s18066_s22 }
 0x29b   :  { %v3116_v14 = vpop.f32.mrf.mxu0 }
 0x29d   :  { %v3118_v16 = vpop.f32.mrf.mxu0  ;;  %v3159_v18 = vpop.f32.mrf.mxu1 }
 0x29e   :  { %v3160_v19 = vadd.f32 %v3159_v18, %v3116_v14 }
 0x29f   :  { %v3161_v36 = vpop.f32.mrf.mxu1  ;;  %v3120_v21 = vpop.f32.mrf.mxu0 }
 0x2a0   :  { %v18439_v47 = vadd.f32 %v3160_v19, %v18348_v52  ;;  %v3162_v30 = vadd.f32 %v3161_v36, %v3118_v16 }
 0x2a1   :  { %v3163_v25 = vpop.f32.mrf.mxu1  ;;  %v3122_v32 = vpop.f32.mrf.mxu0 }
 0x2a2   :  { %v3164_v26 = vadd.f32 %v3163_v25, %v3120_v21  ;;  %3236 = vrot.lane.b32.xlu0 %v18439_v47, %s18071_s6  ;;  %v18456_v61 = vmul.f32 %v18439_v47, %v18439_v47  ;;  %v18475_v11 = vadd.f32 %v3162_v30, %v18351_v43 }
 0x2a3   :  { %v3165_v35 = vpop.f32.mrf.mxu1 }
 0x2a4   :  { %v18444_v28 = vadd.f32 %v3164_v26, %v18354_v49  ;;  %v3166_v37 = vadd.f32 %v3165_v35, %v3122_v32  ;;  %v18494_v52 = vmul.f32 %v18475_v11, %v18475_v11 }
 0x2a6   :  { %3244 = vrot.lane.b32.xlu0 %v18439_v47, %s18070_s4  ;;  %3238 = vrot.lane.b32.xlu1 %v18444_v28, %s18071_s6  ;;  %v18464_v29 = vmul.f32 %v18444_v28, %v18444_v28  ;;  %v18482_v38 = vadd.f32 %v3166_v37, %v18356_v5 }
 0x2a8   :  { %v18502_v15 = vmul.f32 %v18482_v38, %v18482_v38 }
 0x2aa   :  { %3252 = vrot.lane.b32.xlu0 %v18439_v47, %s18066_s22  ;;  %3246 = vrot.lane.b32.xlu1 %v18444_v28, %s18070_s4 }
 0x2ae   :  { %3364 = vrot.lane.b32.xlu0 %v18456_v61, %s18071_s6  ;;  %3254 = vrot.lane.b32.xlu1 %v18444_v28, %s18066_s22 }
 0x2b2   :  { %3372 = vrot.lane.b32.xlu0 %v18456_v61, %s18070_s4  ;;  %3366 = vrot.lane.b32.xlu1 %v18464_v29, %s18071_s6 }
 0x2b6   :  { %3380 = vrot.lane.b32.xlu0 %v18456_v61, %s18066_s22  ;;  %3374 = vrot.lane.b32.xlu1 %v18464_v29, %s18070_s4 }
 0x2ba   :  { %3264 = vrot.lane.b32.xlu0 %v18475_v11, %s18071_s6  ;;  %3382 = vrot.lane.b32.xlu1 %v18464_v29, %s18066_s22 }
 0x2be   :  { %3272 = vrot.lane.b32.xlu0 %v18475_v11, %s18070_s4  ;;  %3266 = vrot.lane.b32.xlu1 %v18482_v38, %s18071_s6 }
 0x2c2   :  { %3280 = vrot.lane.b32.xlu0 %v18475_v11, %s18066_s22  ;;  %3274 = vrot.lane.b32.xlu1 %v18482_v38, %s18070_s4 }
 0x2c6   :  { %3392 = vrot.lane.b32.xlu0 %v18494_v52, %s18071_s6  ;;  %3282 = vrot.lane.b32.xlu1 %v18482_v38, %s18066_s22 }
 0x2ca   :  { %3400 = vrot.lane.b32.xlu0 %v18494_v52, %s18070_s4  ;;  %3394 = vrot.lane.b32.xlu1 %v18502_v15, %s18071_s6 }
 0x2ce   :  { %3408 = vrot.lane.b32.xlu0 %v18494_v52, %s18066_s22  ;;  %3402 = vrot.lane.b32.xlu1 %v18502_v15, %s18070_s4 }
 0x2d2   :  { %3410 = vrot.lane.b32.xlu1 %v18502_v15, %s18066_s22 }
 0x2d4   :  { %v3189_v40 = vpop.permute.xlu1 %3188  ;;  %v3181_v24 = vpop.permute.xlu0 %3180 }
 0x2d5   :  { %v3186_v3 = vadd.f32 %v3181_v24, %v18362_v60 }
 0x2d7   :  { %v3194_v7 = vadd.f32 %v3189_v40, %v3186_v3 }
 0x2d8   :  { %v3191_v43 = vpop.permute.xlu1 %3190  ;;  %v3197_v44 = vpop.permute.xlu0 %3196 }
 0x2d9   :  { %v3202_v33 = vadd.f32 %v3197_v44, %v3194_v7 }
 0x2db   :  { %v3204_v19 = vadd.f32 %v3202_v33, %v18398_v39 }
 0x2dc   :  { %v3309_v45 = vpop.permute.xlu0 %3308  ;;  %v3199_v63 = vpop.permute.xlu1 %3198 }
 0x2dd   :  { %v3314_v30 = vadd.f32 %v3309_v45, %v18376_v22 }
 0x2e0   :  { %v3317_v49 = vpop.permute.xlu0 %3316  ;;  %v3311_v42 = vpop.permute.xlu1 %3310 }
 0x2e1   :  { %v3315_v37 = vadd.f32 %v3311_v42, %v18386_v58  ;;  %v3322_v40 = vadd.f32 %v3317_v49, %v3314_v30 }
 0x2e4   :  { %v3325_v5 = vpop.permute.xlu0 %3324  ;;  %v3319_v9 = vpop.permute.xlu1 %3318 }
 0x2e8   :  { %v3209_v10 = vpop.permute.xlu0 %3208  ;;  %v3327_v51 = vpop.permute.xlu1 %3326 }
 0x2e9   :  { %v3214_v21 = vadd.f32 %v3209_v10, %v3204_v19 }
 0x2ec   :  { %v3217_v53 = vpop.permute.xlu0 %3216  ;;  %v3211_v17 = vpop.permute.xlu1 %3210 }
 0x2ed   :  { %v3222_v32 = vadd.f32 %v3217_v53, %v3214_v21 }
 0x2f0   :  { %v3225_v54 = vpop.permute.xlu0 %3224  ;;  %v3219_v55 = vpop.permute.xlu1 %3218 }
 0x2f1   :  { %v3230_v24 = vadd.f32 %v3225_v54, %v3222_v32 }
 0x2f4   :  { %v3183_v12 = vpop.permute.xlu0 %3182  ;;  %v3227_v57 = vpop.permute.xlu1 %3226 }
 0x2f5   :  { %v3187_v1 = vadd.f32 %v3183_v12, %v18368_v31  ;;  %v3330_v12 = vadd.f32 %v3325_v5, %v3322_v40 }
 0x2f7   :  { %v3195_v4 = vadd.f32 %v3191_v43, %v3187_v1  ;;  %v3332_v7 = vadd.f32 %v3330_v12, %v18420_v0 }
 0x2f8   :  { %v3337_v59 = vpop.permute.xlu0 %3336  ;;  %v3339_v20 = vpop.permute.xlu1 %3338 }
 0x2f9   :  { %v3203_v8 = vadd.f32 %v3199_v63, %v3195_v4  ;;  %v3323_v63 = vadd.f32 %v3319_v9, %v3315_v37  ;;  %v3232_v4 = vadd.f32 %v3230_v24, %v18439_v47  ;;  %v3342_v45 = vadd.f32 %v3337_v59, %v3332_v7 }
 0x2fb   :  { %v3205_v14 = vadd.f32 %v3203_v8, %v18404_v56  ;;  %v3331_v3 = vadd.f32 %v3327_v51, %v3323_v63 }
 0x2fc   :  { %v3345_v62 = vpop.permute.xlu0 %3344  ;;  %v3347_v2 = vpop.permute.xlu1 %3346 }
 0x2fd   :  { %v3215_v36 = vadd.f32 %v3211_v17, %v3205_v14  ;;  %v3333_v58 = vadd.f32 %v3331_v3, %v18424_v13  ;;  %v3350_v5 = vadd.f32 %v3345_v62, %v3342_v45 }
 0x2ff   :  { %v3223_v35 = vadd.f32 %v3219_v55, %v3215_v36  ;;  %v3343_v9 = vadd.f32 %v3339_v20, %v3333_v58 }
 0x300   :  { %v3353_v50 = vpop.permute.xlu0 %3352  ;;  %v3355_v34 = vpop.permute.xlu1 %3354 }
 0x301   :  { %v3231_v1 = vadd.f32 %v3227_v57, %v3223_v35  ;;  %v3351_v57 = vadd.f32 %v3347_v2, %v3343_v9  ;;  %v3358_v33 = vadd.f32 %v3353_v50, %v3350_v5 }
 0x303   :  { %v3233_v22 = vadd.f32 %v3231_v1, %v18444_v28  ;;  %v3359_v0 = vadd.f32 %v3355_v34, %v3351_v57  ;;  %v3360_v59 = vadd.f32 %v3358_v33, %v18456_v61 }
 0x305   :  { %v3361_v20 = vadd.f32 %v3359_v0, %v18464_v29 }
 0x314   :  { %v3237_v6 = vpop.permute.xlu0 %3236 }
 0x315   :  { %v3242_v8 = vadd.f32 %v3237_v6, %v3232_v4 }
 0x318   :  { %v3245_v41 = vpop.permute.xlu0 %3244  ;;  %v3239_v48 = vpop.permute.xlu1 %3238 }
 0x319   :  { %v3250_v49 = vadd.f32 %v3245_v41, %v3242_v8  ;;  %v3243_v42 = vadd.f32 %v3239_v48, %v3233_v22 }
 0x31c   :  { %v3253_v16 = vpop.permute.xlu0 %3252  ;;  %v3247_v18 = vpop.permute.xlu1 %3246 }
 0x31d   :  { %v3258_v55 = vadd.f32 %v3253_v16, %v3250_v49  ;;  %v3251_v51 = vadd.f32 %v3247_v18, %v3243_v42 }
 0x31f   :  { %v3260_v6 = vadd.f32 %v3258_v55, %v18475_v11 }
 0x320   :  { %v3365_v25 = vpop.permute.xlu0 %3364  ;;  %v3255_v26 = vpop.permute.xlu1 %3254 }
 0x321   :  { %v3259_v14 = vadd.f32 %v3255_v26, %v3251_v51  ;;  %v3370_v30 = vadd.f32 %v3365_v25, %v3360_v59 }
 0x323   :  { %v3261_v13 = vadd.f32 %v3259_v14, %v18482_v38 }
 0x324   :  { %v3373_v43 = vpop.permute.xlu0 %3372  ;;  %v3367_v44 = vpop.permute.xlu1 %3366 }
 0x325   :  { %v3378_v2 = vadd.f32 %v3373_v43, %v3370_v30  ;;  %v3371_v50 = vadd.f32 %v3367_v44, %v3361_v20 }
 0x328   :  { %v3381_v17 = vpop.permute.xlu0 %3380  ;;  %v3375_v10 = vpop.permute.xlu1 %3374 }
 0x329   :  { %v3386_v35 = vadd.f32 %v3381_v17, %v3378_v2  ;;  %v3379_v37 = vadd.f32 %v3375_v10, %v3371_v50 }
 0x32b   :  { %v3388_v1 = vadd.f32 %v3386_v35, %v18494_v52 }
 0x32c   :  { %v3265_v53 = vpop.permute.xlu0 %3264  ;;  %v3383_v54 = vpop.permute.xlu1 %3382 }
 0x32d   :  { %v3270_v21 = vadd.f32 %v3265_v53, %v3260_v6  ;;  %v3387_v40 = vadd.f32 %v3383_v54, %v3379_v37 }
 0x32f   :  { %v3389_v3 = vadd.f32 %v3387_v40, %v18502_v15 }
 0x330   :  { %v3273_v19 = vpop.permute.xlu0 %3272  ;;  %v3267_v36 = vpop.permute.xlu1 %3266 }
 0x331   :  { %v3278_v62 = vadd.f32 %v3273_v19, %v3270_v21  ;;  %v3271_v16 = vadd.f32 %v3267_v36, %v3261_v13 }
 0x334   :  { %v3281_v41 = vpop.permute.xlu0 %3280  ;;  %v3275_v48 = vpop.permute.xlu1 %3274 }
 0x335   :  { %v3286_v18 = vadd.f32 %v3281_v41, %v3278_v62  ;;  %v3279_v26 = vadd.f32 %v3275_v48, %v3271_v16 }
 0x337   :  { %v3289_v24 = vsel %vm3288_vm5, %v3286_v18, 0.0 }
 0x338   :  { %v3393_v34 = vpop.permute.xlu0 %3392  ;;  %v3283_v32 = vpop.permute.xlu1 %3282 }
 0x339   :  { %v3287_v61 = vadd.f32 %v3283_v32, %v3279_v26  ;;  %v3398_v44 = vadd.f32 %v3393_v34, %v3388_v1 }
 0x33b   :  { %v3290_v63 = vsel %vm3288_vm5, %v3287_v61, 0.0 }
 0x33c   :  { %v3291_v25 = vadd.f32 %v3290_v63, %v3289_v24  ;;  %v3401_v12 = vpop.permute.xlu0 %3400  ;;  %v3395_v29 = vpop.permute.xlu1 %3394 }
 0x33d   :  { %v3406_v17 = vadd.f32 %v3401_v12, %v3398_v44  ;;  %v3399_v10 = vadd.f32 %v3395_v29, %v3389_v3 }
 0x33e   :  { %v3292_v43 = vrot.slane %v3291_v25, 4 }
 0x340   :  { %v3409_v4 = vpop.permute.xlu0 %3408  ;;  %v3403_v7 = vpop.permute.xlu1 %3402  ;;  %v3293_v8 = vadd.f32 %v3292_v43, %v3291_v25  ;;  %v18541_v25 = vld [vmem:[#allocation8] sm:$0x1] }
 0x341   :  { %v3414_v45 = vadd.f32 %v3409_v4, %v3406_v17  ;;  %v3407_v58 = vadd.f32 %v3403_v7, %v3399_v10 }
 0x342   :  { %v3294_v22 = vrot.slane %v3293_v8, 2 }
 0x343   :  { %v3416_v9 = vsel %vm3288_vm5, %v3414_v45, 0.0 }
 0x344   :  { %v3411_v49 = vpop.permute.xlu1 %3410  ;;  %v3295_v42 = vadd.f32 %v3294_v22, %v3293_v8 }
 0x345   :  { %v3415_v53 = vadd.f32 %v3411_v49, %v3407_v58 }
 0x346   :  { %v3296_v54 = vrot.slane %v3295_v42, 1 }
 0x347   :  { %v3417_v52 = vsel %vm3288_vm5, %v3415_v53, 0.0  ;;  %v16109_v53 = vld [vmem:[#allocation11 + $0x4e0] ss:$16 sps:$4 sm:$0xff]  }
 0x348   :  { %v3418_v5 = vadd.f32 %v3417_v52, %v3416_v9  ;;  %v3297_v55 = vadd.f32 %v3296_v54, %v3295_v42  ;;  %v16111_v54 = vld [vmem:[#allocation11 + $0x4e4] ss:$16 sps:$4 sm:$0xff]   ;;  %v16112_v9 = vld [vmem:[#allocation11 + $0x6e0] ss:$16 sps:$4 sm:$0xff]  }
 0x349   :  { %v16114_v52 = vld [vmem:[#allocation11 + $0x6e4] ss:$16 sps:$4 sm:$0xff]   ;;  %4627 = vmatprep.subr.bf16.mxu0 %v16111_v54  ;;  %v16169_v54 = vld [vmem:[#allocation11 + $0x5a0] ss:$16 sps:$4 sm:$0xff]  }
 0x34a   :  { %v3419_v15 = vrot.slane %v3418_v5, 4  ;;  %v3426_v51 = vsel %vm3425_vm6, %v3297_v55, 0.0  ;;  %4670 = vmatprep.subr.bf16.mxu1 %v16114_v52  ;;  %4628 = vmatpush1.bf16.msra.mxu0 %v16109_v53  ;;  %v16174_v53 = vld [vmem:[#allocation11 + $0x7a4] ss:$16 sps:$4 sm:$0xff]  }
 0x34b   :  { %3427 = vadd.xlane.f32.xlu0 %v3426_v51  ;;  %4671 = vmatpush1.bf16.msra.mxu1 %v16112_v9  ;;  %v16118_v51 = vld [vmem:[#allocation11 + $0x6c0] ss:$16 sps:$4 sm:$0xff]   ;;  %v6994_v52 = vld [vmem:[#allocation3 + $0x48] sm:$0xff] }
 0x34c   :  { %v3420_v57 = vadd.f32 %v3419_v15, %v3418_v5  ;;  %v16117_v5 = vld [vmem:[#allocation11 + $0x4c4] ss:$16 sps:$4 sm:$0xff]   ;;  %v16115_v15 = vld [vmem:[#allocation11 + $0x4c0] ss:$16 sps:$4 sm:$0xff]  }
 0x34d   :  { %4629 = vmatprep.subr.bf16.mxu0 %v16117_v5  ;;  %v16172_v9 = vld [vmem:[#allocation11 + $0x7a0] ss:$16 sps:$4 sm:$0xff]  }
 0x34e   :  { %v3421_v33 = vrot.slane %v3420_v57, 2  ;;  %4630 = vmatpush1.bf16.msra.mxu0 %v16115_v15  ;;  %v6997_v5 = vld [vmem:[#allocation3 + $0x60] sm:$0xff] }
 0x350   :  { %v3422_v14 = vadd.f32 %v3421_v33, %v3420_v57  ;;  %v16123_v57 = vld [vmem:[#allocation11 + $0x4a4] ss:$16 sps:$4 sm:$0xff]  }
 0x351   :  { %v16126_v33 = vld [vmem:[#allocation11 + $0x6a4] ss:$16 sps:$4 sm:$0xff]   ;;  %4631 = vmatprep.subr.bf16.mxu0 %v16123_v57 }
 0x352   :  { %v3423_v19 = vrot.slane %v3422_v14, 1  ;;  %v6996_v57 = vld [vmem:[#allocation3 + $0x58] sm:$0xff] }
 0x354   :  { %v3424_v36 = vadd.f32 %v3423_v19, %v3422_v14  ;;  %v16121_v14 = vld [vmem:[#allocation11 + $0x4a0] ss:$16 sps:$4 sm:$0xff]  }
 0x355   :  { %v16124_v19 = vld [vmem:[#allocation11 + $0x6a0] ss:$16 sps:$4 sm:$0xff]   ;;  %4632 = vmatpush1.bf16.msra.mxu0 %v16121_v14  ;;  %v16180_v14 = vld [vmem:[#allocation11 + $0x784] ss:$16 sps:$4 sm:$0xff]  }
 0x356   :  { %v3439_v0 = vsel %vm3425_vm6, %v3424_v36, 0.0 }
 0x357   :  { %3440 = vadd.xlane.f32.xlu1 %v3439_v0  ;;  %v16132_v0 = vld [vmem:[#allocation11 + $0x684] ss:$16 sps:$4 sm:$0xff]  }
 0x361   :  { %3465 = vrot.lane.b32.xlu0 %v3297_v55, %s18072_s27  ;;  %v16120_v55 = vld [vmem:[#allocation11 + $0x6c4] ss:$16 sps:$4 sm:$0xff]  }
 0x362   :  { %4672 = vmatprep.subr.bf16.mxu1 %v16120_v55  ;;  %v6998_v55 = vld [vmem:[#allocation3 + $0x68] sm:$0xff] }
 0x363   :  { %4673 = vmatpush1.bf16.msra.mxu1 %v16118_v51  ;;  %v6995_v51 = vld [vmem:[#allocation3 + $0x50] sm:$0xff] }
 0x364   :  { %4674 = vmatprep.subr.bf16.mxu1 %v16126_v33  ;;  %v16177_v33 = vld [vmem:[#allocation11 + $0x584] ss:$16 sps:$4 sm:$0xff]  }
 0x367   :  { %4675 = vmatpush1.bf16.msra.mxu1 %v16124_v19  ;;  %v15459_v19 = vpack.c.bf16 %v6998_v55, %v6997_v5  ;;  %v16212_v5 = vld [vmem:[#allocation11 + $0x6ec] ss:$16 sps:$4 sm:$0xff]   ;;  %v3541_v55 = vlaneseq }
 0x368   :  { %3482 = vrot.lane.b32.xlu1 %v3424_v36, %s18072_s27  ;;  %v16129_v36 = vld [vmem:[#allocation11 + $0x484] ss:$16 sps:$4 sm:$0xff]   ;;  %4676 = vmatprep.subr.bf16.mxu1 %v16132_v0  ;;  %v15458_v0 = vpack.c.bf16 %v6996_v57, %v6995_v51 }
 0x369   :  { %4633 = vmatprep.subr.bf16.mxu0 %v16129_v36  ;;  %v6999_v36 = vld [vmem:[#allocation3 + $0x70] sm:$0xff] }
 0x3d4   :  { %v3428_v6 = vpop.xlane.xlu0 %3427 }
 0x3d5   :  { %v3429_v59 = vrot.slane %v3428_v6, 4 }
 0x3d7   :  { %v3430_v21 = vadd.f32 %v3429_v59, %v3428_v6  ;;  %v16127_v6 = vld [vmem:[#allocation11 + $0x480] ss:$16 sps:$4 sm:$0xff]  }
 0x3d8   :  { %v3466_v13 = vpop.permute.xlu0 %3465  ;;  %v16130_v59 = vld [vmem:[#allocation11 + $0x680] ss:$16 sps:$4 sm:$0xff]   ;;  %4634 = vmatpush1.bf16.msra.mxu0 %v16127_v6 }
 0x3d9   :  { %v3468_v41 = vsel %vm3425_vm6, %v3466_v13, 0.0  ;;  %v3431_v48 = vrot.slane %v3430_v21, 2  ;;  %v16138_v13 = vld [vmem:[#allocation11 + $0x664] ss:$16 sps:$4 sm:$0xff]   ;;  %4677 = vmatpush1.bf16.msra.mxu1 %v16130_v59  ;;  %v16175_v6 = vld [vmem:[#allocation11 + $0x580] ss:$16 sps:$4 sm:$0xff]  }
 0x3da   :  { %3469 = vadd.xlane.f32.xlu0 %v3468_v41  ;;  %v16133_v41 = vld [vmem:[#allocation11 + $0x460] ss:$16 sps:$4 sm:$0xff]   ;;  %4678 = vmatprep.subr.bf16.mxu1 %v16138_v13  ;;  %v7000_v13 = vld [vmem:[#allocation3 + $0x78] sm:$0xff] }
 0x3db   :  { %v3432_v30 = vadd.f32 %v3431_v48, %v3430_v21  ;;  %v16135_v21 = vld [vmem:[#allocation11 + $0x464] ss:$16 sps:$4 sm:$0xff]   ;;  %v16136_v48 = vld [vmem:[#allocation11 + $0x660] ss:$16 sps:$4 sm:$0xff]  }
 0x3dc   :  { %4635 = vmatprep.subr.bf16.mxu0 %v16135_v21  ;;  %v16178_v59 = vld [vmem:[#allocation11 + $0x780] ss:$16 sps:$4 sm:$0xff]  }
 0x3dd   :  { %v3433_v20 = vrot.slane %v3432_v30, 1  ;;  %4636 = vmatpush1.bf16.msra.mxu0 %v16133_v41  ;;  %4679 = vmatpush1.bf16.msra.mxu1 %v16136_v48  ;;  %v7037_v41 = vshrl.u32 %v15459_v19, 16 }
 0x3df   :  { %v3434_v62 = vadd.f32 %v3433_v20, %v3432_v30  ;;  %v16141_v30 = vld [vmem:[#allocation11 + $0x444] ss:$16 sps:$4 sm:$0xff]  }
 0x3e0   :  { %v3441_v16 = vpop.xlane.xlu1 %3440  ;;  %v16144_v20 = vld [vmem:[#allocation11 + $0x644] ss:$16 sps:$4 sm:$0xff]   ;;  %4637 = vmatprep.subr.bf16.mxu0 %v16141_v30  ;;  %v7040_v30 = vshll.u32 %v15459_v19, 16 }
 0x3e1   :  { %v3442_v2 = vrot.slane %v3441_v16, 4  ;;  %15465 = vpush %v3434_v62  ;;  %v16139_v62 = vld [vmem:[#allocation11 + $0x440] ss:$16 sps:$4 sm:$0xff]   ;;  %4680 = vmatprep.subr.bf16.mxu1 %v16144_v20  ;;  %v15460_v20 = vpack.c.bf16 %v7000_v13, %v6999_v36 }
 0x3e2   :  { %4638 = vmatpush1.bf16.msra.mxu0 %v16139_v62  ;;  %v7029_v62 = vshrl.u32 %v15458_v0, 16 }
 0x3e3   :  { %v3443_v50 = vadd.f32 %v3442_v2, %v3441_v16  ;;  %v16142_v16 = vld [vmem:[#allocation11 + $0x640] ss:$16 sps:$4 sm:$0xff]  }
 0x3e4   :  { %v3483_v18 = vpop.permute.xlu1 %3482  ;;  %4681 = vmatpush1.bf16.msra.mxu1 %v16142_v16  ;;  %v16183_v16 = vld [vmem:[#allocation11 + $0x564] ss:$16 sps:$4 sm:$0xff]  }
 0x3e5   :  { %v3485_v26 = vsel %vm3425_vm6, %v3483_v18, 0.0  ;;  %v3444_v34 = vrot.slane %v3443_v50, 2  ;;  %v16147_v18 = vld [vmem:[#allocation11 + $0x424] ss:$16 sps:$4 sm:$0xff]  }
 0x3e6   :  { %3486 = vadd.xlane.f32.xlu1 %v3485_v26  ;;  %v16150_v26 = vld [vmem:[#allocation11 + $0x624] ss:$16 sps:$4 sm:$0xff]   ;;  %4639 = vmatprep.subr.bf16.mxu0 %v16147_v18  ;;  %v16181_v18 = vld [vmem:[#allocation11 + $0x560] ss:$16 sps:$4 sm:$0xff]  }
 0x3e7   :  { %v3445_v32 = vadd.f32 %v3444_v34, %v3443_v50  ;;  %v16145_v34 = vld [vmem:[#allocation11 + $0x420] ss:$16 sps:$4 sm:$0xff]   ;;  %4682 = vmatprep.subr.bf16.mxu1 %v16150_v26 }
 0x3e8   :  { %4640 = vmatpush1.bf16.msra.mxu0 %v16145_v34  ;;  %v16184_v26 = vld [vmem:[#allocation11 + $0x760] ss:$16 sps:$4 sm:$0xff]  }
 0x3e9   :  { %v3446_v35 = vrot.slane %v3445_v32, 1 }
 0x3eb   :  { %v3447_v37 = vadd.f32 %v3446_v35, %v3445_v32  ;;  %v16148_v32 = vld [vmem:[#allocation11 + $0x620] ss:$16 sps:$4 sm:$0xff]   ;;  %v16153_v35 = vld [vmem:[#allocation11 + $0x404] ss:$16 sps:$4 sm:$0xff]  }
 0x3ec   :  { %4683 = vmatpush1.bf16.msra.mxu1 %v16148_v32  ;;  %4641 = vmatprep.subr.bf16.mxu0 %v16153_v35  ;;  %v16189_v35 = vld [vmem:[#allocation11 + $0x544] ss:$16 sps:$4 sm:$0xff]  }
 0x3ed   :  { %15467 = vpush %v3447_v37  ;;  %v16156_v37 = vld [vmem:[#allocation11 + $0x604] ss:$16 sps:$4 sm:$0xff]  }
 0x3ee   :  { %4684 = vmatprep.subr.bf16.mxu1 %v16156_v37  ;;  %v7031_v37 = vrot.slane %v7029_v62, 7 }
 0x412   :  { %s15466_s28 = spop %15465 }
 0x413   :  { %s3438_s17 = smul.f32 0.00024414063, %s15466_s28 }
 0x415   :  { %s3452_s18 = smul.f32 %s3438_s17, %s3438_s17  ;;  %v3461_v44 = vstv %s3438_s17 }
 0x41e   :  { %s15468_s19 = spop %15467 }
 0x41f   :  { %s3451_s20 = smul.f32 0.00024414063, %s15468_s19 }
 0x421   :  { %s3453_s21 = ssub.f32 %s3451_s20, %s3452_s18 }
 0x423   :  { %s3454_s24 = smax.f32 %s18073_s23, %s3453_s21 }
 0x424   :  { %s3455_s5 = sadd.f32 1e-05, %s3454_s24 }
 0x426   :  { %v3456_v61 = vstv %s3455_s5 }
 0x427   :  { %17851 = vrsqrt.f32 %v3456_v61  ;;  %v16151_v61 = vld [vmem:[#allocation11 + $0x400] ss:$16 sps:$4 sm:$0xff]  }
 0x428   :  { %4642 = vmatpush1.bf16.msra.mxu0 %v16151_v61  ;;  %v7046_v61 = vshrl.u32 %v15460_v20, 16 }
 0x434   :  { %v17852_v40 = vpop.eup %17851 }
 0x435   :  { %15469 = vpush %v17852_v40  ;;  %v16154_v40 = vld [vmem:[#allocation11 + $0x600] ss:$16 sps:$4 sm:$0xff]  }
 0x436   :  { %4685 = vmatpush1.bf16.msra.mxu1 %v16154_v40  ;;  %v16187_v40 = vld [vmem:[#allocation11 + $0x540] ss:$16 sps:$4 sm:$0xff]  }
 0x463   :  { %v3470_v24 = vpop.xlane.xlu0 %3469 }
 0x464   :  { %v3471_v63 = vrot.slane %v3470_v24, 4 }
 0x466   :  { %v3472_v12 = vadd.f32 %v3471_v63, %v3470_v24  ;;  %s15470_s25 = spop %15469  ;;  %v16159_v24 = vld [vmem:[#allocation11 + $0x5e4] ss:$16 sps:$4 sm:$0xff]  }
 0x467   :  { %v3459_v29 = vstv %s15470_s25  ;;  %v16162_v63 = vld [vmem:[#allocation11 + $0x7e4] ss:$16 sps:$4 sm:$0xff]   ;;  %4643 = vmatprep.subr.bf16.mxu0 %v16159_v24  ;;  %v16190_v24 = vld [vmem:[#allocation11 + $0x740] ss:$16 sps:$4 sm:$0xff]  }
 0x468   :  { %v18544_v1 = vmul.f32 %v3459_v29, %v18541_v25  ;;  %v3473_v43 = vrot.slane %v3472_v12, 2  ;;  %4686 = vmatprep.subr.bf16.mxu1 %v16162_v63  ;;  %v16192_v63 = vld [vmem:[#allocation11 + $0x744] ss:$16 sps:$4 sm:$0xff]  }
 0x46a   :  { %v18547_v3 = vmul.f32 %v3461_v44, %v18544_v1  ;;  %v3474_v4 = vadd.f32 %v3473_v43, %v3472_v12  ;;  %v16157_v43 = vld [vmem:[#allocation11 + $0x5e0] ss:$16 sps:$4 sm:$0xff]  }
 0x46b   :  { %v16160_v44 = vld [vmem:[#allocation11 + $0x7e0] ss:$16 sps:$4 sm:$0xff]   ;;  %4644 = vmatpush2.bf16.msra.mxu0 %v16157_v43  ;;  %v16198_v43 = vld [vmem:[#allocation11 + $0x724] ss:$16 sps:$4 sm:$0xff]  }
 0x46c   :  { %v3475_v7 = vrot.slane %v3474_v4, 1  ;;  %4687 = vmatpush2.bf16.msra.mxu1 %v16160_v44  ;;  %v7049_v44 = vshll.u32 %v15460_v20, 16 }
 0x46e   :  { %v3476_v8 = vadd.f32 %v3475_v7, %v3474_v4  ;;  %v3177_v4 = vld [vmem:[#allocation9] sm:$0x1] }
 0x46f   :  { %v3487_v17 = vpop.xlane.xlu1 %3486 }
 0x470   :  { %v3488_v10 = vrot.slane %v3487_v17, 4  ;;  %15471 = vpush %v3476_v8 }
 0x472   :  { %v3489_v22 = vadd.f32 %v3488_v10, %v3487_v17  ;;  %v16165_v10 = vld [vmem:[#allocation11 + $0x5c4] ss:$16 sps:$4 sm:$0xff]  }
 0x473   :  { %4645 = vmatprep.subr.bf16.mxu0 %v16165_v10  ;;  %v18581_v10 = vrot.slane %v7046_v61, 7 }
 0x474   :  { %v3490_v45 = vrot.slane %v3489_v22, 2 }
 0x476   :  { %v3491_v58 = vadd.f32 %v3490_v45, %v3489_v22  ;;  %v16168_v22 = vld [vmem:[#allocation11 + $0x7c4] ss:$16 sps:$4 sm:$0xff]   ;;  %v16166_v45 = vld [vmem:[#allocation11 + $0x7c0] ss:$16 sps:$4 sm:$0xff]  }
 0x477   :  { %4688 = vmatprep.subr.bf16.mxu1 %v16168_v22  ;;  %v16193_v22 = vld [vmem:[#allocation11 + $0x520] ss:$16 sps:$4 sm:$0xff]  }
 0x478   :  { %v3492_v49 = vrot.slane %v3491_v58, 1  ;;  %4689 = vmatpush2.bf16.msra.mxu1 %v16166_v45  ;;  %v16201_v45 = vld [vmem:[#allocation11 + $0x504] ss:$16 sps:$4 sm:$0xff]  }
 0x479   :  { %4690 = vmatprep.subr.bf16.mxu1 %v16174_v53  ;;  %v7051_v53 = vor.u32 %v7049_v44, %v18581_v10 }
 0x47a   :  { %v3493_v42 = vadd.f32 %v3492_v49, %v3491_v58  ;;  %v3463_v58 = vsub.f32 %v3177_v4, %v18547_v3  ;;  %v6993_v3 = vld [vmem:[#allocation3 + $0x40] sm:$0xff] }
 0x47b   :  { %v15457_v15 = vpack.c.bf16 %v6994_v52, %v6993_v3  ;;  %v16202_v3 = vld [vmem:[#allocation11 + $0x700] ss:$16 sps:$4 sm:$0xff]   ;;  %v16209_v52 = vld [vmem:[#allocation11 + $0x4ec] ss:$16 sps:$4 sm:$0xff]  }
 0x47c   :  { %15473 = vpush %v3493_v42  ;;  %v16171_v42 = vld [vmem:[#allocation11 + $0x5a4] ss:$16 sps:$4 sm:$0xff]   ;;  %4691 = vmatpush2.bf16.msra.mxu1 %v16172_v9  ;;  %v16199_v9 = vld [vmem:[#allocation11 + $0x500] ss:$16 sps:$4 sm:$0xff]  }
 0x47d   :  { %v7022_v21 = vshrl.u32 %v15457_v15, 16  ;;  %4692 = vmatprep.subr.bf16.mxu1 %v16180_v14 }
 0x47f   :  { %v7024_v48 = vrot.slane %v7022_v21, 7 }
 0x480   :  { %4693 = vmatpush2.bf16.msra.mxu1 %v16178_v59 }
 0x481   :  { %v7035_v34 = vrot.slane %v7024_v48, 4 }
 0x4a1   :  { %s15472_s26 = spop %15471 }
 0x4a2   :  { %s18549_s29 = smul.f32 0.00024414063, %s15472_s26 }
 0x4a4   :  { %s3498_s30 = smul.f32 %s18549_s29, %s18549_s29  ;;  %v3507_v7 = vstv %s18549_s29 }
 0x4ad   :  { %s15474_s8 = spop %15473 }
 0x4ae   :  { %s3497_s9 = smul.f32 0.00024414063, %s15474_s8 }
 0x4b0   :  { %s3499_s10 = ssub.f32 %s3497_s9, %s3498_s30 }
 0x4b2   :  { %s3500_s11 = smax.f32 %s18073_s23, %s3499_s10 }
 0x4b3   :  { %s3501_s0 = sadd.f32 1e-05, %s3500_s11 }
 0x4b5   :  { %v3502_v2 = vstv %s3501_s0 }
 0x4b6   :  { %17853 = vrsqrt.f32 %v3502_v2  ;;  %v16186_v2 = vld [vmem:[#allocation11 + $0x764] ss:$16 sps:$4 sm:$0xff]  }
 0x4b7   :  { %4694 = vmatprep.subr.bf16.mxu1 %v16186_v2 }
 0x4b8   :  { %4695 = vmatpush2.bf16.msra.mxu1 %v16184_v26 }
 0x4b9   :  { %4696 = vmatprep.subr.bf16.mxu1 %v16192_v63 }
 0x4bc   :  { %4697 = vmatpush2.bf16.msra.mxu1 %v16190_v24 }
 0x4bd   :  { %4698 = vmatprep.subr.bf16.mxu1 %v16198_v43 }
 0x4c3   :  { %v17854_v50 = vpop.eup %17853 }
 0x4c4   :  { %15475 = vpush %v17854_v50  ;;  %v18576_v50 = vrot.slane %v7037_v41, 7 }
 0x4c6   :  { %v7042_v32 = vor.u32 %v7040_v30, %v18576_v50 }
 0x4f5   :  { %s15476_s12 = spop %15475 }
 0x4f6   :  { %v3505_v12 = vstv %s15476_s12 }
 0x4f7   :  { %v3506_v29 = vmul.f32 %v3505_v12, %v18541_v25  ;;  %v16163_v25 = vld [vmem:[#allocation11 + $0x5c0] ss:$16 sps:$4 sm:$0xff]   ;;  %v7043_v12 = vsel %vm18214_vm3, %v7035_v34, %v7042_v32 }
 0x4f8   :  { %4646 = vmatpush2.bf16.msra.mxu0 %v16163_v25  ;;  %7067 = vst [vmem:[#allocation2 + $0x28] sm:$0xff] %v7043_v12  ;;  %v16196_v25 = vld [vmem:[#allocation11 + $0x720] ss:$16 sps:$4 sm:$0xff]  }
 0x4f9   :  { %v3508_v8 = vmul.f32 %v3507_v7, %v3506_v29  ;;  %v18558_v17 = vsel %vm3510_vm7, %v18544_v1, %v3506_v29  ;;  %4647 = vmatprep.subr.bf16.mxu0 %v16171_v42  ;;  %v16195_v29 = vld [vmem:[#allocation11 + $0x524] ss:$16 sps:$4 sm:$0xff]   ;;  %v7032_v7 = vshll.u32 %v15458_v0, 16  ;;  %4699 = vmatpush2.bf16.msra.mxu1 %v16196_v25 }
 0x4fa   :  { %3517 = vrot.lane.b32.xlu1 %v18558_v17, %s18070_s4  ;;  %3514 = vrot.lane.b32.xlu0 %v18558_v17, %s18066_s22 }
 0x4fb   :  { %v3509_v49 = vsub.f32 %v3177_v4, %v3508_v8  ;;  %v7025_v4 = vshll.u32 %v15457_v15, 16  ;;  %v7044_v8 = vrot.slane %v7031_v37, 4  ;;  %v18585_v42 = vor.u32 %v7032_v7, %v7031_v37 }
 0x4fc   :  { %4648 = vmatpush2.bf16.msra.mxu0 %v16169_v54  ;;  %v3542_v15 = vshrl.u32 %v3541_v55, 7 }
 0x4fd   :  { %v18566_v1 = vsel %vm3510_vm7, %v3463_v58, %v3509_v49  ;;  %4649 = vmatprep.subr.bf16.mxu0 %v16177_v33  ;;  %v16204_v58 = vld [vmem:[#allocation11 + $0x704] ss:$16 sps:$4 sm:$0xff]   ;;  %v18583_v49 = vor.u32 %v7025_v4, %v7024_v48  ;;  %v7052_v54 = vsel %vm18214_vm3, %v7044_v8, %v7051_v53 }
 0x4fe   :  { %3520 = vrot.lane.b32.xlu0 %v18558_v17, %s18071_s6  ;;  %3529 = vrot.lane.b32.xlu1 %v18566_v1, %s18066_s22  ;;  %7068 = vst [vmem:[#allocation2 + $0x10] sm:$0xff] %v7052_v54  ;;  %v18592_v14 = vsub.s32 0, %v3542_v15  ;;  %v3640_v15 = vld [vmem:[#allocation2 + $0x8] sm:$0x11] }
 0x4ff   :  { %4700 = vmatprep.subr.bf16.mxu1 %v16204_v58 }
 0x500   :  { %4650 = vmatpush2.bf16.msra.mxu0 %v16175_v6  ;;  %4701 = vmatpush2.bf16.msra.mxu1 %v16202_v3  ;;  %19894 = vst [vmem:[#allocation24_spill] sm:$0xff] %v18592_v14 }
 0x501   :  { %4651 = vmatprep.subr.bf16.mxu0 %v16183_v16  ;;  %4756 = vmatprep.subr.bf16.mxu1 %v16212_v5 }
 0x502   :  { %3532 = vrot.lane.b32.xlu0 %v18566_v1, %s18070_s4  ;;  %3535 = vrot.lane.b32.xlu1 %v18566_v1, %s18071_s6 }
 0x504   :  { %4652 = vmatpush2.bf16.msra.mxu0 %v16181_v18 }
 0x505   :  { %4653 = vmatprep.subr.bf16.mxu0 %v16189_v35 }
 0x508   :  { %4654 = vmatpush2.bf16.msra.mxu0 %v16187_v40 }
 0x509   :  { %4655 = vmatprep.subr.bf16.mxu0 %v16195_v29 }
 0x50c   :  { %4656 = vmatpush2.bf16.msra.mxu0 %v16193_v22 }
 0x50d   :  { %4657 = vmatprep.subr.bf16.mxu0 %v16201_v45 }
 0x510   :  { %4658 = vmatpush2.bf16.msra.mxu0 %v16199_v9  ;;  %v3635_v9 = vld [vmem:[#allocation2 + $0x20] sm:$0xff] }
 0x511   :  { %4713 = vmatprep.subr.bf16.mxu0 %v16209_v52 }
 0x56c   :  { %v3518_v51 = vpop.permute.xlu1 %3517  ;;  %v3515_v57 = vpop.permute.xlu0 %3514 }
 0x56d   :  { %v3523_v33 = vsel %vm3288_vm5, %v18558_v17, %v3515_v57 }
 0x56e   :  { %v3525_v19 = vsel %vm3524_vm8, %v3523_v33, %v3518_v51  ;;  %v3643_v51 = vld [vmem:[#allocation2] sm:$0x11] }
 0x570   :  { %v3521_v36 = vpop.permute.xlu0 %3520  ;;  %v3530_v0 = vpop.permute.xlu1 %3529 }
 0x571   :  { %v3527_v6 = vsel %vm3526_vm9, %v3525_v19, %v3521_v36  ;;  %v3538_v41 = vsel %vm3288_vm5, %v18566_v1, %v3530_v0 }
 0x572   :  { %v3544_v59 = vrot.slane %v3527_v6, %v18592_v14 }
 0x574   :  { %v3533_v21 = vpop.permute.xlu0 %3532  ;;  %v3536_v13 = vpop.permute.xlu1 %3535  ;;  %v3545_v17 = vmul.f32 %v3544_v59, %v18362_v60  ;;  %v3546_v20 = vmul.f32 %v3544_v59, %v18398_v39  ;;  %v3547_v62 = vmul.f32 %v3544_v59, %v18439_v47  ;;  %v3548_v16 = vmul.f32 %v3544_v59, %v18475_v11 }
 0x575   :  { %v3539_v48 = vsel %vm3524_vm8, %v3538_v41, %v3533_v21  ;;  %v3549_v18 = vmul.f32 %v3544_v59, %v18368_v31  ;;  %v3550_v26 = vmul.f32 %v3544_v59, %v18404_v56  ;;  %v3551_v1 = vmul.f32 %v3544_v59, %v18444_v28 }
 0x576   :  { %v3540_v30 = vsel %vm3526_vm9, %v3539_v48, %v3536_v13  ;;  %v3552_v34 = vmul.f32 %v3544_v59, %v18482_v38  ;;  %v17867_v13 = vld [vmem:[#allocation2 + $0x18] sm:$0xff] }
 0x577   :  { %v3556_v2 = vrot.slane %v3540_v30, %v18592_v14  ;;  %v17177_v14 = vld [vmem:[#allocation6 + $0x8ec] ss:$16 sps:$4 sm:$0xff]  }
 0x579   :  { %v3557_v32 = vadd.f32 %v3556_v2, %v3545_v17  ;;  %v3558_v60 = vadd.f32 %v3556_v2, %v3546_v20  ;;  %v3559_v35 = vadd.f32 %v3556_v2, %v3547_v62  ;;  %v3560_v37 = vadd.f32 %v3556_v2, %v3548_v16 }
 0x57a   :  { %v3561_v61 = vadd.f32 %v3556_v2, %v3549_v18  ;;  %v3562_v39 = vadd.f32 %v3556_v2, %v3550_v26  ;;  %v3563_v40 = vadd.f32 %v3556_v2, %v3551_v1  ;;  %v3564_v47 = vadd.f32 %v3556_v2, %v3552_v34 }
 0x57b   :  { %v3565_v24 = vmax.f32 %v3557_v32, 0.0  ;;  %v3566_v11 = vmax.f32 %v3558_v60, 0.0  ;;  %v3567_v63 = vmax.f32 %v3559_v35, 0.0  ;;  %v3568_v12 = vmax.f32 %v3560_v37, 0.0 }
 0x57c   :  { %v3569_v29 = vmax.f32 %v3561_v61, 0.0  ;;  %v3570_v31 = vmax.f32 %v3562_v39, 0.0  ;;  %v3571_v43 = vmax.f32 %v3563_v40, 0.0  ;;  %v3572_v56 = vmax.f32 %v3564_v47, 0.0 }
 0x57d   :  { %v15453_v44 = vpack.c.bf16 %v3566_v11, %v3565_v24  ;;  %v15454_v28 = vpack.c.bf16 %v3568_v12, %v3567_v63  ;;  %v7053_v32 = vrot.slane %v18576_v50, 4  ;;  %v7054_v60 = vrot.slane %v18581_v10, 4 }
 0x57e   :  { %v15455_v4 = vpack.c.bf16 %v3570_v31, %v3569_v29  ;;  %v15456_v38 = vpack.c.bf16 %v3572_v56, %v3571_v43 }
 0x57f   :  { %v3594_v7 = vshrl.u32 %v15453_v44, 16  ;;  %v3601_v8 = vshrl.u32 %v15454_v28, 16  ;;  %v3597_v58 = vshll.u32 %v15453_v44, 16  ;;  %v3604_v54 = vshll.u32 %v15454_v28, 16 }
 0x580   :  { %v3609_v22 = vshrl.u32 %v15455_v4, 16  ;;  %v3618_v25 = vshrl.u32 %v15456_v38, 16  ;;  %v3612_v52 = vshll.u32 %v15455_v4, 16  ;;  %v3621_v55 = vshll.u32 %v15456_v38, 16 }
 0x581   :  { %v3596_v45 = vrot.slane %v3594_v7, 7  ;;  %v3603_v53 = vrot.slane %v3601_v8, 7 }
 0x582   :  { %v3611_v3 = vrot.slane %v3609_v22, 7  ;;  %v3620_v5 = vrot.slane %v3618_v25, 7 }
 0x583   :  { %v3599_v57 = vor.u32 %v3597_v58, %v3596_v45  ;;  %v3606_v33 = vor.u32 %v3604_v54, %v3603_v53  ;;  %v3607_v19 = vrot.slane %v3596_v45, 4  ;;  %v3616_v36 = vrot.slane %v3603_v53, 4 }
 0x584   :  { %v3625_v0 = vrot.slane %v3611_v3, 4  ;;  %v3626_v6 = vrot.slane %v3620_v5, 4  ;;  %v3614_v59 = vor.u32 %v3612_v52, %v3611_v3  ;;  %v3623_v21 = vor.u32 %v3621_v55, %v3620_v5 }
 0x585   :  { %v3633_v41 = vsel %vm18208_vm2, %v3599_v57, %v17867_v13  ;;  %v3636_v48 = vsel %vm18208_vm2, %v3606_v33, %v3635_v9  ;;  %v16210_v13 = vld [vmem:[#allocation11 + $0x6e8] ss:$16 sps:$4 sm:$0xff]  }
 0x586   :  { %v3641_v17 = vsel %vm18170_vm10, %v3625_v0, %v3640_v15  ;;  %v3644_v30 = vsel %vm18170_vm10, %v3626_v6, %v3643_v51  ;;  %3634 = vst [vmem:[#allocation2 + $0x18] sm:$0xff] %v3633_v41  ;;  %3637 = vst [vmem:[#allocation2 + $0x20] sm:$0xff] %v3636_v48  ;;  %v18620_v20 = vsel %vm18214_vm3, %v3607_v19, %v3614_v59 }
 0x587   :  { %v18624_v62 = vsel %vm18214_vm3, %v3616_v36, %v3623_v21  ;;  %3642 = vst [vmem:[#allocation2 + $0x8] sm:$0x11] %v3641_v17  ;;  %3645 = vst [vmem:[#allocation2] sm:$0x11] %v3644_v30  ;;  %v18627_v16 = vcombine.high %v3633_v41, %v18620_v20  ;;  %v18633_v18 = vcombine.low %v3633_v41, %v18620_v20  ;;  %v16207_v21 = vld [vmem:[#allocation11 + $0x4e8] ss:$16 sps:$4 sm:$0xff]  }
 0x588   :  { %v18630_v2 = vcombine.high %v3636_v48, %v18624_v62  ;;  %v18636_v26 = vcombine.low %v3636_v48, %v18624_v62 }
 0x589   :  { %v3950_v1 = vshll.u32 %v18627_v16, 16  ;;  %v3938_v35 = vshll.u32 %v18633_v18, 16  ;;  %v3948_v61 = vshrl.u32 %v18627_v16, 16  ;;  %v3936_v24 = vshrl.u32 %v18633_v18, 16 }
 0x58a   :  { %v3974_v34 = vshll.u32 %v18630_v2, 16  ;;  %v3962_v37 = vshll.u32 %v18636_v26, 16  ;;  %v3972_v40 = vshrl.u32 %v18630_v2, 16  ;;  %v3960_v63 = vshrl.u32 %v18636_v26, 16 }
 0x58b   :  { %v3952_v39 = vrot.slane %v3950_v1, 1  ;;  %v3940_v11 = vrot.slane %v3938_v35, 1  ;;  %v16218_v35 = vld [vmem:[#allocation11 + $0x6cc] ss:$16 sps:$4 sm:$0xff]  }
 0x58c   :  { %v3976_v47 = vrot.slane %v3974_v34, 1  ;;  %v3964_v12 = vrot.slane %v3962_v37, 1 }
 0x58d   :  { %v3953_v50 = vor.u32 %v3952_v39, %v3948_v61  ;;  %v3941_v56 = vor.u32 %v3940_v11, %v3936_v24  ;;  %v5615_v22 = vld [vmem:[#allocation2 + $0x18] sm:$0xee]  ;;  %v5616_v54 = vld [vmem:[#allocation2 + $0x20] sm:$0xee] }
 0x58e   :  { %v3778_v29 = vld [vmem:[#allocation2 + $0x8] sm:$0x11]  ;;  %v3779_v10 = vld [vmem:[#allocation2] sm:$0x11]  ;;  %v3977_v43 = vor.u32 %v3976_v47, %v3972_v40  ;;  %v3965_v44 = vor.u32 %v3964_v12, %v3960_v63  ;;  %v14518_v58 = vcombine.high %v5615_v22, %v18620_v20  ;;  %v7061_v53 = vld [vmem:[#allocation2 + $0x18] sm:$0xff]  ;;  %v14517_v9 = vcombine.low %v5615_v22, %v18620_v20 }
 0x58f   :  { %v7069_v31 = vld [vmem:[#allocation2 + $0x8] sm:$0x11]  ;;  %v14258_v28 = vcombine.high %v3778_v29, %v3778_v29  ;;  %v14260_v38 = vcombine.high %v3779_v10, %v3779_v10  ;;  %v7072_v7 = vld [vmem:[#allocation2] sm:$0x11]  ;;  %v14257_v8 = vcombine.low %v3778_v29, %v3778_v29  ;;  %v14259_v45 = vcombine.low %v3779_v10, %v3779_v10 }
 0x590   :  { %v7070_v4 = vsel %vm18170_vm10, %v7053_v32, %v7069_v31  ;;  %v7073_v25 = vsel %vm18170_vm10, %v7054_v60, %v7072_v7  ;;  %v7064_v15 = vld [vmem:[#allocation2 + $0x20] sm:$0xff]  ;;  %v5759_v57 = vrot.slane %v14518_v58, 1  ;;  %v7062_v33 = vsel %vm18208_vm2, %v18583_v49, %v7061_v53  ;;  %v16213_v40 = vld [vmem:[#allocation11 + $0x4c8] ss:$16 sps:$4 sm:$0xff]  }
 0x591   :  { %7071 = vst [vmem:[#allocation2 + $0x8] sm:$0x11] %v7070_v4  ;;  %v3955_v3 = vshll.u32 %v14258_v28, 16  ;;  %v3979_v52 = vshll.u32 %v14260_v38, 16  ;;  %7074 = vst [vmem:[#allocation2] sm:$0x11] %v7073_v25  ;;  %v14520_v19 = vcombine.high %v5616_v54, %v18624_v62  ;;  %v7065_v30 = vsel %vm18208_vm2, %v18585_v42, %v7064_v15 }
 0x592   :  { %v3943_v5 = vshll.u32 %v14257_v8, 16  ;;  %v5760_v55 = vrot.slane %v14258_v28, 1  ;;  %v3967_v51 = vshll.u32 %v14259_v45, 16  ;;  %7063 = vst [vmem:[#allocation2 + $0x18] sm:$0xff] %v7062_v33  ;;  %v5766_v59 = vrot.slane %v14260_v38, 1  ;;  %7066 = vst [vmem:[#allocation2 + $0x20] sm:$0xff] %v7065_v30 }
 0x593   :  { %v3957_v36 = vrot.slane %v3955_v3, 1  ;;  %v3981_v0 = vrot.slane %v3979_v52, 1  ;;  %v5765_v17 = vrot.slane %v14520_v19, 1  ;;  %v5756_v34 = vrot.slane %v14517_v9, 1  ;;  %v16215_v60 = vld [vmem:[#allocation11 + $0x4cc] ss:$16 sps:$4 sm:$0xff]  }
 0x594   :  { %v3945_v6 = vrot.slane %v3943_v5, 1  ;;  %v3969_v41 = vrot.slane %v3967_v51, 1  ;;  %v18659_v48 = vsel %vm2339_vm4, %v5759_v57, %v5760_v55  ;;  %v5757_v42 = vrot.slane %v14257_v8, 1  ;;  %v16216_v47 = vld [vmem:[#allocation11 + $0x6c8] ss:$16 sps:$4 sm:$0xff]  }
 0x595   :  { %v3958_v49 = vsel %vm517_vm0, %v3953_v50, %v3957_v36  ;;  %v3982_v20 = vsel %vm517_vm0, %v3977_v43, %v3981_v0  ;;  %v18673_v37 = vsel %vm2339_vm4, %v5765_v17, %v5766_v59  ;;  %v14519_v61 = vcombine.low %v5616_v54, %v18624_v62  ;;  %v16221_v63 = vld [vmem:[#allocation11 + $0x4ac] ss:$16 sps:$4 sm:$0xff]   ;;  %v16219_v29 = vld [vmem:[#allocation11 + $0x4a8] ss:$16 sps:$4 sm:$0xff]  }
 0x596   :  { %v18667_v1 = vsel %vm517_vm0, %v3941_v56, %v3945_v6  ;;  %4659 = vmatprep.mubr.bf16.mxu0 %v3958_v49  ;;  %4702 = vmatprep.mubr.bf16.mxu1 %v3982_v20  ;;  %v18670_v32 = vsel %vm517_vm0, %v3965_v44, %v3969_v41  ;;  %v5763_v39 = vrot.slane %v14259_v45, 1  ;;  %v18679_v24 = vsel %vm2339_vm4, %v5756_v34, %v5757_v42  ;;  %v16224_v12 = vld [vmem:[#allocation11 + $0x6ac] ss:$16 sps:$4 sm:$0xff]   ;;  %v16222_v50 = vld [vmem:[#allocation11 + $0x6a8] ss:$16 sps:$4 sm:$0xff]  }
 0x597   :  { %4660 = vmatmul.mubr.bf16.vlgmr.msra.gmra.mxu0 %v18667_v1  ;;  %4703 = vmatmul.mubr.bf16.vlgmr.msra.gmra.mxu1 %v18670_v32  ;;  %v5762_v11 = vrot.slane %v14519_v61, 1  ;;  %v16227_v31 = vld [vmem:[#allocation11 + $0x48c] ss:$16 sps:$4 sm:$0xff]   ;;  %v16225_v43 = vld [vmem:[#allocation11 + $0x488] ss:$16 sps:$4 sm:$0xff]  }
 0x598   :  { %4714 = vmatpush1.bf16.msra.mxu0 %v16207_v21  ;;  %4757 = vmatpush1.bf16.msra.mxu1 %v16210_v13  ;;  %v16230_v10 = vld [vmem:[#allocation11 + $0x68c] ss:$16 sps:$4 sm:$0xff]   ;;  %v16228_v56 = vld [vmem:[#allocation11 + $0x688] ss:$16 sps:$4 sm:$0xff]  }
 0x599   :  { %4745 = vmatprep.mubr.bf16.mxu0 %v3958_v49  ;;  %4788 = vmatprep.mubr.bf16.mxu1 %v3982_v20  ;;  %v18682_v62 = vsel %vm2339_vm4, %v5762_v11, %v5763_v39  ;;  %v16233_v44 = vld [vmem:[#allocation11 + $0x46c] ss:$16 sps:$4 sm:$0xff]   ;;  %v16231_v4 = vld [vmem:[#allocation11 + $0x468] ss:$16 sps:$4 sm:$0xff]  }
 0x59a   :  { %4715 = vmatprep.subr.bf16.mxu0 %v16215_v60  ;;  %4758 = vmatprep.subr.bf16.mxu1 %v16218_v35  ;;  %v16236_v28 = vld [vmem:[#allocation11 + $0x66c] ss:$16 sps:$4 sm:$0xff]   ;;  %v16234_v38 = vld [vmem:[#allocation11 + $0x668] ss:$16 sps:$4 sm:$0xff]  }
 0x59b   :  { %v16239_v7 = vld [vmem:[#allocation11 + $0x44c] ss:$16 sps:$4 sm:$0xff]   ;;  %v16237_v22 = vld [vmem:[#allocation11 + $0x448] ss:$16 sps:$4 sm:$0xff]  }
 0x59c   :  { %4716 = vmatpush1.bf16.msra.mxu0 %v16213_v40  ;;  %4759 = vmatpush1.bf16.msra.mxu1 %v16216_v47  ;;  %v16242_v8 = vld [vmem:[#allocation11 + $0x64c] ss:$16 sps:$4 sm:$0xff]   ;;  %v16240_v25 = vld [vmem:[#allocation11 + $0x648] ss:$16 sps:$4 sm:$0xff]  }
 0x59d   :  { %4717 = vmatprep.subr.bf16.mxu0 %v16221_v63  ;;  %4760 = vmatprep.subr.bf16.mxu1 %v16224_v12  ;;  %v16245_v45 = vld [vmem:[#allocation11 + $0x42c] ss:$16 sps:$4 sm:$0xff]   ;;  %v16243_v53 = vld [vmem:[#allocation11 + $0x428] ss:$16 sps:$4 sm:$0xff]  }
 0x59e   :  { %v16248_v58 = vld [vmem:[#allocation11 + $0x62c] ss:$16 sps:$4 sm:$0xff]   ;;  %v16246_v54 = vld [vmem:[#allocation11 + $0x628] ss:$16 sps:$4 sm:$0xff]  }
 0x59f   :  { %v16251_v9 = vld [vmem:[#allocation11 + $0x40c] ss:$16 sps:$4 sm:$0xff]   ;;  %v16249_v52 = vld [vmem:[#allocation11 + $0x408] ss:$16 sps:$4 sm:$0xff]  }
 0x5a0   :  { %4718 = vmatpush1.bf16.msra.mxu0 %v16219_v29  ;;  %4761 = vmatpush1.bf16.msra.mxu1 %v16222_v50  ;;  %v16254_v3 = vld [vmem:[#allocation11 + $0x60c] ss:$16 sps:$4 sm:$0xff]   ;;  %v16252_v5 = vld [vmem:[#allocation11 + $0x608] ss:$16 sps:$4 sm:$0xff]  }
 0x5a1   :  { %4719 = vmatprep.subr.bf16.mxu0 %v16227_v31  ;;  %4762 = vmatprep.subr.bf16.mxu1 %v16230_v10  ;;  %v16257_v55 = vld [vmem:[#allocation11 + $0x5ec] ss:$16 sps:$4 sm:$0xff]   ;;  %v16255_v51 = vld [vmem:[#allocation11 + $0x5e8] ss:$16 sps:$4 sm:$0xff]  }
 0x5a2   :  { %v16260_v15 = vld [vmem:[#allocation11 + $0x7ec] ss:$16 sps:$4 sm:$0xff]   ;;  %v16258_v57 = vld [vmem:[#allocation11 + $0x7e8] ss:$16 sps:$4 sm:$0xff]  }
 0x5a3   :  { %v16263_v33 = vld [vmem:[#allocation11 + $0x5cc] ss:$16 sps:$4 sm:$0xff]   ;;  %v16261_v36 = vld [vmem:[#allocation11 + $0x5c8] ss:$16 sps:$4 sm:$0xff]  }
 0x5a4   :  { %4720 = vmatpush1.bf16.msra.mxu0 %v16225_v43  ;;  %4763 = vmatpush1.bf16.msra.mxu1 %v16228_v56  ;;  %v16266_v19 = vld [vmem:[#allocation11 + $0x7cc] ss:$16 sps:$4 sm:$0xff]   ;;  %v16264_v0 = vld [vmem:[#allocation11 + $0x7c8] ss:$16 sps:$4 sm:$0xff]   ;;  %v16305_v43 = vld [vmem:[#allocation11 + $0xe4] ss:$16 sps:$4 sm:$0xff]  }
 0x5a5   :  { %4721 = vmatprep.subr.bf16.mxu0 %v16233_v44  ;;  %4764 = vmatprep.subr.bf16.mxu1 %v16236_v28  ;;  %v16269_v6 = vld [vmem:[#allocation11 + $0x5ac] ss:$16 sps:$4 sm:$0xff]   ;;  %v16267_v21 = vld [vmem:[#allocation11 + $0x5a8] ss:$16 sps:$4 sm:$0xff]   ;;  %v16308_v56 = vld [vmem:[#allocation11 + $0x2e4] ss:$16 sps:$4 sm:$0xff]  }
 0x5a6   :  { %v16272_v59 = vld [vmem:[#allocation11 + $0x7ac] ss:$16 sps:$4 sm:$0xff]   ;;  %v16270_v13 = vld [vmem:[#allocation11 + $0x7a8] ss:$16 sps:$4 sm:$0xff]   ;;  %v16303_v44 = vld [vmem:[#allocation11 + $0xe0] ss:$16 sps:$4 sm:$0xff]  }
 0x5a7   :  { %v16275_v41 = vld [vmem:[#allocation11 + $0x58c] ss:$16 sps:$4 sm:$0xff]   ;;  %v16273_v30 = vld [vmem:[#allocation11 + $0x588] ss:$16 sps:$4 sm:$0xff]   ;;  %v16306_v28 = vld [vmem:[#allocation11 + $0x2e0] ss:$16 sps:$4 sm:$0xff]  }
 0x5a8   :  { %4722 = vmatpush1.bf16.msra.mxu0 %v16231_v4  ;;  %4765 = vmatpush1.bf16.msra.mxu1 %v16234_v38  ;;  %v16278_v17 = vld [vmem:[#allocation11 + $0x78c] ss:$16 sps:$4 sm:$0xff]   ;;  %v16276_v49 = vld [vmem:[#allocation11 + $0x788] ss:$16 sps:$4 sm:$0xff]   ;;  %v16311_v4 = vld [vmem:[#allocation11 + $0xc4] ss:$16 sps:$4 sm:$0xff]  }
 0x5a9   :  { %4723 = vmatprep.subr.bf16.mxu0 %v16239_v7  ;;  %4766 = vmatprep.subr.bf16.mxu1 %v16242_v8  ;;  %v16281_v20 = vld [vmem:[#allocation11 + $0x56c] ss:$16 sps:$4 sm:$0xff]   ;;  %v16279_v60 = vld [vmem:[#allocation11 + $0x568] ss:$16 sps:$4 sm:$0xff]   ;;  %v16314_v38 = vld [vmem:[#allocation11 + $0x2c4] ss:$16 sps:$4 sm:$0xff]  }
 0x5aa   :  { %v16284_v34 = vld [vmem:[#allocation11 + $0x76c] ss:$16 sps:$4 sm:$0xff]   ;;  %v16282_v35 = vld [vmem:[#allocation11 + $0x768] ss:$16 sps:$4 sm:$0xff]   ;;  %v16309_v7 = vld [vmem:[#allocation11 + $0xc0] ss:$16 sps:$4 sm:$0xff]  }
 0x5ab   :  { %v16287_v42 = vld [vmem:[#allocation11 + $0x54c] ss:$16 sps:$4 sm:$0xff]   ;;  %v16285_v39 = vld [vmem:[#allocation11 + $0x548] ss:$16 sps:$4 sm:$0xff]   ;;  %v16312_v8 = vld [vmem:[#allocation11 + $0x2c0] ss:$16 sps:$4 sm:$0xff]  }
 0x5ac   :  { %4724 = vmatpush1.bf16.msra.mxu0 %v16237_v22  ;;  %4767 = vmatpush1.bf16.msra.mxu1 %v16240_v25  ;;  %v16290_v61 = vld [vmem:[#allocation11 + $0x74c] ss:$16 sps:$4 sm:$0xff]   ;;  %v16288_v40 = vld [vmem:[#allocation11 + $0x748] ss:$16 sps:$4 sm:$0xff]   ;;  %v16317_v22 = vld [vmem:[#allocation11 + $0xa4] ss:$16 sps:$4 sm:$0xff]  }
 0x5ad   :  { %4725 = vmatprep.subr.bf16.mxu0 %v16245_v45  ;;  %4768 = vmatprep.subr.bf16.mxu1 %v16248_v58  ;;  %v16293_v47 = vld [vmem:[#allocation11 + $0x52c] ss:$16 sps:$4 sm:$0xff]   ;;  %v16291_v63 = vld [vmem:[#allocation11 + $0x528] ss:$16 sps:$4 sm:$0xff]   ;;  %v16320_v25 = vld [vmem:[#allocation11 + $0x2a4] ss:$16 sps:$4 sm:$0xff]  }
 0x5ae   :  { %v16296_v11 = vld [vmem:[#allocation11 + $0x72c] ss:$16 sps:$4 sm:$0xff]   ;;  %v16294_v12 = vld [vmem:[#allocation11 + $0x728] ss:$16 sps:$4 sm:$0xff]   ;;  %v16315_v45 = vld [vmem:[#allocation11 + $0xa0] ss:$16 sps:$4 sm:$0xff]  }
 0x5af   :  { %v16299_v29 = vld [vmem:[#allocation11 + $0x50c] ss:$16 sps:$4 sm:$0xff]   ;;  %v16297_v31 = vld [vmem:[#allocation11 + $0x508] ss:$16 sps:$4 sm:$0xff]   ;;  %v16318_v58 = vld [vmem:[#allocation11 + $0x2a0] ss:$16 sps:$4 sm:$0xff]  }
 0x5b0   :  { %4726 = vmatpush1.bf16.msra.mxu0 %v16243_v53  ;;  %4769 = vmatpush1.bf16.msra.mxu1 %v16246_v54  ;;  %v16302_v50 = vld [vmem:[#allocation11 + $0x70c] ss:$16 sps:$4 sm:$0xff]   ;;  %v16300_v10 = vld [vmem:[#allocation11 + $0x708] ss:$16 sps:$4 sm:$0xff]   ;;  %v16321_v53 = vld [vmem:[#allocation11 + $0x80] ss:$16 sps:$4 sm:$0xff]  }
 0x5b1   :  { %4727 = vmatprep.subr.bf16.mxu0 %v16251_v9  ;;  %4770 = vmatprep.subr.bf16.mxu1 %v16254_v3  ;;  %v16324_v54 = vld [vmem:[#allocation11 + $0x280] ss:$16 sps:$4 sm:$0xff]   ;;  %v16329_v9 = vld [vmem:[#allocation11 + $0x64] ss:$16 sps:$4 sm:$0xff]  }
 0x5b2   :  { %v16332_v3 = vld [vmem:[#allocation11 + $0x264] ss:$16 sps:$4 sm:$0xff]  }
 0x5b4   :  { %4728 = vmatpush1.bf16.msra.mxu0 %v16249_v52  ;;  %4771 = vmatpush1.bf16.msra.mxu1 %v16252_v5  ;;  %v16327_v52 = vld [vmem:[#allocation11 + $0x60] ss:$16 sps:$4 sm:$0xff]  }
 0x5b5   :  { %4729 = vmatprep.subr.bf16.mxu0 %v16257_v55  ;;  %4772 = vmatprep.subr.bf16.mxu1 %v16260_v15  ;;  %v16330_v5 = vld [vmem:[#allocation11 + $0x260] ss:$16 sps:$4 sm:$0xff]   ;;  %v16335_v55 = vld [vmem:[#allocation11 + $0x44] ss:$16 sps:$4 sm:$0xff]  }
 0x5b6   :  { %v16338_v15 = vld [vmem:[#allocation11 + $0x244] ss:$16 sps:$4 sm:$0xff]  }
 0x5b8   :  { %4730 = vmatpush2.bf16.msra.mxu0 %v16255_v51  ;;  %4773 = vmatpush2.bf16.msra.mxu1 %v16258_v57  ;;  %v16333_v51 = vld [vmem:[#allocation11 + $0x40] ss:$16 sps:$4 sm:$0xff]  }
 0x5b9   :  { %4731 = vmatprep.subr.bf16.mxu0 %v16263_v33  ;;  %4774 = vmatprep.subr.bf16.mxu1 %v16266_v19  ;;  %v16336_v57 = vld [vmem:[#allocation11 + $0x240] ss:$16 sps:$4 sm:$0xff]   ;;  %v16341_v33 = vld [vmem:[#allocation11 + $0x24] ss:$16 sps:$4 sm:$0xff]  }
 0x5ba   :  { %v16344_v19 = vld [vmem:[#allocation11 + $0x224] ss:$16 sps:$4 sm:$0xff]  }
 0x5bc   :  { %4732 = vmatpush2.bf16.msra.mxu0 %v16261_v36  ;;  %4775 = vmatpush2.bf16.msra.mxu1 %v16264_v0  ;;  %v16339_v36 = vld [vmem:[#allocation11 + $0x20] ss:$16 sps:$4 sm:$0xff]  }
 0x5bd   :  { %4733 = vmatprep.subr.bf16.mxu0 %v16269_v6  ;;  %4776 = vmatprep.subr.bf16.mxu1 %v16272_v59  ;;  %v16342_v0 = vld [vmem:[#allocation11 + $0x220] ss:$16 sps:$4 sm:$0xff]   ;;  %v16347_v6 = vld [vmem:[#allocation11 + $0x4] ss:$16 sps:$4 sm:$0xff]  }
 0x5be   :  { %v16350_v59 = vld [vmem:[#allocation11 + $0x204] ss:$16 sps:$4 sm:$0xff]  }
 0x5c0   :  { %4734 = vmatpush2.bf16.msra.mxu0 %v16267_v21  ;;  %4777 = vmatpush2.bf16.msra.mxu1 %v16270_v13  ;;  %v16345_v21 = vld [vmem:[#allocation11] ss:$16 sps:$4 sm:$0xff]  }
 0x5c1   :  { %4735 = vmatprep.subr.bf16.mxu0 %v16275_v41  ;;  %4778 = vmatprep.subr.bf16.mxu1 %v16278_v17  ;;  %v16348_v13 = vld [vmem:[#allocation11 + $0x200] ss:$16 sps:$4 sm:$0xff]   ;;  %v16353_v41 = vld [vmem:[#allocation11 + $0x1e4] ss:$16 sps:$4 sm:$0xff]  }
 0x5c2   :  { %v16356_v17 = vld [vmem:[#allocation11 + $0x3e4] ss:$16 sps:$4 sm:$0xff]  }
 0x5c4   :  { %4736 = vmatpush2.bf16.msra.mxu0 %v16273_v30  ;;  %4779 = vmatpush2.bf16.msra.mxu1 %v16276_v49  ;;  %v16351_v30 = vld [vmem:[#allocation11 + $0x1e0] ss:$16 sps:$4 sm:$0xff]  }
 0x5c5   :  { %4737 = vmatprep.subr.bf16.mxu0 %v16281_v20  ;;  %4780 = vmatprep.subr.bf16.mxu1 %v16284_v34  ;;  %v16354_v49 = vld [vmem:[#allocation11 + $0x3e0] ss:$16 sps:$4 sm:$0xff]   ;;  %v16359_v20 = vld [vmem:[#allocation11 + $0x1c4] ss:$16 sps:$4 sm:$0xff]  }
 0x5c6   :  { %v16362_v34 = vld [vmem:[#allocation11 + $0x3c4] ss:$16 sps:$4 sm:$0xff]  }
 0x5c8   :  { %4738 = vmatpush2.bf16.msra.mxu0 %v16279_v60  ;;  %4781 = vmatpush2.bf16.msra.mxu1 %v16282_v35  ;;  %v16357_v60 = vld [vmem:[#allocation11 + $0x1c0] ss:$16 sps:$4 sm:$0xff]  }
 0x5c9   :  { %4739 = vmatprep.subr.bf16.mxu0 %v16287_v42  ;;  %4782 = vmatprep.subr.bf16.mxu1 %v16290_v61  ;;  %v16360_v35 = vld [vmem:[#allocation11 + $0x3c0] ss:$16 sps:$4 sm:$0xff]   ;;  %v16365_v42 = vld [vmem:[#allocation11 + $0x1a4] ss:$16 sps:$4 sm:$0xff]  }
 0x5ca   :  { %v16368_v61 = vld [vmem:[#allocation11 + $0x3a4] ss:$16 sps:$4 sm:$0xff]  }
 0x5cc   :  { %4740 = vmatpush2.bf16.msra.mxu0 %v16285_v39  ;;  %4783 = vmatpush2.bf16.msra.mxu1 %v16288_v40  ;;  %v16363_v39 = vld [vmem:[#allocation11 + $0x1a0] ss:$16 sps:$4 sm:$0xff]  }
 0x5cd   :  { %4741 = vmatprep.subr.bf16.mxu0 %v16293_v47  ;;  %4784 = vmatprep.subr.bf16.mxu1 %v16296_v11  ;;  %v16366_v40 = vld [vmem:[#allocation11 + $0x3a0] ss:$16 sps:$4 sm:$0xff]   ;;  %v16371_v47 = vld [vmem:[#allocation11 + $0x184] ss:$16 sps:$4 sm:$0xff]  }
 0x5ce   :  { %v16374_v11 = vld [vmem:[#allocation11 + $0x384] ss:$16 sps:$4 sm:$0xff]  }
 0x5d0   :  { %4742 = vmatpush2.bf16.msra.mxu0 %v16291_v63  ;;  %4785 = vmatpush2.bf16.msra.mxu1 %v16294_v12  ;;  %v16369_v63 = vld [vmem:[#allocation11 + $0x180] ss:$16 sps:$4 sm:$0xff]  }
 0x5d1   :  { %4743 = vmatprep.subr.bf16.mxu0 %v16299_v29  ;;  %4786 = vmatprep.subr.bf16.mxu1 %v16302_v50  ;;  %v16372_v12 = vld [vmem:[#allocation11 + $0x380] ss:$16 sps:$4 sm:$0xff]   ;;  %v16377_v29 = vld [vmem:[#allocation11 + $0x164] ss:$16 sps:$4 sm:$0xff]  }
 0x5d2   :  { %v16380_v50 = vld [vmem:[#allocation11 + $0x364] ss:$16 sps:$4 sm:$0xff]  }
 0x5d4   :  { %4744 = vmatpush2.bf16.msra.mxu0 %v16297_v31  ;;  %4787 = vmatpush2.bf16.msra.mxu1 %v16300_v10  ;;  %v16375_v31 = vld [vmem:[#allocation11 + $0x160] ss:$16 sps:$4 sm:$0xff]  }
 0x5d5   :  { %5443 = vmatprep.subr.bf16.mxu0 %v16305_v43  ;;  %5486 = vmatprep.subr.bf16.mxu1 %v16308_v56  ;;  %v16378_v10 = vld [vmem:[#allocation11 + $0x360] ss:$16 sps:$4 sm:$0xff]   ;;  %v16383_v43 = vld [vmem:[#allocation11 + $0x144] ss:$16 sps:$4 sm:$0xff]  }
 0x5d6   :  { %v16386_v56 = vld [vmem:[#allocation11 + $0x344] ss:$16 sps:$4 sm:$0xff]  }
 0x5d7   :  { %4746 = vmatmul.mubr.bf16.vlgmr.msra.gmra.mxu0 %v18667_v1  ;;  %4789 = vmatmul.mubr.bf16.vlgmr.msra.gmra.mxu1 %v18670_v32  ;;  %v16323_v1 = vld [vmem:[#allocation11 + $0x84] ss:$16 sps:$4 sm:$0xff]  }
 0x5d8   :  { %5444 = vmatpush1.bf16.msra.mxu0 %v16303_v44  ;;  %5475 = vmatprep.mubr.bf16.mxu0 %v18627_v16  ;;  %v16326_v32 = vld [vmem:[#allocation11 + $0x284] ss:$16 sps:$4 sm:$0xff]   ;;  %v16381_v44 = vld [vmem:[#allocation11 + $0x140] ss:$16 sps:$4 sm:$0xff]  }
 0x5d9   :  { %5487 = vmatpush1.bf16.msra.mxu1 %v16306_v28  ;;  %5518 = vmatprep.mubr.bf16.mxu1 %v18630_v2  ;;  %v16384_v28 = vld [vmem:[#allocation11 + $0x340] ss:$16 sps:$4 sm:$0xff]  }
 0x5da   :  { %5445 = vmatprep.subr.bf16.mxu0 %v16311_v4  ;;  %5488 = vmatprep.subr.bf16.mxu1 %v16314_v38  ;;  %v16389_v4 = vld [vmem:[#allocation11 + $0x124] ss:$16 sps:$4 sm:$0xff]  }
 0x5db   :  { %v16392_v38 = vld [vmem:[#allocation11 + $0x324] ss:$16 sps:$4 sm:$0xff]  }
 0x5dc   :  { %5446 = vmatpush1.bf16.msra.mxu0 %v16309_v7  ;;  %v16387_v7 = vld [vmem:[#allocation11 + $0x120] ss:$16 sps:$4 sm:$0xff]  }
 0x5dd   :  { %5489 = vmatpush1.bf16.msra.mxu1 %v16312_v8  ;;  %5447 = vmatprep.subr.bf16.mxu0 %v16317_v22  ;;  %v16390_v8 = vld [vmem:[#allocation11 + $0x320] ss:$16 sps:$4 sm:$0xff]   ;;  %v16395_v22 = vld [vmem:[#allocation11 + $0x104] ss:$16 sps:$4 sm:$0xff]  }
 0x5de   :  { %5490 = vmatprep.subr.bf16.mxu1 %v16320_v25  ;;  %v16398_v25 = vld [vmem:[#allocation11 + $0x304] ss:$16 sps:$4 sm:$0xff]  }
 0x5e0   :  { %5448 = vmatpush1.bf16.msra.mxu0 %v16315_v45  ;;  %v16393_v45 = vld [vmem:[#allocation11 + $0x100] ss:$16 sps:$4 sm:$0xff]  }
 0x5e1   :  { %5491 = vmatpush1.bf16.msra.mxu1 %v16318_v58  ;;  %5449 = vmatprep.subr.bf16.mxu0 %v16323_v1  ;;  %v16396_v58 = vld [vmem:[#allocation11 + $0x300] ss:$16 sps:$4 sm:$0xff]   ;;  %v16401_v1 = vld [vmem:[#allocation11 + $0xec] ss:$16 sps:$4 sm:$0xff]  }
 0x5e2   :  { %5492 = vmatprep.subr.bf16.mxu1 %v16326_v32  ;;  %v16404_v32 = vld [vmem:[#allocation11 + $0x2ec] ss:$16 sps:$4 sm:$0xff]  }
 0x5e4   :  { %5450 = vmatpush1.bf16.msra.mxu0 %v16321_v53  ;;  %v16399_v53 = vld [vmem:[#allocation11 + $0xe8] ss:$16 sps:$4 sm:$0xff]  }
 0x5e5   :  { %5493 = vmatpush1.bf16.msra.mxu1 %v16324_v54  ;;  %5451 = vmatprep.subr.bf16.mxu0 %v16329_v9  ;;  %v16402_v54 = vld [vmem:[#allocation11 + $0x2e8] ss:$16 sps:$4 sm:$0xff]   ;;  %v16407_v9 = vld [vmem:[#allocation11 + $0xcc] ss:$16 sps:$4 sm:$0xff]  }
 0x5e6   :  { %5494 = vmatprep.subr.bf16.mxu1 %v16332_v3  ;;  %v16410_v3 = vld [vmem:[#allocation11 + $0x2cc] ss:$16 sps:$4 sm:$0xff]  }
 0x5e8   :  { %5452 = vmatpush1.bf16.msra.mxu0 %v16327_v52  ;;  %v16405_v52 = vld [vmem:[#allocation11 + $0xc8] ss:$16 sps:$4 sm:$0xff]  }
 0x5e9   :  { %5495 = vmatpush1.bf16.msra.mxu1 %v16330_v5  ;;  %5453 = vmatprep.subr.bf16.mxu0 %v16335_v55  ;;  %v16408_v5 = vld [vmem:[#allocation11 + $0x2c8] ss:$16 sps:$4 sm:$0xff]   ;;  %v16413_v55 = vld [vmem:[#allocation11 + $0xac] ss:$16 sps:$4 sm:$0xff]  }
 0x5ea   :  { %5496 = vmatprep.subr.bf16.mxu1 %v16338_v15  ;;  %v16416_v15 = vld [vmem:[#allocation11 + $0x2ac] ss:$16 sps:$4 sm:$0xff]  }
 0x5ec   :  { %5454 = vmatpush1.bf16.msra.mxu0 %v16333_v51  ;;  %v16411_v51 = vld [vmem:[#allocation11 + $0xa8] ss:$16 sps:$4 sm:$0xff]  }
 0x5ed   :  { %5497 = vmatpush1.bf16.msra.mxu1 %v16336_v57  ;;  %5455 = vmatprep.subr.bf16.mxu0 %v16341_v33  ;;  %v16414_v57 = vld [vmem:[#allocation11 + $0x2a8] ss:$16 sps:$4 sm:$0xff]   ;;  %v16419_v33 = vld [vmem:[#allocation11 + $0x8c] ss:$16 sps:$4 sm:$0xff]  }
 0x5ee   :  { %5498 = vmatprep.subr.bf16.mxu1 %v16344_v19  ;;  %v16422_v19 = vld [vmem:[#allocation11 + $0x28c] ss:$16 sps:$4 sm:$0xff]  }
 0x5f0   :  { %5456 = vmatpush1.bf16.msra.mxu0 %v16339_v36  ;;  %v16417_v36 = vld [vmem:[#allocation11 + $0x88] ss:$16 sps:$4 sm:$0xff]  }
 0x5f1   :  { %5499 = vmatpush1.bf16.msra.mxu1 %v16342_v0  ;;  %5457 = vmatprep.subr.bf16.mxu0 %v16347_v6  ;;  %v16425_v0 = vld [vmem:[#allocation11 + $0x6c] ss:$16 sps:$4 sm:$0xff]  }
 0x5f2   :  { %5500 = vmatprep.subr.bf16.mxu1 %v16350_v59  ;;  %v16428_v6 = vld [vmem:[#allocation11 + $0x26c] ss:$16 sps:$4 sm:$0xff]   ;;  %v16426_v59 = vld [vmem:[#allocation11 + $0x268] ss:$16 sps:$4 sm:$0xff]  }
 0x5f4   :  { %5458 = vmatpush1.bf16.msra.mxu0 %v16345_v21  ;;  %v16431_v21 = vld [vmem:[#allocation11 + $0x4c] ss:$16 sps:$4 sm:$0xff]  }
 0x5f5   :  { %5501 = vmatpush1.bf16.msra.mxu1 %v16348_v13  ;;  %5459 = vmatprep.subr.bf16.mxu0 %v16353_v41  ;;  %v16434_v13 = vld [vmem:[#allocation11 + $0x24c] ss:$16 sps:$4 sm:$0xff]   ;;  %v16429_v41 = vld [vmem:[#allocation11 + $0x48] ss:$16 sps:$4 sm:$0xff]  }
 0x5f6   :  { %5502 = vmatprep.subr.bf16.mxu1 %v16356_v17  ;;  %v16432_v17 = vld [vmem:[#allocation11 + $0x248] ss:$16 sps:$4 sm:$0xff]  }
 0x5f8   :  { %5460 = vmatpush2.bf16.msra.mxu0 %v16351_v30  ;;  %v16437_v30 = vld [vmem:[#allocation11 + $0x2c] ss:$16 sps:$4 sm:$0xff]  }
 0x5f9   :  { %5503 = vmatpush2.bf16.msra.mxu1 %v16354_v49  ;;  %5461 = vmatprep.subr.bf16.mxu0 %v16359_v20  ;;  %v16440_v49 = vld [vmem:[#allocation11 + $0x22c] ss:$16 sps:$4 sm:$0xff]   ;;  %v16435_v20 = vld [vmem:[#allocation11 + $0x28] ss:$16 sps:$4 sm:$0xff]  }
 0x5fa   :  { %5504 = vmatprep.subr.bf16.mxu1 %v16362_v34  ;;  %v16438_v34 = vld [vmem:[#allocation11 + $0x228] ss:$16 sps:$4 sm:$0xff]  }
 0x5fc   :  { %5462 = vmatpush2.bf16.msra.mxu0 %v16357_v60  ;;  %v16443_v60 = vld [vmem:[#allocation11 + $0xc] ss:$16 sps:$4 sm:$0xff]  }
 0x5fd   :  { %5505 = vmatpush2.bf16.msra.mxu1 %v16360_v35  ;;  %5463 = vmatprep.subr.bf16.mxu0 %v16365_v42  ;;  %v16446_v35 = vld [vmem:[#allocation11 + $0x20c] ss:$16 sps:$4 sm:$0xff]   ;;  %v16441_v42 = vld [vmem:[#allocation11 + $0x8] ss:$16 sps:$4 sm:$0xff]  }
 0x5fe   :  { %5506 = vmatprep.subr.bf16.mxu1 %v16368_v61  ;;  %v16444_v61 = vld [vmem:[#allocation11 + $0x208] ss:$16 sps:$4 sm:$0xff]  }
 0x600   :  { %5464 = vmatpush2.bf16.msra.mxu0 %v16363_v39  ;;  %v16449_v39 = vld [vmem:[#allocation11 + $0x1ec] ss:$16 sps:$4 sm:$0xff]  }
 0x601   :  { %5507 = vmatpush2.bf16.msra.mxu1 %v16366_v40  ;;  %5465 = vmatprep.subr.bf16.mxu0 %v16371_v47  ;;  %v16452_v40 = vld [vmem:[#allocation11 + $0x3ec] ss:$16 sps:$4 sm:$0xff]   ;;  %v16447_v47 = vld [vmem:[#allocation11 + $0x1e8] ss:$16 sps:$4 sm:$0xff]  }
 0x602   :  { %5508 = vmatprep.subr.bf16.mxu1 %v16374_v11  ;;  %v16450_v11 = vld [vmem:[#allocation11 + $0x3e8] ss:$16 sps:$4 sm:$0xff]  }
 0x604   :  { %5466 = vmatpush2.bf16.msra.mxu0 %v16369_v63  ;;  %v16455_v63 = vld [vmem:[#allocation11 + $0x1cc] ss:$16 sps:$4 sm:$0xff]  }
 0x605   :  { %5509 = vmatpush2.bf16.msra.mxu1 %v16372_v12  ;;  %5467 = vmatprep.subr.bf16.mxu0 %v16377_v29  ;;  %v16458_v12 = vld [vmem:[#allocation11 + $0x3cc] ss:$16 sps:$4 sm:$0xff]   ;;  %v16453_v29 = vld [vmem:[#allocation11 + $0x1c8] ss:$16 sps:$4 sm:$0xff]  }
 0x606   :  { %5510 = vmatprep.subr.bf16.mxu1 %v16380_v50  ;;  %v16456_v50 = vld [vmem:[#allocation11 + $0x3c8] ss:$16 sps:$4 sm:$0xff]  }
 0x608   :  { %5468 = vmatpush2.bf16.msra.mxu0 %v16375_v31  ;;  %v16461_v31 = vld [vmem:[#allocation11 + $0x1ac] ss:$16 sps:$4 sm:$0xff]  }
 0x609   :  { %5511 = vmatpush2.bf16.msra.mxu1 %v16378_v10  ;;  %5469 = vmatprep.subr.bf16.mxu0 %v16383_v43  ;;  %v16464_v10 = vld [vmem:[#allocation11 + $0x3ac] ss:$16 sps:$4 sm:$0xff]   ;;  %v16459_v43 = vld [vmem:[#allocation11 + $0x1a8] ss:$16 sps:$4 sm:$0xff]  }
 0x60a   :  { %5512 = vmatprep.subr.bf16.mxu1 %v16386_v56  ;;  %v16462_v56 = vld [vmem:[#allocation11 + $0x3a8] ss:$16 sps:$4 sm:$0xff]  }
 0x60c   :  { %5470 = vmatpush2.bf16.msra.mxu0 %v16381_v44  ;;  %v16467_v44 = vld [vmem:[#allocation11 + $0x18c] ss:$16 sps:$4 sm:$0xff]  }
 0x60d   :  { %5513 = vmatpush2.bf16.msra.mxu1 %v16384_v28  ;;  %5471 = vmatprep.subr.bf16.mxu0 %v16389_v4  ;;  %v16470_v28 = vld [vmem:[#allocation11 + $0x38c] ss:$16 sps:$4 sm:$0xff]   ;;  %v16465_v4 = vld [vmem:[#allocation11 + $0x188] ss:$16 sps:$4 sm:$0xff]  }
 0x60e   :  { %5514 = vmatprep.subr.bf16.mxu1 %v16392_v38  ;;  %v16468_v38 = vld [vmem:[#allocation11 + $0x388] ss:$16 sps:$4 sm:$0xff]  }
 0x610   :  { %5472 = vmatpush2.bf16.msra.mxu0 %v16387_v7  ;;  %v16473_v7 = vld [vmem:[#allocation11 + $0x16c] ss:$16 sps:$4 sm:$0xff]  }
 0x611   :  { %5515 = vmatpush2.bf16.msra.mxu1 %v16390_v8  ;;  %5473 = vmatprep.subr.bf16.mxu0 %v16395_v22  ;;  %v16476_v8 = vld [vmem:[#allocation11 + $0x36c] ss:$16 sps:$4 sm:$0xff]   ;;  %v16471_v22 = vld [vmem:[#allocation11 + $0x168] ss:$16 sps:$4 sm:$0xff]  }
 0x612   :  { %5516 = vmatprep.subr.bf16.mxu1 %v16398_v25  ;;  %v16474_v25 = vld [vmem:[#allocation11 + $0x368] ss:$16 sps:$4 sm:$0xff]  }
 0x614   :  { %5474 = vmatpush2.bf16.msra.mxu0 %v16393_v45  ;;  %v16479_v45 = vld [vmem:[#allocation11 + $0x14c] ss:$16 sps:$4 sm:$0xff]  }
 0x615   :  { %5517 = vmatpush2.bf16.msra.mxu1 %v16396_v58  ;;  %5529 = vmatprep.subr.bf16.mxu0 %v16401_v1  ;;  %v16482_v58 = vld [vmem:[#allocation11 + $0x34c] ss:$16 sps:$4 sm:$0xff]   ;;  %v16477_v1 = vld [vmem:[#allocation11 + $0x148] ss:$16 sps:$4 sm:$0xff]  }
 0x616   :  { %5572 = vmatprep.subr.bf16.mxu1 %v16404_v32  ;;  %v16480_v32 = vld [vmem:[#allocation11 + $0x348] ss:$16 sps:$4 sm:$0xff]  }
 0x617   :  { %5476 = vmatmul.mubr.bf16.vlgmr.msra.gmra.mxu0 %v18633_v18 }
 0x618   :  { %5519 = vmatmul.mubr.bf16.vlgmr.msra.gmra.mxu1 %v18636_v26  ;;  %5530 = vmatpush1.bf16.msra.mxu0 %v16399_v53  ;;  %v16485_v53 = vld [vmem:[#allocation11 + $0x12c] ss:$16 sps:$4 sm:$0xff]  }
 0x619   :  { %5561 = vmatprep.mubr.bf16.mxu0 %v18627_v16  ;;  %5573 = vmatpush1.bf16.msra.mxu1 %v16402_v54  ;;  %v16420_v16 = vld [vmem:[#allocation11 + $0x288] ss:$16 sps:$4 sm:$0xff]   ;;  %v16488_v54 = vld [vmem:[#allocation11 + $0x32c] ss:$16 sps:$4 sm:$0xff]  }
 0x61a   :  { %5604 = vmatprep.mubr.bf16.mxu1 %v18630_v2  ;;  %5531 = vmatprep.subr.bf16.mxu0 %v16407_v9  ;;  %v16423_v2 = vld [vmem:[#allocation11 + $0x68] ss:$16 sps:$4 sm:$0xff]  }
 0x61b   :  { %5574 = vmatprep.subr.bf16.mxu1 %v16410_v3  ;;  %v16483_v9 = vld [vmem:[#allocation11 + $0x128] ss:$16 sps:$4 sm:$0xff]  }
 0x61c   :  { %5532 = vmatpush1.bf16.msra.mxu0 %v16405_v52  ;;  %v16486_v3 = vld [vmem:[#allocation11 + $0x328] ss:$16 sps:$4 sm:$0xff]   ;;  %v16491_v52 = vld [vmem:[#allocation11 + $0x10c] ss:$16 sps:$4 sm:$0xff]  }
 0x61d   :  { %5575 = vmatpush1.bf16.msra.mxu1 %v16408_v5  ;;  %5533 = vmatprep.subr.bf16.mxu0 %v16413_v55  ;;  %v16494_v5 = vld [vmem:[#allocation11 + $0x30c] ss:$16 sps:$4 sm:$0xff]   ;;  %v16489_v55 = vld [vmem:[#allocation11 + $0x108] ss:$16 sps:$4 sm:$0xff]  }
 0x61e   :  { %5576 = vmatprep.subr.bf16.mxu1 %v16416_v15  ;;  %v16492_v15 = vld [vmem:[#allocation11 + $0x308] ss:$16 sps:$4 sm:$0xff]  }
 0x620   :  { %5534 = vmatpush1.bf16.msra.mxu0 %v16411_v51  ;;  %v16497_v51 = vld [vmem:[#allocation11 + $0x8e4] ss:$16 sps:$4 sm:$0xff]  }
 0x621   :  { %5577 = vmatpush1.bf16.msra.mxu1 %v16414_v57  ;;  %5535 = vmatprep.subr.bf16.mxu0 %v16419_v33  ;;  %v16500_v57 = vld [vmem:[#allocation11 + $0xae4] ss:$16 sps:$4 sm:$0xff]   ;;  %v16495_v33 = vld [vmem:[#allocation11 + $0x8e0] ss:$16 sps:$4 sm:$0xff]  }
 0x622   :  { %5578 = vmatprep.subr.bf16.mxu1 %v16422_v19  ;;  %v16498_v19 = vld [vmem:[#allocation11 + $0xae0] ss:$16 sps:$4 sm:$0xff]  }
 0x624   :  { %5536 = vmatpush1.bf16.msra.mxu0 %v16417_v36  ;;  %v16503_v36 = vld [vmem:[#allocation11 + $0x8c4] ss:$16 sps:$4 sm:$0xff]  }
 0x625   :  { %5579 = vmatpush1.bf16.msra.mxu1 %v16420_v16  ;;  %5537 = vmatprep.subr.bf16.mxu0 %v16425_v0  ;;  %v16506_v16 = vld [vmem:[#allocation11 + $0xac4] ss:$16 sps:$4 sm:$0xff]   ;;  %v16501_v0 = vld [vmem:[#allocation11 + $0x8c0] ss:$16 sps:$4 sm:$0xff]  }
 0x626   :  { %5580 = vmatprep.subr.bf16.mxu1 %v16428_v6  ;;  %v16504_v6 = vld [vmem:[#allocation11 + $0xac0] ss:$16 sps:$4 sm:$0xff]  }
 0x628   :  { %5538 = vmatpush1.bf16.msra.mxu0 %v16423_v2  ;;  %v16509_v2 = vld [vmem:[#allocation11 + $0x8a4] ss:$16 sps:$4 sm:$0xff]  }
 0x629   :  { %5581 = vmatpush1.bf16.msra.mxu1 %v16426_v59  ;;  %5539 = vmatprep.subr.bf16.mxu0 %v16431_v21  ;;  %v16512_v59 = vld [vmem:[#allocation11 + $0xaa4] ss:$16 sps:$4 sm:$0xff]   ;;  %v16507_v21 = vld [vmem:[#allocation11 + $0x8a0] ss:$16 sps:$4 sm:$0xff]  }
 0x62a   :  { %5582 = vmatprep.subr.bf16.mxu1 %v16434_v13  ;;  %v16515_v13 = vld [vmem:[#allocation11 + $0x884] ss:$16 sps:$4 sm:$0xff]  }
 0x62c   :  { %5540 = vmatpush1.bf16.msra.mxu0 %v16429_v41  ;;  %v16513_v41 = vld [vmem:[#allocation11 + $0x880] ss:$16 sps:$4 sm:$0xff]  }
 0x62d   :  { %5583 = vmatpush1.bf16.msra.mxu1 %v16432_v17  ;;  %5541 = vmatprep.subr.bf16.mxu0 %v16437_v30  ;;  %v16516_v17 = vld [vmem:[#allocation11 + $0xa80] ss:$16 sps:$4 sm:$0xff]   ;;  %v16521_v30 = vld [vmem:[#allocation11 + $0x864] ss:$16 sps:$4 sm:$0xff]  }
 0x62e   :  { %5584 = vmatprep.subr.bf16.mxu1 %v16440_v49  ;;  %v16524_v49 = vld [vmem:[#allocation11 + $0xa64] ss:$16 sps:$4 sm:$0xff]  }
 0x630   :  { %5542 = vmatpush1.bf16.msra.mxu0 %v16435_v20  ;;  %v16519_v20 = vld [vmem:[#allocation11 + $0x860] ss:$16 sps:$4 sm:$0xff]  }
 0x631   :  { %5585 = vmatpush1.bf16.msra.mxu1 %v16438_v34  ;;  %5543 = vmatprep.subr.bf16.mxu0 %v16443_v60  ;;  %v16522_v34 = vld [vmem:[#allocation11 + $0xa60] ss:$16 sps:$4 sm:$0xff]   ;;  %v16527_v60 = vld [vmem:[#allocation11 + $0x844] ss:$16 sps:$4 sm:$0xff]  }
 0x632   :  { %5586 = vmatprep.subr.bf16.mxu1 %v16446_v35  ;;  %v16530_v35 = vld [vmem:[#allocation11 + $0xa44] ss:$16 sps:$4 sm:$0xff]  }
 0x634   :  { %5544 = vmatpush1.bf16.msra.mxu0 %v16441_v42  ;;  %v16525_v42 = vld [vmem:[#allocation11 + $0x840] ss:$16 sps:$4 sm:$0xff]  }
 0x635   :  { %5587 = vmatpush1.bf16.msra.mxu1 %v16444_v61  ;;  %5545 = vmatprep.subr.bf16.mxu0 %v16449_v39  ;;  %v16528_v61 = vld [vmem:[#allocation11 + $0xa40] ss:$16 sps:$4 sm:$0xff]   ;;  %v16533_v39 = vld [vmem:[#allocation11 + $0x824] ss:$16 sps:$4 sm:$0xff]  }
 0x636   :  { %5588 = vmatprep.subr.bf16.mxu1 %v16452_v40  ;;  %v16536_v40 = vld [vmem:[#allocation11 + $0xa24] ss:$16 sps:$4 sm:$0xff]  }
 0x638   :  { %5546 = vmatpush2.bf16.msra.mxu0 %v16447_v47  ;;  %v16531_v47 = vld [vmem:[#allocation11 + $0x820] ss:$16 sps:$4 sm:$0xff]  }
 0x639   :  { %5589 = vmatpush2.bf16.msra.mxu1 %v16450_v11  ;;  %5547 = vmatprep.subr.bf16.mxu0 %v16455_v63  ;;  %v16534_v11 = vld [vmem:[#allocation11 + $0xa20] ss:$16 sps:$4 sm:$0xff]   ;;  %v16539_v63 = vld [vmem:[#allocation11 + $0x804] ss:$16 sps:$4 sm:$0xff]  }
 0x63a   :  { %5590 = vmatprep.subr.bf16.mxu1 %v16458_v12  ;;  %v16542_v12 = vld [vmem:[#allocation11 + $0xa04] ss:$16 sps:$4 sm:$0xff]  }
 0x63c   :  { %5548 = vmatpush2.bf16.msra.mxu0 %v16453_v29  ;;  %v16537_v29 = vld [vmem:[#allocation11 + $0x800] ss:$16 sps:$4 sm:$0xff]  }
 0x63d   :  { %5591 = vmatpush2.bf16.msra.mxu1 %v16456_v50  ;;  %5549 = vmatprep.subr.bf16.mxu0 %v16461_v31  ;;  %v16540_v50 = vld [vmem:[#allocation11 + $0xa00] ss:$16 sps:$4 sm:$0xff]   ;;  %v16545_v31 = vld [vmem:[#allocation11 + $0x9e4] ss:$16 sps:$4 sm:$0xff]  }
 0x63e   :  { %5592 = vmatprep.subr.bf16.mxu1 %v16464_v10  ;;  %v16548_v10 = vld [vmem:[#allocation11 + $0xbe4] ss:$16 sps:$4 sm:$0xff]  }
 0x640   :  { %5550 = vmatpush2.bf16.msra.mxu0 %v16459_v43  ;;  %v16543_v43 = vld [vmem:[#allocation11 + $0x9e0] ss:$16 sps:$4 sm:$0xff]  }
 0x641   :  { %5593 = vmatpush2.bf16.msra.mxu1 %v16462_v56  ;;  %5551 = vmatprep.subr.bf16.mxu0 %v16467_v44  ;;  %v16546_v56 = vld [vmem:[#allocation11 + $0xbe0] ss:$16 sps:$4 sm:$0xff]   ;;  %v16551_v44 = vld [vmem:[#allocation11 + $0x9c4] ss:$16 sps:$4 sm:$0xff]  }
 0x642   :  { %5594 = vmatprep.subr.bf16.mxu1 %v16470_v28  ;;  %v16554_v28 = vld [vmem:[#allocation11 + $0xbc4] ss:$16 sps:$4 sm:$0xff]  }
 0x644   :  { %5552 = vmatpush2.bf16.msra.mxu0 %v16465_v4  ;;  %v16549_v4 = vld [vmem:[#allocation11 + $0x9c0] ss:$16 sps:$4 sm:$0xff]  }
 0x645   :  { %5595 = vmatpush2.bf16.msra.mxu1 %v16468_v38  ;;  %5553 = vmatprep.subr.bf16.mxu0 %v16473_v7  ;;  %v16552_v38 = vld [vmem:[#allocation11 + $0xbc0] ss:$16 sps:$4 sm:$0xff]   ;;  %v16557_v7 = vld [vmem:[#allocation11 + $0x9a4] ss:$16 sps:$4 sm:$0xff]  }
 0x646   :  { %5596 = vmatprep.subr.bf16.mxu1 %v16476_v8  ;;  %v16560_v8 = vld [vmem:[#allocation11 + $0xba4] ss:$16 sps:$4 sm:$0xff]  }
 0x648   :  { %5554 = vmatpush2.bf16.msra.mxu0 %v16471_v22  ;;  %v16555_v22 = vld [vmem:[#allocation11 + $0x9a0] ss:$16 sps:$4 sm:$0xff]  }
 0x649   :  { %5597 = vmatpush2.bf16.msra.mxu1 %v16474_v25  ;;  %5555 = vmatprep.subr.bf16.mxu0 %v16479_v45  ;;  %v16558_v25 = vld [vmem:[#allocation11 + $0xba0] ss:$16 sps:$4 sm:$0xff]   ;;  %v16563_v45 = vld [vmem:[#allocation11 + $0x984] ss:$16 sps:$4 sm:$0xff]  }
 0x64a   :  { %5598 = vmatprep.subr.bf16.mxu1 %v16482_v58  ;;  %v16566_v58 = vld [vmem:[#allocation11 + $0xb84] ss:$16 sps:$4 sm:$0xff]  }
 0x64c   :  { %5556 = vmatpush2.bf16.msra.mxu0 %v16477_v1  ;;  %v16561_v1 = vld [vmem:[#allocation11 + $0x980] ss:$16 sps:$4 sm:$0xff]  }
 0x64d   :  { %5599 = vmatpush2.bf16.msra.mxu1 %v16480_v32  ;;  %5557 = vmatprep.subr.bf16.mxu0 %v16485_v53  ;;  %v16564_v32 = vld [vmem:[#allocation11 + $0xb80] ss:$16 sps:$4 sm:$0xff]   ;;  %v16569_v53 = vld [vmem:[#allocation11 + $0x964] ss:$16 sps:$4 sm:$0xff]  }
 0x64e   :  { %5600 = vmatprep.subr.bf16.mxu1 %v16488_v54  ;;  %v16572_v54 = vld [vmem:[#allocation11 + $0xb64] ss:$16 sps:$4 sm:$0xff]  }
 0x650   :  { %5558 = vmatpush2.bf16.msra.mxu0 %v16483_v9  ;;  %v16567_v9 = vld [vmem:[#allocation11 + $0x960] ss:$16 sps:$4 sm:$0xff]  }
 0x651   :  { %5601 = vmatpush2.bf16.msra.mxu1 %v16486_v3  ;;  %5559 = vmatprep.subr.bf16.mxu0 %v16491_v52  ;;  %v16570_v3 = vld [vmem:[#allocation11 + $0xb60] ss:$16 sps:$4 sm:$0xff]   ;;  %v16575_v52 = vld [vmem:[#allocation11 + $0x944] ss:$16 sps:$4 sm:$0xff]  }
 0x652   :  { %5602 = vmatprep.subr.bf16.mxu1 %v16494_v5  ;;  %v16578_v5 = vld [vmem:[#allocation11 + $0xb44] ss:$16 sps:$4 sm:$0xff]  }
 0x654   :  { %5560 = vmatpush2.bf16.msra.mxu0 %v16489_v55  ;;  %v16573_v55 = vld [vmem:[#allocation11 + $0x940] ss:$16 sps:$4 sm:$0xff]  }
 0x655   :  { %5603 = vmatpush2.bf16.msra.mxu1 %v16492_v15  ;;  %6412 = vmatprep.subr.bf16.mxu0 %v16497_v51 }
 0x656   :  { %6455 = vmatprep.subr.bf16.mxu1 %v16500_v57  ;;  %v16576_v57 = vld [vmem:[#allocation11 + $0xb40] ss:$16 sps:$4 sm:$0xff]  }
 0x657   :  { %5562 = vmatmul.mubr.bf16.vlgmr.msra.gmra.mxu0 %v18633_v18  ;;  %v16510_v18 = vld [vmem:[#allocation11 + $0xaa0] ss:$16 sps:$4 sm:$0xff]   ;;  %v18696_v15 = vpop.f32.mrf.mxu0  ;;  %v18698_v51 = vpop.f32.mrf.mxu1 }
 0x658   :  { %5605 = vmatmul.mubr.bf16.vlgmr.msra.gmra.mxu1 %v18636_v26  ;;  %6413 = vmatpush1.bf16.msra.mxu0 %v16495_v33  ;;  %v16518_v26 = vld [vmem:[#allocation11 + $0xa84] ss:$16 sps:$4 sm:$0xff]  }
 0x659   :  { %6444 = vmatprep.mubr.bf16.mxu0 %v18659_v48  ;;  %6456 = vmatpush1.bf16.msra.mxu1 %v16498_v19  ;;  %v16581_v33 = vld [vmem:[#allocation11 + $0x924] ss:$16 sps:$4 sm:$0xff]  }
 0x65a   :  { %6487 = vmatprep.mubr.bf16.mxu1 %v18673_v37  ;;  %6414 = vmatprep.subr.bf16.mxu0 %v16503_v36  ;;  %v16584_v19 = vld [vmem:[#allocation11 + $0xb24] ss:$16 sps:$4 sm:$0xff]   ;;  %v16579_v36 = vld [vmem:[#allocation11 + $0x920] ss:$16 sps:$4 sm:$0xff]  }
 0x65b   :  { %6457 = vmatprep.subr.bf16.mxu1 %v16506_v16  ;;  %v18700_v16 = vpop.f32.mrf.mxu0 }
 0x65c   :  { %6415 = vmatpush1.bf16.msra.mxu0 %v16501_v0  ;;  %v18702_v0 = vpop.f32.mrf.mxu1 }
 0x65d   :  { %6458 = vmatpush1.bf16.msra.mxu1 %v16504_v6  ;;  %6416 = vmatprep.subr.bf16.mxu0 %v16509_v2  ;;  %v16582_v6 = vld [vmem:[#allocation11 + $0xb20] ss:$16 sps:$4 sm:$0xff]   ;;  %v16587_v2 = vld [vmem:[#allocation11 + $0x904] ss:$16 sps:$4 sm:$0xff]  }
 0x65e   :  { %6459 = vmatprep.subr.bf16.mxu1 %v16512_v59  ;;  %v16590_v59 = vld [vmem:[#allocation11 + $0xb04] ss:$16 sps:$4 sm:$0xff]  }
 0x660   :  { %6417 = vmatpush1.bf16.msra.mxu0 %v16507_v21  ;;  %v16585_v21 = vld [vmem:[#allocation11 + $0x900] ss:$16 sps:$4 sm:$0xff]  }
 0x661   :  { %6460 = vmatpush1.bf16.msra.mxu1 %v16510_v18  ;;  %6418 = vmatprep.subr.bf16.mxu0 %v16515_v13  ;;  %v18704_v18 = vpop.f32.mrf.mxu0  ;;  %v18706_v13 = vpop.f32.mrf.mxu1 }
 0x662   :  { %6461 = vmatprep.subr.bf16.mxu1 %v16518_v26  ;;  %v16588_v26 = vld [vmem:[#allocation11 + $0xb00] ss:$16 sps:$4 sm:$0xff]  }
 0x664   :  { %6419 = vmatpush1.bf16.msra.mxu0 %v16513_v41  ;;  %v16593_v41 = vld [vmem:[#allocation11 + $0x8ec] ss:$16 sps:$4 sm:$0xff]  }
 0x665   :  { %6462 = vmatpush1.bf16.msra.mxu1 %v16516_v17  ;;  %6420 = vmatprep.subr.bf16.mxu0 %v16521_v30  ;;  %v16596_v17 = vld [vmem:[#allocation11 + $0xaec] ss:$16 sps:$4 sm:$0xff]   ;;  %v16591_v30 = vld [vmem:[#allocation11 + $0x8e8] ss:$16 sps:$4 sm:$0xff]  }
 0x666   :  { %6463 = vmatprep.subr.bf16.mxu1 %v16524_v49  ;;  %v18708_v49 = vpop.f32.mrf.mxu0 }
 0x668   :  { %6421 = vmatpush1.bf16.msra.mxu0 %v16519_v20  ;;  %v18710_v20 = vpop.f32.mrf.mxu1 }
 0x669   :  { %6464 = vmatpush1.bf16.msra.mxu1 %v16522_v34  ;;  %6422 = vmatprep.subr.bf16.mxu0 %v16527_v60  ;;  %v16594_v34 = vld [vmem:[#allocation11 + $0xae8] ss:$16 sps:$4 sm:$0xff]   ;;  %v16599_v60 = vld [vmem:[#allocation11 + $0x8cc] ss:$16 sps:$4 sm:$0xff]  }
 0x66a   :  { %6465 = vmatprep.subr.bf16.mxu1 %v16530_v35 }
 0x66c   :  { %6423 = vmatpush1.bf16.msra.mxu0 %v16525_v42 }
 0x66d   :  { %6466 = vmatpush1.bf16.msra.mxu1 %v16528_v61  ;;  %6424 = vmatprep.subr.bf16.mxu0 %v16533_v39  ;;  %v16602_v61 = vld [vmem:[#allocation11 + $0xacc] ss:$16 sps:$4 sm:$0xff]  }
 0x66e   :  { %6467 = vmatprep.subr.bf16.mxu1 %v16536_v40  ;;  %v16597_v40 = vld [vmem:[#allocation11 + $0x8c8] ss:$16 sps:$4 sm:$0xff]  }
 0x670   :  { %6425 = vmatpush1.bf16.msra.mxu0 %v16531_v47 }
 0x671   :  { %6468 = vmatpush1.bf16.msra.mxu1 %v16534_v11  ;;  %6426 = vmatprep.subr.bf16.mxu0 %v16539_v63  ;;  %v16600_v63 = vld [vmem:[#allocation11 + $0xac8] ss:$16 sps:$4 sm:$0xff]  }
 0x672   :  { %6469 = vmatprep.subr.bf16.mxu1 %v16542_v12  ;;  %v16605_v12 = vld [vmem:[#allocation11 + $0x8ac] ss:$16 sps:$4 sm:$0xff]  }
 0x674   :  { %6427 = vmatpush1.bf16.msra.mxu0 %v16537_v29 }
 0x675   :  { %6470 = vmatpush1.bf16.msra.mxu1 %v16540_v50  ;;  %6428 = vmatprep.subr.bf16.mxu0 %v16545_v31  ;;  %v16608_v50 = vld [vmem:[#allocation11 + $0xaac] ss:$16 sps:$4 sm:$0xff]  }
 0x676   :  { %6471 = vmatprep.subr.bf16.mxu1 %v16548_v10 }
 0x678   :  { %6429 = vmatpush2.bf16.msra.mxu0 %v16543_v43 }
 0x679   :  { %6472 = vmatpush2.bf16.msra.mxu1 %v16546_v56  ;;  %6430 = vmatprep.subr.bf16.mxu0 %v16551_v44  ;;  %v16603_v56 = vld [vmem:[#allocation11 + $0x8a8] ss:$16 sps:$4 sm:$0xff]  }
 0x67a   :  { %6473 = vmatprep.subr.bf16.mxu1 %v16554_v28  ;;  %v16606_v28 = vld [vmem:[#allocation11 + $0xaa8] ss:$16 sps:$4 sm:$0xff]  }
 0x67c   :  { %6431 = vmatpush2.bf16.msra.mxu0 %v16549_v4  ;;  %v16611_v4 = vld [vmem:[#allocation11 + $0x88c] ss:$16 sps:$4 sm:$0xff]  }
 0x67d   :  { %6474 = vmatpush2.bf16.msra.mxu1 %v16552_v38  ;;  %6432 = vmatprep.subr.bf16.mxu0 %v16557_v7  ;;  %v16609_v7 = vld [vmem:[#allocation11 + $0x888] ss:$16 sps:$4 sm:$0xff]  }
 0x67e   :  { %6475 = vmatprep.subr.bf16.mxu1 %v16560_v8  ;;  %v16612_v8 = vld [vmem:[#allocation11 + $0xa88] ss:$16 sps:$4 sm:$0xff]  }
 0x680   :  { %6433 = vmatpush2.bf16.msra.mxu0 %v16555_v22  ;;  %v16617_v22 = vld [vmem:[#allocation11 + $0x86c] ss:$16 sps:$4 sm:$0xff]  }
 0x681   :  { %6476 = vmatpush2.bf16.msra.mxu1 %v16558_v25  ;;  %6434 = vmatprep.subr.bf16.mxu0 %v16563_v45  ;;  %v16620_v25 = vld [vmem:[#allocation11 + $0xa6c] ss:$16 sps:$4 sm:$0xff]   ;;  %v16615_v45 = vld [vmem:[#allocation11 + $0x868] ss:$16 sps:$4 sm:$0xff]  }
 0x682   :  { %6477 = vmatprep.subr.bf16.mxu1 %v16566_v58  ;;  %v16618_v58 = vld [vmem:[#allocation11 + $0xa68] ss:$16 sps:$4 sm:$0xff]  }
 0x684   :  { %6435 = vmatpush2.bf16.msra.mxu0 %v16561_v1  ;;  %v16623_v1 = vld [vmem:[#allocation11 + $0x84c] ss:$16 sps:$4 sm:$0xff]  }
 0x685   :  { %6478 = vmatpush2.bf16.msra.mxu1 %v16564_v32  ;;  %6436 = vmatprep.subr.bf16.mxu0 %v16569_v53  ;;  %v16626_v32 = vld [vmem:[#allocation11 + $0xa4c] ss:$16 sps:$4 sm:$0xff]   ;;  %v16621_v53 = vld [vmem:[#allocation11 + $0x848] ss:$16 sps:$4 sm:$0xff]  }
 0x686   :  { %6479 = vmatprep.subr.bf16.mxu1 %v16572_v54  ;;  %v16624_v54 = vld [vmem:[#allocation11 + $0xa48] ss:$16 sps:$4 sm:$0xff]  }
 0x688   :  { %6437 = vmatpush2.bf16.msra.mxu0 %v16567_v9  ;;  %v16629_v9 = vld [vmem:[#allocation11 + $0x82c] ss:$16 sps:$4 sm:$0xff]  }
 0x689   :  { %6480 = vmatpush2.bf16.msra.mxu1 %v16570_v3  ;;  %6438 = vmatprep.subr.bf16.mxu0 %v16575_v52  ;;  %v16632_v3 = vld [vmem:[#allocation11 + $0xa2c] ss:$16 sps:$4 sm:$0xff]   ;;  %v16627_v52 = vld [vmem:[#allocation11 + $0x828] ss:$16 sps:$4 sm:$0xff]  }
 0x68a   :  { %6481 = vmatprep.subr.bf16.mxu1 %v16578_v5  ;;  %v16630_v5 = vld [vmem:[#allocation11 + $0xa28] ss:$16 sps:$4 sm:$0xff]  }
 0x68c   :  { %6439 = vmatpush2.bf16.msra.mxu0 %v16573_v55  ;;  %v16635_v55 = vld [vmem:[#allocation11 + $0x80c] ss:$16 sps:$4 sm:$0xff]  }
 0x68d   :  { %6482 = vmatpush2.bf16.msra.mxu1 %v16576_v57  ;;  %6440 = vmatprep.subr.bf16.mxu0 %v16581_v33  ;;  %v16638_v57 = vld [vmem:[#allocation11 + $0xa0c] ss:$16 sps:$4 sm:$0xff]   ;;  %v16633_v33 = vld [vmem:[#allocation11 + $0x808] ss:$16 sps:$4 sm:$0xff]  }
 0x68e   :  { %6483 = vmatprep.subr.bf16.mxu1 %v16584_v19  ;;  %v16636_v19 = vld [vmem:[#allocation11 + $0xa08] ss:$16 sps:$4 sm:$0xff]  }
 0x690   :  { %6441 = vmatpush2.bf16.msra.mxu0 %v16579_v36  ;;  %v16641_v36 = vld [vmem:[#allocation11 + $0x9ec] ss:$16 sps:$4 sm:$0xff]  }
 0x691   :  { %6484 = vmatpush2.bf16.msra.mxu1 %v16582_v6  ;;  %6442 = vmatprep.subr.bf16.mxu0 %v16587_v2  ;;  %v16644_v6 = vld [vmem:[#allocation11 + $0xbec] ss:$16 sps:$4 sm:$0xff]   ;;  %v16639_v2 = vld [vmem:[#allocation11 + $0x9e8] ss:$16 sps:$4 sm:$0xff]  }
 0x692   :  { %6485 = vmatprep.subr.bf16.mxu1 %v16590_v59  ;;  %v16642_v59 = vld [vmem:[#allocation11 + $0xbe8] ss:$16 sps:$4 sm:$0xff]  }
 0x694   :  { %6443 = vmatpush2.bf16.msra.mxu0 %v16585_v21  ;;  %v16647_v21 = vld [vmem:[#allocation11 + $0x9cc] ss:$16 sps:$4 sm:$0xff]  }
 0x695   :  { %6486 = vmatpush2.bf16.msra.mxu1 %v16588_v26  ;;  %6498 = vmatprep.subr.bf16.mxu0 %v16593_v41  ;;  %v16650_v26 = vld [vmem:[#allocation11 + $0xbcc] ss:$16 sps:$4 sm:$0xff]   ;;  %v16645_v41 = vld [vmem:[#allocation11 + $0x9c8] ss:$16 sps:$4 sm:$0xff]  }
 0x696   :  { %6541 = vmatprep.subr.bf16.mxu1 %v16596_v17  ;;  %v16648_v17 = vld [vmem:[#allocation11 + $0xbc8] ss:$16 sps:$4 sm:$0xff]  }
 0x697   :  { %v4747_v35 = vpop.f32.mrf.mxu0  ;;  %v4790_v42 = vpop.f32.mrf.mxu1  ;;  %6445 = vmatmul.mubr.bf16.vlgmr.msra.gmra.mxu0 %v18679_v24 }
 0x698   :  { %v18713_v39 = vadd.f32 %v4790_v42, %v4747_v35  ;;  %6488 = vmatmul.mubr.bf16.vlgmr.msra.gmra.mxu1 %v18682_v62  ;;  %6499 = vmatpush1.bf16.msra.mxu0 %v16591_v30  ;;  %v16653_v30 = vld [vmem:[#allocation11 + $0x9ac] ss:$16 sps:$4 sm:$0xff]   ;;  %v16654_v35 = vld [vmem:[#allocation11 + $0xba8] ss:$16 sps:$4 sm:$0xff]  }
 0x699   :  { %6530 = vmatprep.mubr.bf16.mxu0 %v18659_v48  ;;  %6542 = vmatpush1.bf16.msra.mxu1 %v16594_v34  ;;  %v4749_v47 = vpop.f32.mrf.mxu0  ;;  %v4792_v11 = vpop.f32.mrf.mxu1  ;;  %v16656_v34 = vld [vmem:[#allocation11 + $0xbac] ss:$16 sps:$4 sm:$0xff]  }
 0x69a   :  { %6573 = vmatprep.mubr.bf16.mxu1 %v18673_v37  ;;  %v18718_v29 = vadd.f32 %v4792_v11, %v4749_v47  ;;  %6500 = vmatprep.subr.bf16.mxu0 %v16599_v60  ;;  %v16614_v37 = vld [vmem:[#allocation11 + $0xa8c] ss:$16 sps:$4 sm:$0xff]   ;;  %v16651_v60 = vld [vmem:[#allocation11 + $0x9a8] ss:$16 sps:$4 sm:$0xff]  }
 0x69b   :  { %v4751_v31 = vpop.f32.mrf.mxu0  ;;  %v4794_v10 = vpop.f32.mrf.mxu1  ;;  %6543 = vmatprep.subr.bf16.mxu1 %v16602_v61  ;;  %v16659_v42 = vld [vmem:[#allocation11 + $0x98c] ss:$16 sps:$4 sm:$0xff]   ;;  %v16660_v47 = vld [vmem:[#allocation11 + $0xb88] ss:$16 sps:$4 sm:$0xff]  }
 0x69c   :  { %v18720_v43 = vadd.f32 %v4794_v10, %v4751_v31  ;;  %6501 = vmatpush1.bf16.msra.mxu0 %v16597_v40  ;;  %v16662_v61 = vld [vmem:[#allocation11 + $0xb8c] ss:$16 sps:$4 sm:$0xff]   ;;  %v16657_v40 = vld [vmem:[#allocation11 + $0x988] ss:$16 sps:$4 sm:$0xff]  }
 0x69d   :  { %6544 = vmatpush1.bf16.msra.mxu1 %v16600_v63  ;;  %v4753_v48 = vpop.f32.mrf.mxu0  ;;  %v4796_v44 = vpop.f32.mrf.mxu1  ;;  %6502 = vmatprep.subr.bf16.mxu0 %v16605_v12  ;;  %v16665_v11 = vld [vmem:[#allocation11 + $0x96c] ss:$16 sps:$4 sm:$0xff]   ;;  %v16663_v12 = vld [vmem:[#allocation11 + $0x968] ss:$16 sps:$4 sm:$0xff]  }
 0x69e   :  { %v18722_v38 = vadd.f32 %v4796_v44, %v4753_v48  ;;  %6545 = vmatprep.subr.bf16.mxu1 %v16608_v50  ;;  %v16668_v63 = vld [vmem:[#allocation11 + $0xb6c] ss:$16 sps:$4 sm:$0xff]   ;;  %v16666_v50 = vld [vmem:[#allocation11 + $0xb68] ss:$16 sps:$4 sm:$0xff]  }
 0x69f   :  { %v16671_v31 = vld [vmem:[#allocation11 + $0x94c] ss:$16 sps:$4 sm:$0xff]   ;;  %v16669_v48 = vld [vmem:[#allocation11 + $0x948] ss:$16 sps:$4 sm:$0xff]  }
 0x6a0   :  { %6503 = vmatpush1.bf16.msra.mxu0 %v16603_v56  ;;  %v16674_v10 = vld [vmem:[#allocation11 + $0xb4c] ss:$16 sps:$4 sm:$0xff]   ;;  %v18724_v56 = vld [vmem:[#allocation2 + $0x28] sm:$0xff] }
 0x6a1   :  { %6546 = vmatpush1.bf16.msra.mxu1 %v16606_v28  ;;  %6504 = vmatprep.subr.bf16.mxu0 %v16611_v4  ;;  %v18726_v44 = vld [vmem:[#allocation2 + $0x10] sm:$0xff]  ;;  %v16672_v28 = vld [vmem:[#allocation11 + $0xb48] ss:$16 sps:$4 sm:$0xff]  }
 0x6a2   :  { %6547 = vmatprep.subr.bf16.mxu1 %v16614_v37  ;;  %v16677_v4 = vld [vmem:[#allocation11 + $0x92c] ss:$16 sps:$4 sm:$0xff]   ;;  %v18728_v37 = vld [vmem:[#allocation2 + $0x8] sm:$0x11] }
 0x6a4   :  { %6505 = vmatpush1.bf16.msra.mxu0 %v16609_v7  ;;  %v16680_v7 = vld [vmem:[#allocation11 + $0xb2c] ss:$16 sps:$4 sm:$0xff]  }
 0x6a5   :  { %6548 = vmatpush1.bf16.msra.mxu1 %v16612_v8  ;;  %6506 = vmatprep.subr.bf16.mxu0 %v16617_v22  ;;  %v18730_v8 = vld [vmem:[#allocation2 + $0x18] sm:$0xff] }
 0x6a6   :  { %6549 = vmatprep.subr.bf16.mxu1 %v16620_v25  ;;  %v18734_v22 = vcombine.high %v18730_v8, %v18724_v56  ;;  %v18736_v25 = vld [vmem:[#allocation2] sm:$0x11] }
 0x6a8   :  { %6507 = vmatpush1.bf16.msra.mxu0 %v16615_v45  ;;  %v18738_v45 = vld [vmem:[#allocation2 + $0x20] sm:$0xff] }
 0x6a9   :  { %6550 = vmatpush1.bf16.msra.mxu1 %v16618_v58  ;;  %6508 = vmatprep.subr.bf16.mxu0 %v16623_v1  ;;  %v18742_v58 = vcombine.high %v18738_v45, %v18726_v44  ;;  %v16675_v1 = vld [vmem:[#allocation11 + $0x928] ss:$16 sps:$4 sm:$0xff]  }
 0x6aa   :  { %6551 = vmatprep.subr.bf16.mxu1 %v16626_v32  ;;  %v18746_v32 = vcombine.high %v18728_v37, %v18728_v37 }
 0x6ac   :  { %6509 = vmatpush1.bf16.msra.mxu0 %v16621_v53  ;;  %v16678_v53 = vld [vmem:[#allocation11 + $0xb28] ss:$16 sps:$4 sm:$0xff]  }
 0x6ad   :  { %6552 = vmatpush1.bf16.msra.mxu1 %v16624_v54  ;;  %6510 = vmatprep.subr.bf16.mxu0 %v16629_v9  ;;  %v16683_v54 = vld [vmem:[#allocation11 + $0x90c] ss:$16 sps:$4 sm:$0xff]   ;;  %v18750_v9 = vcombine.high %v18736_v25, %v18736_v25 }
 0x6ae   :  { %6553 = vmatprep.subr.bf16.mxu1 %v16632_v3  ;;  %v16686_v3 = vld [vmem:[#allocation11 + $0xb0c] ss:$16 sps:$4 sm:$0xff]  }
 0x6b0   :  { %6511 = vmatpush1.bf16.msra.mxu0 %v16627_v52  ;;  %v7378_v52 = vshll.u32 %v18734_v22, 16 }
 0x6b1   :  { %6554 = vmatpush1.bf16.msra.mxu1 %v16630_v5  ;;  %6512 = vmatprep.subr.bf16.mxu0 %v16635_v55  ;;  %v7402_v5 = vshll.u32 %v18742_v58, 16  ;;  %v16681_v55 = vld [vmem:[#allocation11 + $0x908] ss:$16 sps:$4 sm:$0xff]  }
 0x6b2   :  { %6555 = vmatprep.subr.bf16.mxu1 %v16638_v57  ;;  %v7383_v57 = vshll.u32 %v18746_v32, 16 }
 0x6b4   :  { %6513 = vmatpush1.bf16.msra.mxu0 %v16633_v33  ;;  %v16684_v33 = vld [vmem:[#allocation11 + $0xb08] ss:$16 sps:$4 sm:$0xff]  }
 0x6b5   :  { %6556 = vmatpush1.bf16.msra.mxu1 %v16636_v19  ;;  %6514 = vmatprep.subr.bf16.mxu0 %v16641_v36  ;;  %v16689_v19 = vld [vmem:[#allocation6 + $0x4e4] ss:$16 sps:$4 sm:$0xff]   ;;  %v7407_v36 = vshll.u32 %v18750_v9, 16 }
 0x6b6   :  { %6557 = vmatprep.subr.bf16.mxu1 %v16644_v6  ;;  %v16692_v6 = vld [vmem:[#allocation6 + $0x6e4] ss:$16 sps:$4 sm:$0xff]  }
 0x6b8   :  { %6515 = vmatpush2.bf16.msra.mxu0 %v16639_v2  ;;  %v7380_v2 = vrot.slane %v7378_v52, 1  ;;  %v16719_v52 = vld [vmem:[#allocation6 + $0x440] ss:$16 sps:$4 sm:$0xff]  }
 0x6b9   :  { %6558 = vmatpush2.bf16.msra.mxu1 %v16642_v59  ;;  %6516 = vmatprep.subr.bf16.mxu0 %v16647_v21  ;;  %v7404_v59 = vrot.slane %v7402_v5, 1  ;;  %v16687_v21 = vld [vmem:[#allocation6 + $0x4e0] ss:$16 sps:$4 sm:$0xff]  }
 0x6ba   :  { %6559 = vmatprep.subr.bf16.mxu1 %v16650_v26  ;;  %v7376_v26 = vshrl.u32 %v18734_v22, 16  ;;  %v16722_v5 = vld [vmem:[#allocation6 + $0x640] ss:$16 sps:$4 sm:$0xff]  }
 0x6bc   :  { %6517 = vmatpush2.bf16.msra.mxu0 %v16645_v41  ;;  %v7385_v41 = vrot.slane %v7383_v57, 1  ;;  %v16730_v57 = vld [vmem:[#allocation6 + $0x624] ss:$16 sps:$4 sm:$0xff]  }
 0x6bd   :  { %6560 = vmatpush2.bf16.msra.mxu1 %v16648_v17  ;;  %6518 = vmatprep.subr.bf16.mxu0 %v16653_v30  ;;  %v16690_v17 = vld [vmem:[#allocation6 + $0x6e0] ss:$16 sps:$4 sm:$0xff]   ;;  %v7400_v30 = vshrl.u32 %v18742_v58, 16 }
 0x6be   :  { %6561 = vmatprep.subr.bf16.mxu1 %v16656_v34  ;;  %v7409_v34 = vrot.slane %v7407_v36, 1  ;;  %v16733_v36 = vld [vmem:[#allocation6 + $0x404] ss:$16 sps:$4 sm:$0xff]  }
 0x6c0   :  { %6519 = vmatpush2.bf16.msra.mxu0 %v16651_v60  ;;  %v7381_v60 = vor.u32 %v7380_v2, %v7376_v26  ;;  %v16731_v2 = vld [vmem:[#allocation6 + $0x400] ss:$16 sps:$4 sm:$0xff]   ;;  %v16742_v26 = vld [vmem:[#allocation6 + $0x7e4] ss:$16 sps:$4 sm:$0xff]  }
 0x6c1   :  { %6562 = vmatpush2.bf16.msra.mxu1 %v16654_v35  ;;  %6520 = vmatprep.subr.bf16.mxu0 %v16659_v42  ;;  %v16697_v35 = vld [vmem:[#allocation6 + $0x4c4] ss:$16 sps:$4 sm:$0xff]   ;;  %v7405_v42 = vor.u32 %v7404_v59, %v7400_v30  ;;  %v16734_v59 = vld [vmem:[#allocation6 + $0x600] ss:$16 sps:$4 sm:$0xff]  }
 0x6c2   :  { %6563 = vmatprep.subr.bf16.mxu1 %v16662_v61  ;;  %v16700_v61 = vld [vmem:[#allocation6 + $0x6c4] ss:$16 sps:$4 sm:$0xff]  }
 0x6c3   :  { %v16745_v30 = vld [vmem:[#allocation6 + $0x5c4] ss:$16 sps:$4 sm:$0xff]  }
 0x6c4   :  { %6521 = vmatpush2.bf16.msra.mxu0 %v16657_v40  ;;  %v18761_v40 = vsel %vm517_vm0, %v7381_v60, %v7385_v41  ;;  %v16737_v41 = vld [vmem:[#allocation6 + $0x5e0] ss:$16 sps:$4 sm:$0xff]  }
 0x6c5   :  { %6564 = vmatpush2.bf16.msra.mxu1 %v16660_v47  ;;  %6522 = vmatprep.subr.bf16.mxu0 %v16665_v11  ;;  %v16695_v47 = vld [vmem:[#allocation6 + $0x4c0] ss:$16 sps:$4 sm:$0xff]   ;;  %v18765_v11 = vsel %vm517_vm0, %v7405_v42, %v7409_v34  ;;  %v16748_v34 = vld [vmem:[#allocation6 + $0x7c4] ss:$16 sps:$4 sm:$0xff]  }
 0x6c6   :  { %6565 = vmatprep.subr.bf16.mxu1 %v16668_v63  ;;  %v16698_v63 = vld [vmem:[#allocation6 + $0x6c0] ss:$16 sps:$4 sm:$0xff]   ;;  %v16751_v42 = vld [vmem:[#allocation6 + $0x5a4] ss:$16 sps:$4 sm:$0xff]  }
 0x6c7   :  { %v16743_v60 = vld [vmem:[#allocation6 + $0x5c0] ss:$16 sps:$4 sm:$0xff]  }
 0x6c8   :  { %6523 = vmatpush2.bf16.msra.mxu0 %v16663_v12  ;;  %v16703_v12 = vld [vmem:[#allocation6 + $0x4a4] ss:$16 sps:$4 sm:$0xff]  }
 0x6c9   :  { %6566 = vmatpush2.bf16.msra.mxu1 %v16666_v50  ;;  %6524 = vmatprep.subr.bf16.mxu0 %v16671_v31  ;;  %v16704_v50 = vld [vmem:[#allocation6 + $0x6a0] ss:$16 sps:$4 sm:$0xff]   ;;  %v16709_v31 = vld [vmem:[#allocation6 + $0x484] ss:$16 sps:$4 sm:$0xff]  }
 0x6ca   :  { %6567 = vmatprep.subr.bf16.mxu1 %v16674_v10  ;;  %v16712_v10 = vld [vmem:[#allocation6 + $0x684] ss:$16 sps:$4 sm:$0xff]  }
 0x6cc   :  { %6525 = vmatpush2.bf16.msra.mxu0 %v16669_v48  ;;  %v16707_v48 = vld [vmem:[#allocation6 + $0x480] ss:$16 sps:$4 sm:$0xff]  }
 0x6cd   :  { %6568 = vmatpush2.bf16.msra.mxu1 %v16672_v28  ;;  %6526 = vmatprep.subr.bf16.mxu0 %v16677_v4  ;;  %v16710_v28 = vld [vmem:[#allocation6 + $0x680] ss:$16 sps:$4 sm:$0xff]   ;;  %v16715_v4 = vld [vmem:[#allocation6 + $0x464] ss:$16 sps:$4 sm:$0xff]  }
 0x6ce   :  { %6569 = vmatprep.subr.bf16.mxu1 %v16680_v7  ;;  %v16718_v7 = vld [vmem:[#allocation6 + $0x664] ss:$16 sps:$4 sm:$0xff]  }
 0x6d0   :  { %6527 = vmatpush2.bf16.msra.mxu0 %v16675_v1  ;;  %v16713_v1 = vld [vmem:[#allocation6 + $0x460] ss:$16 sps:$4 sm:$0xff]  }
 0x6d1   :  { %6570 = vmatpush2.bf16.msra.mxu1 %v16678_v53  ;;  %6528 = vmatprep.subr.bf16.mxu0 %v16683_v54  ;;  %v16716_v53 = vld [vmem:[#allocation6 + $0x660] ss:$16 sps:$4 sm:$0xff]   ;;  %v16721_v54 = vld [vmem:[#allocation6 + $0x444] ss:$16 sps:$4 sm:$0xff]  }
 0x6d2   :  { %6571 = vmatprep.subr.bf16.mxu1 %v16686_v3  ;;  %v16724_v3 = vld [vmem:[#allocation6 + $0x644] ss:$16 sps:$4 sm:$0xff]  }
 0x6d4   :  { %6529 = vmatpush2.bf16.msra.mxu0 %v16681_v55  ;;  %v16727_v55 = vld [vmem:[#allocation6 + $0x424] ss:$16 sps:$4 sm:$0xff]  }
 0x6d5   :  { %6572 = vmatpush2.bf16.msra.mxu1 %v16684_v33  ;;  %8055 = vmatprep.subr.bf16.mxu0 %v16689_v19  ;;  %v16725_v33 = vld [vmem:[#allocation6 + $0x420] ss:$16 sps:$4 sm:$0xff]  }
 0x6d6   :  { %8098 = vmatprep.subr.bf16.mxu1 %v16692_v6  ;;  %v16728_v19 = vld [vmem:[#allocation6 + $0x620] ss:$16 sps:$4 sm:$0xff]   ;;  %v16736_v6 = vld [vmem:[#allocation6 + $0x604] ss:$16 sps:$4 sm:$0xff]  }
 0x6d7   :  { %6531 = vmatmul.mubr.bf16.vlgmr.msra.gmra.mxu0 %v18679_v24  ;;  %v16706_v24 = vld [vmem:[#allocation6 + $0x6a4] ss:$16 sps:$4 sm:$0xff]  }
 0x6d8   :  { %6574 = vmatmul.mubr.bf16.vlgmr.msra.gmra.mxu1 %v18682_v62  ;;  %8056 = vmatpush1.bf16.msra.mxu0 %v16687_v21  ;;  %v16701_v62 = vld [vmem:[#allocation6 + $0x4a0] ss:$16 sps:$4 sm:$0xff]   ;;  %v16739_v21 = vld [vmem:[#allocation6 + $0x5e4] ss:$16 sps:$4 sm:$0xff]  }
 0x6d9   :  { %8087 = vmatprep.mubr.bf16.mxu0 %v18761_v40  ;;  %8099 = vmatpush1.bf16.msra.mxu1 %v16690_v17  ;;  %v16740_v17 = vld [vmem:[#allocation6 + $0x7e0] ss:$16 sps:$4 sm:$0xff]  }
 0x6da   :  { %8130 = vmatprep.mubr.bf16.mxu1 %v18765_v11  ;;  %8057 = vmatprep.subr.bf16.mxu0 %v16697_v35  ;;  %v16746_v35 = vld [vmem:[#allocation6 + $0x7c0] ss:$16 sps:$4 sm:$0xff]  }
 0x6db   :  { %8100 = vmatprep.subr.bf16.mxu1 %v16700_v61  ;;  %v16754_v61 = vld [vmem:[#allocation6 + $0x7a4] ss:$16 sps:$4 sm:$0xff]  }
 0x6dc   :  { %8058 = vmatpush1.bf16.msra.mxu0 %v16695_v47  ;;  %v16749_v47 = vld [vmem:[#allocation6 + $0x5a0] ss:$16 sps:$4 sm:$0xff]  }
 0x6dd   :  { %8101 = vmatpush1.bf16.msra.mxu1 %v16698_v63  ;;  %8059 = vmatprep.subr.bf16.mxu0 %v16703_v12  ;;  %v16752_v63 = vld [vmem:[#allocation6 + $0x7a0] ss:$16 sps:$4 sm:$0xff]   ;;  %v16757_v12 = vld [vmem:[#allocation6 + $0x584] ss:$16 sps:$4 sm:$0xff]  }
 0x6de   :  { %8102 = vmatprep.subr.bf16.mxu1 %v16706_v24  ;;  %v16760_v24 = vld [vmem:[#allocation6 + $0x784] ss:$16 sps:$4 sm:$0xff]  }
 0x6e0   :  { %8060 = vmatpush1.bf16.msra.mxu0 %v16701_v62  ;;  %v16755_v62 = vld [vmem:[#allocation6 + $0x580] ss:$16 sps:$4 sm:$0xff]  }
 0x6e1   :  { %8103 = vmatpush1.bf16.msra.mxu1 %v16704_v50  ;;  %8061 = vmatprep.subr.bf16.mxu0 %v16709_v31  ;;  %v16758_v50 = vld [vmem:[#allocation6 + $0x780] ss:$16 sps:$4 sm:$0xff]   ;;  %v16763_v31 = vld [vmem:[#allocation6 + $0x564] ss:$16 sps:$4 sm:$0xff]  }
 0x6e2   :  { %8104 = vmatprep.subr.bf16.mxu1 %v16712_v10  ;;  %v16766_v10 = vld [vmem:[#allocation6 + $0x764] ss:$16 sps:$4 sm:$0xff]  }
 0x6e4   :  { %8062 = vmatpush1.bf16.msra.mxu0 %v16707_v48  ;;  %v16761_v48 = vld [vmem:[#allocation6 + $0x560] ss:$16 sps:$4 sm:$0xff]  }
 0x6e5   :  { %8105 = vmatpush1.bf16.msra.mxu1 %v16710_v28  ;;  %8063 = vmatprep.subr.bf16.mxu0 %v16715_v4  ;;  %v16764_v28 = vld [vmem:[#allocation6 + $0x760] ss:$16 sps:$4 sm:$0xff]   ;;  %v16769_v4 = vld [vmem:[#allocation6 + $0x544] ss:$16 sps:$4 sm:$0xff]  }
 0x6e6   :  { %8106 = vmatprep.subr.bf16.mxu1 %v16718_v7  ;;  %v16772_v7 = vld [vmem:[#allocation6 + $0x744] ss:$16 sps:$4 sm:$0xff]  }
 0x6e8   :  { %8064 = vmatpush1.bf16.msra.mxu0 %v16713_v1  ;;  %v16767_v1 = vld [vmem:[#allocation6 + $0x540] ss:$16 sps:$4 sm:$0xff]  }
 0x6e9   :  { %8107 = vmatpush1.bf16.msra.mxu1 %v16716_v53  ;;  %8065 = vmatprep.subr.bf16.mxu0 %v16721_v54  ;;  %v18770_v53 = vcombine.low %v18730_v8, %v18724_v56  ;;  %v18772_v54 = vpop.f32.mrf.mxu0  ;;  %v18786_v56 = vcombine.low %v18736_v25, %v18736_v25  ;;  %v16773_v8 = vld [vmem:[#allocation6 + $0x520] ss:$16 sps:$4 sm:$0xff]  }
 0x6ea   :  { %8108 = vmatprep.subr.bf16.mxu1 %v16724_v3  ;;  %v16770_v3 = vld [vmem:[#allocation6 + $0x740] ss:$16 sps:$4 sm:$0xff]  }
 0x6eb   :  { %v7395_v25 = vshll.u32 %v18786_v56, 16 }
 0x6ec   :  { %8066 = vmatpush1.bf16.msra.mxu0 %v16719_v52  ;;  %v16775_v52 = vld [vmem:[#allocation6 + $0x524] ss:$16 sps:$4 sm:$0xff]  }
 0x6ed   :  { %8109 = vmatpush1.bf16.msra.mxu1 %v16722_v5  ;;  %8067 = vmatprep.subr.bf16.mxu0 %v16727_v55  ;;  %v18776_v5 = vcombine.low %v18738_v45, %v18726_v44  ;;  %v18778_v55 = vpop.f32.mrf.mxu1  ;;  %v16776_v44 = vld [vmem:[#allocation6 + $0x720] ss:$16 sps:$4 sm:$0xff]   ;;  %v16781_v45 = vld [vmem:[#allocation6 + $0x504] ss:$16 sps:$4 sm:$0xff]  }
 0x6ee   :  { %8110 = vmatprep.subr.bf16.mxu1 %v16730_v57  ;;  %v16778_v57 = vld [vmem:[#allocation6 + $0x724] ss:$16 sps:$4 sm:$0xff]  }
 0x6f0   :  { %8068 = vmatpush1.bf16.msra.mxu0 %v16725_v33  ;;  %v18782_v33 = vcombine.low %v18728_v37, %v18728_v37  ;;  %v16784_v37 = vld [vmem:[#allocation6 + $0x704] ss:$16 sps:$4 sm:$0xff]  }
 0x6f1   :  { %8111 = vmatpush1.bf16.msra.mxu1 %v16728_v19  ;;  %8069 = vmatprep.subr.bf16.mxu0 %v16733_v36  ;;  %v7366_v19 = vshll.u32 %v18770_v53, 16  ;;  %v18789_v36 = vpop.f32.mrf.mxu0 }
 0x6f2   :  { %8112 = vmatprep.subr.bf16.mxu1 %v16736_v6  ;;  %v7390_v6 = vshll.u32 %v18776_v5, 16 }
 0x6f4   :  { %8070 = vmatpush1.bf16.msra.mxu0 %v16731_v2  ;;  %v18792_v2 = vpop.f32.mrf.mxu1 }
 0x6f5   :  { %8113 = vmatpush1.bf16.msra.mxu1 %v16734_v59  ;;  %8071 = vmatprep.subr.bf16.mxu0 %v16739_v21  ;;  %v7371_v59 = vshll.u32 %v18782_v33, 16  ;;  %v16779_v21 = vld [vmem:[#allocation6 + $0x500] ss:$16 sps:$4 sm:$0xff]  }
 0x6f6   :  { %8114 = vmatprep.subr.bf16.mxu1 %v16742_v26  ;;  %v7368_v26 = vrot.slane %v7366_v19, 1  ;;  %v16796_v19 = vld [vmem:[#allocation6 + $0x6c8] ss:$16 sps:$4 sm:$0xff]  }
 0x6f8   :  { %8072 = vmatpush2.bf16.msra.mxu0 %v16737_v41  ;;  %v18796_v41 = vpop.f32.mrf.mxu0 }
 0x6f9   :  { %8115 = vmatpush2.bf16.msra.mxu1 %v16740_v17  ;;  %8073 = vmatprep.subr.bf16.mxu0 %v16745_v30  ;;  %v16782_v17 = vld [vmem:[#allocation6 + $0x700] ss:$16 sps:$4 sm:$0xff]   ;;  %v7392_v30 = vrot.slane %v7390_v6, 1 }
 0x6fa   :  { %8116 = vmatprep.subr.bf16.mxu1 %v16748_v34  ;;  %v16789_v34 = vld [vmem:[#allocation6 + $0x4ec] ss:$16 sps:$4 sm:$0xff]  }
 0x6fc   :  { %8074 = vmatpush2.bf16.msra.mxu0 %v16743_v60  ;;  %v18798_v60 = vpop.f32.mrf.mxu1 }
 0x6fd   :  { %8117 = vmatpush2.bf16.msra.mxu1 %v16746_v35  ;;  %8075 = vmatprep.subr.bf16.mxu0 %v16751_v42  ;;  %v7364_v35 = vshrl.u32 %v18770_v53, 16  ;;  %v7373_v42 = vrot.slane %v7371_v59, 1 }
 0x6fe   :  { %8118 = vmatprep.subr.bf16.mxu1 %v16754_v61  ;;  %v16792_v61 = vld [vmem:[#allocation6 + $0x6ec] ss:$16 sps:$4 sm:$0xff]  }
 0x700   :  { %8076 = vmatpush2.bf16.msra.mxu0 %v16749_v47  ;;  %v7388_v47 = vshrl.u32 %v18776_v5, 16 }
 0x701   :  { %8119 = vmatpush2.bf16.msra.mxu1 %v16752_v63  ;;  %8077 = vmatprep.subr.bf16.mxu0 %v16757_v12  ;;  %v7397_v63 = vrot.slane %v7395_v25, 1  ;;  %v7369_v12 = vor.u32 %v7368_v26, %v7364_v35  ;;  %v16799_v26 = vld [vmem:[#allocation6 + $0x4a8] ss:$16 sps:$4 sm:$0xff]   ;;  %v16810_v35 = vld [vmem:[#allocation6 + $0x68c] ss:$16 sps:$4 sm:$0xff]  }
 0x702   :  { %8120 = vmatprep.subr.bf16.mxu1 %v16760_v24  ;;  %v16787_v24 = vld [vmem:[#allocation6 + $0x4e8] ss:$16 sps:$4 sm:$0xff]  }
 0x704   :  { %8078 = vmatpush2.bf16.msra.mxu0 %v16755_v62  ;;  %v18802_v62 = vpop.f32.mrf.mxu0 }
 0x705   :  { %8121 = vmatpush2.bf16.msra.mxu1 %v16758_v50  ;;  %8079 = vmatprep.subr.bf16.mxu0 %v16763_v31  ;;  %v7393_v50 = vor.u32 %v7392_v30, %v7388_v47  ;;  %v16790_v31 = vld [vmem:[#allocation6 + $0x6e8] ss:$16 sps:$4 sm:$0xff]  }
 0x706   :  { %8122 = vmatprep.subr.bf16.mxu1 %v16766_v10  ;;  %v18804_v10 = vpop.f32.mrf.mxu1  ;;  %v16802_v30 = vld [vmem:[#allocation6 + $0x6a8] ss:$16 sps:$4 sm:$0xff]  }
 0x707   :  { %v16805_v47 = vld [vmem:[#allocation6 + $0x488] ss:$16 sps:$4 sm:$0xff]  }
 0x708   :  { %8080 = vmatpush2.bf16.msra.mxu0 %v16761_v48  ;;  %v18807_v48 = vsel %vm517_vm0, %v7369_v12, %v7373_v42  ;;  %v16816_v12 = vld [vmem:[#allocation6 + $0x66c] ss:$16 sps:$4 sm:$0xff]  }
 0x709   :  { %8123 = vmatpush2.bf16.msra.mxu1 %v16764_v28  ;;  %8081 = vmatprep.subr.bf16.mxu0 %v16769_v4  ;;  %v16795_v28 = vld [vmem:[#allocation6 + $0x4cc] ss:$16 sps:$4 sm:$0xff]  }
 0x70a   :  { %8124 = vmatprep.subr.bf16.mxu1 %v16772_v7  ;;  %v18811_v7 = vsel %vm517_vm0, %v7393_v50, %v7397_v63  ;;  %v16813_v63 = vld [vmem:[#allocation6 + $0x46c] ss:$16 sps:$4 sm:$0xff]   ;;  %v16814_v50 = vld [vmem:[#allocation6 + $0x668] ss:$16 sps:$4 sm:$0xff]  }
 0x70c   :  { %8082 = vmatpush2.bf16.msra.mxu0 %v16767_v1  ;;  %v16798_v1 = vld [vmem:[#allocation6 + $0x6cc] ss:$16 sps:$4 sm:$0xff]  }
 0x70d   :  { %8125 = vmatpush2.bf16.msra.mxu1 %v16770_v3  ;;  %8083 = vmatprep.subr.bf16.mxu0 %v16775_v52 }
 0x70e   :  { %8126 = vmatprep.subr.bf16.mxu1 %v16778_v57  ;;  %v16793_v57 = vld [vmem:[#allocation6 + $0x4c8] ss:$16 sps:$4 sm:$0xff]  }
 0x710   :  { %8084 = vmatpush2.bf16.msra.mxu0 %v16773_v8 }
 0x711   :  { %8127 = vmatpush2.bf16.msra.mxu1 %v16776_v44  ;;  %8085 = vmatprep.subr.bf16.mxu0 %v16781_v45  ;;  %v16801_v44 = vld [vmem:[#allocation6 + $0x4ac] ss:$16 sps:$4 sm:$0xff]  }
 0x712   :  { %8128 = vmatprep.subr.bf16.mxu1 %v16784_v37 }
 0x714   :  { %8086 = vmatpush2.bf16.msra.mxu0 %v16779_v21 }
 0x715   :  { %8129 = vmatpush2.bf16.msra.mxu1 %v16782_v17  ;;  %8141 = vmatprep.subr.bf16.mxu0 %v16789_v34  ;;  %v16807_v34 = vld [vmem:[#allocation6 + $0x48c] ss:$16 sps:$4 sm:$0xff]  }
 0x716   :  { %8184 = vmatprep.subr.bf16.mxu1 %v16792_v61 }
 0x717   :  { %v5563_v4 = vpop.f32.mrf.mxu0  ;;  %8088 = vmatmul.mubr.bf16.vlgmr.msra.gmra.mxu0 %v18807_v48 }
 0x718   :  { %v5564_v3 = vadd.f32 %v5563_v4, %v18713_v39  ;;  %v5606_v52 = vpop.f32.mrf.mxu1  ;;  %8131 = vmatmul.mubr.bf16.vlgmr.msra.gmra.mxu1 %v18811_v7  ;;  %8142 = vmatpush1.bf16.msra.mxu0 %v16787_v24  ;;  %v16804_v39 = vld [vmem:[#allocation6 + $0x6ac] ss:$16 sps:$4 sm:$0xff]   ;;  %v16811_v24 = vld [vmem:[#allocation6 + $0x468] ss:$16 sps:$4 sm:$0xff]  }
 0x719   :  { %8173 = vmatprep.mubr.bf16.mxu0 %v18761_v40  ;;  %8185 = vmatpush1.bf16.msra.mxu1 %v16790_v31  ;;  %v5565_v8 = vpop.f32.mrf.mxu0  ;;  %v16819_v31 = vld [vmem:[#allocation6 + $0x44c] ss:$16 sps:$4 sm:$0xff]   ;;  %v16820_v4 = vld [vmem:[#allocation6 + $0x648] ss:$16 sps:$4 sm:$0xff]  }
 0x71a   :  { %v18816_v45 = vadd.f32 %v5606_v52, %v5564_v3  ;;  %8216 = vmatprep.mubr.bf16.mxu1 %v18765_v11  ;;  %v5566_v6 = vadd.f32 %v5565_v8, %v18718_v29  ;;  %v5608_v37 = vpop.f32.mrf.mxu1  ;;  %8143 = vmatprep.subr.bf16.mxu0 %v16795_v28  ;;  %v16817_v28 = vld [vmem:[#allocation6 + $0x448] ss:$16 sps:$4 sm:$0xff]   ;;  %v16828_v3 = vld [vmem:[#allocation6 + $0x62c] ss:$16 sps:$4 sm:$0xff]  }
 0x71b   :  { %v5567_v59 = vpop.f32.mrf.mxu0  ;;  %8186 = vmatprep.subr.bf16.mxu1 %v16798_v1  ;;  %v16825_v1 = vld [vmem:[#allocation6 + $0x42c] ss:$16 sps:$4 sm:$0xff]   ;;  %v16823_v52 = vld [vmem:[#allocation6 + $0x428] ss:$16 sps:$4 sm:$0xff]  }
 0x71c   :  { %v18820_v25 = vadd.f32 %v5608_v37, %v5566_v6  ;;  %v5568_v21 = vadd.f32 %v5567_v59, %v18720_v43  ;;  %v5610_v40 = vpop.f32.mrf.mxu1  ;;  %8144 = vmatpush1.bf16.msra.mxu0 %v16793_v57  ;;  %v16808_v43 = vld [vmem:[#allocation6 + $0x688] ss:$16 sps:$4 sm:$0xff]   ;;  %v16831_v8 = vld [vmem:[#allocation6 + $0x40c] ss:$16 sps:$4 sm:$0xff]  }
 0x71d   :  { %8187 = vmatpush1.bf16.msra.mxu1 %v16796_v19  ;;  %v5569_v17 = vpop.f32.mrf.mxu0  ;;  %8145 = vmatprep.subr.bf16.mxu0 %v16801_v44  ;;  %v16826_v57 = vld [vmem:[#allocation6 + $0x628] ss:$16 sps:$4 sm:$0xff]   ;;  %v16834_v19 = vld [vmem:[#allocation6 + $0x60c] ss:$16 sps:$4 sm:$0xff]  }
 0x71e   :  { %v18823_v11 = vadd.f32 %v5610_v40, %v5568_v21  ;;  %v5570_v29 = vadd.f32 %v5569_v17, %v18722_v38  ;;  %8188 = vmatprep.subr.bf16.mxu1 %v16804_v39  ;;  %v5612_v42 = vpop.f32.mrf.mxu1  ;;  %v16822_v38 = vld [vmem:[#allocation6 + $0x64c] ss:$16 sps:$4 sm:$0xff]   ;;  %v16829_v44 = vld [vmem:[#allocation6 + $0x408] ss:$16 sps:$4 sm:$0xff]  }
 0x71f   :  { %v16832_v6 = vld [vmem:[#allocation6 + $0x608] ss:$16 sps:$4 sm:$0xff]   ;;  %v16837_v37 = vld [vmem:[#allocation6 + $0x5ec] ss:$16 sps:$4 sm:$0xff]  }
 0x720   :  { %v18826_v61 = vadd.f32 %v5612_v42, %v5570_v29  ;;  %8146 = vmatpush1.bf16.msra.mxu0 %v16799_v26  ;;  %v16840_v39 = vld [vmem:[#allocation6 + $0x7ec] ss:$16 sps:$4 sm:$0xff]   ;;  %v16835_v59 = vld [vmem:[#allocation6 + $0x5e8] ss:$16 sps:$4 sm:$0xff]  }
 0x721   :  { %8189 = vmatpush1.bf16.msra.mxu1 %v16802_v30  ;;  %8147 = vmatprep.subr.bf16.mxu0 %v16807_v34  ;;  %v16838_v21 = vld [vmem:[#allocation6 + $0x7e8] ss:$16 sps:$4 sm:$0xff]   ;;  %v16843_v40 = vld [vmem:[#allocation6 + $0x5cc] ss:$16 sps:$4 sm:$0xff]  }
 0x722   :  { %8190 = vmatprep.subr.bf16.mxu1 %v16810_v35  ;;  %v16846_v26 = vld [vmem:[#allocation6 + $0x7cc] ss:$16 sps:$4 sm:$0xff]   ;;  %v16841_v17 = vld [vmem:[#allocation6 + $0x5c8] ss:$16 sps:$4 sm:$0xff]  }
 0x723   :  { %v16844_v30 = vld [vmem:[#allocation6 + $0x7c8] ss:$16 sps:$4 sm:$0xff]   ;;  %v16849_v34 = vld [vmem:[#allocation6 + $0x5ac] ss:$16 sps:$4 sm:$0xff]  }
 0x724   :  { %8148 = vmatpush1.bf16.msra.mxu0 %v16805_v47  ;;  %v16852_v29 = vld [vmem:[#allocation6 + $0x7ac] ss:$16 sps:$4 sm:$0xff]   ;;  %v16847_v35 = vld [vmem:[#allocation6 + $0x5a8] ss:$16 sps:$4 sm:$0xff]  }
 0x725   :  { %8191 = vmatpush1.bf16.msra.mxu1 %v16808_v43  ;;  %8149 = vmatprep.subr.bf16.mxu0 %v16813_v63  ;;  %v16850_v42 = vld [vmem:[#allocation6 + $0x7a8] ss:$16 sps:$4 sm:$0xff]   ;;  %v16855_v47 = vld [vmem:[#allocation6 + $0x58c] ss:$16 sps:$4 sm:$0xff]  }
 0x726   :  { %8192 = vmatprep.subr.bf16.mxu1 %v16816_v12  ;;  %v16858_v43 = vld [vmem:[#allocation6 + $0x78c] ss:$16 sps:$4 sm:$0xff]   ;;  %v16853_v63 = vld [vmem:[#allocation6 + $0x588] ss:$16 sps:$4 sm:$0xff]  }
 0x727   :  { %v16856_v12 = vld [vmem:[#allocation6 + $0x788] ss:$16 sps:$4 sm:$0xff]  }
 0x728   :  { %8150 = vmatpush1.bf16.msra.mxu0 %v16811_v24  ;;  %v16861_v24 = vld [vmem:[#allocation6 + $0x56c] ss:$16 sps:$4 sm:$0xff]  }
 0x729   :  { %8193 = vmatpush1.bf16.msra.mxu1 %v16814_v50  ;;  %8151 = vmatprep.subr.bf16.mxu0 %v16819_v31  ;;  %v16864_v50 = vld [vmem:[#allocation6 + $0x76c] ss:$16 sps:$4 sm:$0xff]   ;;  %v16859_v31 = vld [vmem:[#allocation6 + $0x568] ss:$16 sps:$4 sm:$0xff]  }
 0x72a   :  { %8194 = vmatprep.subr.bf16.mxu1 %v16822_v38  ;;  %v16862_v38 = vld [vmem:[#allocation6 + $0x768] ss:$16 sps:$4 sm:$0xff]  }
 0x72c   :  { %8152 = vmatpush1.bf16.msra.mxu0 %v16817_v28  ;;  %v16867_v28 = vld [vmem:[#allocation6 + $0x54c] ss:$16 sps:$4 sm:$0xff]  }
 0x72d   :  { %8195 = vmatpush1.bf16.msra.mxu1 %v16820_v4  ;;  %8153 = vmatprep.subr.bf16.mxu0 %v16825_v1  ;;  %v16870_v4 = vld [vmem:[#allocation6 + $0x74c] ss:$16 sps:$4 sm:$0xff]   ;;  %v16865_v1 = vld [vmem:[#allocation6 + $0x548] ss:$16 sps:$4 sm:$0xff]  }
 0x72e   :  { %8196 = vmatprep.subr.bf16.mxu1 %v16828_v3  ;;  %v16868_v3 = vld [vmem:[#allocation6 + $0x748] ss:$16 sps:$4 sm:$0xff]  }
 0x730   :  { %8154 = vmatpush1.bf16.msra.mxu0 %v16823_v52  ;;  %v16873_v52 = vld [vmem:[#allocation6 + $0x52c] ss:$16 sps:$4 sm:$0xff]  }
 0x731   :  { %8197 = vmatpush1.bf16.msra.mxu1 %v16826_v57  ;;  %8155 = vmatprep.subr.bf16.mxu0 %v16831_v8  ;;  %v16876_v57 = vld [vmem:[#allocation6 + $0x72c] ss:$16 sps:$4 sm:$0xff]   ;;  %v16871_v8 = vld [vmem:[#allocation6 + $0x528] ss:$16 sps:$4 sm:$0xff]  }
 0x732   :  { %8198 = vmatprep.subr.bf16.mxu1 %v16834_v19  ;;  %v16874_v19 = vld [vmem:[#allocation6 + $0x728] ss:$16 sps:$4 sm:$0xff]  }
 0x734   :  { %8156 = vmatpush1.bf16.msra.mxu0 %v16829_v44  ;;  %v16879_v44 = vld [vmem:[#allocation6 + $0x50c] ss:$16 sps:$4 sm:$0xff]  }
 0x735   :  { %8199 = vmatpush1.bf16.msra.mxu1 %v16832_v6  ;;  %8157 = vmatprep.subr.bf16.mxu0 %v16837_v37  ;;  %v16882_v6 = vld [vmem:[#allocation6 + $0x70c] ss:$16 sps:$4 sm:$0xff]   ;;  %v16877_v37 = vld [vmem:[#allocation6 + $0x508] ss:$16 sps:$4 sm:$0xff]  }
 0x736   :  { %8200 = vmatprep.subr.bf16.mxu1 %v16840_v39  ;;  %v16880_v39 = vld [vmem:[#allocation6 + $0x708] ss:$16 sps:$4 sm:$0xff]  }
 0x738   :  { %8158 = vmatpush2.bf16.msra.mxu0 %v16835_v59  ;;  %v16885_v59 = vld [vmem:[#allocation6 + $0xe4] ss:$16 sps:$4 sm:$0xff]  }
 0x739   :  { %8201 = vmatpush2.bf16.msra.mxu1 %v16838_v21  ;;  %8159 = vmatprep.subr.bf16.mxu0 %v16843_v40  ;;  %v16888_v21 = vld [vmem:[#allocation6 + $0x2e4] ss:$16 sps:$4 sm:$0xff]   ;;  %v4705_v40 = vadd.f32 %v18698_v51, %v18696_v15  ;;  %v16889_v15 = vld [vmem:[#allocation6 + $0xc0] ss:$16 sps:$4 sm:$0xff]  }
 0x73a   :  { %8202 = vmatprep.subr.bf16.mxu1 %v16846_v26  ;;  %v16883_v26 = vld [vmem:[#allocation6 + $0xe0] ss:$16 sps:$4 sm:$0xff]  }
 0x73c   :  { %8160 = vmatpush2.bf16.msra.mxu0 %v16841_v17  ;;  %v5478_v17 = vadd.f32 %v18772_v54, %v4705_v40 }
 0x73d   :  { %8203 = vmatpush2.bf16.msra.mxu1 %v16844_v30  ;;  %8161 = vmatprep.subr.bf16.mxu0 %v16849_v34  ;;  %v16886_v30 = vld [vmem:[#allocation6 + $0x2e0] ss:$16 sps:$4 sm:$0xff]   ;;  %v16891_v34 = vld [vmem:[#allocation6 + $0xc4] ss:$16 sps:$4 sm:$0xff]  }
 0x73e   :  { %8204 = vmatprep.subr.bf16.mxu1 %v16852_v29  ;;  %v4709_v29 = vadd.f32 %v18706_v13, %v18704_v18  ;;  %v5521_v51 = vadd.f32 %v18778_v55, %v5478_v17  ;;  %v16892_v18 = vld [vmem:[#allocation6 + $0x2c0] ss:$16 sps:$4 sm:$0xff]   ;;  %v4707_v17 = vadd.f32 %v18702_v0, %v18700_v16 }
 0x740   :  { %8162 = vmatpush2.bf16.msra.mxu0 %v16847_v35  ;;  %v5482_v54 = vadd.f32 %v18796_v41, %v4709_v29  ;;  %v16895_v41 = vld [vmem:[#allocation6 + $0xa0] ss:$16 sps:$4 sm:$0xff]   ;;  %v5480_v29 = vadd.f32 %v18789_v36, %v4707_v17  ;;  %v16969_v17 = vld [vmem:[#allocation6 + $0x124] ss:$16 sps:$4 sm:$0xff]  }
 0x741   :  { %8205 = vmatpush2.bf16.msra.mxu1 %v16850_v42  ;;  %8163 = vmatprep.subr.bf16.mxu0 %v16855_v47  ;;  %v16894_v42 = vld [vmem:[#allocation6 + $0x2c4] ss:$16 sps:$4 sm:$0xff]   ;;  %v16928_v36 = vld [vmem:[#allocation6 + $0x200] ss:$16 sps:$4 sm:$0xff]  }
 0x742   :  { %8206 = vmatprep.subr.bf16.mxu1 %v16858_v43 }
 0x744   :  { %8164 = vmatpush2.bf16.msra.mxu0 %v16853_v63 }
 0x745   :  { %8207 = vmatpush2.bf16.msra.mxu1 %v16856_v12  ;;  %8165 = vmatprep.subr.bf16.mxu0 %v16861_v24 }
 0x746   :  { %8208 = vmatprep.subr.bf16.mxu1 %v16864_v50  ;;  %v5525_v50 = vadd.f32 %v18798_v60, %v5482_v54  ;;  %v16909_v60 = vld [vmem:[#allocation6 + $0x64] ss:$16 sps:$4 sm:$0xff]  }
 0x748   :  { %8166 = vmatpush2.bf16.msra.mxu0 %v16859_v31 }
 0x749   :  { %8209 = vmatpush2.bf16.msra.mxu1 %v16862_v38  ;;  %8167 = vmatprep.subr.bf16.mxu0 %v16867_v28  ;;  %v16898_v38 = vld [vmem:[#allocation6 + $0x2a0] ss:$16 sps:$4 sm:$0xff]   ;;  %v16903_v28 = vld [vmem:[#allocation6 + $0x84] ss:$16 sps:$4 sm:$0xff]  }
 0x74a   :  { %8210 = vmatprep.subr.bf16.mxu1 %v16870_v4 }
 0x74c   :  { %8168 = vmatpush2.bf16.msra.mxu0 %v16865_v1  ;;  %v16906_v1 = vld [vmem:[#allocation6 + $0x284] ss:$16 sps:$4 sm:$0xff]  }
 0x74d   :  { %8211 = vmatpush2.bf16.msra.mxu1 %v16868_v3  ;;  %8169 = vmatprep.subr.bf16.mxu0 %v16873_v52  ;;  %v16901_v3 = vld [vmem:[#allocation6 + $0x80] ss:$16 sps:$4 sm:$0xff]  }
 0x74e   :  { %8212 = vmatprep.subr.bf16.mxu1 %v16876_v57  ;;  %v16904_v52 = vld [vmem:[#allocation6 + $0x280] ss:$16 sps:$4 sm:$0xff]   ;;  %v16912_v57 = vld [vmem:[#allocation6 + $0x264] ss:$16 sps:$4 sm:$0xff]  }
 0x750   :  { %8170 = vmatpush2.bf16.msra.mxu0 %v16871_v8  ;;  %v16907_v8 = vld [vmem:[#allocation6 + $0x60] ss:$16 sps:$4 sm:$0xff]  }
 0x751   :  { %8213 = vmatpush2.bf16.msra.mxu1 %v16874_v19  ;;  %8171 = vmatprep.subr.bf16.mxu0 %v16879_v44  ;;  %v16910_v19 = vld [vmem:[#allocation6 + $0x260] ss:$16 sps:$4 sm:$0xff]   ;;  %v16915_v44 = vld [vmem:[#allocation6 + $0x44] ss:$16 sps:$4 sm:$0xff]  }
 0x752   :  { %8214 = vmatprep.subr.bf16.mxu1 %v16882_v6  ;;  %v16918_v6 = vld [vmem:[#allocation6 + $0x244] ss:$16 sps:$4 sm:$0xff]  }
 0x754   :  { %8172 = vmatpush2.bf16.msra.mxu0 %v16877_v37 }
 0x755   :  { %8215 = vmatpush2.bf16.msra.mxu1 %v16880_v39  ;;  %8871 = vmatprep.subr.bf16.mxu0 %v16885_v59  ;;  %v16913_v39 = vld [vmem:[#allocation6 + $0x40] ss:$16 sps:$4 sm:$0xff]  }
 0x756   :  { %8914 = vmatprep.subr.bf16.mxu1 %v16888_v21  ;;  %v16916_v59 = vld [vmem:[#allocation6 + $0x240] ss:$16 sps:$4 sm:$0xff]   ;;  %v16921_v21 = vld [vmem:[#allocation6 + $0x24] ss:$16 sps:$4 sm:$0xff]  }
 0x757   :  { %v6446_v35 = vpop.f32.mrf.mxu0  ;;  %8174 = vmatmul.mubr.bf16.vlgmr.msra.gmra.mxu0 %v18807_v48  ;;  %v16897_v48 = vld [vmem:[#allocation6 + $0xa4] ss:$16 sps:$4 sm:$0xff]  }
 0x758   :  { %v6489_v47 = vpop.f32.mrf.mxu1  ;;  %8217 = vmatmul.mubr.bf16.vlgmr.msra.gmra.mxu1 %v18811_v7  ;;  %8872 = vmatpush1.bf16.msra.mxu0 %v16883_v26  ;;  %v16900_v7 = vld [vmem:[#allocation6 + $0x2a4] ss:$16 sps:$4 sm:$0xff]  }
 0x759   :  { %v6490_v43 = vadd.f32 %v6489_v47, %v6446_v35  ;;  %8903 = vmatprep.mubr.bf16.mxu0 %v18734_v22  ;;  %8915 = vmatpush1.bf16.msra.mxu1 %v16886_v30  ;;  %v18838_v63 = vpop.f32.mrf.mxu0  ;;  %v16924_v26 = vld [vmem:[#allocation6 + $0x224] ss:$16 sps:$4 sm:$0xff]   ;;  %v16919_v30 = vld [vmem:[#allocation6 + $0x20] ss:$16 sps:$4 sm:$0xff]  }
 0x75a   :  { %8946 = vmatprep.mubr.bf16.mxu1 %v18742_v58  ;;  %v18841_v13 = vpop.f32.mrf.mxu1  ;;  %8873 = vmatprep.subr.bf16.mxu0 %v16891_v34  ;;  %v16922_v34 = vld [vmem:[#allocation6 + $0x220] ss:$16 sps:$4 sm:$0xff]   ;;  %v16927_v35 = vld [vmem:[#allocation6 + $0x4] ss:$16 sps:$4 sm:$0xff]  }
 0x75b   :  { %v18843_v12 = vadd.f32 %v6490_v43, %v5521_v51  ;;  %v6450_v24 = vpop.f32.mrf.mxu0  ;;  %8916 = vmatprep.subr.bf16.mxu1 %v16894_v42  ;;  %v4711_v42 = vadd.f32 %v18710_v20, %v18708_v49  ;;  %v16930_v47 = vld [vmem:[#allocation6 + $0x204] ss:$16 sps:$4 sm:$0xff]   ;;  %v6492_v16 = vadd.f32 %v18841_v13, %v18838_v63  ;;  %v16925_v51 = vld [vmem:[#allocation6] ss:$16 sps:$4 sm:$0xff]   ;;  %v5523_v43 = vadd.f32 %v18792_v2, %v5480_v29 }
 0x75c   :  { %v6493_v55 = vpop.f32.mrf.mxu1  ;;  %8874 = vmatpush1.bf16.msra.mxu0 %v16889_v15  ;;  %v16933_v49 = vld [vmem:[#allocation6 + $0x1e4] ss:$16 sps:$4 sm:$0xff]   ;;  %v16931_v13 = vld [vmem:[#allocation6 + $0x1e0] ss:$16 sps:$4 sm:$0xff]  }
 0x75d   :  { %19895 = vst [vmem:[#allocation25_spill] sm:$0xff] %v18843_v12  ;;  %v6494_v31 = vadd.f32 %v6493_v55, %v6450_v24  ;;  %8917 = vmatpush1.bf16.msra.mxu1 %v16892_v18  ;;  %6596 = vrot.lane.b32.xlu0 %v18843_v12, %s18071_s6  ;;  %v18860_v37 = vmul.f32 %v18843_v12, %v18843_v12  ;;  %v6452_v0 = vpop.f32.mrf.mxu0  ;;  %v16936_v63 = vld [vmem:[#allocation6 + $0x3e4] ss:$16 sps:$4 sm:$0xff]   ;;  %v16937_v55 = vld [vmem:[#allocation6 + $0x1c0] ss:$16 sps:$4 sm:$0xff]  }
 0x75e   :  { %8875 = vmatprep.subr.bf16.mxu0 %v16897_v48  ;;  %8918 = vmatprep.subr.bf16.mxu1 %v16900_v7  ;;  %v6495_v15 = vpop.f32.mrf.mxu1  ;;  %v5484_v54 = vadd.f32 %v18802_v62, %v4711_v42  ;;  %v18887_v18 = vadd.f32 %v6492_v16, %v5523_v43  ;;  %v16934_v48 = vld [vmem:[#allocation6 + $0x3e0] ss:$16 sps:$4 sm:$0xff]   ;;  %v16939_v2 = vld [vmem:[#allocation6 + $0x1c4] ss:$16 sps:$4 sm:$0xff]  }
 0x75f   :  { %v18848_v4 = vadd.f32 %v6494_v31, %v5525_v50  ;;  %v6496_v20 = vadd.f32 %v6495_v15, %v6452_v0  ;;  %v16942_v24 = vld [vmem:[#allocation6 + $0x3c4] ss:$16 sps:$4 sm:$0xff]   ;;  %v16943_v31 = vld [vmem:[#allocation6 + $0x1a0] ss:$16 sps:$4 sm:$0xff]   ;;  %v16981_v0 = vld [vmem:[#allocation6 + $0xec] ss:$16 sps:$4 sm:$0xff]  }
 0x760   :  { %8876 = vmatpush1.bf16.msra.mxu0 %v16895_v41  ;;  %v5527_v62 = vadd.f32 %v18804_v10, %v5484_v54  ;;  %v16940_v10 = vld [vmem:[#allocation6 + $0x3c0] ss:$16 sps:$4 sm:$0xff]   ;;  %v16945_v41 = vld [vmem:[#allocation6 + $0x1a4] ss:$16 sps:$4 sm:$0xff]   ;;  %v16984_v15 = vld [vmem:[#allocation6 + $0x2ec] ss:$16 sps:$4 sm:$0xff]  }
 0x761   :  { %19896 = vst [vmem:[#allocation26_spill] sm:$0xff] %v18848_v4  ;;  %8919 = vmatpush1.bf16.msra.mxu1 %v16898_v38  ;;  %6598 = vrot.lane.b32.xlu1 %v18848_v4, %s18071_s6  ;;  %v18868_v40 = vmul.f32 %v18848_v4, %v18848_v4  ;;  %v16948_v50 = vld [vmem:[#allocation6 + $0x3a4] ss:$16 sps:$4 sm:$0xff]   ;;  %v16946_v38 = vld [vmem:[#allocation6 + $0x3a0] ss:$16 sps:$4 sm:$0xff]  }
 0x762   :  { %6604 = vrot.lane.b32.xlu0 %v18843_v12, %s18070_s4  ;;  %8877 = vmatprep.subr.bf16.mxu0 %v16903_v28  ;;  %v18894_v7 = vadd.f32 %v6496_v20, %v5527_v62  ;;  %v16951_v28 = vld [vmem:[#allocation6 + $0x184] ss:$16 sps:$4 sm:$0xff]   ;;  %v16970_v29 = vld [vmem:[#allocation6 + $0x320] ss:$16 sps:$4 sm:$0xff]   ;;  %v16982_v54 = vld [vmem:[#allocation6 + $0x2e8] ss:$16 sps:$4 sm:$0xff]  }
 0x763   :  { %8920 = vmatprep.subr.bf16.mxu1 %v16906_v1  ;;  %v16954_v1 = vld [vmem:[#allocation6 + $0x384] ss:$16 sps:$4 sm:$0xff]   ;;  %v16976_v16 = vld [vmem:[#allocation6 + $0x300] ss:$16 sps:$4 sm:$0xff]  }
 0x764   :  { %8878 = vmatpush1.bf16.msra.mxu0 %v16901_v3  ;;  %19897 = vst [vmem:[#allocation27_spill] sm:$0xff] %v18894_v7  ;;  %v18906_v3 = vmul.f32 %v18887_v18, %v18887_v18  ;;  %v16978_v42 = vld [vmem:[#allocation6 + $0x304] ss:$16 sps:$4 sm:$0xff]  }
 0x765   :  { %8921 = vmatpush1.bf16.msra.mxu1 %v16904_v52  ;;  %6606 = vrot.lane.b32.xlu1 %v18848_v4, %s18070_s4  ;;  %v16949_v52 = vld [vmem:[#allocation6 + $0x180] ss:$16 sps:$4 sm:$0xff]  }
 0x766   :  { %6612 = vrot.lane.b32.xlu0 %v18843_v12, %s18066_s22  ;;  %8879 = vmatprep.subr.bf16.mxu0 %v16909_v60  ;;  %v16952_v60 = vld [vmem:[#allocation6 + $0x380] ss:$16 sps:$4 sm:$0xff]  }
 0x767   :  { %8922 = vmatprep.subr.bf16.mxu1 %v16912_v57  ;;  %v16957_v57 = vld [vmem:[#allocation6 + $0x164] ss:$16 sps:$4 sm:$0xff]  }
 0x768   :  { %8880 = vmatpush1.bf16.msra.mxu0 %v16907_v8  ;;  %v18914_v8 = vmul.f32 %v18894_v7, %v18894_v7 }
 0x769   :  { %8923 = vmatpush1.bf16.msra.mxu1 %v16910_v19  ;;  %6614 = vrot.lane.b32.xlu1 %v18848_v4, %s18066_s22  ;;  %v16960_v19 = vld [vmem:[#allocation6 + $0x364] ss:$16 sps:$4 sm:$0xff]  }
 0x76a   :  { %6723 = vrot.lane.b32.xlu0 %v18860_v37, %s18071_s6  ;;  %8881 = vmatprep.subr.bf16.mxu0 %v16915_v44  ;;  %v16955_v44 = vld [vmem:[#allocation6 + $0x160] ss:$16 sps:$4 sm:$0xff]  }
 0x76b   :  { %8924 = vmatprep.subr.bf16.mxu1 %v16918_v6  ;;  %v16958_v6 = vld [vmem:[#allocation6 + $0x360] ss:$16 sps:$4 sm:$0xff]  }
 0x76c   :  { %8882 = vmatpush1.bf16.msra.mxu0 %v16913_v39  ;;  %v16963_v39 = vld [vmem:[#allocation6 + $0x144] ss:$16 sps:$4 sm:$0xff]  }
 0x76d   :  { %8925 = vmatpush1.bf16.msra.mxu1 %v16916_v59  ;;  %6725 = vrot.lane.b32.xlu1 %v18868_v40, %s18071_s6  ;;  %v16966_v59 = vld [vmem:[#allocation6 + $0x344] ss:$16 sps:$4 sm:$0xff]  }
 0x76e   :  { %6731 = vrot.lane.b32.xlu0 %v18860_v37, %s18070_s4  ;;  %8883 = vmatprep.subr.bf16.mxu0 %v16921_v21  ;;  %v16961_v21 = vld [vmem:[#allocation6 + $0x140] ss:$16 sps:$4 sm:$0xff]  }
 0x76f   :  { %8926 = vmatprep.subr.bf16.mxu1 %v16924_v26  ;;  %v16964_v26 = vld [vmem:[#allocation6 + $0x340] ss:$16 sps:$4 sm:$0xff]  }
 0x770   :  { %8884 = vmatpush1.bf16.msra.mxu0 %v16919_v30  ;;  %v16972_v30 = vld [vmem:[#allocation6 + $0x324] ss:$16 sps:$4 sm:$0xff]  }
 0x771   :  { %8927 = vmatpush1.bf16.msra.mxu1 %v16922_v34  ;;  %6733 = vrot.lane.b32.xlu1 %v18868_v40, %s18070_s4  ;;  %v16967_v34 = vld [vmem:[#allocation6 + $0x120] ss:$16 sps:$4 sm:$0xff]  }
 0x772   :  { %6739 = vrot.lane.b32.xlu0 %v18860_v37, %s18066_s22  ;;  %8885 = vmatprep.subr.bf16.mxu0 %v16927_v35  ;;  %v16975_v35 = vld [vmem:[#allocation6 + $0x104] ss:$16 sps:$4 sm:$0xff]  }
 0x773   :  { %8928 = vmatprep.subr.bf16.mxu1 %v16930_v47  ;;  %v16973_v47 = vld [vmem:[#allocation6 + $0x100] ss:$16 sps:$4 sm:$0xff]  }
 0x774   :  { %8886 = vmatpush1.bf16.msra.mxu0 %v16925_v51  ;;  %v16979_v51 = vld [vmem:[#allocation6 + $0xe8] ss:$16 sps:$4 sm:$0xff]  }
 0x775   :  { %8929 = vmatpush1.bf16.msra.mxu1 %v16928_v36  ;;  %6741 = vrot.lane.b32.xlu1 %v18868_v40, %s18066_s22  ;;  %v16987_v36 = vld [vmem:[#allocation6 + $0xcc] ss:$16 sps:$4 sm:$0xff]  }
 0x776   :  { %6624 = vrot.lane.b32.xlu0 %v18887_v18, %s18071_s6  ;;  %8887 = vmatprep.subr.bf16.mxu0 %v16933_v49  ;;  %v16990_v49 = vld [vmem:[#allocation6 + $0x2cc] ss:$16 sps:$4 sm:$0xff]  }
 0x777   :  { %8930 = vmatprep.subr.bf16.mxu1 %v16936_v63  ;;  %v16985_v63 = vld [vmem:[#allocation6 + $0xc8] ss:$16 sps:$4 sm:$0xff]  }
 0x778   :  { %8888 = vmatpush2.bf16.msra.mxu0 %v16931_v13 }
 0x779   :  { %8931 = vmatpush2.bf16.msra.mxu1 %v16934_v48  ;;  %6626 = vrot.lane.b32.xlu1 %v18894_v7, %s18071_s6  ;;  %v16988_v48 = vld [vmem:[#allocation6 + $0x2c8] ss:$16 sps:$4 sm:$0xff]  }
 0x77a   :  { %6632 = vrot.lane.b32.xlu0 %v18887_v18, %s18070_s4  ;;  %8889 = vmatprep.subr.bf16.mxu0 %v16939_v2 }
 0x77b   :  { %8932 = vmatprep.subr.bf16.mxu1 %v16942_v24  ;;  %v16993_v24 = vld [vmem:[#allocation6 + $0xac] ss:$16 sps:$4 sm:$0xff]  }
 0x77c   :  { %8890 = vmatpush2.bf16.msra.mxu0 %v16937_v55  ;;  %v16996_v55 = vld [vmem:[#allocation6 + $0x2ac] ss:$16 sps:$4 sm:$0xff]  }
 0x77d   :  { %8933 = vmatpush2.bf16.msra.mxu1 %v16940_v10  ;;  %6634 = vrot.lane.b32.xlu1 %v18894_v7, %s18070_s4 }
 0x77e   :  { %6640 = vrot.lane.b32.xlu0 %v18887_v18, %s18066_s22  ;;  %8891 = vmatprep.subr.bf16.mxu0 %v16945_v41 }
 0x77f   :  { %8934 = vmatprep.subr.bf16.mxu1 %v16948_v50 }
 0x780   :  { %8892 = vmatpush2.bf16.msra.mxu0 %v16943_v31  ;;  %v16991_v31 = vld [vmem:[#allocation6 + $0xa8] ss:$16 sps:$4 sm:$0xff]  }
 0x781   :  { %8935 = vmatpush2.bf16.msra.mxu1 %v16946_v38  ;;  %6642 = vrot.lane.b32.xlu1 %v18894_v7, %s18066_s22 }
 0x782   :  { %6751 = vrot.lane.b32.xlu0 %v18906_v3, %s18071_s6  ;;  %8893 = vmatprep.subr.bf16.mxu0 %v16951_v28 }
 0x783   :  { %8936 = vmatprep.subr.bf16.mxu1 %v16954_v1  ;;  %v17002_v1 = vld [vmem:[#allocation6 + $0x28c] ss:$16 sps:$4 sm:$0xff]  }
 0x784   :  { %8894 = vmatpush2.bf16.msra.mxu0 %v16949_v52  ;;  %v17000_v52 = vld [vmem:[#allocation6 + $0x288] ss:$16 sps:$4 sm:$0xff]  }
 0x785   :  { %8937 = vmatpush2.bf16.msra.mxu1 %v16952_v60  ;;  %6753 = vrot.lane.b32.xlu1 %v18914_v8, %s18071_s6  ;;  %v17005_v60 = vld [vmem:[#allocation6 + $0x6c] ss:$16 sps:$4 sm:$0xff]  }
 0x786   :  { %6759 = vrot.lane.b32.xlu0 %v18906_v3, %s18070_s4  ;;  %8895 = vmatprep.subr.bf16.mxu0 %v16957_v57  ;;  %v17008_v57 = vld [vmem:[#allocation6 + $0x26c] ss:$16 sps:$4 sm:$0xff]  }
 0x787   :  { %8938 = vmatprep.subr.bf16.mxu1 %v16960_v19  ;;  %v17003_v19 = vld [vmem:[#allocation6 + $0x68] ss:$16 sps:$4 sm:$0xff]  }
 0x788   :  { %8896 = vmatpush2.bf16.msra.mxu0 %v16955_v44  ;;  %v17011_v44 = vld [vmem:[#allocation6 + $0x4c] ss:$16 sps:$4 sm:$0xff]  }
 0x789   :  { %8939 = vmatpush2.bf16.msra.mxu1 %v16958_v6  ;;  %6761 = vrot.lane.b32.xlu1 %v18914_v8, %s18070_s4 }
 0x78a   :  { %6767 = vrot.lane.b32.xlu0 %v18906_v3, %s18066_s22  ;;  %8897 = vmatprep.subr.bf16.mxu0 %v16963_v39  ;;  %v17014_v39 = vld [vmem:[#allocation6 + $0x24c] ss:$16 sps:$4 sm:$0xff]  }
 0x78b   :  { %8940 = vmatprep.subr.bf16.mxu1 %v16966_v59  ;;  %v17009_v59 = vld [vmem:[#allocation6 + $0x48] ss:$16 sps:$4 sm:$0xff]  }
 0x78c   :  { %8898 = vmatpush2.bf16.msra.mxu0 %v16961_v21  ;;  %v17012_v21 = vld [vmem:[#allocation6 + $0x248] ss:$16 sps:$4 sm:$0xff]  }
 0x78d   :  { %8941 = vmatpush2.bf16.msra.mxu1 %v16964_v26  ;;  %6769 = vrot.lane.b32.xlu1 %v18914_v8, %s18066_s22  ;;  %v17017_v26 = vld [vmem:[#allocation6 + $0x2c] ss:$16 sps:$4 sm:$0xff]  }
 0x78e   :  { %8899 = vmatprep.subr.bf16.mxu0 %v16969_v17  ;;  %8942 = vmatprep.subr.bf16.mxu1 %v16972_v30  ;;  %v17020_v17 = vld [vmem:[#allocation6 + $0x22c] ss:$16 sps:$4 sm:$0xff]  }
 0x790   :  { %8900 = vmatpush2.bf16.msra.mxu0 %v16967_v34  ;;  %v17015_v34 = vld [vmem:[#allocation6 + $0x28] ss:$16 sps:$4 sm:$0xff]  }
 0x791   :  { %8943 = vmatpush2.bf16.msra.mxu1 %v16970_v29  ;;  %8901 = vmatprep.subr.bf16.mxu0 %v16975_v35  ;;  %v17018_v29 = vld [vmem:[#allocation6 + $0x228] ss:$16 sps:$4 sm:$0xff]   ;;  %v17023_v35 = vld [vmem:[#allocation6 + $0xc] ss:$16 sps:$4 sm:$0xff]  }
 0x792   :  { %8944 = vmatprep.subr.bf16.mxu1 %v16978_v42 }
 0x794   :  { %8902 = vmatpush2.bf16.msra.mxu0 %v16973_v47  ;;  %v17026_v47 = vld [vmem:[#allocation6 + $0x20c] ss:$16 sps:$4 sm:$0xff]  }
 0x795   :  { %8945 = vmatpush2.bf16.msra.mxu1 %v16976_v16  ;;  %8957 = vmatprep.subr.bf16.mxu0 %v16981_v0  ;;  %v17021_v16 = vld [vmem:[#allocation6 + $0x8] ss:$16 sps:$4 sm:$0xff]  }
 0x796   :  { %9000 = vmatprep.subr.bf16.mxu1 %v16984_v15 }
 0x797   :  { %v6532_v43 = vpop.f32.mrf.mxu0  ;;  %8904 = vmatmul.mubr.bf16.vlgmr.msra.gmra.mxu0 %v18770_v53 }
 0x798   :  { %v6575_v20 = vpop.f32.mrf.mxu1  ;;  %8947 = vmatmul.mubr.bf16.vlgmr.msra.gmra.mxu1 %v18776_v5  ;;  %8958 = vmatpush1.bf16.msra.mxu0 %v16979_v51  ;;  %v17024_v51 = vld [vmem:[#allocation6 + $0x208] ss:$16 sps:$4 sm:$0xff]  }
 0x799   :  { %v6576_v13 = vadd.f32 %v6575_v20, %v6532_v43  ;;  %8989 = vmatprep.mubr.bf16.mxu0 %v18734_v22  ;;  %9001 = vmatpush1.bf16.msra.mxu1 %v16982_v54  ;;  %v6534_v62 = vpop.f32.mrf.mxu0  ;;  %v16994_v22 = vld [vmem:[#allocation6 + $0x2a8] ss:$16 sps:$4 sm:$0xff]   ;;  %v17029_v54 = vld [vmem:[#allocation6 + $0x1ec] ss:$16 sps:$4 sm:$0xff]  }
 0x79a   :  { %9032 = vmatprep.mubr.bf16.mxu1 %v18742_v58  ;;  %v6577_v2 = vpop.f32.mrf.mxu1  ;;  %8959 = vmatprep.subr.bf16.mxu0 %v16987_v36  ;;  %v16999_v58 = vld [vmem:[#allocation6 + $0x8c] ss:$16 sps:$4 sm:$0xff]   ;;  %v17027_v20 = vld [vmem:[#allocation6 + $0x1e8] ss:$16 sps:$4 sm:$0xff]  }
 0x79b   :  { %v18931_v10 = vadd.f32 %v6576_v13, %v18816_v45  ;;  %v6536_v41 = vpop.f32.mrf.mxu0  ;;  %9002 = vmatprep.subr.bf16.mxu1 %v16990_v49  ;;  %v16997_v45 = vld [vmem:[#allocation6 + $0x88] ss:$16 sps:$4 sm:$0xff]   ;;  %v6578_v42 = vadd.f32 %v6577_v2, %v6534_v62  ;;  %v17032_v43 = vld [vmem:[#allocation6 + $0x3ec] ss:$16 sps:$4 sm:$0xff]  }
 0x79c   :  { %v6579_v50 = vpop.f32.mrf.mxu1  ;;  %8960 = vmatpush1.bf16.msra.mxu0 %v16985_v63  ;;  %v17030_v63 = vld [vmem:[#allocation6 + $0x3e8] ss:$16 sps:$4 sm:$0xff]   ;;  %v17035_v13 = vld [vmem:[#allocation6 + $0x1cc] ss:$16 sps:$4 sm:$0xff]  }
 0x79d   :  { %v6580_v38 = vadd.f32 %v6579_v50, %v6536_v41  ;;  %9003 = vmatpush1.bf16.msra.mxu1 %v16988_v48  ;;  %6652 = vrot.lane.b32.xlu0 %v18931_v10, %s18071_s6  ;;  %v18948_v6 = vmul.f32 %v18931_v10, %v18931_v10  ;;  %v6538_v0 = vpop.f32.mrf.mxu0  ;;  %v18967_v36 = vadd.f32 %v6578_v42, %v18820_v25  ;;  %v17038_v62 = vld [vmem:[#allocation6 + $0x3cc] ss:$16 sps:$4 sm:$0xff]   ;;  %v17033_v48 = vld [vmem:[#allocation6 + $0x1c8] ss:$16 sps:$4 sm:$0xff]   ;;  %v19008_v42 = vld [vmem:[#allocation2 + $0x20] sm:$0xee] }
 0x79e   :  { %8961 = vmatprep.subr.bf16.mxu0 %v16993_v24  ;;  %9004 = vmatprep.subr.bf16.mxu1 %v16996_v55  ;;  %v6581_v15 = vpop.f32.mrf.mxu1  ;;  %v17036_v2 = vld [vmem:[#allocation6 + $0x3c8] ss:$16 sps:$4 sm:$0xff]   ;;  %v17041_v24 = vld [vmem:[#allocation6 + $0x1ac] ss:$16 sps:$4 sm:$0xff]  }
 0x79f   :  { %v18936_v28 = vadd.f32 %v6580_v38, %v18823_v11  ;;  %v17006_v11 = vld [vmem:[#allocation6 + $0x268] ss:$16 sps:$4 sm:$0xff]   ;;  %v6582_v49 = vadd.f32 %v6581_v15, %v6538_v0  ;;  %v17044_v55 = vld [vmem:[#allocation6 + $0x3ac] ss:$16 sps:$4 sm:$0xff]  }
 0x7a0   :  { %8962 = vmatpush1.bf16.msra.mxu0 %v16991_v31  ;;  %v17039_v41 = vld [vmem:[#allocation6 + $0x1a8] ss:$16 sps:$4 sm:$0xff]   ;;  %v17047_v50 = vld [vmem:[#allocation6 + $0x18c] ss:$16 sps:$4 sm:$0xff]   ;;  %v18986_v31 = vmul.f32 %v18967_v36, %v18967_v36 }
 0x7a1   :  { %19898 = vst [vmem:[#allocation28_spill] sm:$0xff] %v18936_v28  ;;  %9005 = vmatpush1.bf16.msra.mxu1 %v16994_v22  ;;  %6660 = vrot.lane.b32.xlu0 %v18931_v10, %s18070_s4  ;;  %v18956_v30 = vmul.f32 %v18936_v28, %v18936_v28  ;;  %v18974_v25 = vadd.f32 %v6582_v49, %v18826_v61  ;;  %v17042_v61 = vld [vmem:[#allocation6 + $0x3a8] ss:$16 sps:$4 sm:$0xff]   ;;  %v17050_v38 = vld [vmem:[#allocation6 + $0x38c] ss:$16 sps:$4 sm:$0xff]  }
 0x7a2   :  { %6654 = vrot.lane.b32.xlu1 %v18936_v28, %s18071_s6  ;;  %8963 = vmatprep.subr.bf16.mxu0 %v16999_v58  ;;  %v17045_v22 = vld [vmem:[#allocation6 + $0x188] ss:$16 sps:$4 sm:$0xff]  }
 0x7a3   :  { %9006 = vmatprep.subr.bf16.mxu1 %v17002_v1  ;;  %19899 = vst [vmem:[#allocation29_spill] sm:$0xff] %v18974_v25  ;;  %v17048_v58 = vld [vmem:[#allocation6 + $0x388] ss:$16 sps:$4 sm:$0xff]   ;;  %v17053_v1 = vld [vmem:[#allocation6 + $0x16c] ss:$16 sps:$4 sm:$0xff]  }
 0x7a4   :  { %8964 = vmatpush1.bf16.msra.mxu0 %v16997_v45  ;;  %v17056_v45 = vld [vmem:[#allocation6 + $0x36c] ss:$16 sps:$4 sm:$0xff]  }
 0x7a5   :  { %9007 = vmatpush1.bf16.msra.mxu1 %v17000_v52  ;;  %6668 = vrot.lane.b32.xlu0 %v18931_v10, %s18066_s22  ;;  %v18994_v52 = vmul.f32 %v18974_v25, %v18974_v25  ;;  %v19012_v0 = vld [vmem:[#allocation2 + $0x28] sm:$0xff] }
 0x7a6   :  { %6662 = vrot.lane.b32.xlu1 %v18936_v28, %s18070_s4  ;;  %8965 = vmatprep.subr.bf16.mxu0 %v17005_v60  ;;  %v17051_v60 = vld [vmem:[#allocation6 + $0x168] ss:$16 sps:$4 sm:$0xff]  }
 0x7a7   :  { %9008 = vmatprep.subr.bf16.mxu1 %v17008_v57  ;;  %v17054_v57 = vld [vmem:[#allocation6 + $0x368] ss:$16 sps:$4 sm:$0xff]  }
 0x7a8   :  { %8966 = vmatpush1.bf16.msra.mxu0 %v17003_v19  ;;  %v17059_v19 = vld [vmem:[#allocation6 + $0x14c] ss:$16 sps:$4 sm:$0xff]  }
 0x7a9   :  { %9009 = vmatpush1.bf16.msra.mxu1 %v17006_v11  ;;  %6779 = vrot.lane.b32.xlu0 %v18948_v6, %s18071_s6  ;;  %v17062_v11 = vld [vmem:[#allocation6 + $0x34c] ss:$16 sps:$4 sm:$0xff]  }
 0x7aa   :  { %6670 = vrot.lane.b32.xlu1 %v18936_v28, %s18066_s22  ;;  %8967 = vmatprep.subr.bf16.mxu0 %v17011_v44  ;;  %v17057_v44 = vld [vmem:[#allocation6 + $0x148] ss:$16 sps:$4 sm:$0xff]  }
 0x7ab   :  { %9010 = vmatprep.subr.bf16.mxu1 %v17014_v39  ;;  %v17060_v39 = vld [vmem:[#allocation6 + $0x348] ss:$16 sps:$4 sm:$0xff]  }
 0x7ac   :  { %8968 = vmatpush1.bf16.msra.mxu0 %v17009_v59  ;;  %v17065_v59 = vld [vmem:[#allocation6 + $0x12c] ss:$16 sps:$4 sm:$0xff]  }
 0x7ad   :  { %9011 = vmatpush1.bf16.msra.mxu1 %v17012_v21  ;;  %6787 = vrot.lane.b32.xlu0 %v18948_v6, %s18070_s4  ;;  %v17068_v21 = vld [vmem:[#allocation6 + $0x32c] ss:$16 sps:$4 sm:$0xff]  }
 0x7ae   :  { %6781 = vrot.lane.b32.xlu1 %v18956_v30, %s18071_s6  ;;  %8969 = vmatprep.subr.bf16.mxu0 %v17017_v26  ;;  %v17063_v26 = vld [vmem:[#allocation6 + $0x128] ss:$16 sps:$4 sm:$0xff]  }
 0x7af   :  { %9012 = vmatprep.subr.bf16.mxu1 %v17020_v17  ;;  %v17066_v17 = vld [vmem:[#allocation6 + $0x328] ss:$16 sps:$4 sm:$0xff]  }
 0x7b0   :  { %8970 = vmatpush1.bf16.msra.mxu0 %v17015_v34  ;;  %v17071_v34 = vld [vmem:[#allocation6 + $0x10c] ss:$16 sps:$4 sm:$0xff]  }
 0x7b1   :  { %9013 = vmatpush1.bf16.msra.mxu1 %v17018_v29  ;;  %6795 = vrot.lane.b32.xlu0 %v18948_v6, %s18066_s22  ;;  %v19004_v29 = vld [vmem:[#allocation2 + $0x18] sm:$0xee] }
 0x7b2   :  { %6789 = vrot.lane.b32.xlu1 %v18956_v30, %s18070_s4  ;;  %8971 = vmatprep.subr.bf16.mxu0 %v17023_v35  ;;  %v17074_v35 = vld [vmem:[#allocation6 + $0x30c] ss:$16 sps:$4 sm:$0xff]   ;;  %v14918_v15 = vcombine.high %v19004_v29, %v19012_v0  ;;  %v14917_v46 = vcombine.low %v19004_v29, %v19012_v0  ;;  %v9184_v0 = vrot.slane %v18782_v33, 1 }
 0x7b3   :  { %9014 = vmatprep.subr.bf16.mxu1 %v17026_v47 }
 0x7b4   :  { %8972 = vmatpush1.bf16.msra.mxu0 %v17021_v16  ;;  %v17069_v16 = vld [vmem:[#allocation6 + $0x108] ss:$16 sps:$4 sm:$0xff]   ;;  %v9183_v29 = vrot.slane %v14917_v46, 1 }
 0x7b5   :  { %9015 = vmatpush1.bf16.msra.mxu1 %v17024_v51  ;;  %6680 = vrot.lane.b32.xlu0 %v18967_v36, %s18071_s6  ;;  %v17072_v51 = vld [vmem:[#allocation6 + $0x308] ss:$16 sps:$4 sm:$0xff]  }
 0x7b6   :  { %6797 = vrot.lane.b32.xlu1 %v18956_v30, %s18066_s22  ;;  %8973 = vmatprep.subr.bf16.mxu0 %v17029_v54  ;;  %v17077_v54 = vld [vmem:[#allocation6 + $0x8e4] ss:$16 sps:$4 sm:$0xff]  }
 0x7b7   :  { %9016 = vmatprep.subr.bf16.mxu1 %v17032_v43  ;;  %v19016_v43 = vld [vmem:[#allocation2 + $0x10] sm:$0xff] }
 0x7b8   :  { %8974 = vmatpush2.bf16.msra.mxu0 %v17027_v20  ;;  %v14920_v49 = vcombine.high %v19008_v42, %v19016_v43  ;;  %v17080_v20 = vld [vmem:[#allocation6 + $0xae4] ss:$16 sps:$4 sm:$0xff]  }
 0x7b9   :  { %9017 = vmatpush2.bf16.msra.mxu1 %v17030_v63  ;;  %6688 = vrot.lane.b32.xlu0 %v18967_v36, %s18070_s4 }
 0x7ba   :  { %6682 = vrot.lane.b32.xlu1 %v18974_v25, %s18071_s6  ;;  %8975 = vmatprep.subr.bf16.mxu0 %v17035_v13 }
 0x7bb   :  { %9018 = vmatprep.subr.bf16.mxu1 %v17038_v62  ;;  %v17075_v62 = vld [vmem:[#allocation6 + $0x8e0] ss:$16 sps:$4 sm:$0xff]  }
 0x7bc   :  { %8976 = vmatpush2.bf16.msra.mxu0 %v17033_v48  ;;  %v9186_v48 = vrot.slane %v14918_v15, 1  ;;  %v17109_v15 = vld [vmem:[#allocation6 + $0x844] ss:$16 sps:$4 sm:$0xff]  }
 0x7bd   :  { %9019 = vmatpush2.bf16.msra.mxu1 %v17036_v2  ;;  %6696 = vrot.lane.b32.xlu0 %v18967_v36, %s18066_s22  ;;  %v9187_v2 = vrot.slane %v18746_v32, 1 }
 0x7be   :  { %6690 = vrot.lane.b32.xlu1 %v18974_v25, %s18070_s4  ;;  %8977 = vmatprep.subr.bf16.mxu0 %v17041_v24  ;;  %v17078_v24 = vld [vmem:[#allocation6 + $0xae0] ss:$16 sps:$4 sm:$0xff]  }
 0x7bf   :  { %9020 = vmatprep.subr.bf16.mxu1 %v17044_v55  ;;  %v9192_v55 = vrot.slane %v14920_v49, 1  ;;  %v19033_v32 = vsel %vm2339_vm4, %v9186_v48, %v9187_v2  ;;  %v17115_v48 = vld [vmem:[#allocation6 + $0x824] ss:$16 sps:$4 sm:$0xff]  }
 0x7c0   :  { %8978 = vmatpush2.bf16.msra.mxu0 %v17039_v41  ;;  %v9193_v41 = vrot.slane %v18750_v9, 1  ;;  %v17118_v2 = vld [vmem:[#allocation6 + $0xa24] ss:$16 sps:$4 sm:$0xff]  }
 0x7c1   :  { %9021 = vmatpush2.bf16.msra.mxu1 %v17042_v61  ;;  %6807 = vrot.lane.b32.xlu0 %v18986_v31, %s18071_s6  ;;  %v17085_v61 = vld [vmem:[#allocation6 + $0x8c4] ss:$16 sps:$4 sm:$0xff]  }
 0x7c2   :  { %6698 = vrot.lane.b32.xlu1 %v18974_v25, %s18066_s22  ;;  %8979 = vmatprep.subr.bf16.mxu0 %v17047_v50  ;;  %v19037_v9 = vsel %vm2339_vm4, %v9192_v55, %v9193_v41  ;;  %v17113_v55 = vld [vmem:[#allocation6 + $0x820] ss:$16 sps:$4 sm:$0xff]  }
 0x7c3   :  { %9022 = vmatprep.subr.bf16.mxu1 %v17050_v38  ;;  %v17088_v38 = vld [vmem:[#allocation6 + $0xac4] ss:$16 sps:$4 sm:$0xff]  }
 0x7c4   :  { %8980 = vmatpush2.bf16.msra.mxu0 %v17045_v22 }
 0x7c5   :  { %9023 = vmatpush2.bf16.msra.mxu1 %v17048_v58  ;;  %6815 = vrot.lane.b32.xlu0 %v18986_v31, %s18070_s4  ;;  %v17083_v58 = vld [vmem:[#allocation6 + $0x8c0] ss:$16 sps:$4 sm:$0xff]  }
 0x7c6   :  { %6809 = vrot.lane.b32.xlu1 %v18994_v52, %s18071_s6  ;;  %8981 = vmatprep.subr.bf16.mxu0 %v17053_v1  ;;  %v17086_v1 = vld [vmem:[#allocation6 + $0xac0] ss:$16 sps:$4 sm:$0xff]  }
 0x7c7   :  { %9024 = vmatprep.subr.bf16.mxu1 %v17056_v45  ;;  %v17091_v45 = vld [vmem:[#allocation6 + $0x8a4] ss:$16 sps:$4 sm:$0xff]  }
 0x7c8   :  { %8982 = vmatpush2.bf16.msra.mxu0 %v17051_v60 }
 0x7c9   :  { %9025 = vmatpush2.bf16.msra.mxu1 %v17054_v57  ;;  %6823 = vrot.lane.b32.xlu0 %v18986_v31, %s18066_s22  ;;  %v17089_v57 = vld [vmem:[#allocation6 + $0x8a0] ss:$16 sps:$4 sm:$0xff]  }
 0x7ca   :  { %6817 = vrot.lane.b32.xlu1 %v18994_v52, %s18070_s4  ;;  %8983 = vmatprep.subr.bf16.mxu0 %v17059_v19  ;;  %v17092_v19 = vld [vmem:[#allocation6 + $0xaa0] ss:$16 sps:$4 sm:$0xff]  }
 0x7cb   :  { %9026 = vmatprep.subr.bf16.mxu1 %v17062_v11  ;;  %v17097_v11 = vld [vmem:[#allocation6 + $0x884] ss:$16 sps:$4 sm:$0xff]  }
 0x7cc   :  { %8984 = vmatpush2.bf16.msra.mxu0 %v17057_v44  ;;  %v17100_v44 = vld [vmem:[#allocation6 + $0xa84] ss:$16 sps:$4 sm:$0xff]  }
 0x7cd   :  { %9027 = vmatpush2.bf16.msra.mxu1 %v17060_v39  ;;  %8985 = vmatprep.subr.bf16.mxu0 %v17065_v59  ;;  %v17095_v59 = vld [vmem:[#allocation6 + $0x880] ss:$16 sps:$4 sm:$0xff]  }
 0x7ce   :  { %6825 = vrot.lane.b32.xlu1 %v18994_v52, %s18066_s22  ;;  %9028 = vmatprep.subr.bf16.mxu1 %v17068_v21 }
 0x7cf   :  { %v19010_v47 = vpop.permute.xlu0 %6596 }
 0x7d0   :  { %8986 = vmatpush2.bf16.msra.mxu0 %v17063_v26  ;;  %v17098_v26 = vld [vmem:[#allocation6 + $0xa80] ss:$16 sps:$4 sm:$0xff]  }
 0x7d1   :  { %9029 = vmatpush2.bf16.msra.mxu1 %v17066_v17  ;;  %8987 = vmatprep.subr.bf16.mxu0 %v17071_v34  ;;  %v17103_v17 = vld [vmem:[#allocation6 + $0x864] ss:$16 sps:$4 sm:$0xff]  }
 0x7d2   :  { %9030 = vmatprep.subr.bf16.mxu1 %v17074_v35  ;;  %v17106_v34 = vld [vmem:[#allocation6 + $0xa64] ss:$16 sps:$4 sm:$0xff]   ;;  %v17101_v35 = vld [vmem:[#allocation6 + $0x860] ss:$16 sps:$4 sm:$0xff]  }
 0x7d3   :  { %v19020_v63 = vpop.permute.xlu1 %6598 }
 0x7d4   :  { %v19022_v13 = vpop.permute.xlu0 %6604  ;;  %8988 = vmatpush2.bf16.msra.mxu0 %v17069_v16  ;;  %v17104_v16 = vld [vmem:[#allocation6 + $0xa60] ss:$16 sps:$4 sm:$0xff]  }
 0x7d5   :  { %9031 = vmatpush2.bf16.msra.mxu1 %v17072_v51  ;;  %9839 = vmatprep.subr.bf16.mxu0 %v17077_v54  ;;  %v17112_v54 = vld [vmem:[#allocation6 + $0xa44] ss:$16 sps:$4 sm:$0xff]  }
 0x7d6   :  { %9882 = vmatprep.subr.bf16.mxu1 %v17080_v20  ;;  %v17107_v20 = vld [vmem:[#allocation6 + $0x840] ss:$16 sps:$4 sm:$0xff]  }
 0x7d7   :  { %v19026_v50 = vpop.permute.xlu1 %6606  ;;  %8990 = vmatmul.mubr.bf16.vlgmr.msra.gmra.mxu0 %v18770_v53  ;;  %v17094_v53 = vld [vmem:[#allocation6 + $0xaa4] ss:$16 sps:$4 sm:$0xff]  }
 0x7d8   :  { %v19029_v22 = vpop.permute.xlu0 %6612  ;;  %9033 = vmatmul.mubr.bf16.vlgmr.msra.gmra.mxu1 %v18776_v5  ;;  %9840 = vmatpush1.bf16.msra.mxu0 %v17075_v62  ;;  %v17110_v62 = vld [vmem:[#allocation6 + $0xa40] ss:$16 sps:$4 sm:$0xff]  }
 0x7d9   :  { %9871 = vmatprep.mubr.bf16.mxu0 %v19033_v32  ;;  %9883 = vmatpush1.bf16.msra.mxu1 %v17078_v24 }
 0x7da   :  { %9914 = vmatprep.mubr.bf16.mxu1 %v19037_v9  ;;  %9841 = vmatprep.subr.bf16.mxu0 %v17085_v61  ;;  %v17116_v61 = vld [vmem:[#allocation6 + $0xa20] ss:$16 sps:$4 sm:$0xff]  }
 0x7db   :  { %v19040_v60 = vpop.permute.xlu1 %6614  ;;  %9884 = vmatprep.subr.bf16.mxu1 %v17088_v38  ;;  %v17121_v38 = vld [vmem:[#allocation6 + $0x804] ss:$16 sps:$4 sm:$0xff]  }
 0x7dc   :  { %v19042_v5 = vpop.permute.xlu0 %6723  ;;  %9842 = vmatpush1.bf16.msra.mxu0 %v17083_v58  ;;  %v17124_v58 = vld [vmem:[#allocation6 + $0xa04] ss:$16 sps:$4 sm:$0xff]  }
 0x7dd   :  { %9885 = vmatpush1.bf16.msra.mxu1 %v17086_v1  ;;  %9843 = vmatprep.subr.bf16.mxu0 %v17091_v45  ;;  %v17119_v1 = vld [vmem:[#allocation6 + $0x800] ss:$16 sps:$4 sm:$0xff]  }
 0x7de   :  { %9886 = vmatprep.subr.bf16.mxu1 %v17094_v53  ;;  %v17122_v45 = vld [vmem:[#allocation6 + $0xa00] ss:$16 sps:$4 sm:$0xff]   ;;  %v17127_v53 = vld [vmem:[#allocation6 + $0x9e4] ss:$16 sps:$4 sm:$0xff]  }
 0x7df   :  { %v19044_v39 = vpop.permute.xlu1 %6725 }
 0x7e0   :  { %9844 = vmatpush1.bf16.msra.mxu0 %v17089_v57  ;;  %v19046_v21 = vpop.permute.xlu0 %6731 }
 0x7e1   :  { %9887 = vmatpush1.bf16.msra.mxu1 %v17092_v19  ;;  %9845 = vmatprep.subr.bf16.mxu0 %v17097_v11  ;;  %v17130_v19 = vld [vmem:[#allocation6 + $0xbe4] ss:$16 sps:$4 sm:$0xff]  }
 0x7e2   :  { %9888 = vmatprep.subr.bf16.mxu1 %v17100_v44  ;;  %v17125_v44 = vld [vmem:[#allocation6 + $0x9e0] ss:$16 sps:$4 sm:$0xff]  }
 0x7e3   :  { %v19048_v51 = vpop.permute.xlu1 %6733 }
 0x7e4   :  { %9846 = vmatpush1.bf16.msra.mxu0 %v17095_v59  ;;  %v19050_v49 = vpop.permute.xlu0 %6739  ;;  %v17128_v59 = vld [vmem:[#allocation6 + $0xbe0] ss:$16 sps:$4 sm:$0xff]  }
 0x7e5   :  { %9889 = vmatpush1.bf16.msra.mxu1 %v17098_v26  ;;  %9847 = vmatprep.subr.bf16.mxu0 %v17103_v17  ;;  %v17133_v26 = vld [vmem:[#allocation6 + $0x9c4] ss:$16 sps:$4 sm:$0xff]  }
 0x7e6   :  { %9890 = vmatprep.subr.bf16.mxu1 %v17106_v34  ;;  %v17136_v17 = vld [vmem:[#allocation6 + $0xbc4] ss:$16 sps:$4 sm:$0xff]  }
 0x7e7   :  { %v19052_v24 = vpop.permute.xlu1 %6741 }
 0x7e8   :  { %9848 = vmatpush1.bf16.msra.mxu0 %v17101_v35  ;;  %v19054_v41 = vpop.permute.xlu0 %6624  ;;  %v17131_v35 = vld [vmem:[#allocation6 + $0x9c0] ss:$16 sps:$4 sm:$0xff]  }
 0x7e9   :  { %9891 = vmatpush1.bf16.msra.mxu1 %v17104_v16  ;;  %9849 = vmatprep.subr.bf16.mxu0 %v17109_v15  ;;  %v17134_v15 = vld [vmem:[#allocation6 + $0xbc0] ss:$16 sps:$4 sm:$0xff]  }
 0x7ea   :  { %9892 = vmatprep.subr.bf16.mxu1 %v17112_v54  ;;  %v17139_v54 = vld [vmem:[#allocation6 + $0x9a4] ss:$16 sps:$4 sm:$0xff]  }
 0x7eb   :  { %v19056_v57 = vpop.permute.xlu1 %6626 }
 0x7ec   :  { %9850 = vmatpush1.bf16.msra.mxu0 %v17107_v20  ;;  %v19058_v11 = vpop.permute.xlu0 %6632  ;;  %v17142_v20 = vld [vmem:[#allocation6 + $0xba4] ss:$16 sps:$4 sm:$0xff]  }
 0x7ed   :  { %9893 = vmatpush1.bf16.msra.mxu1 %v17110_v62  ;;  %9851 = vmatprep.subr.bf16.mxu0 %v17115_v48  ;;  %v17137_v62 = vld [vmem:[#allocation6 + $0x9a0] ss:$16 sps:$4 sm:$0xff]  }
 0x7ee   :  { %9894 = vmatprep.subr.bf16.mxu1 %v17118_v2  ;;  %v17140_v48 = vld [vmem:[#allocation6 + $0xba0] ss:$16 sps:$4 sm:$0xff]   ;;  %v17145_v2 = vld [vmem:[#allocation6 + $0x984] ss:$16 sps:$4 sm:$0xff]  }
 0x7ef   :  { %v19060_v34 = vpop.permute.xlu1 %6634 }
 0x7f0   :  { %9852 = vmatpush1.bf16.msra.mxu0 %v17113_v55  ;;  %v19062_v16 = vpop.permute.xlu0 %6640 }
 0x7f1   :  { %9895 = vmatpush1.bf16.msra.mxu1 %v17116_v61  ;;  %9853 = vmatprep.subr.bf16.mxu0 %v17121_v38  ;;  %v17148_v61 = vld [vmem:[#allocation6 + $0xb84] ss:$16 sps:$4 sm:$0xff]  }
 0x7f2   :  { %9896 = vmatprep.subr.bf16.mxu1 %v17124_v58  ;;  %v17143_v58 = vld [vmem:[#allocation6 + $0x980] ss:$16 sps:$4 sm:$0xff]  }
 0x7f3   :  { %v19064_v55 = vpop.permute.xlu1 %6642 }
 0x7f4   :  { %9854 = vmatpush1.bf16.msra.mxu0 %v17119_v1  ;;  %v19066_v38 = vpop.permute.xlu0 %6751  ;;  %v17146_v1 = vld [vmem:[#allocation6 + $0xb80] ss:$16 sps:$4 sm:$0xff]  }
 0x7f5   :  { %9897 = vmatpush1.bf16.msra.mxu1 %v17122_v45  ;;  %9855 = vmatprep.subr.bf16.mxu0 %v17127_v53  ;;  %v17151_v45 = vld [vmem:[#allocation6 + $0x964] ss:$16 sps:$4 sm:$0xff]  }
 0x7f6   :  { %9898 = vmatprep.subr.bf16.mxu1 %v17130_v19  ;;  %v17154_v53 = vld [vmem:[#allocation6 + $0xb64] ss:$16 sps:$4 sm:$0xff]  }
 0x7f7   :  { %v19068_v19 = vpop.permute.xlu1 %6753 }
 0x7f8   :  { %9856 = vmatpush2.bf16.msra.mxu0 %v17125_v44  ;;  %v17149_v44 = vld [vmem:[#allocation6 + $0x960] ss:$16 sps:$4 sm:$0xff]  }
 0x7f9   :  { %9899 = vmatpush2.bf16.msra.mxu1 %v17128_v59  ;;  %9857 = vmatprep.subr.bf16.mxu0 %v17133_v26  ;;  %v19070_v59 = vpop.permute.xlu0 %6759  ;;  %v17152_v26 = vld [vmem:[#allocation6 + $0xb60] ss:$16 sps:$4 sm:$0xff]  }
 0x7fa   :  { %9900 = vmatprep.subr.bf16.mxu1 %v17136_v17  ;;  %v17157_v17 = vld [vmem:[#allocation6 + $0x944] ss:$16 sps:$4 sm:$0xff]  }
 0x7fc   :  { %9858 = vmatpush2.bf16.msra.mxu0 %v17131_v35  ;;  %v17160_v35 = vld [vmem:[#allocation6 + $0xb44] ss:$16 sps:$4 sm:$0xff]  }
 0x7fd   :  { %9901 = vmatpush2.bf16.msra.mxu1 %v17134_v15  ;;  %9859 = vmatprep.subr.bf16.mxu0 %v17139_v54  ;;  %v17155_v15 = vld [vmem:[#allocation6 + $0x940] ss:$16 sps:$4 sm:$0xff]   ;;  %v19072_v54 = vpop.f32.mrf.mxu0 }
 0x7fe   :  { %9902 = vmatprep.subr.bf16.mxu1 %v17142_v20  ;;  %v17158_v20 = vld [vmem:[#allocation6 + $0xb40] ss:$16 sps:$4 sm:$0xff]  }
 0x800   :  { %9860 = vmatpush2.bf16.msra.mxu0 %v17137_v62  ;;  %v17163_v62 = vld [vmem:[#allocation6 + $0x924] ss:$16 sps:$4 sm:$0xff]  }
 0x801   :  { %9903 = vmatpush2.bf16.msra.mxu1 %v17140_v48  ;;  %9861 = vmatprep.subr.bf16.mxu0 %v17145_v2  ;;  %v19074_v48 = vpop.f32.mrf.mxu1  ;;  %v19076_v2 = vpop.permute.xlu1 %6761 }
 0x802   :  { %9904 = vmatprep.subr.bf16.mxu1 %v17148_v61  ;;  %v17166_v61 = vld [vmem:[#allocation6 + $0xb24] ss:$16 sps:$4 sm:$0xff]  }
 0x804   :  { %9862 = vmatpush2.bf16.msra.mxu0 %v17143_v58  ;;  %v19078_v58 = vpop.permute.xlu0 %6767 }
 0x805   :  { %9905 = vmatpush2.bf16.msra.mxu1 %v17146_v1  ;;  %9863 = vmatprep.subr.bf16.mxu0 %v17151_v45  ;;  %v17161_v1 = vld [vmem:[#allocation6 + $0x920] ss:$16 sps:$4 sm:$0xff]   ;;  %v19080_v45 = vpop.f32.mrf.mxu0 }
 0x806   :  { %9906 = vmatprep.subr.bf16.mxu1 %v17154_v53  ;;  %19900 = vst [vmem:[#allocation30_spill] sm:$0xff] %v19080_v45  ;;  %v17164_v53 = vld [vmem:[#allocation6 + $0xb20] ss:$16 sps:$4 sm:$0xff]  }
 0x808   :  { %9864 = vmatpush2.bf16.msra.mxu0 %v17149_v44  ;;  %v17169_v44 = vld [vmem:[#allocation6 + $0x904] ss:$16 sps:$4 sm:$0xff]  }
 0x809   :  { %9907 = vmatpush2.bf16.msra.mxu1 %v17152_v26  ;;  %9865 = vmatprep.subr.bf16.mxu0 %v17157_v17  ;;  %v19082_v26 = vpop.f32.mrf.mxu1  ;;  %v17172_v17 = vld [vmem:[#allocation6 + $0xb04] ss:$16 sps:$4 sm:$0xff]  }
 0x80a   :  { %9908 = vmatprep.subr.bf16.mxu1 %v17160_v35  ;;  %19901 = vst [vmem:[#allocation31_spill] sm:$0xff] %v19082_v26  ;;  %v14919_v35 = vcombine.low %v19008_v42, %v19016_v43  ;;  %v17180_v42 = vld [vmem:[#allocation6 + $0xaec] ss:$16 sps:$4 sm:$0xff]   ;;  %v6603_v43 = vadd.f32 %v19020_v63, %v18848_v4  ;;  %v17178_v63 = vld [vmem:[#allocation6 + $0xae8] ss:$16 sps:$4 sm:$0xff]  }
 0x80b   :  { %v19096_v26 = vpop.f32.mrf.mxu1 }
 0x80c   :  { %9866 = vmatpush2.bf16.msra.mxu0 %v17155_v15  ;;  %v19090_v15 = vpop.permute.xlu1 %6769 }
 0x80d   :  { %9909 = vmatpush2.bf16.msra.mxu1 %v17158_v20  ;;  %9867 = vmatprep.subr.bf16.mxu0 %v17163_v62  ;;  %v6602_v20 = vadd.f32 %v19010_v47, %v18843_v12  ;;  %v19094_v62 = vpop.f32.mrf.mxu0  ;;  %v9189_v47 = vrot.slane %v14919_v35, 1  ;;  %v17175_v12 = vld [vmem:[#allocation6 + $0x8e8] ss:$16 sps:$4 sm:$0xff]   ;;  %v19111_v4 = vpop.f32.mrf.mxu1 }
 0x80e   :  { %9910 = vmatprep.subr.bf16.mxu1 %v17166_v61  ;;  %v17170_v61 = vld [vmem:[#allocation6 + $0xb00] ss:$16 sps:$4 sm:$0xff]   ;;  %19902 = vst [vmem:[#allocation32_spill] sm:$0xff] %v19111_v4 }
 0x80f   :  { %v19086_v27 = vpop.permute.xlu0 %6652  ;;  %v19109_v33 = vpop.f32.mrf.mxu0 }
 0x810   :  { %9868 = vmatpush2.bf16.msra.mxu0 %v17161_v1  ;;  %v6610_v1 = vadd.f32 %v19022_v13, %v6602_v20  ;;  %v19114_v13 = vsel %vm2339_vm4, %v9183_v29, %v9184_v0  ;;  %v17181_v29 = vld [vmem:[#allocation6 + $0x8c8] ss:$16 sps:$4 sm:$0xff]  }
 0x811   :  { %9911 = vmatpush2.bf16.msra.mxu1 %v17164_v53  ;;  %9869 = vmatprep.subr.bf16.mxu0 %v17169_v44  ;;  %v9190_v53 = vrot.slane %v18786_v56, 1  ;;  %v17183_v56 = vld [vmem:[#allocation6 + $0x8cc] ss:$16 sps:$4 sm:$0xff]  }
 0x812   :  { %9912 = vmatprep.subr.bf16.mxu1 %v17172_v17  ;;  %v6611_v17 = vadd.f32 %v19026_v50, %v6603_v43  ;;  %v6618_v46 = vadd.f32 %v19029_v22, %v6610_v1  ;;  %v17186_v22 = vld [vmem:[#allocation6 + $0xacc] ss:$16 sps:$4 sm:$0xff]   ;;  %v17184_v43 = vld [vmem:[#allocation6 + $0xac8] ss:$16 sps:$4 sm:$0xff]  }
 0x813   :  { %v19102_v45 = vpop.permute.xlu0 %6660  ;;  %v19121_v50 = vsel %vm2339_vm4, %v9189_v47, %v9190_v53  ;;  %v17189_v1 = vld [vmem:[#allocation6 + $0x8ac] ss:$16 sps:$4 sm:$0xff]  }
 0x814   :  { %v19105_v44 = vpop.permute.xlu1 %6654  ;;  %9870 = vmatpush2.bf16.msra.mxu0 %v17167_v23  ;;  %v6619_v35 = vadd.f32 %v19040_v60, %v6611_v17  ;;  %v6620_v0 = vadd.f32 %v6618_v46, %v18887_v18  ;;  %v17192_v53 = vld [vmem:[#allocation6 + $0xaac] ss:$16 sps:$4 sm:$0xff]  }
 0x815   :  { %9913 = vmatpush2.bf16.msra.mxu1 %v17170_v61  ;;  %9925 = vmatprep.subr.bf16.mxu0 %v17177_v14 }
 0x816   :  { %9968 = vmatprep.subr.bf16.mxu1 %v17180_v42  ;;  %v6630_v17 = vadd.f32 %v19054_v41, %v6620_v0 }
 0x817   :  { %v19117_v23 = vpop.permute.xlu0 %6668  ;;  %v8175_v20 = vpop.f32.mrf.mxu0  ;;  %9872 = vmatmul.mubr.bf16.vlgmr.msra.gmra.mxu0 %v19114_v13 }
 0x818   :  { %v19123_v14 = vpop.permute.xlu1 %6662  ;;  %v8218_v61 = vpop.f32.mrf.mxu1  ;;  %9915 = vmatmul.mubr.bf16.vlgmr.msra.gmra.mxu1 %v19121_v50  ;;  %9926 = vmatpush1.bf16.msra.mxu0 %v17175_v12  ;;  %v6621_v12 = vadd.f32 %v6619_v35, %v18894_v7 }
 0x819   :  { %v19127_v42 = vadd.f32 %v8218_v61, %v8175_v20  ;;  %9957 = vmatprep.mubr.bf16.mxu0 %v19033_v32  ;;  %9969 = vmatpush1.bf16.msra.mxu1 %v17178_v63  ;;  %v8177_v60 = vpop.f32.mrf.mxu0  ;;  %v6729_v32 = vadd.f32 %v19042_v5, %v18860_v37  ;;  %v17198_v5 = vld [vmem:[#allocation6 + $0xa8c] ss:$16 sps:$4 sm:$0xff]  }
 0x81a   :  { %10000 = vmatprep.mubr.bf16.mxu1 %v19037_v9  ;;  %v8220_v47 = vpop.f32.mrf.mxu1  ;;  %9927 = vmatprep.subr.bf16.mxu0 %v17183_v56  ;;  %v17187_v9 = vld [vmem:[#allocation6 + $0x8a8] ss:$16 sps:$4 sm:$0xff]   ;;  %v6638_v56 = vadd.f32 %v19058_v11, %v6630_v17  ;;  %v6631_v41 = vadd.f32 %v19056_v57, %v6621_v12 }
 0x81b   :  { %v19133_v4 = vadd.f32 %v8220_v47, %v8177_v60  ;;  %v19135_v46 = vpop.permute.xlu0 %6779  ;;  %v8179_v20 = vpop.f32.mrf.mxu0  ;;  %9970 = vmatprep.subr.bf16.mxu1 %v17186_v22  ;;  %v17190_v60 = vld [vmem:[#allocation6 + $0xaa8] ss:$16 sps:$4 sm:$0xff]   ;;  %v17195_v47 = vld [vmem:[#allocation6 + $0x88c] ss:$16 sps:$4 sm:$0xff]   ;;  %v6730_v22 = vadd.f32 %v19044_v39, %v18868_v40 }
 0x81c   :  { %v19139_v63 = vpop.permute.xlu1 %6670  ;;  %v8222_v61 = vpop.f32.mrf.mxu1  ;;  %9928 = vmatpush1.bf16.msra.mxu0 %v17181_v29  ;;  %v6737_v29 = vadd.f32 %v19046_v21, %v6729_v32  ;;  %v6646_v7 = vadd.f32 %v19062_v16, %v6638_v56  ;;  %v6639_v11 = vadd.f32 %v19060_v34, %v6631_v41  ;;  %v17193_v12 = vld [vmem:[#allocation6 + $0x888] ss:$16 sps:$4 sm:$0xff]   ;;  %v17201_v16 = vld [vmem:[#allocation6 + $0x86c] ss:$16 sps:$4 sm:$0xff]  }
 0x81d   :  { %v19143_v0 = vadd.f32 %v8222_v61, %v8179_v20  ;;  %9971 = vmatpush1.bf16.msra.mxu1 %v17184_v43  ;;  %v8181_v35 = vpop.f32.mrf.mxu0  ;;  %9929 = vmatprep.subr.bf16.mxu0 %v17189_v1  ;;  %v6738_v43 = vadd.f32 %v19048_v51, %v6730_v22  ;;  %v17196_v21 = vld [vmem:[#allocation6 + $0xa88] ss:$16 sps:$4 sm:$0xff]  }
 0x81e   :  { %v8224_v37 = vpop.f32.mrf.mxu1  ;;  %9972 = vmatprep.subr.bf16.mxu1 %v17192_v53  ;;  %v6745_v40 = vadd.f32 %v19050_v49, %v6737_v29  ;;  %v6647_v39 = vadd.f32 %v19064_v55, %v6639_v11  ;;  %v17204_v53 = vld [vmem:[#allocation6 + $0xa6c] ss:$16 sps:$4 sm:$0xff]   ;;  %v6648_v20 = vadd.f32 %v6646_v7, %v18931_v10  ;;  %v17199_v61 = vld [vmem:[#allocation6 + $0x868] ss:$16 sps:$4 sm:$0xff]  }
 0x81f   :  { %v19150_v57 = vadd.f32 %v8224_v37, %v8181_v35  ;;  %v19152_v17 = vpop.permute.xlu0 %6787  ;;  %v6746_v34 = vadd.f32 %v19052_v24, %v6738_v43  ;;  %v17202_v56 = vld [vmem:[#allocation6 + $0xa68] ss:$16 sps:$4 sm:$0xff]   ;;  %v17207_v24 = vld [vmem:[#allocation6 + $0x84c] ss:$16 sps:$4 sm:$0xff]  }
 0x820   :  { %v19155_v1 = vpop.permute.xlu1 %6781  ;;  %9930 = vmatpush1.bf16.msra.mxu0 %v17187_v9  ;;  %v6747_v49 = vadd.f32 %v6745_v40, %v18906_v3  ;;  %v6658_v55 = vadd.f32 %v19086_v27, %v6648_v20  ;;  %v6649_v9 = vadd.f32 %v6647_v39, %v18936_v28  ;;  %v17210_v7 = vld [vmem:[#allocation6 + $0xa4c] ss:$16 sps:$4 sm:$0xff]   ;;  %v17205_v37 = vld [vmem:[#allocation6 + $0x848] ss:$16 sps:$4 sm:$0xff]  }
 0x821   :  { %9973 = vmatpush1.bf16.msra.mxu1 %v17190_v60  ;;  %9931 = vmatprep.subr.bf16.mxu0 %v17195_v47  ;;  %v6748_v41 = vadd.f32 %v6746_v34, %v18914_v8  ;;  %v17208_v11 = vld [vmem:[#allocation6 + $0xa48] ss:$16 sps:$4 sm:$0xff]  }
 0x822   :  { %9974 = vmatprep.subr.bf16.mxu1 %v17198_v5  ;;  %v6757_v35 = vadd.f32 %v19066_v38, %v6747_v49  ;;  %v6666_v60 = vadd.f32 %v19102_v45, %v6658_v55  ;;  %v6659_v47 = vadd.f32 %v19105_v44, %v6649_v9  ;;  %v17213_v38 = vld [vmem:[#allocation6 + $0x82c] ss:$16 sps:$4 sm:$0xff]   ;;  %v17214_v39 = vld [vmem:[#allocation6 + $0xa28] ss:$16 sps:$4 sm:$0xff]  }
 0x823   :  { %v19161_v32 = vpop.permute.xlu0 %6795  ;;  %v6758_v3 = vadd.f32 %v19068_v19, %v6748_v41  ;;  %v17216_v44 = vld [vmem:[#allocation6 + $0xa2c] ss:$16 sps:$4 sm:$0xff]   ;;  %v17217_v20 = vld [vmem:[#allocation6 + $0x808] ss:$16 sps:$4 sm:$0xff]  }
 0x824   :  { %v19163_v51 = vpop.permute.xlu1 %6789  ;;  %9932 = vmatpush1.bf16.msra.mxu0 %v17193_v12  ;;  %v6765_v5 = vadd.f32 %v19070_v59, %v6757_v35  ;;  %v6674_v29 = vadd.f32 %v19117_v23, %v6666_v60  ;;  %v6667_v8 = vadd.f32 %v19123_v14, %v6659_v47  ;;  %v17211_v23 = vld [vmem:[#allocation6 + $0x828] ss:$16 sps:$4 sm:$0xff]  }
 0x825   :  { %9975 = vmatpush1.bf16.msra.mxu1 %v17196_v21  ;;  %9933 = vmatprep.subr.bf16.mxu0 %v17201_v16  ;;  %v6766_v45 = vadd.f32 %v19076_v2, %v6758_v3  ;;  %v17219_v21 = vld [vmem:[#allocation6 + $0x80c] ss:$16 sps:$4 sm:$0xff]   ;;  %v17220_v9 = vld [vmem:[#allocation6 + $0xa08] ss:$16 sps:$4 sm:$0xff]  }
 0x826   :  { %9976 = vmatprep.subr.bf16.mxu1 %v17204_v53  ;;  %v6773_v43 = vadd.f32 %v19078_v58, %v6765_v5  ;;  %v6675_v19 = vadd.f32 %v19139_v63, %v6667_v8  ;;  %v6676_v14 = vadd.f32 %v6674_v29, %v18967_v36  ;;  %v17222_v2 = vld [vmem:[#allocation6 + $0xa0c] ss:$16 sps:$4 sm:$0xff]   ;;  %v17223_v47 = vld [vmem:[#allocation6 + $0x9e8] ss:$16 sps:$4 sm:$0xff]  }
 0x827   :  { %v6681_v22 = vpop.permute.xlu0 %6680  ;;  %v6774_v40 = vadd.f32 %v19090_v15, %v6766_v45  ;;  %v17231_v5 = vld [vmem:[#allocation6 + $0x9cc] ss:$16 sps:$4 sm:$0xff]  }
 0x828   :  { %v6798_v27 = vpop.permute.xlu1 %6797  ;;  %9934 = vmatpush1.bf16.msra.mxu0 %v17199_v61  ;;  %v6775_v16 = vadd.f32 %v6773_v43, %v18948_v6  ;;  %v6686_v34 = vadd.f32 %v6681_v22, %v6676_v14  ;;  %v6677_v58 = vadd.f32 %v6675_v19, %v18974_v25  ;;  %v17234_v29 = vld [vmem:[#allocation6 + $0xbcc] ss:$16 sps:$4 sm:$0xff]  }
 0x829   :  { %9977 = vmatpush1.bf16.msra.mxu1 %v17202_v56  ;;  %9935 = vmatprep.subr.bf16.mxu0 %v17207_v24  ;;  %v6776_v53 = vadd.f32 %v6774_v40, %v18956_v30  ;;  %v17225_v56 = vld [vmem:[#allocation6 + $0x9ec] ss:$16 sps:$4 sm:$0xff]  }
 0x82a   :  { %9978 = vmatprep.subr.bf16.mxu1 %v17210_v7  ;;  %v6785_v61 = vadd.f32 %v19135_v46, %v6775_v16  ;;  %v17228_v24 = vld [vmem:[#allocation6 + $0xbec] ss:$16 sps:$4 sm:$0xff]  }
 0x82b   :  { %v6689_v12 = vpop.permute.xlu0 %6688  ;;  %v6786_v41 = vadd.f32 %v19155_v1, %v6776_v53  ;;  %v17237_v43 = vld [vmem:[#allocation6 + $0x9ac] ss:$16 sps:$4 sm:$0xff]  }
 0x82c   :  { %v6683_v59 = vpop.permute.xlu1 %6682  ;;  %9936 = vmatpush1.bf16.msra.mxu0 %v17205_v37  ;;  %v6694_v49 = vadd.f32 %v6689_v12, %v6686_v34  ;;  %v6793_v6 = vadd.f32 %v19152_v17, %v6785_v61  ;;  %v17226_v37 = vld [vmem:[#allocation6 + $0xbe8] ss:$16 sps:$4 sm:$0xff]   ;;  %v17240_v12 = vld [vmem:[#allocation6 + $0xbac] ss:$16 sps:$4 sm:$0xff]  }
 0x82d   :  { %9979 = vmatpush1.bf16.msra.mxu1 %v17208_v11  ;;  %9937 = vmatprep.subr.bf16.mxu0 %v17213_v38  ;;  %v6687_v55 = vadd.f32 %v6683_v59, %v6677_v58  ;;  %v6794_v22 = vadd.f32 %v19163_v51, %v6786_v41  ;;  %v17232_v51 = vld [vmem:[#allocation6 + $0xbc8] ss:$16 sps:$4 sm:$0xff]   ;;  %v17243_v16 = vld [vmem:[#allocation6 + $0x98c] ss:$16 sps:$4 sm:$0xff]  }
 0x82e   :  { %9980 = vmatprep.subr.bf16.mxu1 %v17216_v44  ;;  %v6801_v46 = vadd.f32 %v19161_v32, %v6793_v6  ;;  %v17229_v44 = vld [vmem:[#allocation6 + $0x9c8] ss:$16 sps:$4 sm:$0xff]   ;;  %v17246_v58 = vld [vmem:[#allocation6 + $0xb8c] ss:$16 sps:$4 sm:$0xff]  }
 0x82f   :  { %v6697_v63 = vpop.permute.xlu0 %6696  ;;  %v6802_v17 = vadd.f32 %v6798_v27, %v6794_v22 }
 0x830   :  { %v6691_v15 = vpop.permute.xlu1 %6690  ;;  %9938 = vmatpush1.bf16.msra.mxu0 %v17211_v23  ;;  %v6702_v7 = vadd.f32 %v6697_v63, %v6694_v49  ;;  %v6803_v32 = vadd.f32 %v6801_v46, %v18986_v31  ;;  %v17238_v31 = vld [vmem:[#allocation6 + $0xba8] ss:$16 sps:$4 sm:$0xff]   ;;  %v17258_v46 = vld [vmem:[#allocation6 + $0xb4c] ss:$16 sps:$4 sm:$0xff]  }
 0x831   :  { %9981 = vmatpush1.bf16.msra.mxu1 %v17214_v39  ;;  %9939 = vmatprep.subr.bf16.mxu0 %v17219_v21  ;;  %v6695_v35 = vadd.f32 %v6691_v15, %v6687_v55  ;;  %v6804_v27 = vadd.f32 %v6802_v17, %v18994_v52  ;;  %v17235_v39 = vld [vmem:[#allocation6 + $0x9a8] ss:$16 sps:$4 sm:$0xff]   ;;  %v17249_v55 = vld [vmem:[#allocation6 + $0x96c] ss:$16 sps:$4 sm:$0xff]  }
 0x832   :  { %9982 = vmatprep.subr.bf16.mxu1 %v17222_v2  ;;  %v6704_v1 = vsel %vm3288_vm5, %v6702_v7, 0.0  ;;  %v17241_v52 = vld [vmem:[#allocation6 + $0x988] ss:$16 sps:$4 sm:$0xff]   ;;  %v17264_v17 = vld [vmem:[#allocation6 + $0xb2c] ss:$16 sps:$4 sm:$0xff]  }
 0x833   :  { %v6808_v30 = vpop.permute.xlu0 %6807  ;;  %v17244_v49 = vld [vmem:[#allocation6 + $0xb88] ss:$16 sps:$4 sm:$0xff]  }
 0x834   :  { %v6699_v60 = vpop.permute.xlu1 %6698  ;;  %9940 = vmatpush1.bf16.msra.mxu0 %v17217_v20  ;;  %v6813_v40 = vadd.f32 %v6808_v30, %v6803_v32  ;;  %v17250_v30 = vld [vmem:[#allocation6 + $0xb68] ss:$16 sps:$4 sm:$0xff]  }
 0x835   :  { %v6703_v3 = vadd.f32 %v6699_v60, %v6695_v35  ;;  %9983 = vmatpush1.bf16.msra.mxu1 %v17220_v9  ;;  %9941 = vmatprep.subr.bf16.mxu0 %v17225_v56  ;;  %v17252_v56 = vld [vmem:[#allocation6 + $0xb6c] ss:$16 sps:$4 sm:$0xff]   ;;  %v17247_v35 = vld [vmem:[#allocation6 + $0x968] ss:$16 sps:$4 sm:$0xff]  }
 0x836   :  { %9984 = vmatprep.subr.bf16.mxu1 %v17228_v24  ;;  %v17255_v60 = vld [vmem:[#allocation6 + $0x94c] ss:$16 sps:$4 sm:$0xff]  }
 0x837   :  { %v6705_v8 = vsel %vm3288_vm5, %v6703_v3, 0.0  ;;  %v6816_v11 = vpop.permute.xlu0 %6815  ;;  %v17253_v3 = vld [vmem:[#allocation6 + $0x948] ss:$16 sps:$4 sm:$0xff]  }
 0x838   :  { %v6706_v38 = vadd.f32 %v6705_v8, %v6704_v1  ;;  %v6810_v45 = vpop.permute.xlu1 %6809  ;;  %9942 = vmatpush2.bf16.msra.mxu0 %v17223_v47  ;;  %v6821_v21 = vadd.f32 %v6816_v11, %v6813_v40  ;;  %v17259_v8 = vld [vmem:[#allocation6 + $0x928] ss:$16 sps:$4 sm:$0xff]  }
 0x839   :  { %9985 = vmatpush2.bf16.msra.mxu1 %v17226_v37  ;;  %9943 = vmatprep.subr.bf16.mxu0 %v17231_v5  ;;  %v6814_v2 = vadd.f32 %v6810_v45, %v6804_v27  ;;  %v17256_v37 = vld [vmem:[#allocation6 + $0xb48] ss:$16 sps:$4 sm:$0xff]   ;;  %v17261_v5 = vld [vmem:[#allocation6 + $0x92c] ss:$16 sps:$4 sm:$0xff]  }
 0x83a   :  { %v6707_v19 = vrot.slane %v6706_v38, 4  ;;  %9986 = vmatprep.subr.bf16.mxu1 %v17234_v29  ;;  %v17262_v11 = vld [vmem:[#allocation6 + $0xb28] ss:$16 sps:$4 sm:$0xff]  }
 0x83b   :  { %v6824_v23 = vpop.permute.xlu0 %6823 }
 0x83c   :  { %v6708_v59 = vadd.f32 %v6707_v19, %v6706_v38  ;;  %v6818_v14 = vpop.permute.xlu1 %6817  ;;  %9944 = vmatpush2.bf16.msra.mxu0 %v17229_v44  ;;  %v6829_v63 = vadd.f32 %v6824_v23, %v6821_v21  ;;  %v17267_v38 = vld [vmem:[#allocation6 + $0x90c] ss:$16 sps:$4 sm:$0xff]  }
 0x83d   :  { %9987 = vmatpush2.bf16.msra.mxu1 %v17232_v51  ;;  %9945 = vmatprep.subr.bf16.mxu0 %v17237_v43  ;;  %v6822_v53 = vadd.f32 %v6818_v14, %v6814_v2  ;;  %v17270_v44 = vld [vmem:[#allocation6 + $0xb0c] ss:$16 sps:$4 sm:$0xff]   ;;  %v17265_v51 = vld [vmem:[#allocation6 + $0x908] ss:$16 sps:$4 sm:$0xff]  }
 0x83e   :  { %v6709_v34 = vrot.slane %v6708_v59, 2  ;;  %9988 = vmatprep.subr.bf16.mxu1 %v17240_v12  ;;  %v6831_v24 = vsel %vm3288_vm5, %v6829_v63, 0.0  ;;  %v17268_v43 = vld [vmem:[#allocation6 + $0xb08] ss:$16 sps:$4 sm:$0xff]  }
 0x840   :  { %v6710_v15 = vadd.f32 %v6709_v34, %v6708_v59  ;;  %v6826_v20 = vpop.permute.xlu1 %6825  ;;  %9946 = vmatpush2.bf16.msra.mxu0 %v17235_v39 }
 0x841   :  { %v6830_v61 = vadd.f32 %v6826_v20, %v6822_v53  ;;  %9989 = vmatpush2.bf16.msra.mxu1 %v17238_v31  ;;  %9947 = vmatprep.subr.bf16.mxu0 %v17243_v16 }
 0x842   :  { %9990 = vmatprep.subr.bf16.mxu1 %v17246_v58  ;;  %v6711_v9 = vrot.slane %v6710_v15, 1 }
 0x843   :  { %v6832_v6 = vsel %vm3288_vm5, %v6830_v61, 0.0 }
 0x844   :  { %v6833_v41 = vadd.f32 %v6832_v6, %v6831_v24  ;;  %9948 = vmatpush2.bf16.msra.mxu0 %v17241_v52  ;;  %v6712_v7 = vadd.f32 %v6711_v9, %v6710_v15 }
 0x845   :  { %9991 = vmatpush2.bf16.msra.mxu1 %v17244_v49  ;;  %9949 = vmatprep.subr.bf16.mxu0 %v17249_v55 }
 0x846   :  { %v6834_v47 = vrot.slane %v6833_v41, 4  ;;  %6879 = vrot.lane.b32.xlu0 %v6712_v7, %s18072_s27  ;;  %9992 = vmatprep.subr.bf16.mxu1 %v17252_v56  ;;  %v6840_v19 = vsel %vm3425_vm6, %v6712_v7, 0.0  ;;  %v8133_v56 = vadd.f32 %v19074_v48, %v19072_v54 }
 0x848   :  { %v6835_v22 = vadd.f32 %v6834_v47, %v6833_v41  ;;  %9950 = vmatpush2.bf16.msra.mxu0 %v17247_v35 }
 0x849   :  { %9993 = vmatpush2.bf16.msra.mxu1 %v17250_v30  ;;  %9951 = vmatprep.subr.bf16.mxu0 %v17255_v60 }
 0x84a   :  { %v6836_v29 = vrot.slane %v6835_v22, 2  ;;  %9994 = vmatprep.subr.bf16.mxu1 %v17258_v46 }
 0x84c   :  { %v6837_v1 = vadd.f32 %v6836_v29, %v6835_v22  ;;  %9952 = vmatpush2.bf16.msra.mxu0 %v17253_v3 }
 0x84d   :  { %9995 = vmatpush2.bf16.msra.mxu1 %v17256_v37  ;;  %9953 = vmatprep.subr.bf16.mxu0 %v17261_v5  ;;  %v19904_v37 = vld [vmem:[#allocation31_spill] sm:$0xff] }
 0x84e   :  { %9996 = vmatprep.subr.bf16.mxu1 %v17264_v17  ;;  %v6838_v45 = vrot.slane %v6837_v1, 1 }
 0x850   :  { %9954 = vmatpush2.bf16.msra.mxu0 %v17259_v8  ;;  %v6839_v32 = vadd.f32 %v6838_v45, %v6837_v1  ;;  %v19905_v8 = vld [vmem:[#allocation32_spill] sm:$0xff] }
 0x851   :  { %9997 = vmatpush2.bf16.msra.mxu1 %v17262_v11  ;;  %9955 = vmatprep.subr.bf16.mxu0 %v17267_v38  ;;  %v8139_v11 = vadd.f32 %v19905_v8, %v19109_v33 }
 0x852   :  { %6896 = vrot.lane.b32.xlu1 %v6839_v32, %s18072_s27  ;;  %9998 = vmatprep.subr.bf16.mxu1 %v17270_v44  ;;  %v6853_v12 = vsel %vm3425_vm6, %v6839_v32, 0.0 }
 0x854   :  { %9956 = vmatpush2.bf16.msra.mxu0 %v17265_v51 }
 0x855   :  { %9999 = vmatpush2.bf16.msra.mxu1 %v17268_v43 }
 0x857   :  { %9958 = vmatmul.mubr.bf16.vlgmr.msra.gmra.mxu0 %v19114_v13  ;;  %v8905_v40 = vpop.f32.mrf.mxu0 }
 0x858   :  { %10001 = vmatmul.mubr.bf16.vlgmr.msra.gmra.mxu1 %v19121_v50  ;;  %v8948_v27 = vpop.f32.mrf.mxu1  ;;  %v8906_v24 = vadd.f32 %v8905_v40, %v8133_v56 }
 0x859   :  { %v8907_v59 = vpop.f32.mrf.mxu0 }
 0x85a   :  { %v8950_v23 = vpop.f32.mrf.mxu1  ;;  %v8949_v7 = vadd.f32 %v8948_v27, %v8906_v24 }
 0x85b   :  { %v8909_v14 = vpop.f32.mrf.mxu0 }
 0x85c   :  { %v8952_v39 = vpop.f32.mrf.mxu1 }
 0x85d   :  { %v8911_v21 = vpop.f32.mrf.mxu0 }
 0x85e   :  { %v8954_v2 = vpop.f32.mrf.mxu1  ;;  %v8912_v43 = vadd.f32 %v8911_v21, %v8139_v11 }
 0x865   :  { %6841 = vadd.xlane.f32.xlu0 %v6840_v19 }
 0x876   :  { %6854 = vadd.xlane.f32.xlu1 %v6853_v12 }
 0x897   :  { %v8991_v31 = vpop.f32.mrf.mxu0 }
 0x898   :  { %v8992_v16 = vadd.f32 %v8991_v31, %v19127_v42  ;;  %v9034_v13 = vpop.f32.mrf.mxu1 }
 0x899   :  { %v8993_v34 = vpop.f32.mrf.mxu0 }
 0x89a   :  { %v19202_v50 = vadd.f32 %v9034_v13, %v8992_v16  ;;  %v8994_v58 = vadd.f32 %v8993_v34, %v19133_v4  ;;  %v9036_v63 = vpop.f32.mrf.mxu1  ;;  %v8137_v4 = vadd.f32 %v19096_v26, %v19094_v62  ;;  %v19903_v62 = vld [vmem:[#allocation30_spill] sm:$0xff] }
 0x89b   :  { %v8995_v53 = vpop.f32.mrf.mxu0  ;;  %v8135_v5 = vadd.f32 %v19904_v37, %v19903_v62 }
 0x89c   :  { %v19205_v15 = vadd.f32 %v9036_v63, %v8994_v58  ;;  %v8996_v20 = vadd.f32 %v8995_v53, %v19143_v0  ;;  %v9038_v52 = vpop.f32.mrf.mxu1  ;;  %v8910_v0 = vadd.f32 %v8909_v14, %v8137_v4 }
 0x89d   :  { %v8997_v61 = vpop.f32.mrf.mxu0  ;;  %v8908_v17 = vadd.f32 %v8907_v59, %v8135_v5  ;;  %v8955_v59 = vadd.f32 %v8954_v2, %v8912_v43 }
 0x89e   :  { %v19208_v49 = vadd.f32 %v9038_v52, %v8996_v20  ;;  %v8998_v55 = vadd.f32 %v8997_v61, %v19150_v57  ;;  %v9040_v9 = vpop.f32.mrf.mxu1  ;;  %v8953_v22 = vadd.f32 %v8952_v39, %v8910_v0 }
 0x89f   :  { %v8951_v51 = vadd.f32 %v8950_v23, %v8908_v17 }
 0x8a0   :  { %v19211_v42 = vadd.f32 %v9040_v9, %v8998_v55 }
 0x8b8   :  { %v19239_v26 = vpop.permute.xlu0 %6879 }
 0x8c4   :  { %v19269_v21 = vpop.permute.xlu1 %6896 }
 0x8d7   :  { %v9873_v6 = vpop.f32.mrf.mxu0 }
 0x8d8   :  { %v9916_v41 = vpop.f32.mrf.mxu1 }
 0x8d9   :  { %v9917_v35 = vadd.f32 %v9916_v41, %v9873_v6  ;;  %v9875_v30 = vpop.f32.mrf.mxu0 }
 0x8da   :  { %v9918_v60 = vpop.f32.mrf.mxu1 }
 0x8db   :  { %v19217_v47 = vadd.f32 %v9917_v35, %v8949_v7  ;;  %v9877_v57 = vpop.f32.mrf.mxu0  ;;  %v9919_v38 = vadd.f32 %v9918_v60, %v9875_v30 }
 0x8dc   :  { %v9920_v46 = vpop.f32.mrf.mxu1 }
 0x8dd   :  { %v9921_v3 = vadd.f32 %v9920_v46, %v9877_v57  ;;  %10023 = vrot.lane.b32.xlu0 %v19217_v47, %s18071_s6  ;;  %v19233_v48 = vmul.f32 %v19217_v47, %v19217_v47  ;;  %v9879_v44 = vpop.f32.mrf.mxu0  ;;  %v19257_v12 = vadd.f32 %v9919_v38, %v8951_v51 }
 0x8de   :  { %v9922_v32 = vpop.f32.mrf.mxu1 }
 0x8df   :  { %v19221_v54 = vadd.f32 %v9921_v3, %v8953_v22  ;;  %v9923_v40 = vadd.f32 %v9922_v32, %v9879_v44  ;;  %v19277_v31 = vmul.f32 %v19257_v12, %v19257_v12  ;;  %v6882_v44 = vsel %vm3425_vm6, %v19239_v26, 0.0 }
 0x8e1   :  { %10025 = vrot.lane.b32.xlu1 %v19221_v54, %s18071_s6  ;;  %10031 = vrot.lane.b32.xlu0 %v19217_v47, %s18070_s4  ;;  %v19245_v29 = vmul.f32 %v19221_v54, %v19221_v54  ;;  %v19263_v23 = vadd.f32 %v9923_v40, %v8955_v59  ;;  %v6899_v59 = vsel %vm3425_vm6, %v19269_v21, 0.0 }
 0x8e3   :  { %v19285_v34 = vmul.f32 %v19263_v23, %v19263_v23 }
 0x8e5   :  { %10033 = vrot.lane.b32.xlu1 %v19221_v54, %s18070_s4  ;;  %10039 = vrot.lane.b32.xlu0 %v19217_v47, %s18066_s22 }
 0x8e9   :  { %10041 = vrot.lane.b32.xlu1 %v19221_v54, %s18066_s22  ;;  %10150 = vrot.lane.b32.xlu0 %v19233_v48, %s18071_s6 }
 0x8ed   :  { %10152 = vrot.lane.b32.xlu1 %v19245_v29, %s18071_s6  ;;  %10158 = vrot.lane.b32.xlu0 %v19233_v48, %s18070_s4 }
 0x8ee   :  { %v6842_v1 = vpop.xlane.xlu0 %6841 }
 0x8ef   :  { %v6843_v45 = vrot.slane %v6842_v1, 4 }
 0x8f1   :  { %v6844_v19 = vadd.f32 %v6843_v45, %v6842_v1  ;;  %10160 = vrot.lane.b32.xlu1 %v19245_v29, %s18070_s4  ;;  %10166 = vrot.lane.b32.xlu0 %v19233_v48, %s18066_s22 }
 0x8f3   :  { %v6845_v27 = vrot.slane %v6844_v19, 2 }
 0x8f5   :  { %10168 = vrot.lane.b32.xlu1 %v19245_v29, %s18066_s22  ;;  %10051 = vrot.lane.b32.xlu0 %v19257_v12, %s18071_s6  ;;  %v6846_v33 = vadd.f32 %v6845_v27, %v6844_v19 }
 0x8f7   :  { %v6847_v14 = vrot.slane %v6846_v33, 1 }
 0x8f9   :  { %10053 = vrot.lane.b32.xlu1 %v19263_v23, %s18071_s6  ;;  %10059 = vrot.lane.b32.xlu0 %v19257_v12, %s18070_s4  ;;  %v6848_v39 = vadd.f32 %v6847_v14, %v6846_v33 }
 0x8fb   :  { %15477 = vpush %v6848_v39 }
 0x8fd   :  { %10061 = vrot.lane.b32.xlu1 %v19263_v23, %s18070_s4  ;;  %10067 = vrot.lane.b32.xlu0 %v19257_v12, %s18066_s22 }
 0x8ff   :  { %v6855_v2 = vpop.xlane.xlu1 %6854 }
 0x900   :  { %v6856_v16 = vrot.slane %v6855_v2, 4 }
 0x901   :  { %10069 = vrot.lane.b32.xlu1 %v19263_v23, %s18066_s22  ;;  %10178 = vrot.lane.b32.xlu0 %v19277_v31, %s18071_s6 }
 0x902   :  { %v6857_v13 = vadd.f32 %v6856_v16, %v6855_v2 }
 0x904   :  { %v6858_v58 = vrot.slane %v6857_v13, 2 }
 0x905   :  { %10180 = vrot.lane.b32.xlu1 %v19285_v34, %s18071_s6  ;;  %10186 = vrot.lane.b32.xlu0 %v19277_v31, %s18070_s4 }
 0x906   :  { %v6859_v63 = vadd.f32 %v6858_v58, %v6857_v13 }
 0x908   :  { %v6860_v53 = vrot.slane %v6859_v63, 1 }
 0x909   :  { %10188 = vrot.lane.b32.xlu1 %v19285_v34, %s18070_s4  ;;  %10194 = vrot.lane.b32.xlu0 %v19277_v31, %s18066_s22 }
 0x90a   :  { %v6861_v20 = vadd.f32 %v6860_v53, %v6859_v63 }
 0x90c   :  { %15479 = vpush %v6861_v20 }
 0x90d   :  { %10196 = vrot.lane.b32.xlu1 %v19285_v34, %s18066_s22 }
 0x917   :  { %v9959_v52 = vpop.f32.mrf.mxu0 }
 0x918   :  { %v10002_v61 = vpop.f32.mrf.mxu1 }
 0x919   :  { %v10003_v55 = vadd.f32 %v10002_v61, %v9959_v52  ;;  %v9961_v9 = vpop.f32.mrf.mxu0 }
 0x91a   :  { %v10004_v56 = vpop.f32.mrf.mxu1 }
 0x91b   :  { %v19298_v24 = vadd.f32 %v10003_v55, %v19202_v50  ;;  %v9963_v4 = vpop.f32.mrf.mxu0  ;;  %v10005_v0 = vadd.f32 %v10004_v56, %v9961_v9 }
 0x91c   :  { %v10006_v6 = vpop.f32.mrf.mxu1 }
 0x91d   :  { %v10007_v41 = vadd.f32 %v10006_v6, %v9963_v4  ;;  %10079 = vrot.lane.b32.xlu0 %v19298_v24, %s18071_s6  ;;  %v19314_v50 = vadd.f32 %v10005_v0, %v19205_v15  ;;  %v9965_v30 = vpop.f32.mrf.mxu0 }
 0x91e   :  { %v10008_v60 = vpop.f32.mrf.mxu1 }
 0x91f   :  { %v19303_v7 = vadd.f32 %v10007_v41, %v19208_v49  ;;  %v19318_v49 = vmul.f32 %v19298_v24, %v19298_v24  ;;  %v19326_v35 = vmul.f32 %v19314_v50, %v19314_v50  ;;  %v10009_v57 = vadd.f32 %v10008_v60, %v9965_v30 }
 0x921   :  { %10081 = vrot.lane.b32.xlu1 %v19303_v7, %s18071_s6  ;;  %10087 = vrot.lane.b32.xlu0 %v19298_v24, %s18070_s4  ;;  %v19334_v15 = vmul.f32 %v19303_v7, %v19303_v7  ;;  %v19351_v46 = vadd.f32 %v10009_v57, %v19211_v42 }
 0x923   :  { %v19370_v22 = vmul.f32 %v19351_v46, %v19351_v46 }
 0x925   :  { %10089 = vrot.lane.b32.xlu1 %v19303_v7, %s18070_s4  ;;  %10095 = vrot.lane.b32.xlu0 %v19298_v24, %s18066_s22 }
 0x929   :  { %10097 = vrot.lane.b32.xlu1 %v19303_v7, %s18066_s22  ;;  %10206 = vrot.lane.b32.xlu0 %v19318_v49, %s18071_s6 }
 0x92c   :  { %s15478_s13 = spop %15477 }
 0x92d   :  { %10250 = vrot.lane.b32.xlu1 %v19326_v35, %s18066_s22  ;;  %10214 = vrot.lane.b32.xlu0 %v19318_v49, %s18070_s4  ;;  %s19344_s14 = smul.f32 0.00024414063, %s15478_s13 }
 0x92f   :  { %s6866_s15 = smul.f32 %s19344_s14, %s19344_s14 }
 0x931   :  { %10208 = vrot.lane.b32.xlu1 %v19334_v15, %s18071_s6  ;;  %10222 = vrot.lane.b32.xlu0 %v19318_v49, %s18066_s22 }
 0x935   :  { %10216 = vrot.lane.b32.xlu1 %v19334_v15, %s18070_s4  ;;  %10107 = vrot.lane.b32.xlu0 %v19314_v50, %s18071_s6 }
 0x939   :  { %10224 = vrot.lane.b32.xlu1 %v19334_v15, %s18066_s22  ;;  %10115 = vrot.lane.b32.xlu0 %v19314_v50, %s18070_s4 }
 0x93d   :  { %s15480_s2 = spop %15479  ;;  %10109 = vrot.lane.b32.xlu1 %v19351_v46, %s18071_s6  ;;  %10123 = vrot.lane.b32.xlu0 %v19314_v50, %s18066_s22 }
 0x93e   :  { %s6865_s16 = smul.f32 0.00024414063, %s15480_s2 }
 0x940   :  { %s6867_s1 = ssub.f32 %s6865_s16, %s6866_s15 }
 0x941   :  { %10117 = vrot.lane.b32.xlu1 %v19351_v46, %s18070_s4  ;;  %10234 = vrot.lane.b32.xlu0 %v19326_v35, %s18071_s6 }
 0x942   :  { %s6868_s28 = smax.f32 %s18073_s23, %s6867_s1 }
 0x943   :  { %s6869_s17 = sadd.f32 1e-05, %s6868_s28 }
 0x945   :  { %v6870_v42 = vstv %s6869_s17  ;;  %10125 = vrot.lane.b32.xlu1 %v19351_v46, %s18066_s22  ;;  %10242 = vrot.lane.b32.xlu0 %v19326_v35, %s18070_s4 }
 0x946   :  { %17855 = vrsqrt.f32 %v6870_v42 }
 0x949   :  { %10236 = vrot.lane.b32.xlu1 %v19370_v22, %s18071_s6 }
 0x94d   :  { %10244 = vrot.lane.b32.xlu1 %v19370_v22, %s18070_s4 }
 0x94f   :  { %v10024_v3 = vpop.permute.xlu0 %10023 }
 0x950   :  { %v10029_v61 = vadd.f32 %v10024_v3, %v19217_v47 }
 0x951   :  { %10252 = vrot.lane.b32.xlu1 %v19370_v22, %s18066_s22 }
 0x953   :  { %v17856_v62 = vpop.eup %17855  ;;  %v10026_v37 = vpop.permute.xlu1 %10025 }
 0x954   :  { %v10032_v5 = vpop.permute.xlu0 %10031  ;;  %15481 = vpush %v17856_v62  ;;  %v10030_v55 = vadd.f32 %v10026_v37, %v19221_v54 }
 0x955   :  { %v10037_v9 = vadd.f32 %v10032_v5, %v10029_v61 }
 0x957   :  { %v10034_v17 = vpop.permute.xlu1 %10033 }
 0x958   :  { %v10040_v1 = vpop.permute.xlu0 %10039  ;;  %v10038_v4 = vadd.f32 %v10034_v17, %v10030_v55 }
 0x959   :  { %v10045_v6 = vadd.f32 %v10040_v1, %v10037_v9 }
 0x95b   :  { %v10042_v8 = vpop.permute.xlu1 %10041  ;;  %v10047_v60 = vadd.f32 %v10045_v6, %v19257_v12 }
 0x95c   :  { %v10151_v11 = vpop.permute.xlu0 %10150  ;;  %v10046_v41 = vadd.f32 %v10042_v8, %v10038_v4 }
 0x95d   :  { %v10156_v57 = vadd.f32 %v10151_v11, %v19233_v48 }
 0x95e   :  { %v10048_v62 = vadd.f32 %v10046_v41, %v19263_v23 }
 0x95f   :  { %v10153_v38 = vpop.permute.xlu1 %10152 }
 0x960   :  { %v10159_v45 = vpop.permute.xlu0 %10158  ;;  %v10157_v61 = vadd.f32 %v10153_v38, %v19245_v29 }
 0x963   :  { %v10161_v32 = vpop.permute.xlu1 %10160 }
 0x964   :  { %6883 = vadd.xlane.f32.xlu0 %v6882_v44  ;;  %v10167_v51 = vpop.permute.xlu0 %10166  ;;  %v10165_v4 = vadd.f32 %v10161_v32, %v10157_v61 }
 0x967   :  { %v10169_v43 = vpop.permute.xlu1 %10168 }
 0x968   :  { %v10052_v19 = vpop.permute.xlu0 %10051  ;;  %v10173_v25 = vadd.f32 %v10169_v43, %v10165_v4 }
 0x969   :  { %v10057_v42 = vadd.f32 %v10052_v19, %v10047_v60 }
 0x96a   :  { %v10175_v29 = vadd.f32 %v10173_v25, %v19285_v34 }
 0x96b   :  { %v10054_v40 = vpop.permute.xlu1 %10053 }
 0x96c   :  { %v10060_v27 = vpop.permute.xlu0 %10059  ;;  %v10058_v37 = vadd.f32 %v10054_v40, %v10048_v62 }
 0x96d   :  { %v10065_v5 = vadd.f32 %v10060_v27, %v10057_v42 }
 0x96f   :  { %v10062_v33 = vpop.permute.xlu1 %10061 }
 0x970   :  { %v10068_v14 = vpop.permute.xlu0 %10067  ;;  %v10066_v1 = vadd.f32 %v10062_v33, %v10058_v37 }
 0x971   :  { %v10073_v8 = vadd.f32 %v10068_v14, %v10065_v5 }
 0x973   :  { %v10070_v39 = vpop.permute.xlu1 %10069  ;;  %v10075_v11 = vadd.f32 %v10073_v8, %v19298_v24 }
 0x974   :  { %v10179_v2 = vpop.permute.xlu0 %10178  ;;  %v10074_v6 = vadd.f32 %v10070_v39, %v10066_v1 }
 0x975   :  { %6900 = vadd.xlane.f32.xlu1 %v6899_v59  ;;  %v10164_v59 = vadd.f32 %v10159_v45, %v10156_v57 }
 0x976   :  { %v10076_v40 = vadd.f32 %v10074_v6, %v19303_v7 }
 0x977   :  { %v10181_v16 = vpop.permute.xlu1 %10180  ;;  %v10172_v17 = vadd.f32 %v10167_v51, %v10164_v59 }
 0x978   :  { %v10187_v13 = vpop.permute.xlu0 %10186  ;;  %v10185_v32 = vadd.f32 %v10181_v16, %v10175_v29 }
 0x979   :  { %v10174_v48 = vadd.f32 %v10172_v17, %v19277_v31 }
 0x97b   :  { %v10189_v58 = vpop.permute.xlu1 %10188  ;;  %v10184_v60 = vadd.f32 %v10179_v2, %v10174_v48 }
 0x97c   :  { %v10195_v63 = vpop.permute.xlu0 %10194  ;;  %v10193_v31 = vadd.f32 %v10189_v58, %v10185_v32 }
 0x97d   :  { %v10192_v38 = vadd.f32 %v10187_v13, %v10184_v60 }
 0x97f   :  { %v10197_v26 = vpop.permute.xlu1 %10196  ;;  %v10200_v39 = vadd.f32 %v10195_v63, %v10192_v38 }
 0x980   :  { %v10201_v37 = vadd.f32 %v10197_v26, %v10193_v31 }
 0x981   :  { %v10202_v2 = vadd.f32 %v10200_v39, %v19318_v49 }
 0x982   :  { %v10203_v16 = vadd.f32 %v10201_v37, %v19334_v15 }
 0x985   :  { %s19409_s18 = spop %15481 }
 0x98f   :  { %v10080_v53 = vpop.permute.xlu0 %10079 }
 0x990   :  { %v10085_v45 = vadd.f32 %v10080_v53, %v10075_v11 }
 0x993   :  { %v10082_v20 = vpop.permute.xlu1 %10081  ;;  %v10088_v52 = vpop.permute.xlu0 %10087 }
 0x994   :  { %v10086_v51 = vadd.f32 %v10082_v20, %v10076_v40  ;;  %v10093_v27 = vadd.f32 %v10088_v52, %v10085_v45 }
 0x997   :  { %v10090_v56 = vpop.permute.xlu1 %10089  ;;  %v10096_v21 = vpop.permute.xlu0 %10095 }
 0x998   :  { %v10094_v43 = vadd.f32 %v10090_v56, %v10086_v51  ;;  %v10101_v57 = vadd.f32 %v10096_v21, %v10093_v27 }
 0x99a   :  { %v10103_v53 = vadd.f32 %v10101_v57, %v19314_v50 }
 0x99b   :  { %v10098_v0 = vpop.permute.xlu1 %10097  ;;  %v10207_v30 = vpop.permute.xlu0 %10206 }
 0x99c   :  { %v10102_v42 = vadd.f32 %v10098_v0, %v10094_v43  ;;  %v10212_v5 = vadd.f32 %v10207_v30, %v10202_v2 }
 0x99e   :  { %v10104_v34 = vadd.f32 %v10102_v42, %v19351_v46 }
 0x99f   :  { %v19387_v44 = vpop.permute.xlu1 %10250  ;;  %v10215_v3 = vpop.permute.xlu0 %10214 }
 0x9a0   :  { %v10220_v20 = vadd.f32 %v10215_v3, %v10212_v5 }
 0x9a3   :  { %v10209_v55 = vpop.permute.xlu1 %10208  ;;  %v10223_v9 = vpop.permute.xlu0 %10222 }
 0x9a4   :  { %v10213_v58 = vadd.f32 %v10209_v55, %v10203_v16  ;;  %v10228_v21 = vadd.f32 %v10223_v9, %v10220_v20 }
 0x9a6   :  { %v10230_v8 = vadd.f32 %v10228_v21, %v19326_v35 }
 0x9a7   :  { %v10217_v19 = vpop.permute.xlu1 %10216  ;;  %v10108_v41 = vpop.permute.xlu0 %10107 }
 0x9a8   :  { %v10113_v25 = vadd.f32 %v10108_v41, %v10103_v53  ;;  %v10221_v17 = vadd.f32 %v10217_v19, %v10213_v58 }
 0x9ab   :  { %v10225_v33 = vpop.permute.xlu1 %10224  ;;  %v10116_v14 = vpop.permute.xlu0 %10115 }
 0x9ac   :  { %v10121_v63 = vadd.f32 %v10116_v14, %v10113_v25  ;;  %v10229_v1 = vadd.f32 %v10225_v33, %v10221_v17 }
 0x9ae   :  { %v10231_v55 = vadd.f32 %v10229_v1, %v19370_v22 }
 0x9af   :  { %v10110_v62 = vpop.permute.xlu1 %10109  ;;  %v10124_v59 = vpop.permute.xlu0 %10123 }
 0x9b0   :  { %v10114_v52 = vadd.f32 %v10110_v62, %v10104_v34  ;;  %v10129_v0 = vadd.f32 %v10124_v59, %v10121_v63 }
 0x9b2   :  { %v10131_v30 = vsel %vm3288_vm5, %v10129_v0, 0.0 }
 0x9b3   :  { %v10118_v13 = vpop.permute.xlu1 %10117  ;;  %v10235_v56 = vpop.permute.xlu0 %10234 }
 0x9b4   :  { %v10122_v61 = vadd.f32 %v10118_v13, %v10114_v52  ;;  %v10240_v48 = vadd.f32 %v10235_v56, %v10230_v8 }
 0x9b7   :  { %v10126_v26 = vpop.permute.xlu1 %10125  ;;  %v10243_v6 = vpop.permute.xlu0 %10242 }
 0x9b8   :  { %v10130_v49 = vadd.f32 %v10126_v26, %v10122_v61  ;;  %v10248_v41 = vadd.f32 %v10243_v6, %v10240_v48 }
 0x9ba   :  { %v10132_v4 = vsel %vm3288_vm5, %v10130_v49, 0.0  ;;  %v10256_v40 = vadd.f32 %v19387_v44, %v10248_v41 }
 0x9bb   :  { %v10133_v3 = vadd.f32 %v10132_v4, %v10131_v30  ;;  %v10237_v15 = vpop.permute.xlu1 %10236 }
 0x9bc   :  { %v10241_v45 = vadd.f32 %v10237_v15, %v10231_v55  ;;  %v10258_v33 = vsel %vm3288_vm5, %v10256_v40, 0.0  ;;  %v6592_v40 = vld [vmem:[#allocation12] sm:$0x1] }
 0x9bd   :  { %v10134_v11 = vrot.slane %v10133_v3, 4 }
 0x9bf   :  { %v10135_v9 = vadd.f32 %v10134_v11, %v10133_v3  ;;  %v10245_v60 = vpop.permute.xlu1 %10244 }
 0x9c0   :  { %v10249_v29 = vadd.f32 %v10245_v60, %v10241_v45 }
 0x9c1   :  { %v10136_v19 = vrot.slane %v10135_v9, 2 }
 0x9c3   :  { %v10253_v38 = vpop.permute.xlu1 %10252  ;;  %v10137_v51 = vadd.f32 %v10136_v19, %v10135_v9 }
 0x9c4   :  { %v10257_v35 = vadd.f32 %v10253_v38, %v10249_v29  ;;  %v6873_v29 = vstv %s19409_s18 }
 0x9c5   :  { %v10138_v27 = vrot.slane %v10137_v51, 1  ;;  %v19419_v38 = vmul.f32 %v6873_v29, %v6592_v40 }
 0x9c6   :  { %v10259_v14 = vsel %vm3288_vm5, %v10257_v35, 0.0 }
 0x9c7   :  { %v10260_v32 = vadd.f32 %v10259_v14, %v10258_v33  ;;  %v10139_v39 = vadd.f32 %v10138_v27, %v10137_v51  ;;  %v6875_v51 = vstv %s19344_s14  ;;  %v6593_v14 = vld [vmem:[#allocation14] sm:$0x1] }
 0x9c8   :  { %v6876_v27 = vmul.f32 %v6875_v51, %v19419_v38 }
 0x9c9   :  { %v10261_v43 = vrot.slane %v10260_v32, 4  ;;  %v10267_v22 = vsel %vm3425_vm6, %v10139_v39, 0.0 }
 0x9ca   :  { %10268 = vadd.xlane.f32.xlu0 %v10267_v22 }
 0x9cb   :  { %v10262_v57 = vadd.f32 %v10261_v43, %v10260_v32  ;;  %v6877_v43 = vsub.f32 %v6593_v14, %v6876_v27  ;;  %v17309_v27 = vld [vmem:[#allocation11 + $0x424] ss:$16 sps:$4 sm:$0xff]  }
 0x9cd   :  { %v10263_v31 = vrot.slane %v10262_v57, 2 }
 0x9cf   :  { %v10264_v42 = vadd.f32 %v10263_v31, %v10262_v57 }
 0x9d1   :  { %v10265_v62 = vrot.slane %v10264_v42, 1 }
 0x9d3   :  { %v10266_v44 = vadd.f32 %v10265_v62, %v10264_v42 }
 0x9d5   :  { %10323 = vrot.lane.b32.xlu1 %v10266_v44, %s18072_s27  ;;  %v10280_v59 = vsel %vm3425_vm6, %v10266_v44, 0.0 }
 0x9d6   :  { %10281 = vadd.xlane.f32.xlu0 %v10280_v59 }
 0x9ec   :  { %10306 = vrot.lane.b32.xlu0 %v10139_v39, %s18072_s27 }
 0x9ed   :  { %v6884_v37 = vpop.xlane.xlu0 %6883 }
 0x9ee   :  { %v6885_v2 = vrot.slane %v6884_v37, 4 }
 0x9f0   :  { %v6886_v53 = vadd.f32 %v6885_v2, %v6884_v37 }
 0x9f2   :  { %v6887_v5 = vrot.slane %v6886_v53, 2 }
 0x9f4   :  { %v6888_v25 = vadd.f32 %v6887_v5, %v6886_v53 }
 0x9f6   :  { %v6889_v34 = vrot.slane %v6888_v25, 1 }
 0x9f8   :  { %v6890_v13 = vadd.f32 %v6889_v34, %v6888_v25 }
 0x9fa   :  { %15483 = vpush %v6890_v13 }
 0x9fe   :  { %v6901_v20 = vpop.xlane.xlu1 %6900 }
 0x9ff   :  { %v6902_v16 = vrot.slane %v6901_v20, 4 }
 0xa01   :  { %v6903_v63 = vadd.f32 %v6902_v16, %v6901_v20 }
 0xa03   :  { %v6904_v52 = vrot.slane %v6903_v63, 2 }
 0xa05   :  { %v6905_v56 = vadd.f32 %v6904_v52, %v6903_v63 }
 0xa07   :  { %v6906_v58 = vrot.slane %v6905_v56, 1 }
 0xa09   :  { %v6907_v21 = vadd.f32 %v6906_v58, %v6905_v56  ;;  %v17271_v56 = vld [vmem:[#allocation11 + $0x4e0] ss:$16 sps:$4 sm:$0xff]   ;;  %v17273_v58 = vld [vmem:[#allocation11 + $0x4e4] ss:$16 sps:$4 sm:$0xff]  }
 0xa0a   :  { %11464 = vmatprep.subr.bf16.mxu0 %v17273_v58  ;;  %v17319_v58 = vld [vmem:[#allocation11 + $0x5e0] ss:$16 sps:$4 sm:$0xff]  }
 0xa0b   :  { %15485 = vpush %v6907_v21  ;;  %v17274_v21 = vld [vmem:[#allocation11 + $0x6e0] ss:$16 sps:$4 sm:$0xff]   ;;  %11465 = vmatpush1.bf16.msra.mxu0 %v17271_v56  ;;  %v17324_v56 = vld [vmem:[#allocation11 + $0x7e4] ss:$16 sps:$4 sm:$0xff]  }
 0xa2b   :  { %s15484_s19 = spop %15483 }
 0xa2c   :  { %s19411_s20 = smul.f32 0.00024414063, %s15484_s19 }
 0xa2e   :  { %s6912_s21 = smul.f32 %s19411_s20, %s19411_s20  ;;  %v6921_v32 = vstv %s19411_s20 }
 0xa3c   :  { %s15486_s24 = spop %15485 }
 0xa3d   :  { %s6911_s5 = smul.f32 0.00024414063, %s15486_s24 }
 0xa3f   :  { %s6913_s25 = ssub.f32 %s6911_s5, %s6912_s21 }
 0xa41   :  { %s6914_s26 = smax.f32 %s18073_s23, %s6913_s25 }
 0xa42   :  { %s6915_s29 = sadd.f32 1e-05, %s6914_s26 }
 0xa44   :  { %v6916_v0 = vstv %s6915_s29 }
 0xa45   :  { %17857 = vrsqrt.f32 %v6916_v0  ;;  %v17276_v0 = vld [vmem:[#allocation11 + $0x6e4] ss:$16 sps:$4 sm:$0xff]  }
 0xa46   :  { %11507 = vmatprep.subr.bf16.mxu1 %v17276_v0  ;;  %v17327_v0 = vld [vmem:[#allocation11 + $0x5c4] ss:$16 sps:$4 sm:$0xff]  }
 0xa47   :  { %v10324_v61 = vpop.permute.xlu1 %10323  ;;  %11508 = vmatpush1.bf16.msra.mxu1 %v17274_v21  ;;  %v17322_v21 = vld [vmem:[#allocation11 + $0x7e0] ss:$16 sps:$4 sm:$0xff]  }
 0xa48   :  { %v10326_v26 = vsel %vm3425_vm6, %v10324_v61, 0.0  ;;  %v17279_v61 = vld [vmem:[#allocation11 + $0x4c4] ss:$16 sps:$4 sm:$0xff]  }
 0xa49   :  { %10327 = vadd.xlane.f32.xlu1 %v10326_v26  ;;  %v17282_v26 = vld [vmem:[#allocation11 + $0x6c4] ss:$16 sps:$4 sm:$0xff]   ;;  %11466 = vmatprep.subr.bf16.mxu0 %v17279_v61 }
 0xa4a   :  { %11509 = vmatprep.subr.bf16.mxu1 %v17282_v26  ;;  %v17330_v61 = vld [vmem:[#allocation11 + $0x7c4] ss:$16 sps:$4 sm:$0xff]   ;;  %v17325_v26 = vld [vmem:[#allocation11 + $0x5c0] ss:$16 sps:$4 sm:$0xff]  }
 0xa52   :  { %v17858_v17 = vpop.eup %17857 }
 0xa53   :  { %15487 = vpush %v17858_v17  ;;  %v10269_v49 = vpop.xlane.xlu0 %10268  ;;  %v17277_v17 = vld [vmem:[#allocation11 + $0x4c0] ss:$16 sps:$4 sm:$0xff]  }
 0xa54   :  { %v10270_v1 = vrot.slane %v10269_v49, 4  ;;  %11467 = vmatpush1.bf16.msra.mxu0 %v17277_v17  ;;  %v17328_v17 = vld [vmem:[#allocation11 + $0x7c0] ss:$16 sps:$4 sm:$0xff]  }
 0xa56   :  { %v10271_v30 = vadd.f32 %v10270_v1, %v10269_v49  ;;  %v17280_v49 = vld [vmem:[#allocation11 + $0x6c0] ss:$16 sps:$4 sm:$0xff]   ;;  %v17285_v1 = vld [vmem:[#allocation11 + $0x4a4] ss:$16 sps:$4 sm:$0xff]  }
 0xa57   :  { %11510 = vmatpush1.bf16.msra.mxu1 %v17280_v49  ;;  %11468 = vmatprep.subr.bf16.mxu0 %v17285_v1  ;;  %v17333_v49 = vld [vmem:[#allocation11 + $0x5a4] ss:$16 sps:$4 sm:$0xff]  }
 0xa58   :  { %v10272_v8 = vrot.slane %v10271_v30, 2  ;;  %v17336_v1 = vld [vmem:[#allocation11 + $0x7a4] ss:$16 sps:$4 sm:$0xff]  }
 0xa5a   :  { %v10273_v4 = vadd.f32 %v10272_v8, %v10271_v30  ;;  %v17288_v30 = vld [vmem:[#allocation11 + $0x6a4] ss:$16 sps:$4 sm:$0xff]   ;;  %v17283_v8 = vld [vmem:[#allocation11 + $0x4a0] ss:$16 sps:$4 sm:$0xff]  }
 0xa5b   :  { %11511 = vmatprep.subr.bf16.mxu1 %v17288_v30  ;;  %11469 = vmatpush1.bf16.msra.mxu0 %v17283_v8  ;;  %v17331_v30 = vld [vmem:[#allocation11 + $0x5a0] ss:$16 sps:$4 sm:$0xff]  }
 0xa5c   :  { %v10274_v3 = vrot.slane %v10273_v4, 1  ;;  %v17334_v8 = vld [vmem:[#allocation11 + $0x7a0] ss:$16 sps:$4 sm:$0xff]  }
 0xa5e   :  { %v10275_v6 = vadd.f32 %v10274_v3, %v10273_v4  ;;  %v17286_v4 = vld [vmem:[#allocation11 + $0x6a0] ss:$16 sps:$4 sm:$0xff]   ;;  %v17291_v3 = vld [vmem:[#allocation11 + $0x484] ss:$16 sps:$4 sm:$0xff]  }
 0xa5f   :  { %v10282_v15 = vpop.xlane.xlu0 %10281  ;;  %11512 = vmatpush1.bf16.msra.mxu1 %v17286_v4  ;;  %11470 = vmatprep.subr.bf16.mxu0 %v17291_v3  ;;  %v17339_v4 = vld [vmem:[#allocation11 + $0x584] ss:$16 sps:$4 sm:$0xff]  }
 0xa60   :  { %v10283_v48 = vrot.slane %v10282_v15, 4  ;;  %15489 = vpush %v10275_v6  ;;  %v17294_v6 = vld [vmem:[#allocation11 + $0x684] ss:$16 sps:$4 sm:$0xff]  }
 0xa61   :  { %11513 = vmatprep.subr.bf16.mxu1 %v17294_v6  ;;  %v17342_v3 = vld [vmem:[#allocation11 + $0x784] ss:$16 sps:$4 sm:$0xff]   ;;  %v17337_v6 = vld [vmem:[#allocation11 + $0x580] ss:$16 sps:$4 sm:$0xff]  }
 0xa62   :  { %v10284_v11 = vadd.f32 %v10283_v48, %v10282_v15  ;;  %v17289_v15 = vld [vmem:[#allocation11 + $0x480] ss:$16 sps:$4 sm:$0xff]  }
 0xa63   :  { %v10307_v41 = vpop.permute.xlu0 %10306  ;;  %v17292_v48 = vld [vmem:[#allocation11 + $0x680] ss:$16 sps:$4 sm:$0xff]   ;;  %11471 = vmatpush1.bf16.msra.mxu0 %v17289_v15 }
 0xa64   :  { %v10285_v55 = vrot.slane %v10284_v11, 2  ;;  %v10309_v9 = vsel %vm3425_vm6, %v10307_v41, 0.0  ;;  %v17300_v41 = vld [vmem:[#allocation11 + $0x664] ss:$16 sps:$4 sm:$0xff]   ;;  %11514 = vmatpush1.bf16.msra.mxu1 %v17292_v48  ;;  %v17340_v15 = vld [vmem:[#allocation11 + $0x780] ss:$16 sps:$4 sm:$0xff]  }
 0xa65   :  { %10310 = vadd.xlane.f32.xlu0 %v10309_v9  ;;  %v17298_v9 = vld [vmem:[#allocation11 + $0x660] ss:$16 sps:$4 sm:$0xff]   ;;  %11515 = vmatprep.subr.bf16.mxu1 %v17300_v41  ;;  %v17345_v48 = vld [vmem:[#allocation11 + $0x564] ss:$16 sps:$4 sm:$0xff]  }
 0xa66   :  { %v10286_v60 = vadd.f32 %v10285_v55, %v10284_v11  ;;  %v17297_v11 = vld [vmem:[#allocation11 + $0x464] ss:$16 sps:$4 sm:$0xff]   ;;  %v17295_v55 = vld [vmem:[#allocation11 + $0x460] ss:$16 sps:$4 sm:$0xff]  }
 0xa67   :  { %11472 = vmatprep.subr.bf16.mxu0 %v17297_v11  ;;  %v17348_v11 = vld [vmem:[#allocation11 + $0x764] ss:$16 sps:$4 sm:$0xff]   ;;  %v17343_v41 = vld [vmem:[#allocation11 + $0x560] ss:$16 sps:$4 sm:$0xff]  }
 0xa68   :  { %v10287_v45 = vrot.slane %v10286_v60, 1  ;;  %11473 = vmatpush1.bf16.msra.mxu0 %v17295_v55  ;;  %11516 = vmatpush1.bf16.msra.mxu1 %v17298_v9  ;;  %v17346_v55 = vld [vmem:[#allocation11 + $0x760] ss:$16 sps:$4 sm:$0xff]   ;;  %v17351_v9 = vld [vmem:[#allocation11 + $0x544] ss:$16 sps:$4 sm:$0xff]  }
 0xa6a   :  { %v10288_v19 = vadd.f32 %v10287_v45, %v10286_v60  ;;  %v17303_v60 = vld [vmem:[#allocation11 + $0x444] ss:$16 sps:$4 sm:$0xff]  }
 0xa6b   :  { %v17306_v45 = vld [vmem:[#allocation11 + $0x644] ss:$16 sps:$4 sm:$0xff]   ;;  %11474 = vmatprep.subr.bf16.mxu0 %v17303_v60 }
 0xa6c   :  { %15491 = vpush %v10288_v19  ;;  %v17301_v19 = vld [vmem:[#allocation11 + $0x440] ss:$16 sps:$4 sm:$0xff]   ;;  %11517 = vmatprep.subr.bf16.mxu1 %v17306_v45  ;;  %v17354_v60 = vld [vmem:[#allocation11 + $0x744] ss:$16 sps:$4 sm:$0xff]  }
 0xa6d   :  { %11475 = vmatpush1.bf16.msra.mxu0 %v17301_v19  ;;  %v17349_v45 = vld [vmem:[#allocation11 + $0x540] ss:$16 sps:$4 sm:$0xff]  }
 0xa6e   :  { %11476 = vmatprep.subr.bf16.mxu0 %v17309_v27  ;;  %v17352_v19 = vld [vmem:[#allocation11 + $0x740] ss:$16 sps:$4 sm:$0xff]   ;;  %v17363_v27 = vld [vmem:[#allocation11 + $0x504] ss:$16 sps:$4 sm:$0xff]  }
 0xa84   :  { %s15488_s30 = spop %15487 }
 0xa85   :  { %v6919_v35 = vstv %s15488_s30 }
 0xa86   :  { %v19423_v33 = vmul.f32 %v6919_v35, %v6592_v40  ;;  %v17304_v40 = vld [vmem:[#allocation11 + $0x640] ss:$16 sps:$4 sm:$0xff]  }
 0xa87   :  { %11518 = vmatpush1.bf16.msra.mxu1 %v17304_v40  ;;  %v17307_v35 = vld [vmem:[#allocation11 + $0x420] ss:$16 sps:$4 sm:$0xff]   ;;  %v17357_v40 = vld [vmem:[#allocation11 + $0x524] ss:$16 sps:$4 sm:$0xff]  }
 0xa88   :  { %v6922_v39 = vmul.f32 %v6921_v32, %v19423_v33  ;;  %v17312_v32 = vld [vmem:[#allocation11 + $0x624] ss:$16 sps:$4 sm:$0xff]   ;;  %11477 = vmatpush1.bf16.msra.mxu0 %v17307_v35  ;;  %v17358_v35 = vld [vmem:[#allocation11 + $0x720] ss:$16 sps:$4 sm:$0xff]  }
 0xa89   :  { %11519 = vmatprep.subr.bf16.mxu1 %v17312_v32  ;;  %v17361_v32 = vld [vmem:[#allocation11 + $0x500] ss:$16 sps:$4 sm:$0xff]  }
 0xa8a   :  { %v6923_v22 = vsub.f32 %v6593_v14, %v6922_v39  ;;  %v17310_v14 = vld [vmem:[#allocation11 + $0x620] ss:$16 sps:$4 sm:$0xff]   ;;  %v10019_v39 = vld [vmem:[#allocation8] sm:$0x1] }
 0xa8b   :  { %11520 = vmatpush1.bf16.msra.mxu1 %v17310_v14  ;;  %v17366_v14 = vld [vmem:[#allocation11 + $0x704] ss:$16 sps:$4 sm:$0xff]  }
 0xa8c   :  { %v19428_v57 = vsel %vm3510_vm7, %v6877_v43, %v6923_v22 }
 0xa91   :  { %s15490_s8 = spop %15489 }
 0xa92   :  { %s19430_s9 = smul.f32 0.00024414063, %s15490_s8 }
 0xa94   :  { %s10293_s10 = smul.f32 %s19430_s9, %s19430_s9 }
 0xa9d   :  { %s15492_s11 = spop %15491 }
 0xa9e   :  { %s10292_s0 = smul.f32 0.00024414063, %s15492_s11 }
 0xaa0   :  { %s10294_s12 = ssub.f32 %s10292_s0, %s10293_s10 }
 0xaa2   :  { %s10295_s13 = smax.f32 %s18073_s23, %s10294_s12 }
 0xaa3   :  { %s10296_s14 = sadd.f32 1e-05, %s10295_s13 }
 0xaa5   :  { %v10297_v31 = vstv %s10296_s14 }
 0xaa6   :  { %17859 = vrsqrt.f32 %v10297_v31  ;;  %v17313_v31 = vld [vmem:[#allocation11 + $0x400] ss:$16 sps:$4 sm:$0xff]  }
 0xab3   :  { %v17860_v42 = vpop.eup %17859 }
 0xab4   :  { %15493 = vpush %v17860_v42  ;;  %v17315_v42 = vld [vmem:[#allocation11 + $0x404] ss:$16 sps:$4 sm:$0xff]  }
 0xab5   :  { %11478 = vmatprep.subr.bf16.mxu0 %v17315_v42 }
 0xab6   :  { %11479 = vmatpush1.bf16.msra.mxu0 %v17313_v31 }
 0xad2   :  { %v10328_v62 = vpop.xlane.xlu1 %10327 }
 0xad3   :  { %v10329_v44 = vrot.slane %v10328_v62, 4 }
 0xad5   :  { %v10330_v59 = vadd.f32 %v10329_v44, %v10328_v62  ;;  %v17316_v62 = vld [vmem:[#allocation11 + $0x600] ss:$16 sps:$4 sm:$0xff]   ;;  %v10302_v44 = vstv %s19430_s9 }
 0xad7   :  { %v10331_v37 = vrot.slane %v10330_v59, 2 }
 0xad9   :  { %v10332_v25 = vadd.f32 %v10331_v37, %v10330_v59  ;;  %v17318_v37 = vld [vmem:[#allocation11 + $0x604] ss:$16 sps:$4 sm:$0xff]  }
 0xada   :  { %11521 = vmatprep.subr.bf16.mxu1 %v17318_v37 }
 0xadb   :  { %v10333_v20 = vrot.slane %v10332_v25, 1  ;;  %11522 = vmatpush1.bf16.msra.mxu1 %v17316_v62 }
 0xadc   :  { %11523 = vmatprep.subr.bf16.mxu1 %v17324_v56 }
 0xadd   :  { %v10334_v52 = vadd.f32 %v10333_v20, %v10332_v25 }
 0xadf   :  { %11524 = vmatpush2.bf16.msra.mxu1 %v17322_v21 }
 0xae0   :  { %11525 = vmatprep.subr.bf16.mxu1 %v17330_v61 }
 0xae3   :  { %11526 = vmatpush2.bf16.msra.mxu1 %v17328_v17 }
 0xae4   :  { %11527 = vmatprep.subr.bf16.mxu1 %v17336_v1 }
 0xae5   :  { %s15494_s15 = spop %15493 }
 0xae6   :  { %v10300_v43 = vstv %s15494_s15 }
 0xae7   :  { %v10301_v22 = vmul.f32 %v10300_v43, %v10019_v39  ;;  %11528 = vmatpush2.bf16.msra.mxu1 %v17334_v8  ;;  %v17371_v43 = vld [vmem:[#allocation11 + $0x4ec] ss:$16 sps:$4 sm:$0xff]  }
 0xae8   :  { %11529 = vmatprep.subr.bf16.mxu1 %v17342_v3 }
 0xaeb   :  { %11530 = vmatpush2.bf16.msra.mxu1 %v17340_v15 }
 0xaec   :  { %11531 = vmatprep.subr.bf16.mxu1 %v17348_v11 }
 0xaee   :  { %v10311_v2 = vpop.xlane.xlu0 %10310 }
 0xaef   :  { %v10312_v53 = vrot.slane %v10311_v2, 4  ;;  %11532 = vmatpush2.bf16.msra.mxu1 %v17346_v55 }
 0xaf0   :  { %11533 = vmatprep.subr.bf16.mxu1 %v17354_v60 }
 0xaf1   :  { %v10313_v5 = vadd.f32 %v10312_v53, %v10311_v2  ;;  %v10303_v2 = vmul.f32 %v10302_v44, %v10301_v22 }
 0xaf3   :  { %v10314_v34 = vrot.slane %v10313_v5, 2  ;;  %11534 = vmatpush2.bf16.msra.mxu1 %v17352_v19 }
 0xaf5   :  { %v10315_v13 = vadd.f32 %v10314_v34, %v10313_v5  ;;  %v10020_v5 = vld [vmem:[#allocation9] sm:$0x1] }
 0xaf6   :  { %v10304_v20 = vsub.f32 %v10020_v5, %v10303_v2 }
 0xaf7   :  { %v10316_v16 = vrot.slane %v10315_v13, 1 }
 0xaf9   :  { %v10317_v63 = vadd.f32 %v10316_v16, %v10315_v13 }
 0xafb   :  { %15495 = vpush %v10317_v63 }
 0xafc   :  { %15497 = vpush %v10334_v52  ;;  %v17321_v52 = vld [vmem:[#allocation11 + $0x5e4] ss:$16 sps:$4 sm:$0xff]  }
 0xafd   :  { %11480 = vmatprep.subr.bf16.mxu0 %v17321_v52 }
 0xafe   :  { %11481 = vmatpush2.bf16.msra.mxu0 %v17319_v58 }
 0xaff   :  { %11482 = vmatprep.subr.bf16.mxu0 %v17327_v0 }
 0xb02   :  { %11483 = vmatpush2.bf16.msra.mxu0 %v17325_v26 }
 0xb03   :  { %11484 = vmatprep.subr.bf16.mxu0 %v17333_v49 }
 0xb06   :  { %11485 = vmatpush2.bf16.msra.mxu0 %v17331_v30 }
 0xb07   :  { %11486 = vmatprep.subr.bf16.mxu0 %v17339_v4 }
 0xb0a   :  { %11487 = vmatpush2.bf16.msra.mxu0 %v17337_v6 }
 0xb0b   :  { %11488 = vmatprep.subr.bf16.mxu0 %v17345_v48 }
 0xb0e   :  { %11489 = vmatpush2.bf16.msra.mxu0 %v17343_v41 }
 0xb0f   :  { %11490 = vmatprep.subr.bf16.mxu0 %v17351_v9 }
 0xb12   :  { %11491 = vmatpush2.bf16.msra.mxu0 %v17349_v45 }
 0xb13   :  { %11492 = vmatprep.subr.bf16.mxu0 %v17357_v40 }
 0xb2c   :  { %s15496_s2 = spop %15495 }
 0xb2d   :  { %s19435_s16 = smul.f32 0.00024414063, %s15496_s2  ;;  %s15498_s1 = spop %15497 }
 0xb2e   :  { %s10338_s28 = smul.f32 0.00024414063, %s15498_s1 }
 0xb2f   :  { %s10339_s17 = smul.f32 %s19435_s16, %s19435_s16  ;;  %v10348_v25 = vstv %s19435_s16 }
 0xb31   :  { %s10340_s18 = ssub.f32 %s10338_s28, %s10339_s17 }
 0xb33   :  { %s10341_s19 = smax.f32 %s18073_s23, %s10340_s18 }
 0xb34   :  { %s10342_s20 = sadd.f32 1e-05, %s10341_s19 }
 0xb36   :  { %v10343_v29 = vstv %s10342_s20 }
 0xb37   :  { %17861 = vrsqrt.f32 %v10343_v29  ;;  %v17360_v29 = vld [vmem:[#allocation11 + $0x724] ss:$16 sps:$4 sm:$0xff]  }
 0xb38   :  { %11535 = vmatprep.subr.bf16.mxu1 %v17360_v29 }
 0xb39   :  { %11536 = vmatpush2.bf16.msra.mxu1 %v17358_v35 }
 0xb3a   :  { %11537 = vmatprep.subr.bf16.mxu1 %v17366_v14 }
 0xb44   :  { %v17862_v51 = vpop.eup %17861 }
 0xb45   :  { %15499 = vpush %v17862_v51  ;;  %v17355_v51 = vld [vmem:[#allocation11 + $0x520] ss:$16 sps:$4 sm:$0xff]  }
 0xb46   :  { %11493 = vmatpush2.bf16.msra.mxu0 %v17355_v51 }
 0xb47   :  { %11494 = vmatprep.subr.bf16.mxu0 %v17363_v27 }
 0xb4a   :  { %11495 = vmatpush2.bf16.msra.mxu0 %v17361_v32 }
 0xb4b   :  { %11550 = vmatprep.subr.bf16.mxu0 %v17371_v43 }
 0xb76   :  { %s15500_s21 = spop %15499 }
 0xb77   :  { %v10346_v59 = vstv %s15500_s21 }
 0xb78   :  { %v10347_v53 = vmul.f32 %v10346_v59, %v10019_v39  ;;  %v17364_v39 = vld [vmem:[#allocation11 + $0x700] ss:$16 sps:$4 sm:$0xff]  }
 0xb79   :  { %11538 = vmatpush2.bf16.msra.mxu1 %v17364_v39 }
 0xb7a   :  { %v10349_v34 = vmul.f32 %v10348_v25, %v10347_v53  ;;  %v19443_v13 = vsel %vm3510_vm7, %v10301_v22, %v10347_v53  ;;  %v17374_v22 = vld [vmem:[#allocation11 + $0x6ec] ss:$16 sps:$4 sm:$0xff]  }
 0xb7b   :  { %10357 = vrot.lane.b32.xlu1 %v19443_v13, %s18070_s4  ;;  %10354 = vrot.lane.b32.xlu0 %v19443_v13, %s18066_s22  ;;  %v19906_v53 = vld [vmem:[#allocation24_spill] sm:$0xff] }
 0xb7c   :  { %v10350_v16 = vsub.f32 %v10020_v5, %v10349_v34  ;;  %11593 = vmatprep.subr.bf16.mxu1 %v17374_v22 }
 0xb7e   :  { %v19450_v63 = vsel %vm3510_vm7, %v10304_v20, %v10350_v16 }
 0xb7f   :  { %10360 = vrot.lane.b32.xlu0 %v19443_v13, %s18071_s6  ;;  %10367 = vrot.lane.b32.xlu1 %v19450_v63, %s18066_s22 }
 0xb83   :  { %10370 = vrot.lane.b32.xlu0 %v19450_v63, %s18070_s4  ;;  %10373 = vrot.lane.b32.xlu1 %v19450_v63, %s18071_s6 }
 0xbed   :  { %v10358_v31 = vpop.permute.xlu1 %10357  ;;  %v10355_v42 = vpop.permute.xlu0 %10354 }
 0xbee   :  { %v10363_v62 = vsel %vm3288_vm5, %v19443_v13, %v10355_v42 }
 0xbef   :  { %v10364_v44 = vsel %vm3524_vm8, %v10363_v62, %v10358_v31  ;;  %v10473_v62 = vld [vmem:[#allocation2 + $0x20] sm:$0xff] }
 0xbf1   :  { %v10361_v59 = vpop.permute.xlu0 %10360  ;;  %v10368_v37 = vpop.permute.xlu1 %10367 }
 0xbf2   :  { %v10365_v2 = vsel %vm3526_vm9, %v10364_v44, %v10361_v59  ;;  %v10376_v20 = vsel %vm3288_vm5, %v19450_v63, %v10368_v37 }
 0xbf3   :  { %v10382_v5 = vrot.slane %v10365_v2, %v19906_v53 }
 0xbf5   :  { %v10371_v25 = vpop.permute.xlu0 %10370  ;;  %v10374_v34 = vpop.permute.xlu1 %10373  ;;  %v10383_v52 = vmul.f32 %v10382_v5, %v19217_v47  ;;  %v10384_v13 = vmul.f32 %v10382_v5, %v19257_v12  ;;  %v10385_v58 = vmul.f32 %v10382_v5, %v19298_v24  ;;  %v10386_v21 = vmul.f32 %v10382_v5, %v19314_v50 }
 0xbf6   :  { %v10377_v16 = vsel %vm3524_vm8, %v10376_v20, %v10371_v25  ;;  %v10387_v61 = vmul.f32 %v10382_v5, %v19221_v54  ;;  %v10388_v26 = vmul.f32 %v10382_v5, %v19263_v23  ;;  %v10389_v63 = vmul.f32 %v10382_v5, %v19303_v7  ;;  %v10481_v25 = vld [vmem:[#allocation2] sm:$0x11] }
 0xbf7   :  { %v10378_v56 = vsel %vm3526_vm9, %v10377_v16, %v10374_v34  ;;  %v10390_v17 = vmul.f32 %v10382_v5, %v19351_v46  ;;  %v10478_v5 = vld [vmem:[#allocation2 + $0x8] sm:$0x11]  ;;  %v17872_v34 = vld [vmem:[#allocation2 + $0x18] sm:$0xff] }
 0xbf8   :  { %v10394_v0 = vrot.slane %v10378_v56, %v19906_v53  ;;  %v17379_v56 = vld [vmem:[#allocation11 + $0x4cc] ss:$16 sps:$4 sm:$0xff]  }
 0xbfa   :  { %v10395_v49 = vadd.f32 %v10394_v0, %v10383_v52  ;;  %v10396_v47 = vadd.f32 %v10394_v0, %v10384_v13  ;;  %v10397_v1 = vadd.f32 %v10394_v0, %v10385_v58  ;;  %v10398_v30 = vadd.f32 %v10394_v0, %v10386_v21 }
 0xbfb   :  { %v10399_v8 = vadd.f32 %v10394_v0, %v10387_v61  ;;  %v10400_v12 = vadd.f32 %v10394_v0, %v10388_v26  ;;  %v10401_v4 = vadd.f32 %v10394_v0, %v10389_v63  ;;  %v10402_v24 = vadd.f32 %v10394_v0, %v10390_v17 }
 0xbfc   :  { %v10403_v3 = vmax.f32 %v10395_v49, 0.0  ;;  %v10404_v50 = vmax.f32 %v10396_v47, 0.0  ;;  %v10405_v6 = vmax.f32 %v10397_v1, 0.0  ;;  %v10406_v15 = vmax.f32 %v10398_v30, 0.0 }
 0xbfd   :  { %v10407_v48 = vmax.f32 %v10399_v8, 0.0  ;;  %v10408_v54 = vmax.f32 %v10400_v12, 0.0  ;;  %v10409_v11 = vmax.f32 %v10401_v4, 0.0  ;;  %v10410_v23 = vmax.f32 %v10402_v24, 0.0 }
 0xbfe   :  { %v15461_v41 = vpack.c.bf16 %v10404_v50, %v10403_v3  ;;  %v15462_v7 = vpack.c.bf16 %v10406_v15, %v10405_v6 }
 0xbff   :  { %v15463_v55 = vpack.c.bf16 %v10408_v54, %v10407_v48  ;;  %v15464_v46 = vpack.c.bf16 %v10410_v23, %v10409_v11 }
 0xc00   :  { %v10432_v9 = vshrl.u32 %v15461_v41, 16  ;;  %v10439_v60 = vshrl.u32 %v15462_v7, 16  ;;  %v10435_v29 = vshll.u32 %v15461_v41, 16  ;;  %v10442_v35 = vshll.u32 %v15462_v7, 16 }
 0xc01   :  { %v10447_v45 = vshrl.u32 %v15463_v55, 16  ;;  %v10456_v19 = vshrl.u32 %v15464_v46, 16  ;;  %v10450_v14 = vshll.u32 %v15463_v55, 16  ;;  %v10459_v39 = vshll.u32 %v15464_v46, 16 }
 0xc02   :  { %v10434_v40 = vrot.slane %v10432_v9, 7  ;;  %v10441_v51 = vrot.slane %v10439_v60, 7 }
 0xc03   :  { %v10449_v27 = vrot.slane %v10447_v45, 7  ;;  %v10458_v32 = vrot.slane %v10456_v19, 7 }
 0xc04   :  { %v10437_v43 = vor.u32 %v10435_v29, %v10434_v40  ;;  %v10444_v22 = vor.u32 %v10442_v35, %v10441_v51  ;;  %v10445_v31 = vrot.slane %v10434_v40, 4  ;;  %v10454_v42 = vrot.slane %v10441_v51, 4 }
 0xc05   :  { %v10452_v44 = vor.u32 %v10450_v14, %v10449_v27  ;;  %v10461_v59 = vor.u32 %v10459_v39, %v10458_v32  ;;  %v10463_v37 = vrot.slane %v10449_v27, 4  ;;  %v10464_v2 = vrot.slane %v10458_v32, 4 }
 0xc06   :  { %v10471_v16 = vsel %vm18208_vm2, %v10437_v43, %v17872_v34  ;;  %v10474_v52 = vsel %vm18208_vm2, %v10444_v22, %v10473_v62 }
 0xc07   :  { %v19484_v13 = vsel %vm18214_vm3, %v10445_v31, %v10452_v44  ;;  %v19488_v58 = vsel %vm18214_vm3, %v10454_v42, %v10461_v59  ;;  %v10479_v0 = vsel %vm18170_vm10, %v10463_v37, %v10478_v5  ;;  %v10482_v61 = vsel %vm18170_vm10, %v10464_v2, %v10481_v25  ;;  %10472 = vst [vmem:[#allocation2 + $0x18] sm:$0xff] %v10471_v16  ;;  %v17369_v42 = vld [vmem:[#allocation11 + $0x4e8] ss:$16 sps:$4 sm:$0xff]  }
 0xc08   :  { %10475 = vst [vmem:[#allocation2 + $0x20] sm:$0xff] %v10474_v52  ;;  %10476 = vst [vmem:[#allocation2 + $0x28] sm:$0xff] %v19484_v13  ;;  %v19497_v26 = vcombine.high %v10471_v16, %v19484_v13  ;;  %v19500_v63 = vcombine.high %v10474_v52, %v19488_v58  ;;  %v19503_v17 = vcombine.low %v10471_v16, %v19484_v13  ;;  %v17372_v59 = vld [vmem:[#allocation11 + $0x6e8] ss:$16 sps:$4 sm:$0xff]  }
 0xc09   :  { %10477 = vst [vmem:[#allocation2 + $0x10] sm:$0xff] %v19488_v58  ;;  %10480 = vst [vmem:[#allocation2 + $0x8] sm:$0x11] %v10479_v0  ;;  %v19506_v49 = vcombine.low %v10474_v52, %v19488_v58 }
 0xc0a   :  { %10483 = vst [vmem:[#allocation2] sm:$0x11] %v10482_v61  ;;  %v10787_v47 = vshll.u32 %v19497_v26, 16  ;;  %v10811_v1 = vshll.u32 %v19500_v63, 16  ;;  %v10775_v30 = vshll.u32 %v19503_v17, 16  ;;  %v10785_v24 = vshrl.u32 %v19497_v26, 16 }
 0xc0b   :  { %v10799_v8 = vshll.u32 %v19506_v49, 16  ;;  %v10809_v3 = vshrl.u32 %v19500_v63, 16  ;;  %v10773_v50 = vshrl.u32 %v19503_v17, 16  ;;  %v10797_v6 = vshrl.u32 %v19506_v49, 16 }
 0xc0c   :  { %v10789_v12 = vrot.slane %v10787_v47, 1  ;;  %v10813_v4 = vrot.slane %v10811_v1, 1  ;;  %v10777_v54 = vrot.slane %v10775_v30, 1  ;;  %v17377_v30 = vld [vmem:[#allocation11 + $0x4c8] ss:$16 sps:$4 sm:$0xff]  }
 0xc0d   :  { %v10801_v11 = vrot.slane %v10799_v8, 1  ;;  %v17380_v8 = vld [vmem:[#allocation11 + $0x6c8] ss:$16 sps:$4 sm:$0xff]  }
 0xc0e   :  { %v12452_v46 = vld [vmem:[#allocation2 + $0x18] sm:$0xee]  ;;  %v10790_v60 = vor.u32 %v10789_v12, %v10785_v24  ;;  %v10814_v45 = vor.u32 %v10813_v4, %v10809_v3  ;;  %v10778_v14 = vor.u32 %v10777_v54, %v10773_v50  ;;  %v17385_v4 = vld [vmem:[#allocation11 + $0x4ac] ss:$16 sps:$4 sm:$0xff]  }
 0xc0f   :  { %v12453_v9 = vld [vmem:[#allocation2 + $0x20] sm:$0xee]  ;;  %v15318_v19 = vcombine.high %v12452_v46, %v19484_v13  ;;  %v10802_v32 = vor.u32 %v10801_v11, %v10797_v6  ;;  %v15317_v39 = vcombine.low %v12452_v46, %v19484_v13  ;;  %v17383_v50 = vld [vmem:[#allocation11 + $0x4a8] ss:$16 sps:$4 sm:$0xff]  }
 0xc10   :  { %v10616_v15 = vld [vmem:[#allocation2 + $0x8] sm:$0x11]  ;;  %v15320_v40 = vcombine.high %v12453_v9, %v19488_v58  ;;  %v15319_v43 = vcombine.low %v12453_v9, %v19488_v58  ;;  %v17382_v13 = vld [vmem:[#allocation11 + $0x6cc] ss:$16 sps:$4 sm:$0xff]  }
 0xc11   :  { %v10617_v48 = vld [vmem:[#allocation2] sm:$0x11]  ;;  %v15058_v23 = vcombine.high %v10616_v15, %v10616_v15  ;;  %v15057_v7 = vcombine.low %v10616_v15, %v10616_v15  ;;  %v12595_v37 = vrot.slane %v15318_v19, 1  ;;  %v12592_v0 = vrot.slane %v15317_v39, 1  ;;  %v17386_v6 = vld [vmem:[#allocation11 + $0x6a8] ss:$16 sps:$4 sm:$0xff]  }
 0xc12   :  { %v15060_v41 = vcombine.high %v10617_v48, %v10617_v48  ;;  %v15059_v55 = vcombine.low %v10617_v48, %v10617_v48  ;;  %v12601_v5 = vrot.slane %v15320_v40, 1  ;;  %v12598_v47 = vrot.slane %v15319_v43, 1  ;;  %v17388_v24 = vld [vmem:[#allocation11 + $0x6ac] ss:$16 sps:$4 sm:$0xff]   ;;  %v17389_v54 = vld [vmem:[#allocation11 + $0x488] ss:$16 sps:$4 sm:$0xff]  }
 0xc13   :  { %v10792_v29 = vshll.u32 %v15058_v23, 16  ;;  %v10780_v35 = vshll.u32 %v15057_v7, 16  ;;  %v12596_v2 = vrot.slane %v15058_v23, 1  ;;  %v12593_v61 = vrot.slane %v15057_v7, 1  ;;  %v17391_v15 = vld [vmem:[#allocation11 + $0x48c] ss:$16 sps:$4 sm:$0xff]  }
 0xc14   :  { %v10816_v51 = vshll.u32 %v15060_v41, 16  ;;  %v10804_v27 = vshll.u32 %v15059_v55, 16  ;;  %v12602_v25 = vrot.slane %v15060_v41, 1  ;;  %v12599_v1 = vrot.slane %v15059_v55, 1  ;;  %v17394_v48 = vld [vmem:[#allocation11 + $0x68c] ss:$16 sps:$4 sm:$0xff]  }
 0xc15   :  { %v10794_v22 = vrot.slane %v10792_v29, 1  ;;  %v10782_v62 = vrot.slane %v10780_v35, 1  ;;  %v19529_v58 = vsel %vm2339_vm4, %v12595_v37, %v12596_v2  ;;  %v19537_v12 = vsel %vm2339_vm4, %v12592_v0, %v12593_v61  ;;  %v17392_v11 = vld [vmem:[#allocation11 + $0x688] ss:$16 sps:$4 sm:$0xff]   ;;  %v17397_v23 = vld [vmem:[#allocation11 + $0x46c] ss:$16 sps:$4 sm:$0xff]  }
 0xc16   :  { %v10818_v31 = vrot.slane %v10816_v51, 1  ;;  %v10806_v44 = vrot.slane %v10804_v27, 1  ;;  %v19532_v21 = vsel %vm2339_vm4, %v12601_v5, %v12602_v25  ;;  %v19540_v3 = vsel %vm2339_vm4, %v12598_v47, %v12599_v1  ;;  %v17400_v41 = vld [vmem:[#allocation11 + $0x66c] ss:$16 sps:$4 sm:$0xff]   ;;  %v17395_v7 = vld [vmem:[#allocation11 + $0x468] ss:$16 sps:$4 sm:$0xff]  }
 0xc17   :  { %v10795_v34 = vsel %vm517_vm0, %v10790_v60, %v10794_v22  ;;  %v19523_v16 = vsel %vm517_vm0, %v10778_v14, %v10782_v62  ;;  %v17398_v55 = vld [vmem:[#allocation11 + $0x668] ss:$16 sps:$4 sm:$0xff]   ;;  %v17403_v46 = vld [vmem:[#allocation11 + $0x44c] ss:$16 sps:$4 sm:$0xff]  }
 0xc18   :  { %v10819_v20 = vsel %vm517_vm0, %v10814_v45, %v10818_v31  ;;  %v19526_v52 = vsel %vm517_vm0, %v10802_v32, %v10806_v44  ;;  %11496 = vmatprep.mubr.bf16.mxu0 %v10795_v34  ;;  %v17406_v9 = vld [vmem:[#allocation11 + $0x64c] ss:$16 sps:$4 sm:$0xff]   ;;  %v17401_v60 = vld [vmem:[#allocation11 + $0x448] ss:$16 sps:$4 sm:$0xff]  }
 0xc19   :  { %11539 = vmatprep.mubr.bf16.mxu1 %v10819_v20  ;;  %11497 = vmatmul.mubr.bf16.vlgmr.msra.gmra.mxu0 %v19523_v16  ;;  %v17404_v45 = vld [vmem:[#allocation11 + $0x648] ss:$16 sps:$4 sm:$0xff]   ;;  %v17409_v19 = vld [vmem:[#allocation11 + $0x42c] ss:$16 sps:$4 sm:$0xff]  }
 0xc1a   :  { %11540 = vmatmul.mubr.bf16.vlgmr.msra.gmra.mxu1 %v19526_v52  ;;  %11551 = vmatpush1.bf16.msra.mxu0 %v17369_v42  ;;  %v17412_v40 = vld [vmem:[#allocation11 + $0x62c] ss:$16 sps:$4 sm:$0xff]   ;;  %v17407_v29 = vld [vmem:[#allocation11 + $0x428] ss:$16 sps:$4 sm:$0xff]  }
 0xc1b   :  { %11594 = vmatpush1.bf16.msra.mxu1 %v17372_v59  ;;  %11582 = vmatprep.mubr.bf16.mxu0 %v10795_v34  ;;  %v17410_v51 = vld [vmem:[#allocation11 + $0x628] ss:$16 sps:$4 sm:$0xff]   ;;  %v17415_v35 = vld [vmem:[#allocation11 + $0x40c] ss:$16 sps:$4 sm:$0xff]  }
 0xc1c   :  { %11625 = vmatprep.mubr.bf16.mxu1 %v10819_v20  ;;  %11552 = vmatprep.subr.bf16.mxu0 %v17379_v56  ;;  %v17418_v27 = vld [vmem:[#allocation11 + $0x60c] ss:$16 sps:$4 sm:$0xff]   ;;  %v17413_v14 = vld [vmem:[#allocation11 + $0x408] ss:$16 sps:$4 sm:$0xff]  }
 0xc1d   :  { %11595 = vmatprep.subr.bf16.mxu1 %v17382_v13  ;;  %v17416_v32 = vld [vmem:[#allocation11 + $0x608] ss:$16 sps:$4 sm:$0xff]   ;;  %v17421_v39 = vld [vmem:[#allocation11 + $0x5ec] ss:$16 sps:$4 sm:$0xff]  }
 0xc1e   :  { %11553 = vmatpush1.bf16.msra.mxu0 %v17377_v30  ;;  %v17424_v43 = vld [vmem:[#allocation11 + $0x7ec] ss:$16 sps:$4 sm:$0xff]   ;;  %v17419_v22 = vld [vmem:[#allocation11 + $0x5e8] ss:$16 sps:$4 sm:$0xff]  }
 0xc1f   :  { %11596 = vmatpush1.bf16.msra.mxu1 %v17380_v8  ;;  %11554 = vmatprep.subr.bf16.mxu0 %v17385_v4  ;;  %v17422_v31 = vld [vmem:[#allocation11 + $0x7e8] ss:$16 sps:$4 sm:$0xff]   ;;  %v17427_v42 = vld [vmem:[#allocation11 + $0x5cc] ss:$16 sps:$4 sm:$0xff]  }
 0xc20   :  { %11597 = vmatprep.subr.bf16.mxu1 %v17388_v24  ;;  %v17430_v62 = vld [vmem:[#allocation11 + $0x7cc] ss:$16 sps:$4 sm:$0xff]   ;;  %v17425_v44 = vld [vmem:[#allocation11 + $0x5c8] ss:$16 sps:$4 sm:$0xff]  }
 0xc21   :  { %v17428_v59 = vld [vmem:[#allocation11 + $0x7c8] ss:$16 sps:$4 sm:$0xff]   ;;  %v17433_v37 = vld [vmem:[#allocation11 + $0x5ac] ss:$16 sps:$4 sm:$0xff]  }
 0xc22   :  { %11555 = vmatpush1.bf16.msra.mxu0 %v17383_v50  ;;  %v17436_v2 = vld [vmem:[#allocation11 + $0x7ac] ss:$16 sps:$4 sm:$0xff]   ;;  %v17431_v5 = vld [vmem:[#allocation11 + $0x5a8] ss:$16 sps:$4 sm:$0xff]  }
 0xc23   :  { %11598 = vmatpush1.bf16.msra.mxu1 %v17386_v6  ;;  %11556 = vmatprep.subr.bf16.mxu0 %v17391_v15  ;;  %v17434_v25 = vld [vmem:[#allocation11 + $0x7a8] ss:$16 sps:$4 sm:$0xff]   ;;  %v17439_v34 = vld [vmem:[#allocation11 + $0x58c] ss:$16 sps:$4 sm:$0xff]  }
 0xc24   :  { %11599 = vmatprep.subr.bf16.mxu1 %v17394_v48  ;;  %v17442_v20 = vld [vmem:[#allocation11 + $0x78c] ss:$16 sps:$4 sm:$0xff]   ;;  %v17437_v56 = vld [vmem:[#allocation11 + $0x588] ss:$16 sps:$4 sm:$0xff]  }
 0xc25   :  { %v17440_v13 = vld [vmem:[#allocation11 + $0x788] ss:$16 sps:$4 sm:$0xff]   ;;  %v17445_v0 = vld [vmem:[#allocation11 + $0x56c] ss:$16 sps:$4 sm:$0xff]  }
 0xc26   :  { %11557 = vmatpush1.bf16.msra.mxu0 %v17389_v54  ;;  %v17448_v61 = vld [vmem:[#allocation11 + $0x76c] ss:$16 sps:$4 sm:$0xff]   ;;  %v17443_v47 = vld [vmem:[#allocation11 + $0x568] ss:$16 sps:$4 sm:$0xff]  }
 0xc27   :  { %11600 = vmatpush1.bf16.msra.mxu1 %v17392_v11  ;;  %11558 = vmatprep.subr.bf16.mxu0 %v17397_v23  ;;  %v17446_v1 = vld [vmem:[#allocation11 + $0x768] ss:$16 sps:$4 sm:$0xff]   ;;  %v17451_v30 = vld [vmem:[#allocation11 + $0x54c] ss:$16 sps:$4 sm:$0xff]  }
 0xc28   :  { %11601 = vmatprep.subr.bf16.mxu1 %v17400_v41  ;;  %v17454_v8 = vld [vmem:[#allocation11 + $0x74c] ss:$16 sps:$4 sm:$0xff]   ;;  %v17449_v4 = vld [vmem:[#allocation11 + $0x548] ss:$16 sps:$4 sm:$0xff]  }
 0xc29   :  { %v17452_v24 = vld [vmem:[#allocation11 + $0x748] ss:$16 sps:$4 sm:$0xff]   ;;  %v17457_v50 = vld [vmem:[#allocation11 + $0x52c] ss:$16 sps:$4 sm:$0xff]  }
 0xc2a   :  { %11559 = vmatpush1.bf16.msra.mxu0 %v17395_v7  ;;  %v17460_v6 = vld [vmem:[#allocation11 + $0x72c] ss:$16 sps:$4 sm:$0xff]   ;;  %v17455_v15 = vld [vmem:[#allocation11 + $0x528] ss:$16 sps:$4 sm:$0xff]   ;;  %v17469_v7 = vld [vmem:[#allocation11 + $0xe4] ss:$16 sps:$4 sm:$0xff]  }
 0xc2b   :  { %11602 = vmatpush1.bf16.msra.mxu1 %v17398_v55  ;;  %11560 = vmatprep.subr.bf16.mxu0 %v17403_v46  ;;  %v17458_v48 = vld [vmem:[#allocation11 + $0x728] ss:$16 sps:$4 sm:$0xff]   ;;  %v17463_v54 = vld [vmem:[#allocation11 + $0x50c] ss:$16 sps:$4 sm:$0xff]   ;;  %v17472_v55 = vld [vmem:[#allocation11 + $0x2e4] ss:$16 sps:$4 sm:$0xff]  }
 0xc2c   :  { %11603 = vmatprep.subr.bf16.mxu1 %v17406_v9  ;;  %v17466_v11 = vld [vmem:[#allocation11 + $0x70c] ss:$16 sps:$4 sm:$0xff]   ;;  %v17461_v23 = vld [vmem:[#allocation11 + $0x508] ss:$16 sps:$4 sm:$0xff]   ;;  %v17467_v46 = vld [vmem:[#allocation11 + $0xe0] ss:$16 sps:$4 sm:$0xff]  }
 0xc2d   :  { %v17464_v41 = vld [vmem:[#allocation11 + $0x708] ss:$16 sps:$4 sm:$0xff]   ;;  %v17470_v9 = vld [vmem:[#allocation11 + $0x2e0] ss:$16 sps:$4 sm:$0xff]  }
 0xc2e   :  { %11561 = vmatpush1.bf16.msra.mxu0 %v17401_v60  ;;  %v17475_v60 = vld [vmem:[#allocation11 + $0xc4] ss:$16 sps:$4 sm:$0xff]  }
 0xc2f   :  { %11604 = vmatpush1.bf16.msra.mxu1 %v17404_v45  ;;  %11562 = vmatprep.subr.bf16.mxu0 %v17409_v19  ;;  %v17478_v45 = vld [vmem:[#allocation11 + $0x2c4] ss:$16 sps:$4 sm:$0xff]   ;;  %v17473_v19 = vld [vmem:[#allocation11 + $0xc0] ss:$16 sps:$4 sm:$0xff]  }
 0xc30   :  { %11605 = vmatprep.subr.bf16.mxu1 %v17412_v40  ;;  %v17476_v40 = vld [vmem:[#allocation11 + $0x2c0] ss:$16 sps:$4 sm:$0xff]  }
 0xc32   :  { %11563 = vmatpush1.bf16.msra.mxu0 %v17407_v29  ;;  %v17481_v29 = vld [vmem:[#allocation11 + $0xa4] ss:$16 sps:$4 sm:$0xff]  }
 0xc33   :  { %11606 = vmatpush1.bf16.msra.mxu1 %v17410_v51  ;;  %11564 = vmatprep.subr.bf16.mxu0 %v17415_v35  ;;  %v17484_v51 = vld [vmem:[#allocation11 + $0x2a4] ss:$16 sps:$4 sm:$0xff]   ;;  %v17479_v35 = vld [vmem:[#allocation11 + $0xa0] ss:$16 sps:$4 sm:$0xff]  }
 0xc34   :  { %11607 = vmatprep.subr.bf16.mxu1 %v17418_v27  ;;  %v17482_v27 = vld [vmem:[#allocation11 + $0x2a0] ss:$16 sps:$4 sm:$0xff]  }
 0xc36   :  { %11565 = vmatpush1.bf16.msra.mxu0 %v17413_v14  ;;  %v17485_v14 = vld [vmem:[#allocation11 + $0x80] ss:$16 sps:$4 sm:$0xff]  }
 0xc37   :  { %11608 = vmatpush1.bf16.msra.mxu1 %v17416_v32  ;;  %11566 = vmatprep.subr.bf16.mxu0 %v17421_v39  ;;  %v17488_v32 = vld [vmem:[#allocation11 + $0x280] ss:$16 sps:$4 sm:$0xff]   ;;  %v17493_v39 = vld [vmem:[#allocation11 + $0x64] ss:$16 sps:$4 sm:$0xff]  }
 0xc38   :  { %11609 = vmatprep.subr.bf16.mxu1 %v17424_v43  ;;  %v17496_v43 = vld [vmem:[#allocation11 + $0x264] ss:$16 sps:$4 sm:$0xff]  }
 0xc3a   :  { %11567 = vmatpush2.bf16.msra.mxu0 %v17419_v22  ;;  %v17491_v22 = vld [vmem:[#allocation11 + $0x60] ss:$16 sps:$4 sm:$0xff]  }
 0xc3b   :  { %11610 = vmatpush2.bf16.msra.mxu1 %v17422_v31  ;;  %11568 = vmatprep.subr.bf16.mxu0 %v17427_v42  ;;  %v17494_v31 = vld [vmem:[#allocation11 + $0x260] ss:$16 sps:$4 sm:$0xff]   ;;  %v17499_v42 = vld [vmem:[#allocation11 + $0x44] ss:$16 sps:$4 sm:$0xff]  }
 0xc3c   :  { %11611 = vmatprep.subr.bf16.mxu1 %v17430_v62  ;;  %v17502_v62 = vld [vmem:[#allocation11 + $0x244] ss:$16 sps:$4 sm:$0xff]  }
 0xc3e   :  { %11569 = vmatpush2.bf16.msra.mxu0 %v17425_v44  ;;  %v17497_v44 = vld [vmem:[#allocation11 + $0x40] ss:$16 sps:$4 sm:$0xff]  }
 0xc3f   :  { %11612 = vmatpush2.bf16.msra.mxu1 %v17428_v59  ;;  %11570 = vmatprep.subr.bf16.mxu0 %v17433_v37  ;;  %v17500_v59 = vld [vmem:[#allocation11 + $0x240] ss:$16 sps:$4 sm:$0xff]   ;;  %v17505_v37 = vld [vmem:[#allocation11 + $0x24] ss:$16 sps:$4 sm:$0xff]  }
 0xc40   :  { %11613 = vmatprep.subr.bf16.mxu1 %v17436_v2  ;;  %v17508_v2 = vld [vmem:[#allocation11 + $0x224] ss:$16 sps:$4 sm:$0xff]  }
 0xc42   :  { %11571 = vmatpush2.bf16.msra.mxu0 %v17431_v5  ;;  %v17503_v5 = vld [vmem:[#allocation11 + $0x20] ss:$16 sps:$4 sm:$0xff]  }
 0xc43   :  { %11614 = vmatpush2.bf16.msra.mxu1 %v17434_v25  ;;  %11572 = vmatprep.subr.bf16.mxu0 %v17439_v34  ;;  %v17506_v25 = vld [vmem:[#allocation11 + $0x220] ss:$16 sps:$4 sm:$0xff]   ;;  %v17511_v34 = vld [vmem:[#allocation11 + $0x4] ss:$16 sps:$4 sm:$0xff]  }
 0xc44   :  { %11615 = vmatprep.subr.bf16.mxu1 %v17442_v20  ;;  %v17514_v20 = vld [vmem:[#allocation11 + $0x204] ss:$16 sps:$4 sm:$0xff]  }
 0xc46   :  { %11573 = vmatpush2.bf16.msra.mxu0 %v17437_v56  ;;  %v17509_v56 = vld [vmem:[#allocation11] ss:$16 sps:$4 sm:$0xff]  }
 0xc47   :  { %11616 = vmatpush2.bf16.msra.mxu1 %v17440_v13  ;;  %11574 = vmatprep.subr.bf16.mxu0 %v17445_v0  ;;  %v17512_v13 = vld [vmem:[#allocation11 + $0x200] ss:$16 sps:$4 sm:$0xff]   ;;  %v17517_v0 = vld [vmem:[#allocation11 + $0x1e4] ss:$16 sps:$4 sm:$0xff]  }
 0xc48   :  { %11617 = vmatprep.subr.bf16.mxu1 %v17448_v61  ;;  %v17520_v61 = vld [vmem:[#allocation11 + $0x3e4] ss:$16 sps:$4 sm:$0xff]  }
 0xc4a   :  { %11575 = vmatpush2.bf16.msra.mxu0 %v17443_v47  ;;  %v17515_v47 = vld [vmem:[#allocation11 + $0x1e0] ss:$16 sps:$4 sm:$0xff]  }
 0xc4b   :  { %11618 = vmatpush2.bf16.msra.mxu1 %v17446_v1  ;;  %11576 = vmatprep.subr.bf16.mxu0 %v17451_v30  ;;  %v17518_v1 = vld [vmem:[#allocation11 + $0x3e0] ss:$16 sps:$4 sm:$0xff]   ;;  %v17523_v30 = vld [vmem:[#allocation11 + $0x1c4] ss:$16 sps:$4 sm:$0xff]  }
 0xc4c   :  { %11619 = vmatprep.subr.bf16.mxu1 %v17454_v8  ;;  %v17526_v8 = vld [vmem:[#allocation11 + $0x3c4] ss:$16 sps:$4 sm:$0xff]  }
 0xc4e   :  { %11577 = vmatpush2.bf16.msra.mxu0 %v17449_v4  ;;  %v17521_v4 = vld [vmem:[#allocation11 + $0x1c0] ss:$16 sps:$4 sm:$0xff]  }
 0xc4f   :  { %11620 = vmatpush2.bf16.msra.mxu1 %v17452_v24  ;;  %11578 = vmatprep.subr.bf16.mxu0 %v17457_v50  ;;  %v17524_v24 = vld [vmem:[#allocation11 + $0x3c0] ss:$16 sps:$4 sm:$0xff]   ;;  %v17529_v50 = vld [vmem:[#allocation11 + $0x1a4] ss:$16 sps:$4 sm:$0xff]  }
 0xc50   :  { %11621 = vmatprep.subr.bf16.mxu1 %v17460_v6  ;;  %v17532_v6 = vld [vmem:[#allocation11 + $0x3a4] ss:$16 sps:$4 sm:$0xff]  }
 0xc52   :  { %11579 = vmatpush2.bf16.msra.mxu0 %v17455_v15  ;;  %v17527_v15 = vld [vmem:[#allocation11 + $0x1a0] ss:$16 sps:$4 sm:$0xff]  }
 0xc53   :  { %11622 = vmatpush2.bf16.msra.mxu1 %v17458_v48  ;;  %11580 = vmatprep.subr.bf16.mxu0 %v17463_v54  ;;  %v17530_v48 = vld [vmem:[#allocation11 + $0x3a0] ss:$16 sps:$4 sm:$0xff]   ;;  %v17535_v54 = vld [vmem:[#allocation11 + $0x184] ss:$16 sps:$4 sm:$0xff]  }
 0xc54   :  { %11623 = vmatprep.subr.bf16.mxu1 %v17466_v11  ;;  %v17538_v11 = vld [vmem:[#allocation11 + $0x384] ss:$16 sps:$4 sm:$0xff]  }
 0xc56   :  { %11581 = vmatpush2.bf16.msra.mxu0 %v17461_v23  ;;  %v17533_v23 = vld [vmem:[#allocation11 + $0x180] ss:$16 sps:$4 sm:$0xff]  }
 0xc57   :  { %11624 = vmatpush2.bf16.msra.mxu1 %v17464_v41  ;;  %12280 = vmatprep.subr.bf16.mxu0 %v17469_v7  ;;  %v17536_v41 = vld [vmem:[#allocation11 + $0x380] ss:$16 sps:$4 sm:$0xff]   ;;  %v17541_v7 = vld [vmem:[#allocation11 + $0x164] ss:$16 sps:$4 sm:$0xff]  }
 0xc58   :  { %12323 = vmatprep.subr.bf16.mxu1 %v17472_v55  ;;  %v17544_v55 = vld [vmem:[#allocation11 + $0x364] ss:$16 sps:$4 sm:$0xff]  }
 0xc59   :  { %11583 = vmatmul.mubr.bf16.vlgmr.msra.gmra.mxu0 %v19523_v16  ;;  %v17487_v16 = vld [vmem:[#allocation11 + $0x84] ss:$16 sps:$4 sm:$0xff]  }
 0xc5a   :  { %11626 = vmatmul.mubr.bf16.vlgmr.msra.gmra.mxu1 %v19526_v52  ;;  %12281 = vmatpush1.bf16.msra.mxu0 %v17467_v46  ;;  %v17490_v52 = vld [vmem:[#allocation11 + $0x284] ss:$16 sps:$4 sm:$0xff]   ;;  %v17539_v46 = vld [vmem:[#allocation11 + $0x160] ss:$16 sps:$4 sm:$0xff]  }
 0xc5b   :  { %12312 = vmatprep.mubr.bf16.mxu0 %v19497_v26  ;;  %12324 = vmatpush1.bf16.msra.mxu1 %v17470_v9  ;;  %v17542_v9 = vld [vmem:[#allocation11 + $0x360] ss:$16 sps:$4 sm:$0xff]  }
 0xc5c   :  { %12355 = vmatprep.mubr.bf16.mxu1 %v19500_v63  ;;  %12282 = vmatprep.subr.bf16.mxu0 %v17475_v60  ;;  %v17547_v60 = vld [vmem:[#allocation11 + $0x144] ss:$16 sps:$4 sm:$0xff]  }
 0xc5d   :  { %12325 = vmatprep.subr.bf16.mxu1 %v17478_v45  ;;  %v17550_v45 = vld [vmem:[#allocation11 + $0x344] ss:$16 sps:$4 sm:$0xff]  }
 0xc5e   :  { %12283 = vmatpush1.bf16.msra.mxu0 %v17473_v19  ;;  %v17545_v19 = vld [vmem:[#allocation11 + $0x140] ss:$16 sps:$4 sm:$0xff]  }
 0xc5f   :  { %12326 = vmatpush1.bf16.msra.mxu1 %v17476_v40  ;;  %12284 = vmatprep.subr.bf16.mxu0 %v17481_v29  ;;  %v17548_v40 = vld [vmem:[#allocation11 + $0x340] ss:$16 sps:$4 sm:$0xff]   ;;  %v17553_v29 = vld [vmem:[#allocation11 + $0x124] ss:$16 sps:$4 sm:$0xff]  }
 0xc60   :  { %12327 = vmatprep.subr.bf16.mxu1 %v17484_v51  ;;  %v17556_v51 = vld [vmem:[#allocation11 + $0x324] ss:$16 sps:$4 sm:$0xff]  }
 0xc62   :  { %12285 = vmatpush1.bf16.msra.mxu0 %v17479_v35  ;;  %v17551_v35 = vld [vmem:[#allocation11 + $0x120] ss:$16 sps:$4 sm:$0xff]  }
 0xc63   :  { %12328 = vmatpush1.bf16.msra.mxu1 %v17482_v27  ;;  %12286 = vmatprep.subr.bf16.mxu0 %v17487_v16  ;;  %v17554_v27 = vld [vmem:[#allocation11 + $0x320] ss:$16 sps:$4 sm:$0xff]   ;;  %v17559_v16 = vld [vmem:[#allocation11 + $0x104] ss:$16 sps:$4 sm:$0xff]  }
 0xc64   :  { %12329 = vmatprep.subr.bf16.mxu1 %v17490_v52  ;;  %v17562_v52 = vld [vmem:[#allocation11 + $0x304] ss:$16 sps:$4 sm:$0xff]  }
 0xc66   :  { %12287 = vmatpush1.bf16.msra.mxu0 %v17485_v14  ;;  %v17557_v14 = vld [vmem:[#allocation11 + $0x100] ss:$16 sps:$4 sm:$0xff]  }
 0xc67   :  { %12330 = vmatpush1.bf16.msra.mxu1 %v17488_v32  ;;  %12288 = vmatprep.subr.bf16.mxu0 %v17493_v39  ;;  %v17560_v32 = vld [vmem:[#allocation11 + $0x300] ss:$16 sps:$4 sm:$0xff]   ;;  %v17565_v39 = vld [vmem:[#allocation11 + $0xec] ss:$16 sps:$4 sm:$0xff]  }
 0xc68   :  { %12331 = vmatprep.subr.bf16.mxu1 %v17496_v43  ;;  %v17568_v43 = vld [vmem:[#allocation11 + $0x2ec] ss:$16 sps:$4 sm:$0xff]  }
 0xc6a   :  { %12289 = vmatpush1.bf16.msra.mxu0 %v17491_v22  ;;  %v17563_v22 = vld [vmem:[#allocation11 + $0xe8] ss:$16 sps:$4 sm:$0xff]  }
 0xc6b   :  { %12332 = vmatpush1.bf16.msra.mxu1 %v17494_v31  ;;  %12290 = vmatprep.subr.bf16.mxu0 %v17499_v42  ;;  %v17566_v31 = vld [vmem:[#allocation11 + $0x2e8] ss:$16 sps:$4 sm:$0xff]   ;;  %v17571_v42 = vld [vmem:[#allocation11 + $0xcc] ss:$16 sps:$4 sm:$0xff]  }
 0xc6c   :  { %12333 = vmatprep.subr.bf16.mxu1 %v17502_v62  ;;  %v17574_v62 = vld [vmem:[#allocation11 + $0x2cc] ss:$16 sps:$4 sm:$0xff]  }
 0xc6e   :  { %12291 = vmatpush1.bf16.msra.mxu0 %v17497_v44  ;;  %v17569_v44 = vld [vmem:[#allocation11 + $0xc8] ss:$16 sps:$4 sm:$0xff]  }
 0xc6f   :  { %12334 = vmatpush1.bf16.msra.mxu1 %v17500_v59  ;;  %12292 = vmatprep.subr.bf16.mxu0 %v17505_v37  ;;  %v17572_v59 = vld [vmem:[#allocation11 + $0x2c8] ss:$16 sps:$4 sm:$0xff]   ;;  %v17577_v37 = vld [vmem:[#allocation11 + $0xac] ss:$16 sps:$4 sm:$0xff]  }
 0xc70   :  { %12335 = vmatprep.subr.bf16.mxu1 %v17508_v2  ;;  %v17580_v2 = vld [vmem:[#allocation11 + $0x2ac] ss:$16 sps:$4 sm:$0xff]  }
 0xc72   :  { %12293 = vmatpush1.bf16.msra.mxu0 %v17503_v5  ;;  %v17575_v5 = vld [vmem:[#allocation11 + $0xa8] ss:$16 sps:$4 sm:$0xff]  }
 0xc73   :  { %12336 = vmatpush1.bf16.msra.mxu1 %v17506_v25  ;;  %12294 = vmatprep.subr.bf16.mxu0 %v17511_v34  ;;  %v17578_v25 = vld [vmem:[#allocation11 + $0x2a8] ss:$16 sps:$4 sm:$0xff]   ;;  %v17583_v34 = vld [vmem:[#allocation11 + $0x8c] ss:$16 sps:$4 sm:$0xff]  }
 0xc74   :  { %12337 = vmatprep.subr.bf16.mxu1 %v17514_v20  ;;  %v17586_v20 = vld [vmem:[#allocation11 + $0x28c] ss:$16 sps:$4 sm:$0xff]  }
 0xc76   :  { %12295 = vmatpush1.bf16.msra.mxu0 %v17509_v56  ;;  %v17581_v56 = vld [vmem:[#allocation11 + $0x88] ss:$16 sps:$4 sm:$0xff]  }
 0xc77   :  { %12338 = vmatpush1.bf16.msra.mxu1 %v17512_v13  ;;  %12296 = vmatprep.subr.bf16.mxu0 %v17517_v0  ;;  %v17589_v13 = vld [vmem:[#allocation11 + $0x6c] ss:$16 sps:$4 sm:$0xff]  }
 0xc78   :  { %12339 = vmatprep.subr.bf16.mxu1 %v17520_v61  ;;  %v17592_v0 = vld [vmem:[#allocation11 + $0x26c] ss:$16 sps:$4 sm:$0xff]   ;;  %v17590_v61 = vld [vmem:[#allocation11 + $0x268] ss:$16 sps:$4 sm:$0xff]  }
 0xc7a   :  { %12297 = vmatpush2.bf16.msra.mxu0 %v17515_v47  ;;  %v17595_v47 = vld [vmem:[#allocation11 + $0x4c] ss:$16 sps:$4 sm:$0xff]  }
 0xc7b   :  { %12340 = vmatpush2.bf16.msra.mxu1 %v17518_v1  ;;  %12298 = vmatprep.subr.bf16.mxu0 %v17523_v30  ;;  %v17598_v1 = vld [vmem:[#allocation11 + $0x24c] ss:$16 sps:$4 sm:$0xff]   ;;  %v17593_v30 = vld [vmem:[#allocation11 + $0x48] ss:$16 sps:$4 sm:$0xff]  }
 0xc7c   :  { %12341 = vmatprep.subr.bf16.mxu1 %v17526_v8  ;;  %v17596_v8 = vld [vmem:[#allocation11 + $0x248] ss:$16 sps:$4 sm:$0xff]  }
 0xc7e   :  { %12299 = vmatpush2.bf16.msra.mxu0 %v17521_v4  ;;  %v17601_v4 = vld [vmem:[#allocation11 + $0x2c] ss:$16 sps:$4 sm:$0xff]  }
 0xc7f   :  { %12342 = vmatpush2.bf16.msra.mxu1 %v17524_v24  ;;  %12300 = vmatprep.subr.bf16.mxu0 %v17529_v50  ;;  %v17604_v24 = vld [vmem:[#allocation11 + $0x22c] ss:$16 sps:$4 sm:$0xff]   ;;  %v17599_v50 = vld [vmem:[#allocation11 + $0x28] ss:$16 sps:$4 sm:$0xff]  }
 0xc80   :  { %12343 = vmatprep.subr.bf16.mxu1 %v17532_v6  ;;  %v17602_v6 = vld [vmem:[#allocation11 + $0x228] ss:$16 sps:$4 sm:$0xff]  }
 0xc82   :  { %12301 = vmatpush2.bf16.msra.mxu0 %v17527_v15  ;;  %v17607_v15 = vld [vmem:[#allocation11 + $0xc] ss:$16 sps:$4 sm:$0xff]  }
 0xc83   :  { %12344 = vmatpush2.bf16.msra.mxu1 %v17530_v48  ;;  %12302 = vmatprep.subr.bf16.mxu0 %v17535_v54  ;;  %v17610_v48 = vld [vmem:[#allocation11 + $0x20c] ss:$16 sps:$4 sm:$0xff]   ;;  %v17605_v54 = vld [vmem:[#allocation11 + $0x8] ss:$16 sps:$4 sm:$0xff]  }
 0xc84   :  { %12345 = vmatprep.subr.bf16.mxu1 %v17538_v11  ;;  %v17608_v11 = vld [vmem:[#allocation11 + $0x208] ss:$16 sps:$4 sm:$0xff]  }
 0xc86   :  { %12303 = vmatpush2.bf16.msra.mxu0 %v17533_v23  ;;  %v17613_v23 = vld [vmem:[#allocation11 + $0x1ec] ss:$16 sps:$4 sm:$0xff]  }
 0xc87   :  { %12346 = vmatpush2.bf16.msra.mxu1 %v17536_v41  ;;  %12304 = vmatprep.subr.bf16.mxu0 %v17541_v7  ;;  %v17616_v41 = vld [vmem:[#allocation11 + $0x3ec] ss:$16 sps:$4 sm:$0xff]   ;;  %v17611_v7 = vld [vmem:[#allocation11 + $0x1e8] ss:$16 sps:$4 sm:$0xff]  }
 0xc88   :  { %12347 = vmatprep.subr.bf16.mxu1 %v17544_v55  ;;  %v17614_v55 = vld [vmem:[#allocation11 + $0x3e8] ss:$16 sps:$4 sm:$0xff]  }
 0xc8a   :  { %12305 = vmatpush2.bf16.msra.mxu0 %v17539_v46  ;;  %v17619_v46 = vld [vmem:[#allocation11 + $0x1cc] ss:$16 sps:$4 sm:$0xff]  }
 0xc8b   :  { %12348 = vmatpush2.bf16.msra.mxu1 %v17542_v9  ;;  %12306 = vmatprep.subr.bf16.mxu0 %v17547_v60  ;;  %v17622_v9 = vld [vmem:[#allocation11 + $0x3cc] ss:$16 sps:$4 sm:$0xff]   ;;  %v17617_v60 = vld [vmem:[#allocation11 + $0x1c8] ss:$16 sps:$4 sm:$0xff]  }
 0xc8c   :  { %12349 = vmatprep.subr.bf16.mxu1 %v17550_v45  ;;  %v17620_v45 = vld [vmem:[#allocation11 + $0x3c8] ss:$16 sps:$4 sm:$0xff]  }
 0xc8e   :  { %12307 = vmatpush2.bf16.msra.mxu0 %v17545_v19  ;;  %v17625_v19 = vld [vmem:[#allocation11 + $0x1ac] ss:$16 sps:$4 sm:$0xff]  }
 0xc8f   :  { %12350 = vmatpush2.bf16.msra.mxu1 %v17548_v40  ;;  %12308 = vmatprep.subr.bf16.mxu0 %v17553_v29  ;;  %v17628_v40 = vld [vmem:[#allocation11 + $0x3ac] ss:$16 sps:$4 sm:$0xff]   ;;  %v17623_v29 = vld [vmem:[#allocation11 + $0x1a8] ss:$16 sps:$4 sm:$0xff]  }
 0xc90   :  { %12351 = vmatprep.subr.bf16.mxu1 %v17556_v51  ;;  %v17626_v51 = vld [vmem:[#allocation11 + $0x3a8] ss:$16 sps:$4 sm:$0xff]  }
 0xc92   :  { %12309 = vmatpush2.bf16.msra.mxu0 %v17551_v35  ;;  %v17631_v35 = vld [vmem:[#allocation11 + $0x18c] ss:$16 sps:$4 sm:$0xff]  }
 0xc93   :  { %12352 = vmatpush2.bf16.msra.mxu1 %v17554_v27  ;;  %12310 = vmatprep.subr.bf16.mxu0 %v17559_v16  ;;  %v17634_v27 = vld [vmem:[#allocation11 + $0x38c] ss:$16 sps:$4 sm:$0xff]   ;;  %v17629_v16 = vld [vmem:[#allocation11 + $0x188] ss:$16 sps:$4 sm:$0xff]  }
 0xc94   :  { %12353 = vmatprep.subr.bf16.mxu1 %v17562_v52  ;;  %v17632_v52 = vld [vmem:[#allocation11 + $0x388] ss:$16 sps:$4 sm:$0xff]  }
 0xc96   :  { %12311 = vmatpush2.bf16.msra.mxu0 %v17557_v14  ;;  %v17637_v14 = vld [vmem:[#allocation11 + $0x16c] ss:$16 sps:$4 sm:$0xff]  }
 0xc97   :  { %12354 = vmatpush2.bf16.msra.mxu1 %v17560_v32  ;;  %12366 = vmatprep.subr.bf16.mxu0 %v17565_v39  ;;  %v17640_v32 = vld [vmem:[#allocation11 + $0x36c] ss:$16 sps:$4 sm:$0xff]   ;;  %v17635_v39 = vld [vmem:[#allocation11 + $0x168] ss:$16 sps:$4 sm:$0xff]  }
 0xc98   :  { %12409 = vmatprep.subr.bf16.mxu1 %v17568_v43  ;;  %v17638_v43 = vld [vmem:[#allocation11 + $0x368] ss:$16 sps:$4 sm:$0xff]  }
 0xc99   :  { %12313 = vmatmul.mubr.bf16.vlgmr.msra.gmra.mxu0 %v19503_v17 }
 0xc9a   :  { %12356 = vmatmul.mubr.bf16.vlgmr.msra.gmra.mxu1 %v19506_v49  ;;  %12367 = vmatpush1.bf16.msra.mxu0 %v17563_v22  ;;  %v17643_v22 = vld [vmem:[#allocation11 + $0x14c] ss:$16 sps:$4 sm:$0xff]  }
 0xc9b   :  { %12398 = vmatprep.mubr.bf16.mxu0 %v19497_v26  ;;  %12410 = vmatpush1.bf16.msra.mxu1 %v17566_v31  ;;  %v17584_v26 = vld [vmem:[#allocation11 + $0x288] ss:$16 sps:$4 sm:$0xff]   ;;  %v17646_v31 = vld [vmem:[#allocation11 + $0x34c] ss:$16 sps:$4 sm:$0xff]  }
 0xc9c   :  { %12441 = vmatprep.mubr.bf16.mxu1 %v19500_v63  ;;  %12368 = vmatprep.subr.bf16.mxu0 %v17571_v42  ;;  %v17587_v63 = vld [vmem:[#allocation11 + $0x68] ss:$16 sps:$4 sm:$0xff]  }
 0xc9d   :  { %12411 = vmatprep.subr.bf16.mxu1 %v17574_v62  ;;  %v17641_v42 = vld [vmem:[#allocation11 + $0x148] ss:$16 sps:$4 sm:$0xff]  }
 0xc9e   :  { %12369 = vmatpush1.bf16.msra.mxu0 %v17569_v44  ;;  %v17644_v62 = vld [vmem:[#allocation11 + $0x348] ss:$16 sps:$4 sm:$0xff]   ;;  %v17649_v44 = vld [vmem:[#allocation11 + $0x12c] ss:$16 sps:$4 sm:$0xff]  }
 0xc9f   :  { %12412 = vmatpush1.bf16.msra.mxu1 %v17572_v59  ;;  %12370 = vmatprep.subr.bf16.mxu0 %v17577_v37  ;;  %v17652_v59 = vld [vmem:[#allocation11 + $0x32c] ss:$16 sps:$4 sm:$0xff]   ;;  %v17647_v37 = vld [vmem:[#allocation11 + $0x128] ss:$16 sps:$4 sm:$0xff]  }
 0xca0   :  { %12413 = vmatprep.subr.bf16.mxu1 %v17580_v2  ;;  %v17650_v2 = vld [vmem:[#allocation11 + $0x328] ss:$16 sps:$4 sm:$0xff]  }
 0xca2   :  { %12371 = vmatpush1.bf16.msra.mxu0 %v17575_v5  ;;  %v17655_v5 = vld [vmem:[#allocation11 + $0x10c] ss:$16 sps:$4 sm:$0xff]  }
 0xca3   :  { %12414 = vmatpush1.bf16.msra.mxu1 %v17578_v25  ;;  %12372 = vmatprep.subr.bf16.mxu0 %v17583_v34  ;;  %v17658_v25 = vld [vmem:[#allocation11 + $0x30c] ss:$16 sps:$4 sm:$0xff]   ;;  %v17653_v34 = vld [vmem:[#allocation11 + $0x108] ss:$16 sps:$4 sm:$0xff]  }
 0xca4   :  { %12415 = vmatprep.subr.bf16.mxu1 %v17586_v20  ;;  %v17656_v20 = vld [vmem:[#allocation11 + $0x308] ss:$16 sps:$4 sm:$0xff]  }
 0xca6   :  { %12373 = vmatpush1.bf16.msra.mxu0 %v17581_v56  ;;  %v17661_v56 = vld [vmem:[#allocation11 + $0x8e4] ss:$16 sps:$4 sm:$0xff]  }
 0xca7   :  { %12416 = vmatpush1.bf16.msra.mxu1 %v17584_v26  ;;  %12374 = vmatprep.subr.bf16.mxu0 %v17589_v13  ;;  %v17664_v26 = vld [vmem:[#allocation11 + $0xae4] ss:$16 sps:$4 sm:$0xff]   ;;  %v17659_v13 = vld [vmem:[#allocation11 + $0x8e0] ss:$16 sps:$4 sm:$0xff]  }
 0xca8   :  { %12417 = vmatprep.subr.bf16.mxu1 %v17592_v0  ;;  %v17662_v0 = vld [vmem:[#allocation11 + $0xae0] ss:$16 sps:$4 sm:$0xff]  }
 0xcaa   :  { %12375 = vmatpush1.bf16.msra.mxu0 %v17587_v63  ;;  %v17667_v63 = vld [vmem:[#allocation11 + $0x8c4] ss:$16 sps:$4 sm:$0xff]  }
 0xcab   :  { %12418 = vmatpush1.bf16.msra.mxu1 %v17590_v61  ;;  %12376 = vmatprep.subr.bf16.mxu0 %v17595_v47  ;;  %v17670_v61 = vld [vmem:[#allocation11 + $0xac4] ss:$16 sps:$4 sm:$0xff]   ;;  %v17665_v47 = vld [vmem:[#allocation11 + $0x8c0] ss:$16 sps:$4 sm:$0xff]  }
 0xcac   :  { %12419 = vmatprep.subr.bf16.mxu1 %v17598_v1  ;;  %v17668_v1 = vld [vmem:[#allocation11 + $0xac0] ss:$16 sps:$4 sm:$0xff]  }
 0xcae   :  { %12377 = vmatpush1.bf16.msra.mxu0 %v17593_v30  ;;  %v17673_v30 = vld [vmem:[#allocation11 + $0x8a4] ss:$16 sps:$4 sm:$0xff]  }
 0xcaf   :  { %12420 = vmatpush1.bf16.msra.mxu1 %v17596_v8  ;;  %12378 = vmatprep.subr.bf16.mxu0 %v17601_v4  ;;  %v17676_v8 = vld [vmem:[#allocation11 + $0xaa4] ss:$16 sps:$4 sm:$0xff]   ;;  %v17671_v4 = vld [vmem:[#allocation11 + $0x8a0] ss:$16 sps:$4 sm:$0xff]  }
 0xcb0   :  { %12421 = vmatprep.subr.bf16.mxu1 %v17604_v24  ;;  %v17679_v24 = vld [vmem:[#allocation11 + $0x884] ss:$16 sps:$4 sm:$0xff]  }
 0xcb2   :  { %12379 = vmatpush1.bf16.msra.mxu0 %v17599_v50  ;;  %v17677_v50 = vld [vmem:[#allocation11 + $0x880] ss:$16 sps:$4 sm:$0xff]  }
 0xcb3   :  { %12422 = vmatpush1.bf16.msra.mxu1 %v17602_v6  ;;  %12380 = vmatprep.subr.bf16.mxu0 %v17607_v15  ;;  %v17680_v6 = vld [vmem:[#allocation11 + $0xa80] ss:$16 sps:$4 sm:$0xff]   ;;  %v17685_v15 = vld [vmem:[#allocation11 + $0x864] ss:$16 sps:$4 sm:$0xff]  }
 0xcb4   :  { %12423 = vmatprep.subr.bf16.mxu1 %v17610_v48  ;;  %v17688_v48 = vld [vmem:[#allocation11 + $0xa64] ss:$16 sps:$4 sm:$0xff]  }
 0xcb6   :  { %12381 = vmatpush1.bf16.msra.mxu0 %v17605_v54  ;;  %v17683_v54 = vld [vmem:[#allocation11 + $0x860] ss:$16 sps:$4 sm:$0xff]  }
 0xcb7   :  { %12424 = vmatpush1.bf16.msra.mxu1 %v17608_v11  ;;  %12382 = vmatprep.subr.bf16.mxu0 %v17613_v23  ;;  %v17686_v11 = vld [vmem:[#allocation11 + $0xa60] ss:$16 sps:$4 sm:$0xff]   ;;  %v17691_v23 = vld [vmem:[#allocation11 + $0x844] ss:$16 sps:$4 sm:$0xff]  }
 0xcb8   :  { %12425 = vmatprep.subr.bf16.mxu1 %v17616_v41  ;;  %v17694_v41 = vld [vmem:[#allocation11 + $0xa44] ss:$16 sps:$4 sm:$0xff]  }
 0xcba   :  { %12383 = vmatpush2.bf16.msra.mxu0 %v17611_v7  ;;  %v17689_v7 = vld [vmem:[#allocation11 + $0x840] ss:$16 sps:$4 sm:$0xff]  }
 0xcbb   :  { %12426 = vmatpush2.bf16.msra.mxu1 %v17614_v55  ;;  %12384 = vmatprep.subr.bf16.mxu0 %v17619_v46  ;;  %v17692_v55 = vld [vmem:[#allocation11 + $0xa40] ss:$16 sps:$4 sm:$0xff]   ;;  %v17697_v46 = vld [vmem:[#allocation11 + $0x824] ss:$16 sps:$4 sm:$0xff]  }
 0xcbc   :  { %12427 = vmatprep.subr.bf16.mxu1 %v17622_v9  ;;  %v17700_v9 = vld [vmem:[#allocation11 + $0xa24] ss:$16 sps:$4 sm:$0xff]  }
 0xcbe   :  { %12385 = vmatpush2.bf16.msra.mxu0 %v17617_v60  ;;  %v17695_v60 = vld [vmem:[#allocation11 + $0x820] ss:$16 sps:$4 sm:$0xff]  }
 0xcbf   :  { %12428 = vmatpush2.bf16.msra.mxu1 %v17620_v45  ;;  %12386 = vmatprep.subr.bf16.mxu0 %v17625_v19  ;;  %v17698_v45 = vld [vmem:[#allocation11 + $0xa20] ss:$16 sps:$4 sm:$0xff]   ;;  %v17703_v19 = vld [vmem:[#allocation11 + $0x804] ss:$16 sps:$4 sm:$0xff]  }
 0xcc0   :  { %12429 = vmatprep.subr.bf16.mxu1 %v17628_v40  ;;  %v17706_v40 = vld [vmem:[#allocation11 + $0xa04] ss:$16 sps:$4 sm:$0xff]  }
 0xcc2   :  { %12387 = vmatpush2.bf16.msra.mxu0 %v17623_v29  ;;  %v17701_v29 = vld [vmem:[#allocation11 + $0x800] ss:$16 sps:$4 sm:$0xff]  }
 0xcc3   :  { %12430 = vmatpush2.bf16.msra.mxu1 %v17626_v51  ;;  %12388 = vmatprep.subr.bf16.mxu0 %v17631_v35  ;;  %v17704_v51 = vld [vmem:[#allocation11 + $0xa00] ss:$16 sps:$4 sm:$0xff]   ;;  %v17709_v35 = vld [vmem:[#allocation11 + $0x9e4] ss:$16 sps:$4 sm:$0xff]  }
 0xcc4   :  { %12431 = vmatprep.subr.bf16.mxu1 %v17634_v27  ;;  %v17712_v27 = vld [vmem:[#allocation11 + $0xbe4] ss:$16 sps:$4 sm:$0xff]  }
 0xcc6   :  { %12389 = vmatpush2.bf16.msra.mxu0 %v17629_v16  ;;  %v17707_v16 = vld [vmem:[#allocation11 + $0x9e0] ss:$16 sps:$4 sm:$0xff]  }
 0xcc7   :  { %12432 = vmatpush2.bf16.msra.mxu1 %v17632_v52  ;;  %12390 = vmatprep.subr.bf16.mxu0 %v17637_v14  ;;  %v17710_v52 = vld [vmem:[#allocation11 + $0xbe0] ss:$16 sps:$4 sm:$0xff]   ;;  %v17715_v14 = vld [vmem:[#allocation11 + $0x9c4] ss:$16 sps:$4 sm:$0xff]  }
 0xcc8   :  { %12433 = vmatprep.subr.bf16.mxu1 %v17640_v32  ;;  %v17718_v32 = vld [vmem:[#allocation11 + $0xbc4] ss:$16 sps:$4 sm:$0xff]  }
 0xcca   :  { %12391 = vmatpush2.bf16.msra.mxu0 %v17635_v39  ;;  %v17713_v39 = vld [vmem:[#allocation11 + $0x9c0] ss:$16 sps:$4 sm:$0xff]  }
 0xccb   :  { %12434 = vmatpush2.bf16.msra.mxu1 %v17638_v43  ;;  %12392 = vmatprep.subr.bf16.mxu0 %v17643_v22  ;;  %v17716_v43 = vld [vmem:[#allocation11 + $0xbc0] ss:$16 sps:$4 sm:$0xff]   ;;  %v17721_v22 = vld [vmem:[#allocation11 + $0x9a4] ss:$16 sps:$4 sm:$0xff]  }
 0xccc   :  { %12435 = vmatprep.subr.bf16.mxu1 %v17646_v31  ;;  %v17724_v31 = vld [vmem:[#allocation11 + $0xba4] ss:$16 sps:$4 sm:$0xff]  }
 0xcce   :  { %12393 = vmatpush2.bf16.msra.mxu0 %v17641_v42  ;;  %v17719_v42 = vld [vmem:[#allocation11 + $0x9a0] ss:$16 sps:$4 sm:$0xff]  }
 0xccf   :  { %12436 = vmatpush2.bf16.msra.mxu1 %v17644_v62  ;;  %12394 = vmatprep.subr.bf16.mxu0 %v17649_v44  ;;  %v17722_v62 = vld [vmem:[#allocation11 + $0xba0] ss:$16 sps:$4 sm:$0xff]   ;;  %v17727_v44 = vld [vmem:[#allocation11 + $0x984] ss:$16 sps:$4 sm:$0xff]  }
 0xcd0   :  { %12437 = vmatprep.subr.bf16.mxu1 %v17652_v59  ;;  %v17730_v59 = vld [vmem:[#allocation11 + $0xb84] ss:$16 sps:$4 sm:$0xff]  }
 0xcd2   :  { %12395 = vmatpush2.bf16.msra.mxu0 %v17647_v37  ;;  %v17725_v37 = vld [vmem:[#allocation11 + $0x980] ss:$16 sps:$4 sm:$0xff]  }
 0xcd3   :  { %12438 = vmatpush2.bf16.msra.mxu1 %v17650_v2  ;;  %12396 = vmatprep.subr.bf16.mxu0 %v17655_v5  ;;  %v17728_v2 = vld [vmem:[#allocation11 + $0xb80] ss:$16 sps:$4 sm:$0xff]   ;;  %v17733_v5 = vld [vmem:[#allocation11 + $0x964] ss:$16 sps:$4 sm:$0xff]  }
 0xcd4   :  { %12439 = vmatprep.subr.bf16.mxu1 %v17658_v25  ;;  %v17736_v25 = vld [vmem:[#allocation11 + $0xb64] ss:$16 sps:$4 sm:$0xff]  }
 0xcd6   :  { %12397 = vmatpush2.bf16.msra.mxu0 %v17653_v34  ;;  %v17731_v34 = vld [vmem:[#allocation11 + $0x960] ss:$16 sps:$4 sm:$0xff]  }
 0xcd7   :  { %12440 = vmatpush2.bf16.msra.mxu1 %v17656_v20  ;;  %13248 = vmatprep.subr.bf16.mxu0 %v17661_v56  ;;  %v17734_v20 = vld [vmem:[#allocation11 + $0xb60] ss:$16 sps:$4 sm:$0xff]   ;;  %v17739_v56 = vld [vmem:[#allocation11 + $0x944] ss:$16 sps:$4 sm:$0xff]  }
 0xcd8   :  { %13291 = vmatprep.subr.bf16.mxu1 %v17664_v26  ;;  %v17742_v26 = vld [vmem:[#allocation11 + $0xb44] ss:$16 sps:$4 sm:$0xff]  }
 0xcd9   :  { %12399 = vmatmul.mubr.bf16.vlgmr.msra.gmra.mxu0 %v19503_v17  ;;  %v17674_v17 = vld [vmem:[#allocation11 + $0xaa0] ss:$16 sps:$4 sm:$0xff]  }
 0xcda   :  { %12442 = vmatmul.mubr.bf16.vlgmr.msra.gmra.mxu1 %v19506_v49  ;;  %13249 = vmatpush1.bf16.msra.mxu0 %v17659_v13  ;;  %v17682_v49 = vld [vmem:[#allocation11 + $0xa84] ss:$16 sps:$4 sm:$0xff]   ;;  %v17737_v13 = vld [vmem:[#allocation11 + $0x940] ss:$16 sps:$4 sm:$0xff]  }
 0xcdb   :  { %13280 = vmatprep.mubr.bf16.mxu0 %v19529_v58  ;;  %13292 = vmatpush1.bf16.msra.mxu1 %v17662_v0  ;;  %v19554_v0 = vpop.f32.mrf.mxu0 }
 0xcdc   :  { %13323 = vmatprep.mubr.bf16.mxu1 %v19532_v21  ;;  %13250 = vmatprep.subr.bf16.mxu0 %v17667_v63  ;;  %v19556_v63 = vpop.f32.mrf.mxu1 }
 0xcdd   :  { %13293 = vmatprep.subr.bf16.mxu1 %v17670_v61  ;;  %v17740_v61 = vld [vmem:[#allocation11 + $0xb40] ss:$16 sps:$4 sm:$0xff]  }
 0xcde   :  { %13251 = vmatpush1.bf16.msra.mxu0 %v17665_v47  ;;  %v17745_v47 = vld [vmem:[#allocation11 + $0x924] ss:$16 sps:$4 sm:$0xff]  }
 0xcdf   :  { %13294 = vmatpush1.bf16.msra.mxu1 %v17668_v1  ;;  %13252 = vmatprep.subr.bf16.mxu0 %v17673_v30  ;;  %v17748_v1 = vld [vmem:[#allocation11 + $0xb24] ss:$16 sps:$4 sm:$0xff]   ;;  %v17743_v30 = vld [vmem:[#allocation11 + $0x920] ss:$16 sps:$4 sm:$0xff]  }
 0xce0   :  { %13295 = vmatprep.subr.bf16.mxu1 %v17676_v8  ;;  %v19558_v8 = vpop.f32.mrf.mxu0 }
 0xce2   :  { %13253 = vmatpush1.bf16.msra.mxu0 %v17671_v4  ;;  %v19560_v4 = vpop.f32.mrf.mxu1 }
 0xce3   :  { %13296 = vmatpush1.bf16.msra.mxu1 %v17674_v17  ;;  %13254 = vmatprep.subr.bf16.mxu0 %v17679_v24  ;;  %v17746_v17 = vld [vmem:[#allocation11 + $0xb20] ss:$16 sps:$4 sm:$0xff]   ;;  %v17751_v24 = vld [vmem:[#allocation11 + $0x904] ss:$16 sps:$4 sm:$0xff]  }
 0xce4   :  { %13297 = vmatprep.subr.bf16.mxu1 %v17682_v49  ;;  %v17754_v49 = vld [vmem:[#allocation11 + $0xb04] ss:$16 sps:$4 sm:$0xff]  }
 0xce6   :  { %13255 = vmatpush1.bf16.msra.mxu0 %v17677_v50  ;;  %v17749_v50 = vld [vmem:[#allocation11 + $0x900] ss:$16 sps:$4 sm:$0xff]  }
 0xce7   :  { %13298 = vmatpush1.bf16.msra.mxu1 %v17680_v6  ;;  %13256 = vmatprep.subr.bf16.mxu0 %v17685_v15  ;;  %v19562_v6 = vpop.f32.mrf.mxu0  ;;  %v19564_v15 = vpop.f32.mrf.mxu1 }
 0xce8   :  { %13299 = vmatprep.subr.bf16.mxu1 %v17688_v48  ;;  %v17752_v48 = vld [vmem:[#allocation11 + $0xb00] ss:$16 sps:$4 sm:$0xff]  }
 0xcea   :  { %13257 = vmatpush1.bf16.msra.mxu0 %v17683_v54  ;;  %v17757_v54 = vld [vmem:[#allocation11 + $0x8ec] ss:$16 sps:$4 sm:$0xff]  }
 0xceb   :  { %13300 = vmatpush1.bf16.msra.mxu1 %v17686_v11  ;;  %13258 = vmatprep.subr.bf16.mxu0 %v17691_v23  ;;  %v17760_v11 = vld [vmem:[#allocation11 + $0xaec] ss:$16 sps:$4 sm:$0xff]   ;;  %v17755_v23 = vld [vmem:[#allocation11 + $0x8e8] ss:$16 sps:$4 sm:$0xff]  }
 0xcec   :  { %13301 = vmatprep.subr.bf16.mxu1 %v17694_v41  ;;  %v19566_v41 = vpop.f32.mrf.mxu0 }
 0xcee   :  { %13259 = vmatpush1.bf16.msra.mxu0 %v17689_v7  ;;  %v19568_v7 = vpop.f32.mrf.mxu1 }
 0xcef   :  { %13302 = vmatpush1.bf16.msra.mxu1 %v17692_v55  ;;  %13260 = vmatprep.subr.bf16.mxu0 %v17697_v46  ;;  %v17758_v55 = vld [vmem:[#allocation11 + $0xae8] ss:$16 sps:$4 sm:$0xff]   ;;  %v17763_v46 = vld [vmem:[#allocation11 + $0x8cc] ss:$16 sps:$4 sm:$0xff]  }
 0xcf0   :  { %13303 = vmatprep.subr.bf16.mxu1 %v17700_v9 }
 0xcf2   :  { %13261 = vmatpush1.bf16.msra.mxu0 %v17695_v60 }
 0xcf3   :  { %13304 = vmatpush1.bf16.msra.mxu1 %v17698_v45  ;;  %13262 = vmatprep.subr.bf16.mxu0 %v17703_v19  ;;  %v17766_v45 = vld [vmem:[#allocation11 + $0xacc] ss:$16 sps:$4 sm:$0xff]  }
 0xcf4   :  { %13305 = vmatprep.subr.bf16.mxu1 %v17706_v40  ;;  %v17761_v40 = vld [vmem:[#allocation11 + $0x8c8] ss:$16 sps:$4 sm:$0xff]  }
 0xcf6   :  { %13263 = vmatpush1.bf16.msra.mxu0 %v17701_v29 }
 0xcf7   :  { %13306 = vmatpush1.bf16.msra.mxu1 %v17704_v51  ;;  %13264 = vmatprep.subr.bf16.mxu0 %v17709_v35  ;;  %v17764_v35 = vld [vmem:[#allocation11 + $0xac8] ss:$16 sps:$4 sm:$0xff]  }
 0xcf8   :  { %13307 = vmatprep.subr.bf16.mxu1 %v17712_v27  ;;  %v17769_v27 = vld [vmem:[#allocation11 + $0x8ac] ss:$16 sps:$4 sm:$0xff]  }
 0xcfa   :  { %13265 = vmatpush2.bf16.msra.mxu0 %v17707_v16 }
 0xcfb   :  { %13308 = vmatpush2.bf16.msra.mxu1 %v17710_v52  ;;  %13266 = vmatprep.subr.bf16.mxu0 %v17715_v14  ;;  %v17772_v52 = vld [vmem:[#allocation11 + $0xaac] ss:$16 sps:$4 sm:$0xff]  }
 0xcfc   :  { %13309 = vmatprep.subr.bf16.mxu1 %v17718_v32 }
 0xcfe   :  { %13267 = vmatpush2.bf16.msra.mxu0 %v17713_v39 }
 0xcff   :  { %13310 = vmatpush2.bf16.msra.mxu1 %v17716_v43  ;;  %13268 = vmatprep.subr.bf16.mxu0 %v17721_v22  ;;  %v17767_v43 = vld [vmem:[#allocation11 + $0x8a8] ss:$16 sps:$4 sm:$0xff]  }
 0xd00   :  { %13311 = vmatprep.subr.bf16.mxu1 %v17724_v31  ;;  %v17770_v31 = vld [vmem:[#allocation11 + $0xaa8] ss:$16 sps:$4 sm:$0xff]  }
 0xd02   :  { %13269 = vmatpush2.bf16.msra.mxu0 %v17719_v42  ;;  %v17775_v42 = vld [vmem:[#allocation11 + $0x88c] ss:$16 sps:$4 sm:$0xff]  }
 0xd03   :  { %13312 = vmatpush2.bf16.msra.mxu1 %v17722_v62  ;;  %13270 = vmatprep.subr.bf16.mxu0 %v17727_v44  ;;  %v17773_v44 = vld [vmem:[#allocation11 + $0x888] ss:$16 sps:$4 sm:$0xff]  }
 0xd04   :  { %13313 = vmatprep.subr.bf16.mxu1 %v17730_v59  ;;  %v17776_v59 = vld [vmem:[#allocation11 + $0xa88] ss:$16 sps:$4 sm:$0xff]  }
 0xd06   :  { %13271 = vmatpush2.bf16.msra.mxu0 %v17725_v37  ;;  %v17781_v37 = vld [vmem:[#allocation11 + $0x86c] ss:$16 sps:$4 sm:$0xff]  }
 0xd07   :  { %13314 = vmatpush2.bf16.msra.mxu1 %v17728_v2  ;;  %13272 = vmatprep.subr.bf16.mxu0 %v17733_v5  ;;  %v17784_v2 = vld [vmem:[#allocation11 + $0xa6c] ss:$16 sps:$4 sm:$0xff]   ;;  %v17779_v5 = vld [vmem:[#allocation11 + $0x868] ss:$16 sps:$4 sm:$0xff]  }
 0xd08   :  { %13315 = vmatprep.subr.bf16.mxu1 %v17736_v25  ;;  %v17782_v25 = vld [vmem:[#allocation11 + $0xa68] ss:$16 sps:$4 sm:$0xff]  }
 0xd0a   :  { %13273 = vmatpush2.bf16.msra.mxu0 %v17731_v34  ;;  %v17787_v34 = vld [vmem:[#allocation11 + $0x84c] ss:$16 sps:$4 sm:$0xff]  }
 0xd0b   :  { %13316 = vmatpush2.bf16.msra.mxu1 %v17734_v20  ;;  %13274 = vmatprep.subr.bf16.mxu0 %v17739_v56  ;;  %v17790_v20 = vld [vmem:[#allocation11 + $0xa4c] ss:$16 sps:$4 sm:$0xff]   ;;  %v17785_v56 = vld [vmem:[#allocation11 + $0x848] ss:$16 sps:$4 sm:$0xff]  }
 0xd0c   :  { %13317 = vmatprep.subr.bf16.mxu1 %v17742_v26  ;;  %v17788_v26 = vld [vmem:[#allocation11 + $0xa48] ss:$16 sps:$4 sm:$0xff]  }
 0xd0e   :  { %13275 = vmatpush2.bf16.msra.mxu0 %v17737_v13  ;;  %v17793_v13 = vld [vmem:[#allocation11 + $0x82c] ss:$16 sps:$4 sm:$0xff]  }
 0xd0f   :  { %13318 = vmatpush2.bf16.msra.mxu1 %v17740_v61  ;;  %13276 = vmatprep.subr.bf16.mxu0 %v17745_v47  ;;  %v17796_v61 = vld [vmem:[#allocation11 + $0xa2c] ss:$16 sps:$4 sm:$0xff]   ;;  %v17791_v47 = vld [vmem:[#allocation11 + $0x828] ss:$16 sps:$4 sm:$0xff]  }
 0xd10   :  { %13319 = vmatprep.subr.bf16.mxu1 %v17748_v1  ;;  %v17794_v1 = vld [vmem:[#allocation11 + $0xa28] ss:$16 sps:$4 sm:$0xff]  }
 0xd12   :  { %13277 = vmatpush2.bf16.msra.mxu0 %v17743_v30  ;;  %v17799_v30 = vld [vmem:[#allocation11 + $0x80c] ss:$16 sps:$4 sm:$0xff]  }
 0xd13   :  { %13320 = vmatpush2.bf16.msra.mxu1 %v17746_v17  ;;  %13278 = vmatprep.subr.bf16.mxu0 %v17751_v24  ;;  %v17802_v17 = vld [vmem:[#allocation11 + $0xa0c] ss:$16 sps:$4 sm:$0xff]   ;;  %v17797_v24 = vld [vmem:[#allocation11 + $0x808] ss:$16 sps:$4 sm:$0xff]  }
 0xd14   :  { %13321 = vmatprep.subr.bf16.mxu1 %v17754_v49  ;;  %v17800_v49 = vld [vmem:[#allocation11 + $0xa08] ss:$16 sps:$4 sm:$0xff]  }
 0xd16   :  { %13279 = vmatpush2.bf16.msra.mxu0 %v17749_v50  ;;  %v17805_v50 = vld [vmem:[#allocation11 + $0x9ec] ss:$16 sps:$4 sm:$0xff]  }
 0xd17   :  { %13322 = vmatpush2.bf16.msra.mxu1 %v17752_v48  ;;  %13334 = vmatprep.subr.bf16.mxu0 %v17757_v54  ;;  %v17808_v48 = vld [vmem:[#allocation11 + $0xbec] ss:$16 sps:$4 sm:$0xff]   ;;  %v17803_v54 = vld [vmem:[#allocation11 + $0x9e8] ss:$16 sps:$4 sm:$0xff]  }
 0xd18   :  { %13377 = vmatprep.subr.bf16.mxu1 %v17760_v11  ;;  %v17806_v11 = vld [vmem:[#allocation11 + $0xbe8] ss:$16 sps:$4 sm:$0xff]  }
 0xd19   :  { %v11584_v9 = vpop.f32.mrf.mxu0  ;;  %13281 = vmatmul.mubr.bf16.vlgmr.msra.gmra.mxu0 %v19537_v12 }
 0xd1a   :  { %v11627_v60 = vpop.f32.mrf.mxu1  ;;  %13324 = vmatmul.mubr.bf16.vlgmr.msra.gmra.mxu1 %v19540_v3  ;;  %13335 = vmatpush1.bf16.msra.mxu0 %v17755_v23  ;;  %v17811_v23 = vld [vmem:[#allocation11 + $0x9cc] ss:$16 sps:$4 sm:$0xff]  }
 0xd1b   :  { %v19571_v19 = vadd.f32 %v11627_v60, %v11584_v9  ;;  %13366 = vmatprep.mubr.bf16.mxu0 %v19529_v58  ;;  %13378 = vmatpush1.bf16.msra.mxu1 %v17758_v55  ;;  %v11586_v29 = vpop.f32.mrf.mxu0  ;;  %v17814_v55 = vld [vmem:[#allocation11 + $0xbcc] ss:$16 sps:$4 sm:$0xff]   ;;  %v17812_v9 = vld [vmem:[#allocation11 + $0xbc8] ss:$16 sps:$4 sm:$0xff]  }
 0xd1c   :  { %v11629_v51 = vpop.f32.mrf.mxu1  ;;  %13409 = vmatprep.mubr.bf16.mxu1 %v19532_v21  ;;  %13336 = vmatprep.subr.bf16.mxu0 %v17763_v46  ;;  %v17778_v21 = vld [vmem:[#allocation11 + $0xa8c] ss:$16 sps:$4 sm:$0xff]   ;;  %v17809_v46 = vld [vmem:[#allocation11 + $0x9c8] ss:$16 sps:$4 sm:$0xff]  }
 0xd1d   :  { %v19576_v16 = vadd.f32 %v11629_v51, %v11586_v29  ;;  %v11588_v14 = vpop.f32.mrf.mxu0  ;;  %13379 = vmatprep.subr.bf16.mxu1 %v17766_v45  ;;  %v17817_v60 = vld [vmem:[#allocation11 + $0x9ac] ss:$16 sps:$4 sm:$0xff]   ;;  %v17818_v29 = vld [vmem:[#allocation11 + $0xba8] ss:$16 sps:$4 sm:$0xff]  }
 0xd1e   :  { %v11631_v32 = vpop.f32.mrf.mxu1  ;;  %13337 = vmatpush1.bf16.msra.mxu0 %v17761_v40  ;;  %v17820_v45 = vld [vmem:[#allocation11 + $0xbac] ss:$16 sps:$4 sm:$0xff]   ;;  %v17815_v40 = vld [vmem:[#allocation11 + $0x9a8] ss:$16 sps:$4 sm:$0xff]  }
 0xd1f   :  { %v19578_v39 = vadd.f32 %v11631_v32, %v11588_v14  ;;  %13380 = vmatpush1.bf16.msra.mxu1 %v17764_v35  ;;  %v11590_v58 = vpop.f32.mrf.mxu0  ;;  %13338 = vmatprep.subr.bf16.mxu0 %v17769_v27  ;;  %v17823_v51 = vld [vmem:[#allocation11 + $0x98c] ss:$16 sps:$4 sm:$0xff]   ;;  %v17821_v27 = vld [vmem:[#allocation11 + $0x988] ss:$16 sps:$4 sm:$0xff]  }
 0xd20   :  { %v11633_v22 = vpop.f32.mrf.mxu1  ;;  %13381 = vmatprep.subr.bf16.mxu1 %v17772_v52  ;;  %v17826_v35 = vld [vmem:[#allocation11 + $0xb8c] ss:$16 sps:$4 sm:$0xff]   ;;  %v17824_v52 = vld [vmem:[#allocation11 + $0xb88] ss:$16 sps:$4 sm:$0xff]  }
 0xd21   :  { %v19580_v62 = vadd.f32 %v11633_v22, %v11590_v58  ;;  %v17829_v14 = vld [vmem:[#allocation11 + $0x96c] ss:$16 sps:$4 sm:$0xff]   ;;  %v17830_v58 = vld [vmem:[#allocation11 + $0xb68] ss:$16 sps:$4 sm:$0xff]  }
 0xd22   :  { %13339 = vmatpush1.bf16.msra.mxu0 %v17767_v43  ;;  %v17832_v32 = vld [vmem:[#allocation11 + $0xb6c] ss:$16 sps:$4 sm:$0xff]   ;;  %v17827_v43 = vld [vmem:[#allocation11 + $0x968] ss:$16 sps:$4 sm:$0xff]  }
 0xd23   :  { %13382 = vmatpush1.bf16.msra.mxu1 %v17770_v31  ;;  %13340 = vmatprep.subr.bf16.mxu0 %v17775_v42  ;;  %v17835_v22 = vld [vmem:[#allocation11 + $0x94c] ss:$16 sps:$4 sm:$0xff]   ;;  %v17833_v42 = vld [vmem:[#allocation11 + $0x948] ss:$16 sps:$4 sm:$0xff]  }
 0xd24   :  { %13383 = vmatprep.subr.bf16.mxu1 %v17778_v21  ;;  %v17838_v31 = vld [vmem:[#allocation11 + $0xb4c] ss:$16 sps:$4 sm:$0xff]   ;;  %v17836_v21 = vld [vmem:[#allocation11 + $0xb48] ss:$16 sps:$4 sm:$0xff]  }
 0xd26   :  { %13341 = vmatpush1.bf16.msra.mxu0 %v17773_v44  ;;  %v17841_v44 = vld [vmem:[#allocation11 + $0x92c] ss:$16 sps:$4 sm:$0xff]  }
 0xd27   :  { %13384 = vmatpush1.bf16.msra.mxu1 %v17776_v59  ;;  %13342 = vmatprep.subr.bf16.mxu0 %v17781_v37  ;;  %v17844_v59 = vld [vmem:[#allocation11 + $0xb2c] ss:$16 sps:$4 sm:$0xff]   ;;  %v17839_v37 = vld [vmem:[#allocation11 + $0x928] ss:$16 sps:$4 sm:$0xff]  }
 0xd28   :  { %13385 = vmatprep.subr.bf16.mxu1 %v17784_v2  ;;  %v17842_v2 = vld [vmem:[#allocation11 + $0xb28] ss:$16 sps:$4 sm:$0xff]  }
 0xd2a   :  { %13343 = vmatpush1.bf16.msra.mxu0 %v17779_v5  ;;  %v17847_v5 = vld [vmem:[#allocation11 + $0x90c] ss:$16 sps:$4 sm:$0xff]  }
 0xd2b   :  { %13386 = vmatpush1.bf16.msra.mxu1 %v17782_v25  ;;  %13344 = vmatprep.subr.bf16.mxu0 %v17787_v34  ;;  %v17850_v25 = vld [vmem:[#allocation11 + $0xb0c] ss:$16 sps:$4 sm:$0xff]   ;;  %v17845_v34 = vld [vmem:[#allocation11 + $0x908] ss:$16 sps:$4 sm:$0xff]  }
 0xd2c   :  { %13387 = vmatprep.subr.bf16.mxu1 %v17790_v20  ;;  %v17848_v20 = vld [vmem:[#allocation11 + $0xb08] ss:$16 sps:$4 sm:$0xff]  }
 0xd2e   :  { %13345 = vmatpush1.bf16.msra.mxu0 %v17785_v56 }
 0xd2f   :  { %13388 = vmatpush1.bf16.msra.mxu1 %v17788_v26  ;;  %13346 = vmatprep.subr.bf16.mxu0 %v17793_v13 }
 0xd30   :  { %13389 = vmatprep.subr.bf16.mxu1 %v17796_v61 }
 0xd32   :  { %13347 = vmatpush1.bf16.msra.mxu0 %v17791_v47 }
 0xd33   :  { %13390 = vmatpush1.bf16.msra.mxu1 %v17794_v1  ;;  %13348 = vmatprep.subr.bf16.mxu0 %v17799_v30 }
 0xd34   :  { %13391 = vmatprep.subr.bf16.mxu1 %v17802_v17 }
 0xd36   :  { %13349 = vmatpush1.bf16.msra.mxu0 %v17797_v24 }
 0xd37   :  { %13392 = vmatpush1.bf16.msra.mxu1 %v17800_v49  ;;  %13350 = vmatprep.subr.bf16.mxu0 %v17805_v50 }
 0xd38   :  { %13393 = vmatprep.subr.bf16.mxu1 %v17808_v48 }
 0xd3a   :  { %13351 = vmatpush2.bf16.msra.mxu0 %v17803_v54 }
 0xd3b   :  { %13394 = vmatpush2.bf16.msra.mxu1 %v17806_v11  ;;  %13352 = vmatprep.subr.bf16.mxu0 %v17811_v23 }
 0xd3c   :  { %13395 = vmatprep.subr.bf16.mxu1 %v17814_v55 }
 0xd3e   :  { %13353 = vmatpush2.bf16.msra.mxu0 %v17809_v46 }
 0xd3f   :  { %13396 = vmatpush2.bf16.msra.mxu1 %v17812_v9  ;;  %13354 = vmatprep.subr.bf16.mxu0 %v17817_v60 }
 0xd40   :  { %13397 = vmatprep.subr.bf16.mxu1 %v17820_v45 }
 0xd42   :  { %13355 = vmatpush2.bf16.msra.mxu0 %v17815_v40 }
 0xd43   :  { %13398 = vmatpush2.bf16.msra.mxu1 %v17818_v29  ;;  %13356 = vmatprep.subr.bf16.mxu0 %v17823_v51  ;;  %v11542_v29 = vadd.f32 %v19556_v63, %v19554_v0 }
 0xd44   :  { %13399 = vmatprep.subr.bf16.mxu1 %v17826_v35 }
 0xd46   :  { %13357 = vmatpush2.bf16.msra.mxu0 %v17821_v27 }
 0xd47   :  { %13400 = vmatpush2.bf16.msra.mxu1 %v17824_v52  ;;  %13358 = vmatprep.subr.bf16.mxu0 %v17829_v14 }
 0xd48   :  { %13401 = vmatprep.subr.bf16.mxu1 %v17832_v32 }
 0xd4a   :  { %13359 = vmatpush2.bf16.msra.mxu0 %v17827_v43 }
 0xd4b   :  { %13402 = vmatpush2.bf16.msra.mxu1 %v17830_v58  ;;  %13360 = vmatprep.subr.bf16.mxu0 %v17835_v22 }
 0xd4c   :  { %13403 = vmatprep.subr.bf16.mxu1 %v17838_v31 }
 0xd4e   :  { %13361 = vmatpush2.bf16.msra.mxu0 %v17833_v42 }
 0xd4f   :  { %13404 = vmatpush2.bf16.msra.mxu1 %v17836_v21  ;;  %13362 = vmatprep.subr.bf16.mxu0 %v17841_v44  ;;  %v11548_v44 = vadd.f32 %v19568_v7, %v19566_v41 }
 0xd50   :  { %13405 = vmatprep.subr.bf16.mxu1 %v17844_v59 }
 0xd52   :  { %13363 = vmatpush2.bf16.msra.mxu0 %v17839_v37 }
 0xd53   :  { %13406 = vmatpush2.bf16.msra.mxu1 %v17842_v2  ;;  %13364 = vmatprep.subr.bf16.mxu0 %v17847_v5 }
 0xd54   :  { %13407 = vmatprep.subr.bf16.mxu1 %v17850_v25 }
 0xd56   :  { %13365 = vmatpush2.bf16.msra.mxu0 %v17845_v34 }
 0xd57   :  { %13408 = vmatpush2.bf16.msra.mxu1 %v17848_v20 }
 0xd59   :  { %13367 = vmatmul.mubr.bf16.vlgmr.msra.gmra.mxu0 %v19537_v12  ;;  %v12314_v56 = vpop.f32.mrf.mxu0 }
 0xd5a   :  { %13410 = vmatmul.mubr.bf16.vlgmr.msra.gmra.mxu1 %v19540_v3  ;;  %v12357_v26 = vpop.f32.mrf.mxu1  ;;  %v12315_v51 = vadd.f32 %v12314_v56, %v11542_v29 }
 0xd5b   :  { %v12316_v13 = vpop.f32.mrf.mxu0 }
 0xd5c   :  { %v12359_v61 = vpop.f32.mrf.mxu1  ;;  %v12358_v52 = vadd.f32 %v12357_v26, %v12315_v51 }
 0xd5d   :  { %v12318_v47 = vpop.f32.mrf.mxu0 }
 0xd5e   :  { %v12361_v1 = vpop.f32.mrf.mxu1 }
 0xd5f   :  { %v12320_v30 = vpop.f32.mrf.mxu0 }
 0xd60   :  { %v12363_v17 = vpop.f32.mrf.mxu1  ;;  %v12321_v25 = vadd.f32 %v12320_v30, %v11548_v44 }
 0xd62   :  { %v12364_v34 = vadd.f32 %v12363_v17, %v12321_v25 }
 0xd99   :  { %v12400_v24 = vpop.f32.mrf.mxu0 }
 0xd9a   :  { %v12401_v49 = vadd.f32 %v12400_v24, %v19571_v19  ;;  %v12443_v50 = vpop.f32.mrf.mxu1 }
 0xd9b   :  { %v12402_v48 = vpop.f32.mrf.mxu0 }
 0xd9c   :  { %v19585_v54 = vadd.f32 %v12443_v50, %v12401_v49  ;;  %v12403_v11 = vadd.f32 %v12402_v48, %v19576_v16  ;;  %v12445_v12 = vpop.f32.mrf.mxu1  ;;  %v11546_v16 = vadd.f32 %v19564_v15, %v19562_v6  ;;  %v11544_v6 = vadd.f32 %v19560_v4, %v19558_v8 }
 0xd9d   :  { %v12404_v23 = vpop.f32.mrf.mxu0 }
 0xd9e   :  { %v19588_v3 = vadd.f32 %v12445_v12, %v12403_v11  ;;  %v12405_v55 = vadd.f32 %v12404_v23, %v19578_v39  ;;  %v12447_v46 = vpop.f32.mrf.mxu1  ;;  %v12319_v39 = vadd.f32 %v12318_v47, %v11546_v16  ;;  %v12317_v21 = vadd.f32 %v12316_v13, %v11544_v6 }
 0xd9f   :  { %v12406_v9 = vpop.f32.mrf.mxu0 }
 0xda0   :  { %v19591_v60 = vadd.f32 %v12447_v46, %v12405_v55  ;;  %v12407_v45 = vadd.f32 %v12406_v9, %v19580_v62  ;;  %v12449_v40 = vpop.f32.mrf.mxu1  ;;  %v12362_v31 = vadd.f32 %v12361_v1, %v12319_v39  ;;  %v12360_v5 = vadd.f32 %v12359_v61, %v12317_v21 }
 0xda2   :  { %v19594_v19 = vadd.f32 %v12449_v40, %v12407_v45 }
 0xdd9   :  { %v13282_v35 = vpop.f32.mrf.mxu0 }
 0xdda   :  { %v13325_v27 = vpop.f32.mrf.mxu1 }
 0xddb   :  { %v13326_v14 = vadd.f32 %v13325_v27, %v13282_v35  ;;  %v13284_v32 = vpop.f32.mrf.mxu0 }
 0xddc   :  { %v13327_v43 = vpop.f32.mrf.mxu1 }
 0xddd   :  { %v19600_v58 = vadd.f32 %v13326_v14, %v12358_v52  ;;  %v13286_v62 = vpop.f32.mrf.mxu0  ;;  %v13328_v59 = vadd.f32 %v13327_v43, %v13284_v32 }
 0xdde   :  { %v13329_v22 = vpop.f32.mrf.mxu1 }
 0xddf   :  { %19910 = vst [vmem:[#allocation30_spill] sm:$0xff] %v19600_v58  ;;  %v13330_v42 = vadd.f32 %v13329_v22, %v13286_v62  ;;  %13432 = vrot.lane.b32.xlu0 %v19600_v58, %s18071_s6  ;;  %v19616_v63 = vmul.f32 %v19600_v58, %v19600_v58  ;;  %v13288_v37 = vpop.f32.mrf.mxu0  ;;  %v19638_v8 = vadd.f32 %v13328_v59, %v12360_v5 }
 0xde0   :  { %v13331_v2 = vpop.f32.mrf.mxu1 }
 0xde1   :  { %v19604_v0 = vadd.f32 %v13330_v42, %v12362_v31  ;;  %v13332_v4 = vadd.f32 %v13331_v2, %v13288_v37  ;;  %v19656_v7 = vmul.f32 %v19638_v8, %v19638_v8 }
 0xde3   :  { %13434 = vrot.lane.b32.xlu1 %v19604_v0, %s18071_s6  ;;  %13440 = vrot.lane.b32.xlu0 %v19600_v58, %s18070_s4  ;;  %v19626_v15 = vmul.f32 %v19604_v0, %v19604_v0  ;;  %v19644_v41 = vadd.f32 %v13332_v4, %v12364_v34 }
 0xde5   :  { %19911 = vst [vmem:[#allocation31_spill] sm:$0xff] %v19644_v41  ;;  %v19664_v20 = vmul.f32 %v19644_v41, %v19644_v41 }
 0xde7   :  { %13442 = vrot.lane.b32.xlu1 %v19604_v0, %s18070_s4  ;;  %13448 = vrot.lane.b32.xlu0 %v19600_v58, %s18066_s22 }
 0xdeb   :  { %13450 = vrot.lane.b32.xlu1 %v19604_v0, %s18066_s22  ;;  %13559 = vrot.lane.b32.xlu0 %v19616_v63, %s18071_s6 }
 0xdef   :  { %13561 = vrot.lane.b32.xlu1 %v19626_v15, %s18071_s6  ;;  %13567 = vrot.lane.b32.xlu0 %v19616_v63, %s18070_s4 }
 0xdf3   :  { %13569 = vrot.lane.b32.xlu1 %v19626_v15, %s18070_s4  ;;  %13575 = vrot.lane.b32.xlu0 %v19616_v63, %s18066_s22 }
 0xdf7   :  { %13577 = vrot.lane.b32.xlu1 %v19626_v15, %s18066_s22  ;;  %13460 = vrot.lane.b32.xlu0 %v19638_v8, %s18071_s6 }
 0xdfb   :  { %13468 = vrot.lane.b32.xlu0 %v19638_v8, %s18070_s4  ;;  %13462 = vrot.lane.b32.xlu1 %v19644_v41, %s18071_s6 }
 0xdff   :  { %13476 = vrot.lane.b32.xlu0 %v19638_v8, %s18066_s22  ;;  %13470 = vrot.lane.b32.xlu1 %v19644_v41, %s18070_s4 }
 0xe03   :  { %13587 = vrot.lane.b32.xlu0 %v19656_v7, %s18071_s6  ;;  %13478 = vrot.lane.b32.xlu1 %v19644_v41, %s18066_s22 }
 0xe07   :  { %13595 = vrot.lane.b32.xlu0 %v19656_v7, %s18070_s4  ;;  %13589 = vrot.lane.b32.xlu1 %v19664_v20, %s18071_s6 }
 0xe0b   :  { %13603 = vrot.lane.b32.xlu0 %v19656_v7, %s18066_s22  ;;  %13597 = vrot.lane.b32.xlu1 %v19664_v20, %s18070_s4 }
 0xe0f   :  { %13605 = vrot.lane.b32.xlu1 %v19664_v20, %s18066_s22 }
 0xe19   :  { %v13368_v56 = vpop.f32.mrf.mxu0 }
 0xe1a   :  { %v13411_v26 = vpop.f32.mrf.mxu1 }
 0xe1b   :  { %v13412_v13 = vadd.f32 %v13411_v26, %v13368_v56  ;;  %v13370_v61 = vpop.f32.mrf.mxu0 }
 0xe1c   :  { %v13413_v47 = vpop.f32.mrf.mxu1 }
 0xe1d   :  { %v19677_v1 = vadd.f32 %v13412_v13, %v19585_v54  ;;  %v13372_v30 = vpop.f32.mrf.mxu0  ;;  %v13414_v54 = vadd.f32 %v13413_v47, %v13370_v61 }
 0xe1e   :  { %v13415_v17 = vpop.f32.mrf.mxu1 }
 0xe1f   :  { %v13416_v24 = vadd.f32 %v13415_v17, %v13372_v30  ;;  %13488 = vrot.lane.b32.xlu0 %v19677_v1, %s18071_s6  ;;  %v19694_v50 = vmul.f32 %v19677_v1, %v19677_v1  ;;  %v13374_v11 = vpop.f32.mrf.mxu0  ;;  %v19713_v23 = vadd.f32 %v13414_v54, %v19588_v3 }
 0xe20   :  { %v13417_v12 = vpop.f32.mrf.mxu1 }
 0xe21   :  { %v19682_v49 = vadd.f32 %v13416_v24, %v19591_v60  ;;  %v13418_v55 = vadd.f32 %v13417_v12, %v13374_v11  ;;  %v19732_v3 = vmul.f32 %v19713_v23, %v19713_v23 }
 0xe23   :  { %13496 = vrot.lane.b32.xlu0 %v19677_v1, %s18070_s4  ;;  %13490 = vrot.lane.b32.xlu1 %v19682_v49, %s18071_s6  ;;  %v19702_v48 = vmul.f32 %v19682_v49, %v19682_v49  ;;  %v19720_v46 = vadd.f32 %v13418_v55, %v19594_v19 }
 0xe25   :  { %v19740_v9 = vmul.f32 %v19720_v46, %v19720_v46 }
 0xe27   :  { %13504 = vrot.lane.b32.xlu0 %v19677_v1, %s18066_s22  ;;  %13498 = vrot.lane.b32.xlu1 %v19682_v49, %s18070_s4 }
 0xe2b   :  { %13615 = vrot.lane.b32.xlu0 %v19694_v50, %s18071_s6  ;;  %13506 = vrot.lane.b32.xlu1 %v19682_v49, %s18066_s22 }
 0xe2f   :  { %13623 = vrot.lane.b32.xlu0 %v19694_v50, %s18070_s4  ;;  %13617 = vrot.lane.b32.xlu1 %v19702_v48, %s18071_s6 }
 0xe33   :  { %13631 = vrot.lane.b32.xlu0 %v19694_v50, %s18066_s22  ;;  %13625 = vrot.lane.b32.xlu1 %v19702_v48, %s18070_s4 }
 0xe37   :  { %13516 = vrot.lane.b32.xlu0 %v19713_v23, %s18071_s6  ;;  %13633 = vrot.lane.b32.xlu1 %v19702_v48, %s18066_s22 }
 0xe3b   :  { %13524 = vrot.lane.b32.xlu0 %v19713_v23, %s18070_s4  ;;  %13518 = vrot.lane.b32.xlu1 %v19720_v46, %s18071_s6 }
 0xe3f   :  { %13532 = vrot.lane.b32.xlu0 %v19713_v23, %s18066_s22  ;;  %13526 = vrot.lane.b32.xlu1 %v19720_v46, %s18070_s4 }
 0xe43   :  { %13643 = vrot.lane.b32.xlu0 %v19732_v3, %s18071_s6  ;;  %13534 = vrot.lane.b32.xlu1 %v19720_v46, %s18066_s22 }
 0xe47   :  { %13651 = vrot.lane.b32.xlu0 %v19732_v3, %s18070_s4  ;;  %13645 = vrot.lane.b32.xlu1 %v19740_v9, %s18071_s6 }
 0xe4b   :  { %13659 = vrot.lane.b32.xlu0 %v19732_v3, %s18066_s22  ;;  %13653 = vrot.lane.b32.xlu1 %v19740_v9, %s18070_s4 }
 0xe4f   :  { %13661 = vrot.lane.b32.xlu1 %v19740_v9, %s18066_s22 }
 0xe51   :  { %v13433_v60 = vpop.permute.xlu0 %13432 }
 0xe52   :  { %v13438_v25 = vadd.f32 %v13433_v60, %v19600_v58 }
 0xe55   :  { %v13435_v45 = vpop.permute.xlu1 %13434  ;;  %v13441_v40 = vpop.permute.xlu0 %13440 }
 0xe56   :  { %v13439_v4 = vadd.f32 %v13435_v45, %v19604_v0  ;;  %v13446_v34 = vadd.f32 %v13441_v40, %v13438_v25 }
 0xe59   :  { %v13443_v19 = vpop.permute.xlu1 %13442  ;;  %v13449_v29 = vpop.permute.xlu0 %13448 }
 0xe5a   :  { %v13447_v13 = vadd.f32 %v13443_v19, %v13439_v4  ;;  %v13454_v61 = vadd.f32 %v13449_v29, %v13446_v34 }
 0xe5c   :  { %v13456_v24 = vadd.f32 %v13454_v61, %v19638_v8 }
 0xe5d   :  { %v13451_v51 = vpop.permute.xlu1 %13450  ;;  %v13560_v16 = vpop.permute.xlu0 %13559 }
 0xe5e   :  { %v13455_v47 = vadd.f32 %v13451_v51, %v13447_v13  ;;  %v13565_v28 = vadd.f32 %v13560_v16, %v19616_v63 }
 0xe60   :  { %v13457_v11 = vadd.f32 %v13455_v47, %v19644_v41 }
 0xe61   :  { %v13562_v35 = vpop.permute.xlu1 %13561  ;;  %v13568_v27 = vpop.permute.xlu0 %13567 }
 0xe62   :  { %v13566_v45 = vadd.f32 %v13562_v35, %v19626_v15  ;;  %v13573_v40 = vadd.f32 %v13568_v27, %v13565_v28 }
 0xe65   :  { %v13570_v52 = vpop.permute.xlu1 %13569  ;;  %v13576_v39 = vpop.permute.xlu0 %13575 }
 0xe66   :  { %v13574_v4 = vadd.f32 %v13570_v52, %v13566_v45  ;;  %v13581_v34 = vadd.f32 %v13576_v39, %v13573_v40 }
 0xe68   :  { %v13583_v41 = vadd.f32 %v13581_v34, %v19656_v7 }
 0xe69   :  { %v13578_v14 = vpop.permute.xlu1 %13577  ;;  %v13461_v32 = vpop.permute.xlu0 %13460 }
 0xe6a   :  { %v13466_v54 = vadd.f32 %v13461_v32, %v13456_v24  ;;  %v13582_v61 = vadd.f32 %v13578_v14, %v13574_v4 }
 0xe6c   :  { %v13584_v28 = vadd.f32 %v13582_v61, %v19664_v20 }
 0xe6d   :  { %v13463_v43 = vpop.permute.xlu1 %13462  ;;  %v13469_v62 = vpop.permute.xlu0 %13468 }
 0xe6e   :  { %v13474_v60 = vadd.f32 %v13469_v62, %v13466_v54  ;;  %v13467_v58 = vadd.f32 %v13463_v43, %v13457_v11 }
 0xe71   :  { %v13471_v22 = vpop.permute.xlu1 %13470  ;;  %v13477_v31 = vpop.permute.xlu0 %13476 }
 0xe72   :  { %v13482_v25 = vadd.f32 %v13477_v31, %v13474_v60  ;;  %v13475_v19 = vadd.f32 %v13471_v22, %v13467_v58 }
 0xe74   :  { %v13484_v32 = vadd.f32 %v13482_v25, %v19677_v1 }
 0xe75   :  { %v13479_v42 = vpop.permute.xlu1 %13478  ;;  %v13588_v6 = vpop.permute.xlu0 %13587 }
 0xe76   :  { %v13483_v13 = vadd.f32 %v13479_v42, %v13475_v19  ;;  %v13593_v43 = vadd.f32 %v13588_v6, %v13583_v41 }
 0xe78   :  { %v13485_v16 = vadd.f32 %v13483_v13, %v19682_v49 }
 0xe79   :  { %v13590_v21 = vpop.permute.xlu1 %13589  ;;  %v13596_v44 = vpop.permute.xlu0 %13595 }
 0xe7a   :  { %v13601_v52 = vadd.f32 %v13596_v44, %v13593_v43  ;;  %v13594_v39 = vadd.f32 %v13590_v21, %v13584_v28 }
 0xe7d   :  { %v13598_v59 = vpop.permute.xlu1 %13597  ;;  %v13604_v37 = vpop.permute.xlu0 %13603 }
 0xe7e   :  { %v13609_v22 = vadd.f32 %v13604_v37, %v13601_v52  ;;  %v13602_v31 = vadd.f32 %v13598_v59, %v13594_v39 }
 0xe80   :  { %v13611_v41 = vadd.f32 %v13609_v22, %v19694_v50 }
 0xe81   :  { %v13606_v2 = vpop.permute.xlu1 %13605 }
 0xe82   :  { %v13610_v7 = vadd.f32 %v13606_v2, %v13602_v31 }
 0xe84   :  { %v13612_v21 = vadd.f32 %v13610_v7, %v19702_v48 }
 0xe91   :  { %v13489_v5 = vpop.permute.xlu0 %13488 }
 0xe92   :  { %v13494_v63 = vadd.f32 %v13489_v5, %v13484_v32 }
 0xe95   :  { %v13497_v56 = vpop.permute.xlu0 %13496  ;;  %v13491_v26 = vpop.permute.xlu1 %13490 }
 0xe96   :  { %v13502_v15 = vadd.f32 %v13497_v56, %v13494_v63  ;;  %v13495_v58 = vadd.f32 %v13491_v26, %v13485_v16 }
 0xe99   :  { %v13505_v30 = vpop.permute.xlu0 %13504  ;;  %v13499_v17 = vpop.permute.xlu1 %13498 }
 0xe9a   :  { %v13510_v62 = vadd.f32 %v13505_v30, %v13502_v15  ;;  %v13503_v14 = vadd.f32 %v13499_v17, %v13495_v58 }
 0xe9c   :  { %v13512_v5 = vadd.f32 %v13510_v62, %v19713_v23 }
 0xe9d   :  { %v13616_v12 = vpop.permute.xlu0 %13615  ;;  %v13507_v55 = vpop.permute.xlu1 %13506 }
 0xe9e   :  { %v13511_v42 = vadd.f32 %v13507_v55, %v13503_v14  ;;  %v13621_v60 = vadd.f32 %v13616_v12, %v13611_v41 }
 0xea0   :  { %v13513_v20 = vadd.f32 %v13511_v42, %v19720_v46 }
 0xea1   :  { %v13624_v29 = vpop.permute.xlu0 %13623  ;;  %v13618_v51 = vpop.permute.xlu1 %13617 }
 0xea2   :  { %v13629_v37 = vadd.f32 %v13624_v29, %v13621_v60  ;;  %v13622_v59 = vadd.f32 %v13618_v51, %v13612_v21 }
 0xea5   :  { %v13632_v47 = vpop.permute.xlu0 %13631  ;;  %v13626_v24 = vpop.permute.xlu1 %13625 }
 0xea6   :  { %v13637_v40 = vadd.f32 %v13632_v47, %v13629_v37  ;;  %v13630_v25 = vadd.f32 %v13626_v24, %v13622_v59 }
 0xea8   :  { %v13639_v48 = vadd.f32 %v13637_v40, %v19732_v3 }
 0xea9   :  { %v13517_v35 = vpop.permute.xlu0 %13516  ;;  %v13634_v27 = vpop.permute.xlu1 %13633 }
 0xeaa   :  { %v13522_v6 = vadd.f32 %v13517_v35, %v13512_v5  ;;  %v13638_v50 = vadd.f32 %v13634_v27, %v13630_v25 }
 0xeac   :  { %v13640_v51 = vadd.f32 %v13638_v50, %v19740_v9 }
 0xead   :  { %v13525_v54 = vpop.permute.xlu0 %13524  ;;  %v13519_v11 = vpop.permute.xlu1 %13518 }
 0xeae   :  { %v13530_v44 = vadd.f32 %v13525_v54, %v13522_v6  ;;  %v13523_v30 = vadd.f32 %v13519_v11, %v13513_v20 }
 0xeb1   :  { %v13533_v56 = vpop.permute.xlu0 %13532  ;;  %v13527_v26 = vpop.permute.xlu1 %13526 }
 0xeb2   :  { %v13538_v17 = vadd.f32 %v13533_v56, %v13530_v44  ;;  %v13531_v55 = vadd.f32 %v13527_v26, %v13523_v30 }
 0xeb4   :  { %v13540_v4 = vsel %vm3288_vm5, %v13538_v17, 0.0 }
 0xeb5   :  { %v13644_v45 = vpop.permute.xlu0 %13643  ;;  %v13535_v2 = vpop.permute.xlu1 %13534 }
 0xeb6   :  { %v13539_v19 = vadd.f32 %v13535_v2, %v13531_v55  ;;  %v13649_v29 = vadd.f32 %v13644_v45, %v13639_v48 }
 0xeb8   :  { %v13541_v34 = vsel %vm3288_vm5, %v13539_v19, 0.0 }
 0xeb9   :  { %v13542_v13 = vadd.f32 %v13541_v34, %v13540_v4  ;;  %v13652_v12 = vpop.permute.xlu0 %13651  ;;  %v13646_v61 = vpop.permute.xlu1 %13645  ;;  %v6924_v4 = vsel %vm3510_vm7, %v19419_v38, %v19423_v33 }
 0xeba   :  { %v13657_v47 = vadd.f32 %v13652_v12, %v13649_v29  ;;  %v13650_v24 = vadd.f32 %v13646_v61, %v13640_v51  ;;  %v19791_v12 = vld [vmem:[#allocation12] sm:$0x1] }
 0xebb   :  { %v13543_v32 = vrot.slane %v13542_v13, 4 }
 0xebd   :  { %v13544_v63 = vadd.f32 %v13543_v32, %v13542_v13  ;;  %v13660_v16 = vpop.permute.xlu0 %13659  ;;  %v13654_v43 = vpop.permute.xlu1 %13653 }
 0xebe   :  { %v13665_v15 = vadd.f32 %v13660_v16, %v13657_v47  ;;  %v13658_v58 = vadd.f32 %v13654_v43, %v13650_v24 }
 0xebf   :  { %v13545_v28 = vrot.slane %v13544_v63, 2 }
 0xec0   :  { %v13667_v62 = vsel %vm3288_vm5, %v13665_v15, 0.0 }
 0xec1   :  { %v13662_v35 = vpop.permute.xlu1 %13661  ;;  %v13546_v27 = vadd.f32 %v13545_v28, %v13544_v63 }
 0xec2   :  { %v13666_v52 = vadd.f32 %v13662_v35, %v13658_v58 }
 0xec3   :  { %v13547_v39 = vrot.slane %v13546_v27, 1 }
 0xec4   :  { %v13668_v3 = vsel %vm3288_vm5, %v13666_v52, 0.0 }
 0xec5   :  { %v13669_v14 = vadd.f32 %v13668_v3, %v13667_v62  ;;  %v13548_v22 = vadd.f32 %v13547_v39, %v13546_v27 }
 0xec7   :  { %v13670_v31 = vrot.slane %v13669_v14, 4  ;;  %v13676_v9 = vsel %vm3425_vm6, %v13548_v22, 0.0 }
 0xec8   :  { %13677 = vadd.xlane.f32.xlu0 %v13676_v9 }
 0xec9   :  { %v13671_v42 = vadd.f32 %v13670_v31, %v13669_v14 }
 0xecb   :  { %v13672_v54 = vrot.slane %v13671_v42, 2 }
 0xecd   :  { %v13673_v11 = vadd.f32 %v13672_v54, %v13671_v42 }
 0xecf   :  { %v13674_v7 = vrot.slane %v13673_v11, 1 }
 0xed1   :  { %v13675_v5 = vadd.f32 %v13674_v7, %v13673_v11 }
 0xed3   :  { %v13689_v41 = vsel %vm3425_vm6, %v13675_v5, 0.0 }
 0xed4   :  { %13690 = vadd.xlane.f32.xlu1 %v13689_v41  ;;  %v19912_v41 = vld [vmem:[#allocation25_spill] sm:$0xff] }
 0xede   :  { %13715 = vrot.lane.b32.xlu0 %v13548_v22, %s18072_s27 }
 0xee5   :  { %13732 = vrot.lane.b32.xlu1 %v13675_v5, %s18072_s27 }
 0xf51   :  { %v13678_v6 = vpop.xlane.xlu0 %13677 }
 0xf52   :  { %v13679_v20 = vrot.slane %v13678_v6, 4 }
 0xf54   :  { %v13680_v56 = vadd.f32 %v13679_v20, %v13678_v6 }
 0xf55   :  { %v13716_v26 = vpop.permute.xlu0 %13715 }
 0xf56   :  { %v13681_v60 = vrot.slane %v13680_v56, 2  ;;  %v13718_v21 = vsel %vm3425_vm6, %v13716_v26, 0.0 }
 0xf57   :  { %13719 = vadd.xlane.f32.xlu0 %v13718_v21 }
 0xf58   :  { %v13682_v44 = vadd.f32 %v13681_v60, %v13680_v56 }
 0xf5a   :  { %v13683_v30 = vrot.slane %v13682_v44, 1 }
 0xf5c   :  { %v13684_v37 = vadd.f32 %v13683_v30, %v13682_v44  ;;  %v19913_v44 = vld [vmem:[#allocation26_spill] sm:$0xff]  ;;  %v19914_v30 = vld [vmem:[#allocation27_spill] sm:$0xff] }
 0xf5d   :  { %v13691_v59 = vpop.xlane.xlu1 %13690 }
 0xf5e   :  { %v13692_v17 = vrot.slane %v13691_v59, 4  ;;  %15501 = vpush %v13684_v37 }
 0xf60   :  { %v13693_v55 = vadd.f32 %v13692_v17, %v13691_v59  ;;  %v19915_v59 = vld [vmem:[#allocation28_spill] sm:$0xff] }
 0xf61   :  { %v13733_v45 = vpop.permute.xlu1 %13732 }
 0xf62   :  { %v13694_v2 = vrot.slane %v13693_v55, 2  ;;  %v13735_v40 = vsel %vm3425_vm6, %v13733_v45, 0.0 }
 0xf63   :  { %13736 = vadd.xlane.f32.xlu1 %v13735_v40 }
 0xf64   :  { %v13695_v25 = vadd.f32 %v13694_v2, %v13693_v55  ;;  %v19916_v55 = vld [vmem:[#allocation29_spill] sm:$0xff] }
 0xf66   :  { %v13696_v19 = vrot.slane %v13695_v25, 1 }
 0xf68   :  { %v13697_v50 = vadd.f32 %v13696_v19, %v13695_v25 }
 0xf6a   :  { %15503 = vpush %v13697_v50 }
 0xf6d   :  { %6927 = vrot.lane.b32.xlu0 %v6924_v4, %s18066_s22 }
 0xf71   :  { %6933 = vrot.lane.b32.xlu0 %v6924_v4, %s18071_s6 }
 0xf74   :  { %6930 = vrot.lane.b32.xlu1 %v6924_v4, %s18070_s4 }
 0xf75   :  { %6943 = vrot.lane.b32.xlu0 %v19428_v57, %s18070_s4 }
 0xf78   :  { %6940 = vrot.lane.b32.xlu1 %v19428_v57, %s18066_s22 }
 0xf7c   :  { %6946 = vrot.lane.b32.xlu1 %v19428_v57, %s18071_s6 }
 0xf8f   :  { %s15502_s27 = spop %15501 }
 0xf90   :  { %s13688_s24 = smul.f32 0.00024414063, %s15502_s27 }
 0xf92   :  { %s13702_s5 = smul.f32 %s13688_s24, %s13688_s24  ;;  %v13711_v51 = vstv %s13688_s24 }
 0xf9b   :  { %s15504_s25 = spop %15503 }
 0xf9c   :  { %s13701_s26 = smul.f32 0.00024414063, %s15504_s25 }
 0xf9e   :  { %s13703_s29 = ssub.f32 %s13701_s26, %s13702_s5 }
 0xfa0   :  { %s13704_s30 = smax.f32 %s18073_s23, %s13703_s29 }
 0xfa1   :  { %s13705_s8 = sadd.f32 1e-05, %s13704_s30 }
 0xfa3   :  { %v13706_v38 = vstv %s13705_s8 }
 0xfa4   :  { %17863 = vrsqrt.f32 %v13706_v38 }
 0xfb1   :  { %v17864_v33 = vpop.eup %17863 }
 0xfb2   :  { %15505 = vpush %v17864_v33  ;;  %v17874_v33 = vld [vmem:[#allocation3 + $0x8] sm:$0xff] }
 0xfe0   :  { %v13720_v34 = vpop.xlane.xlu0 %13719 }
 0xfe1   :  { %v13721_v13 = vrot.slane %v13720_v34, 4 }
 0xfe3   :  { %v13722_v61 = vadd.f32 %v13721_v13, %v13720_v34  ;;  %s15506_s9 = spop %15505  ;;  %v17875_v13 = vld [vmem:[#allocation3 + $0x10] sm:$0xff] }
 0xfe4   :  { %v13709_v48 = vstv %s15506_s9  ;;  %v6928_v47 = vpop.permute.xlu0 %6927 }
 0xfe5   :  { %v13723_v32 = vrot.slane %v13722_v61, 2  ;;  %v19794_v29 = vmul.f32 %v13709_v48, %v19791_v12  ;;  %v6936_v35 = vsel %vm3288_vm5, %v6924_v4, %v6928_v47  ;;  %v17876_v48 = vld [vmem:[#allocation3 + $0x18] sm:$0xff] }
 0xfe7   :  { %v19797_v63 = vmul.f32 %v13711_v51, %v19794_v29  ;;  %v13724_v16 = vadd.f32 %v13723_v32, %v13722_v61  ;;  %v17877_v51 = vld [vmem:[#allocation3 + $0x20] sm:$0xff] }
 0xfe8   :  { %v6934_v52 = vpop.permute.xlu0 %6933 }
 0xfe9   :  { %v13725_v43 = vrot.slane %v13724_v16, 1 }
 0xfeb   :  { %v13726_v24 = vadd.f32 %v13725_v43, %v13724_v16  ;;  %v17878_v43 = vld [vmem:[#allocation3 + $0x28] sm:$0xff] }
 0xfec   :  { %v13737_v28 = vpop.xlane.xlu1 %13736  ;;  %v6944_v42 = vpop.permute.xlu0 %6943 }
 0xfed   :  { %v13738_v15 = vrot.slane %v13737_v28, 4  ;;  %15507 = vpush %v13726_v24  ;;  %v17879_v24 = vld [vmem:[#allocation3 + $0x30] sm:$0xff] }
 0xfef   :  { %v13739_v58 = vadd.f32 %v13738_v15, %v13737_v28  ;;  %v17880_v15 = vld [vmem:[#allocation3 + $0x38] sm:$0xff] }
 0xff0   :  { %v6931_v27 = vpop.permute.xlu1 %6930 }
 0xff1   :  { %v13740_v39 = vrot.slane %v13739_v58, 2  ;;  %v6937_v62 = vsel %vm3524_vm8, %v6936_v35, %v6931_v27 }
 0xff2   :  { %v6938_v3 = vsel %vm3526_vm9, %v6937_v62, %v6934_v52  ;;  %v13429_v62 = vld [vmem:[#allocation14] sm:$0x1] }
 0xff3   :  { %v13741_v14 = vadd.f32 %v13740_v39, %v13739_v58  ;;  %v6955_v31 = vrot.slane %v6938_v3, %v19906_v53 }
 0xff4   :  { %v6941_v22 = vpop.permute.xlu1 %6940 }
 0xff5   :  { %v6949_v9 = vsel %vm3288_vm5, %v19428_v57, %v6941_v22  ;;  %v13742_v54 = vrot.slane %v13741_v14, 1  ;;  %v6956_v6 = vmul.f32 %v6955_v31, %v19912_v41  ;;  %v6957_v56 = vmul.f32 %v6955_v31, %v18887_v18 }
 0xff6   :  { %v6950_v7 = vsel %vm3524_vm8, %v6949_v9, %v6944_v42  ;;  %v6958_v26 = vmul.f32 %v6955_v31, %v18931_v10  ;;  %v6959_v60 = vmul.f32 %v6955_v31, %v18967_v36  ;;  %v6960_v57 = vmul.f32 %v6955_v31, %v19913_v44  ;;  %v17873_v36 = vld [vmem:[#allocation3] sm:$0xff] }
 0xff7   :  { %v13743_v20 = vadd.f32 %v13742_v54, %v13741_v14  ;;  %v6961_v37 = vmul.f32 %v6955_v31, %v19914_v30  ;;  %v6962_v17 = vmul.f32 %v6955_v31, %v19915_v59  ;;  %v6963_v45 = vmul.f32 %v6955_v31, %v19916_v55  ;;  %v19918_v55 = vld [vmem:[#allocation31_spill] sm:$0xff] }
 0xff8   :  { %v6947_v11 = vpop.permute.xlu1 %6946  ;;  %v13713_v31 = vsub.f32 %v13429_v62, %v19797_v63 }
 0xff9   :  { %v6951_v5 = vsel %vm3526_vm9, %v6950_v7, %v6947_v11  ;;  %15509 = vpush %v13743_v20 }
 0xffa   :  { %v6967_v21 = vrot.slane %v6951_v5, %v19906_v53 }
 0xffc   :  { %v6968_v2 = vadd.f32 %v6967_v21, %v6956_v6  ;;  %v6969_v40 = vadd.f32 %v6967_v21, %v6957_v56  ;;  %v6970_v25 = vadd.f32 %v6967_v21, %v6958_v26  ;;  %v6971_v19 = vadd.f32 %v6967_v21, %v6959_v60  ;;  %v19917_v60 = vld [vmem:[#allocation30_spill] sm:$0xff] }
 0xffd   :  { %v6972_v18 = vadd.f32 %v6967_v21, %v6960_v57  ;;  %v6973_v50 = vadd.f32 %v6967_v21, %v6961_v37  ;;  %v6974_v10 = vadd.f32 %v6967_v21, %v6962_v17  ;;  %v6975_v4 = vadd.f32 %v6967_v21, %v6963_v45 }
 0xffe   :  { %v6976_v38 = vadd.f32 %v17873_v36, %v6968_v2  ;;  %v6977_v34 = vadd.f32 %v17874_v33, %v6969_v40  ;;  %v6978_v61 = vadd.f32 %v17875_v13, %v6970_v25  ;;  %v6979_v32 = vadd.f32 %v17876_v48, %v6971_v19  ;;  %v17882_v36 = vld [vmem:[#allocation3 + $0x48] sm:$0xff]  ;;  %v17885_v13 = vld [vmem:[#allocation3 + $0x60] sm:$0xff] }
 0xfff   :  { %v6980_v16 = vadd.f32 %v17877_v51, %v6972_v18  ;;  %v6981_v47 = vadd.f32 %v17878_v43, %v6973_v50  ;;  %v6982_v28 = vadd.f32 %v17879_v24, %v6974_v10  ;;  %v6983_v58 = vadd.f32 %v17880_v15, %v6975_v4  ;;  %v17881_v4 = vld [vmem:[#allocation3 + $0x40] sm:$0xff] }
0x1000   :  { %6984 = vst [vmem:[#allocation15] sm:$0xff] %v6976_v38  ;;  %6985 = vst [vmem:[#allocation15 + $0x8] sm:$0xff] %v6977_v34  ;;  %v17883_v38 = vld [vmem:[#allocation3 + $0x50] sm:$0xff]  ;;  %v17884_v34 = vld [vmem:[#allocation3 + $0x58] sm:$0xff] }
0x1001   :  { %6986 = vst [vmem:[#allocation15 + $0x10] sm:$0xff] %v6978_v61  ;;  %6987 = vst [vmem:[#allocation15 + $0x18] sm:$0xff] %v6979_v32  ;;  %v17886_v61 = vld [vmem:[#allocation3 + $0x68] sm:$0xff]  ;;  %v17887_v32 = vld [vmem:[#allocation3 + $0x70] sm:$0xff] }
0x1002   :  { %6988 = vst [vmem:[#allocation15 + $0x20] sm:$0xff] %v6980_v16  ;;  %6989 = vst [vmem:[#allocation15 + $0x28] sm:$0xff] %v6981_v47  ;;  %v17888_v16 = vld [vmem:[#allocation3 + $0x78] sm:$0xff] }
0x1003   :  { %6990 = vst [vmem:[#allocation15 + $0x30] sm:$0xff] %v6982_v28  ;;  %6991 = vst [vmem:[#allocation15 + $0x38] sm:$0xff] %v6983_v58 }
0x101e   :  { %s15508_s10 = spop %15507 }
0x101f   :  { %s13730_s11 = smul.f32 0.00024414063, %s15508_s10 }
0x1021   :  { %s13748_s0 = smul.f32 %s13730_s11, %s13730_s11  ;;  %v13757_v3 = vstv %s13730_s11 }
0x102a   :  { %s15510_s12 = spop %15509 }
0x102b   :  { %s13747_s13 = smul.f32 0.00024414063, %s15510_s12 }
0x102d   :  { %s13749_s14 = ssub.f32 %s13747_s13, %s13748_s0 }
0x102f   :  { %s13750_s15 = smax.f32 %s18073_s23, %s13749_s14 }
0x1030   :  { %s13751_s2 = sadd.f32 1e-05, %s13750_s15 }
0x1032   :  { %v13752_v35 = vstv %s13751_s2 }
0x1033   :  { %17865 = vrsqrt.f32 %v13752_v35 }
0x1040   :  { %v17866_v27 = vpop.eup %17865 }
0x1041   :  { %15511 = vpush %v17866_v27 }
0x1072   :  { %s15512_s16 = spop %15511 }
0x1073   :  { %v13755_v52 = vstv %s15512_s16 }
0x1074   :  { %v13756_v39 = vmul.f32 %v13755_v52, %v19791_v12 }
0x1076   :  { %v13758_v14 = vmul.f32 %v13757_v3, %v13756_v39  ;;  %v13760_v22 = vsel %vm3510_vm7, %v19794_v29, %v13756_v39 }
0x1077   :  { %13766 = vrot.lane.b32.xlu1 %v13760_v22, %s18070_s4  ;;  %13763 = vrot.lane.b32.xlu0 %v13760_v22, %s18066_s22 }
0x1078   :  { %v13759_v9 = vsub.f32 %v13429_v62, %v13758_v14 }
0x107a   :  { %v13761_v42 = vsel %vm3510_vm7, %v13713_v31, %v13759_v9 }
0x107b   :  { %13769 = vrot.lane.b32.xlu0 %v13760_v22, %s18071_s6  ;;  %13776 = vrot.lane.b32.xlu1 %v13761_v42, %s18066_s22 }
0x107f   :  { %13779 = vrot.lane.b32.xlu0 %v13761_v42, %s18070_s4  ;;  %13782 = vrot.lane.b32.xlu1 %v13761_v42, %s18071_s6  ;;  %s18074_s4 = smov [#allocation15]  }
0x1080   :  { %s13834_s6 = sshll.u32 %s18074_s4, 4  ;;  %s13835_s6 = int_to_ptr.vmem [resolvable:$true] %s13834_s6 }
0x1081   :  { %s18029_s23 = scalar_lea.vmem %s13835_s6, 2048  ;;  %p18034_p8 = scmp.lt.s32.totalorder %s13835_s6, %s13835_s6 }
0x1082   :  { %p18030_p7 = scmp.ne.s32.totalorder %s13835_s6, %s18029_s23  ;;  %p18035_p9 = scmp.lt.s32.totalorder %s18029_s23, %s18029_s23 }
0x1084   :  { %p18036_p10 = por %p18035_p9, %p18034_p8 }
0x1086   :  { %p18037_p11 = pnand %p18036_p10, %p18030_p7 }
0x10e9   :  { %v13767_v12 = vpop.permute.xlu1 %13766  ;;  %v13764_v54 = vpop.permute.xlu0 %13763 }
0x10ea   :  { %v13772_v29 = vsel %vm3288_vm5, %v13760_v22, %v13764_v54 }
0x10eb   :  { %v13773_v7 = vsel %vm3524_vm8, %v13772_v29, %v13767_v12 }
0x10ed   :  { %v13777_v11 = vpop.permute.xlu1 %13776  ;;  %v13770_v5 = vpop.permute.xlu0 %13769 }
0x10ee   :  { %v13774_v63 = vsel %vm3526_vm9, %v13773_v7, %v13770_v5  ;;  %v13785_v56 = vsel %vm3288_vm5, %v13761_v42, %v13777_v11 }
0x10ef   :  { %v13791_v41 = vrot.slane %v13774_v63, %v19906_v53 }
0x10f1   :  { %v13783_v6 = vpop.permute.xlu1 %13782  ;;  %v13780_v20 = vpop.permute.xlu0 %13779  ;;  %v13792_v21 = vmul.f32 %v13791_v41, %v19917_v60  ;;  %v13793_v57 = vmul.f32 %v13791_v41, %v19638_v8  ;;  %v13794_v30 = vmul.f32 %v13791_v41, %v19677_v1  ;;  %v13795_v37 = vmul.f32 %v13791_v41, %v19713_v23 }
0x10f2   :  { %v13786_v26 = vsel %vm3524_vm8, %v13785_v56, %v13780_v20  ;;  %v13796_v17 = vmul.f32 %v13791_v41, %v19604_v0  ;;  %v13797_v45 = vmul.f32 %v13791_v41, %v19918_v55  ;;  %v13798_v2 = vmul.f32 %v13791_v41, %v19682_v49 }
0x10f3   :  { %v13787_v44 = vsel %vm3526_vm9, %v13786_v26, %v13783_v6  ;;  %v13799_v40 = vmul.f32 %v13791_v41, %v19720_v46 }
0x10f4   :  { %v13803_v59 = vrot.slane %v13787_v44, %v19906_v53 }
0x10f6   :  { %v13804_v25 = vadd.f32 %v13803_v59, %v13792_v21  ;;  %v13805_v19 = vadd.f32 %v13803_v59, %v13793_v57  ;;  %v13806_v18 = vadd.f32 %v13803_v59, %v13794_v30  ;;  %v13807_v50 = vadd.f32 %v13803_v59, %v13795_v37 }
0x10f7   :  { %v13808_v8 = vadd.f32 %v13803_v59, %v13796_v17  ;;  %v13809_v1 = vadd.f32 %v13803_v59, %v13797_v45  ;;  %v13810_v10 = vadd.f32 %v13803_v59, %v13798_v2  ;;  %v13811_v23 = vadd.f32 %v13803_v59, %v13799_v40 }
0x10f8   :  { %v13812_v53 = vadd.f32 %v17881_v4, %v13804_v25  ;;  %v13813_v0 = vadd.f32 %v17882_v36, %v13805_v19  ;;  %v13814_v33 = vadd.f32 %v17883_v38, %v13806_v18  ;;  %v13815_v49 = vadd.f32 %v17884_v34, %v13807_v50 }
0x10f9   :  { %v13816_v46 = vadd.f32 %v17885_v13, %v13808_v8  ;;  %v13817_v48 = vadd.f32 %v17886_v61, %v13809_v1  ;;  %v13818_v51 = vadd.f32 %v17887_v32, %v13810_v10  ;;  %v13819_v43 = vadd.f32 %v17888_v16, %v13811_v23 }
0x10fa   :  { %13821 = vst [vmem:[#allocation15 + $0x40] sm:$0xff] %v13812_v53  ;;  %13822 = vst [vmem:[#allocation15 + $0x48] sm:$0xff] %v13813_v0 }
0x10fb   :  { %13823 = vst [vmem:[#allocation15 + $0x50] sm:$0xff] %v13814_v33  ;;  %13824 = vst [vmem:[#allocation15 + $0x58] sm:$0xff] %v13815_v49 }
0x10fc   :  { %13825 = vst [vmem:[#allocation15 + $0x60] sm:$0xff] %v13816_v46  ;;  %13826 = vst [vmem:[#allocation15 + $0x68] sm:$0xff] %v13817_v48 }
0x10fd   :  { %13827 = vst [vmem:[#allocation15 + $0x70] sm:$0xff] %v13818_v51  ;;  %13828 = vst [vmem:[#allocation15 + $0x78] sm:$0xff] %v13819_v43 }
0x10fe   :  { %18040 = shalt.err (!%p18037_p11)
}
0x10ff   :  { %13840 = dma.vmem_to_hbm [thread:$0]  %s13835_s6, 2048, %s19857_s7, [#allocation5], %s18065_s3, %s18065_s3, %s18066_s22  }
0x1100   :  { %18057 = dma.done.wait [#allocation5], 2048  }
0x1101   :  { %18058 = vsyncadd [#allocation5], 4294965248 }
0x1102   :  { %13844 = vsyncpa [#allocation4], 1 }
0x1103   :  { %13845 = vsyncpa [#allocation7], 1 }
0x1104   :  { %13846 = vsyncpa [#allocation10], 1 }
0x1105   :  { %13847 = vsyncpa [#allocation13], 1 }
0x1106   :  { %13848 = vsyncpa [#allocation5], 1 }

</bundles_post_ra>
